<compile_context>
chip_gen: v6e
topology: v6e:2x2x1
jax: 0.10.0
libtpu: 0.0.40
codegen_flags: <defaults>
</compile_context>

<pallas_src>
import functools
import math

import jax
import jax.numpy as jnp
from jax.experimental import pallas as pl
from jax.experimental.pallas import tpu as pltpu

TEMPERATURE = 0.7

# ---- small, module-consistent config --------------------------------------
B = 2             # batch
S = 8             # sequence length
VOCAB = 64        # vocab size
H = 32            # hidden_size
N_LAYERS = 2      # transformer layers (first half "frozen" -- forward-irrelevant)
N_HEADS = 4
HEAD_DIM = H // N_HEADS
FFN = 64          # SwiGLU intermediate size
VALUE_HIDDEN = 2048   # hard-coded in the PyTorch value_head
LM_PAD = 128      # lm_head output padded to a lane-dense width (>= VOCAB)
RMS_EPS = 1e-5
BLOCK_N = 1024    # fc2 streaming block (<=1024 keeps v5e's 16 MiB scoped VMEM happy)


# ============================ the fused kernel ==============================

def _forward_kernel(x_ref, ln1_ref, wqkv_ref, wo_ref, ln2_ref, wgu_ref, wd_ref,
                    rot_ref, cos_ref, sin_ref, bias_ref,
                    lnf_ref, wlm_ref, w1_ref, b1_ref,
                    w2_ref, b2_ref, w3t_ref, b3_ref,
                    logits_ref, values_ref,
                    vh1_ref, acc_ref,
                    *, n_layers, bsz, seq, n_heads, head_dim, ffn,
                    scale, eps, inv_temp, bn):
    j = pl.program_id(0)

    def rmsnorm(v, gamma):
        var = jnp.mean(v * v, axis=-1, keepdims=True)
        return (v * jax.lax.rsqrt(var + eps)
                * gamma.astype(jnp.float32)).astype(jnp.bfloat16)

    # ---------- everything up to value fc1 runs once, overlapped with the ----------
    # ---------- w2 block-1 prefetch the pipeline already has in flight    ----------
    @pl.when(j == 0)
    def _layers_and_head():
        hd_all = n_heads * head_dim
        m = bsz * seq
        x = x_ref[...].astype(jnp.float32)                     # (M, H) residual, f32
        rot = rot_ref[...]
        cos = cos_ref[...]
        sin = sin_ref[...]
        bias = bias_ref[...]                                    # (B, S, S) causal+pad

        for l in range(n_layers):                               # static unroll
            # ---- attention: RMSNorm -> fused QKV -> RoPE -> SDPA -> Wo ----
            xn = rmsnorm(x, ln1_ref[l])
            qkv = jnp.dot(xn, wqkv_ref[l],
                          preferred_element_type=jnp.float32)   # (M, 3H)
            q = qkv[:, 0 * hd_all:1 * hd_all]
            k = qkv[:, 1 * hd_all:2 * hd_all]
            v = qkv[:, 2 * hd_all:3 * hd_all].astype(jnp.bfloat16)
            # RoPE rotate-half as a block-diagonal +/-1 matmul (idle MXU slot)
            q = (q * cos + jnp.dot(q.astype(jnp.bfloat16), rot,
                                   preferred_element_type=jnp.float32) * sin
                 ).astype(jnp.bfloat16)
            k = (k * cos + jnp.dot(k.astype(jnp.bfloat16), rot,
                                   preferred_element_type=jnp.float32) * sin
                 ).astype(jnp.bfloat16)
            wo = wo_ref[l]

            attn = jnp.zeros((m, hd_all), jnp.float32)
            for h in range(n_heads):                            # static unroll
                sl = slice(h * head_dim, (h + 1) * head_dim)
                qh = q[:, sl].reshape(bsz, seq, head_dim)       # leading-dim split only
                kh = k[:, sl].reshape(bsz, seq, head_dim)
                vh = v[:, sl].reshape(bsz, seq, head_dim)
                s = jnp.einsum('bqd,bkd->bqk', qh, kh,
                               preferred_element_type=jnp.float32) * scale
                s = s + bias
                s = s - jnp.max(s, axis=-1, keepdims=True)
                pw = jnp.exp(s)
                pw = pw * pl.reciprocal(jnp.sum(pw, axis=-1, keepdims=True),
                                        approx=True)            # EUP, not VALU
                oh = jnp.einsum('bqk,bkd->bqd', pw.astype(jnp.bfloat16), vh,
                                preferred_element_type=jnp.float32)  # (B, S, dh)
                # concat_h(oh) @ Wo == sum_h oh @ Wo[h*dh:(h+1)*dh, :]
                attn = attn + jnp.dot(
                    oh.reshape(m, head_dim).astype(jnp.bfloat16), wo[sl, :],
                    preferred_element_type=jnp.float32)
            x = x + attn

            # ---- MLP: RMSNorm -> fused gate/up -> SwiGLU -> down ----
            xn = rmsnorm(x, ln2_ref[l])
            gu = jnp.dot(xn, wgu_ref[l], preferred_element_type=jnp.float32)
            g = gu[:, :ffn]
            u = gu[:, ffn:]
            hact = (g * jax.nn.sigmoid(g)) * u
            x = x + jnp.dot(hact.astype(jnp.bfloat16), wd_ref[l],
                            preferred_element_type=jnp.float32)

        # ---- final RMSNorm + lm_head (temperature folded) + value fc1+ReLU ----
        hn = rmsnorm(x, lnf_ref[...])
        logits_ref[...] = jnp.dot(hn, wlm_ref[...],
                                  preferred_element_type=jnp.float32) * inv_temp
        v1 = jnp.dot(hn, w1_ref[...], preferred_element_type=jnp.float32) + b1_ref[...]
        vh1_ref[...] = jnp.maximum(v1, 0.0).astype(vh1_ref.dtype)   # bf16 scratch
        acc_ref[...] = jnp.zeros_like(acc_ref)

    # ---------- value-head fc2 block (every grid step) + folded fc3 partial ----------
    h2 = jnp.dot(vh1_ref[...], w2_ref[...],
                 preferred_element_type=jnp.float32) + b2_ref[...]    # (M, bn)
    h2 = jnp.maximum(h2, 0.0)
    part = h2 * w3t_ref[...]                                          # (M, bn)
    psum = part[:, 0:128]                                             # lane-dense acc
    for c in range(1, bn // 128):
        psum = psum + part[:, c * 128:(c + 1) * 128]
    acc_ref[...] += psum

    @pl.when(j == pl.num_programs(0) - 1)
    def _finalize():
        values_ref[...] = (jnp.sum(acc_ref[...], axis=-1, keepdims=True)
                           + b3_ref[...].astype(jnp.float32))


def fused_forward(x, p, cos_full, sin_full, attn_bias):
    m, hd = x.shape
    bsz, seq, _ = attn_bias.shape
    assert VALUE_HIDDEN % BLOCK_N == 0 and BLOCK_N % 128 == 0
    nblk = VALUE_HIDDEN // BLOCK_N

    const = lambda shp: pl.BlockSpec(shp, lambda j: (0,) * len(shp))

    kernel = functools.partial(
        _forward_kernel, n_layers=N_LAYERS, bsz=bsz, seq=seq,
        n_heads=N_HEADS, head_dim=HEAD_DIM, ffn=FFN,
        scale=1.0 / math.sqrt(HEAD_DIM), eps=RMS_EPS,
        inv_temp=1.0 / TEMPERATURE, bn=BLOCK_N)

    return pl.pallas_call(
        kernel,
        out_shape=(jax.ShapeDtypeStruct((m, LM_PAD), jnp.float32),   # padded logits
                   jax.ShapeDtypeStruct((m, 1), jnp.float32)),       # values
        grid=(nblk,),
        in_specs=[
            const((m, hd)),                          # token embeddings
            const((N_LAYERS, 1, hd)),                # attn norms (stacked)
            const((N_LAYERS, hd, 3 * hd)),           # fused wq|wk|wv (stacked)
            const((N_LAYERS, hd, hd)),               # wo (stacked)
            const((N_LAYERS, 1, hd)),                # mlp norms (stacked)
            const((N_LAYERS, hd, 2 * FFN)),          # fused wg|wu (stacked)
            const((N_LAYERS, FFN, hd)),              # wd (stacked)
            const((hd, hd)),                         # RoPE rotate-half matrix
            const((m, hd)), const((m, hd)),          # cos, sin
            const((bsz, seq, seq)),                  # attention bias (causal + pad)
            const((1, hd)),                          # final norm
            const((hd, LM_PAD)),                     # lm_head (padded, bf16)
            const((hd, VALUE_HIDDEN)),               # value fc1 weight
            const((1, VALUE_HIDDEN)),                # value fc1 bias
            pl.BlockSpec((VALUE_HIDDEN, BLOCK_N), lambda j: (0, j)),   # v_w2 (streamed)
            pl.BlockSpec((1, BLOCK_N), lambda j: (0, j)),              # v_b2 block
            pl.BlockSpec((1, BLOCK_N), lambda j: (0, j)),              # v_w3 (transposed)
            const((1, 1)),                           # v_b3
        ],
        out_specs=(const((m, LM_PAD)), const((m, 1))),
        scratch_shapes=[pltpu.VMEM((m, VALUE_HIDDEN), jnp.bfloat16),   # vh1 (fc1 acts)
                        pltpu.VMEM((m, 128), jnp.float32)],            # fc3 lane-dense acc
        compiler_params=pltpu.CompilerParams(
            dimension_semantics=("arbitrary",),      # outputs/scratch resident across j
            vmem_limit_bytes=32 * 1024 * 1024),
    )(x, p["ln1"], p["wqkv"], p["wo"], p["ln2"], p["wgu"], p["wd"],
      p["rot"], cos_full, sin_full, attn_bias,
      p["final_norm"], p["lm_head_pad"], p["v_w1"], p["v_b1"],
      p["v_w2"], p["v_b2"], p["v_w3t"], p["v_b3"])


# ============================ glue (plain JAX) ==============================

def rope_tables(seq, dh, base=10000.0):
    inv_freq = 1.0 / (base ** (jnp.arange(0, dh, 2, dtype=jnp.float32) / dh))
    t = jnp.arange(seq, dtype=jnp.float32)
    freqs = jnp.outer(t, inv_freq)                        # (S, dh/2)
    emb = jnp.concatenate([freqs, freqs], axis=-1)        # (S, dh)
    return jnp.cos(emb), jnp.sin(emb)


def rotate_half_matrix():
    """Per-head rotate-half as a block-diagonal +/-1 matrix: x @ R == rotate_half(x)."""
    half = HEAD_DIM // 2
    rb = jnp.zeros((HEAD_DIM, HEAD_DIM), jnp.float32)
    rb = rb.at[half:, :half].set(-jnp.eye(half, dtype=jnp.float32))
    rb = rb.at[:half, half:].set(jnp.eye(half, dtype=jnp.float32))
    return jnp.kron(jnp.eye(N_HEADS, dtype=jnp.float32), rb)        # (H, H)


def make_params(key):
    keys = iter(jax.random.split(key, 8 * N_LAYERS + 16))

    def nrm(shape, scale, dtype):
        return (jax.random.normal(next(keys), shape, jnp.float32) * scale).astype(dtype)

    bf16 = jnp.bfloat16
    p = {"embed": nrm((VOCAB, H), 0.02, bf16)}
    ln1, wqkv, wo, ln2, wgu, wd = [], [], [], [], [], []
    for _ in range(N_LAYERS):
        wq = nrm((H, H), 1.0 / math.sqrt(H), jnp.float32)
        wk = nrm((H, H), 1.0 / math.sqrt(H), jnp.float32)
        wv = nrm((H, H), 1.0 / math.sqrt(H), jnp.float32)
        wg = nrm((H, FFN), 1.0 / math.sqrt(H), jnp.float32)
        wu = nrm((H, FFN), 1.0 / math.sqrt(H), jnp.float32)
        ln1.append(jnp.ones((1, H), bf16))
        wqkv.append(jnp.concatenate([wq, wk, wv], axis=1).astype(bf16))   # (H, 3H)
        wo.append(nrm((H, H), 1.0 / math.sqrt(H), bf16))
        ln2.append(jnp.ones((1, H), bf16))
        wgu.append(jnp.concatenate([wg, wu], axis=1).astype(bf16))        # (H, 2F)
        wd.append(nrm((FFN, H), 1.0 / math.sqrt(FFN), bf16))
    p["ln1"] = jnp.stack(ln1)
    p["wqkv"] = jnp.stack(wqkv)
    p["wo"] = jnp.stack(wo)
    p["ln2"] = jnp.stack(ln2)
    p["wgu"] = jnp.stack(wgu)
    p["wd"] = jnp.stack(wd)
    p["final_norm"] = jnp.ones((1, H), bf16)
    lm = nrm((H, VOCAB), 1.0 / math.sqrt(H), jnp.float32)
    p["lm_head_pad"] = (jnp.zeros((H, LM_PAD), jnp.float32)
                        .at[:, :VOCAB].set(lm).astype(bf16))
    p["rot"] = rotate_half_matrix().astype(bf16)           # exact in bf16 ({-1,0,1})
    # value head: bf16 weights (halves the dominant HBM read), fp32 biases/accumulation
    # TODO(synk): int8 (v5e/v6e) or fp8 (v7x) v_w2 would further shrink the dominant stream.
    p["v_w1"] = nrm((H, VALUE_HIDDEN), 1.0 / math.sqrt(H), bf16)
    p["v_b1"] = jnp.zeros((1, VALUE_HIDDEN), jnp.float32)
    p["v_w2"] = nrm((VALUE_HIDDEN, VALUE_HIDDEN), 1.0 / math.sqrt(VALUE_HIDDEN), bf16)
    p["v_b2"] = jnp.zeros((1, VALUE_HIDDEN), jnp.float32)
    p["v_w3t"] = nrm((1, VALUE_HIDDEN), 1.0 / math.sqrt(VALUE_HIDDEN), jnp.float32)
    p["v_b3"] = jnp.zeros((1, 1), jnp.float32)
    return p


def actor_critic_forward(params, input_ids, attention_mask=None):
    bsz, seq = input_ids.shape
    m = bsz * seq

    if attention_mask is None:
        attention_mask = jnp.ones((bsz, seq), jnp.int32)
    pad_bias = (1.0 - attention_mask.astype(jnp.float32)) * -1e30          # (B, S)
    pos = jnp.arange(seq)
    causal = jnp.where(pos[None, :] <= pos[:, None], 0.0, -1e30)           # (S, S)
    attn_bias = (causal[None, :, :] + pad_bias[:, None, :]).astype(jnp.float32)

    cos, sin = rope_tables(seq, HEAD_DIM)                                  # (S, dh)
    cos_full = jnp.tile(cos, (bsz, N_HEADS)).astype(jnp.float32)           # (M, H)
    sin_full = jnp.tile(sin, (bsz, N_HEADS)).astype(jnp.float32)

    # embedding gather (data-dependent) stays in plain JAX
    x = params["embed"][input_ids].reshape(m, H)                           # (M, H) bf16

    # single fused pallas_call: layers + head at j==0, v_w2 streamed over the grid
    logits_pad, values = fused_forward(x, params, cos_full, sin_full, attn_bias)

    lm_logits = logits_pad[:, :VOCAB].reshape(bsz, seq, VOCAB)             # /T folded in
    values = values.reshape(bsz, seq)
    return lm_logits, values


if __name__ == "__main__":
    root = jax.random.PRNGKey(0)
    k_param, k_ids = jax.random.split(root)
    params = make_params(k_param)
    input_ids = jax.random.randint(k_ids, (B, S), 0, VOCAB, dtype=jnp.int32)
    attention_mask = jnp.ones((B, S), jnp.int32)

    forward = jax.jit(actor_critic_forward)
    lm_logits, values = forward(params, input_ids, attention_mask)
    jax.block_until_ready((lm_logits, values))

    assert lm_logits.shape == (B, S, VOCAB)
    assert values.shape == (B, S)
    assert bool(jnp.all(jnp.isfinite(lm_logits))) and bool(jnp.all(jnp.isfinite(values)))
    print("KERNEL_OK")
</pallas_src>

<mosaic_0001>
module attributes {stable_mosaic.version = 11 : i64} {
  func.func @_forward_kernel(%arg0: i32, %arg1: memref<16x32xbf16, #tpu.memory_space<vmem>>, %arg2: memref<2x1x32xbf16, #tpu.memory_space<vmem>>, %arg3: memref<2x32x96xbf16, #tpu.memory_space<vmem>>, %arg4: memref<2x32x32xbf16, #tpu.memory_space<vmem>>, %arg5: memref<2x1x32xbf16, #tpu.memory_space<vmem>>, %arg6: memref<2x32x128xbf16, #tpu.memory_space<vmem>>, %arg7: memref<2x64x32xbf16, #tpu.memory_space<vmem>>, %arg8: memref<32x32xbf16, #tpu.memory_space<vmem>>, %arg9: memref<16x32xf32, #tpu.memory_space<vmem>>, %arg10: memref<16x32xf32, #tpu.memory_space<vmem>>, %arg11: memref<2x8x8xf32, #tpu.memory_space<vmem>>, %arg12: memref<1x32xbf16, #tpu.memory_space<vmem>>, %arg13: memref<32x128xbf16, #tpu.memory_space<vmem>>, %arg14: memref<32x2048xbf16, #tpu.memory_space<vmem>>, %arg15: memref<1x2048xf32, #tpu.memory_space<vmem>>, %arg16: memref<2048x1024xbf16, #tpu.memory_space<vmem>>, %arg17: memref<1x1024xf32, #tpu.memory_space<vmem>>, %arg18: memref<1x1024xf32, #tpu.memory_space<vmem>>, %arg19: memref<1x1xf32, #tpu.memory_space<vmem>>, %arg20: memref<16x128xf32, #tpu.memory_space<vmem>>, %arg21: memref<16x1xf32, #tpu.memory_space<vmem>>, %arg22: memref<16x2048xbf16, #tpu.memory_space<vmem>>, %arg23: memref<16x128xf32, #tpu.memory_space<vmem>>) attributes {dimension_semantics = [#tpu.dimension_semantics<arbitrary>], iteration_bounds = array<i64: 2>, scalar_prefetch = 0 : i64, scratch_operands = 2 : i64, tpu.core_type = #tpu.core_type<tc>, window_params = [{pipeline_mode = #tpu.pipeline_mode<synchronous>, transform_indices = @transform_0, window_bounds = array<i64: 16, 32>}, {pipeline_mode = #tpu.pipeline_mode<synchronous>, transform_indices = @transform_1, window_bounds = array<i64: 2, 1, 32>}, {pipeline_mode = #tpu.pipeline_mode<synchronous>, transform_indices = @transform_2, window_bounds = array<i64: 2, 32, 96>}, {pipeline_mode = #tpu.pipeline_mode<synchronous>, transform_indices = @transform_3, window_bounds = array<i64: 2, 32, 32>}, {pipeline_mode = #tpu.pipeline_mode<synchronous>, transform_indices = @transform_4, window_bounds = array<i64: 2, 1, 32>}, {pipeline_mode = #tpu.pipeline_mode<synchronous>, transform_indices = @transform_5, window_bounds = array<i64: 2, 32, 128>}, {pipeline_mode = #tpu.pipeline_mode<synchronous>, transform_indices = @transform_6, window_bounds = array<i64: 2, 64, 32>}, {pipeline_mode = #tpu.pipeline_mode<synchronous>, transform_indices = @transform_7, window_bounds = array<i64: 32, 32>}, {pipeline_mode = #tpu.pipeline_mode<synchronous>, transform_indices = @transform_8, window_bounds = array<i64: 16, 32>}, {pipeline_mode = #tpu.pipeline_mode<synchronous>, transform_indices = @transform_9, window_bounds = array<i64: 16, 32>}, {pipeline_mode = #tpu.pipeline_mode<synchronous>, transform_indices = @transform_10, window_bounds = array<i64: 2, 8, 8>}, {pipeline_mode = #tpu.pipeline_mode<synchronous>, transform_indices = @transform_11, window_bounds = array<i64: 1, 32>}, {pipeline_mode = #tpu.pipeline_mode<synchronous>, transform_indices = @transform_12, window_bounds = array<i64: 32, 128>}, {pipeline_mode = #tpu.pipeline_mode<synchronous>, transform_indices = @transform_13, window_bounds = array<i64: 32, 2048>}, {pipeline_mode = #tpu.pipeline_mode<synchronous>, transform_indices = @transform_14, window_bounds = array<i64: 1, 2048>}, {transform_indices = @transform_15, window_bounds = array<i64: 2048, 1024>}, {transform_indices = @transform_16, window_bounds = array<i64: 1, 1024>}, {transform_indices = @transform_17, window_bounds = array<i64: 1, 1024>}, {pipeline_mode = #tpu.pipeline_mode<synchronous>, transform_indices = @transform_18, window_bounds = array<i64: 1, 1>}, {pipeline_mode = #tpu.pipeline_mode<synchronous>, transform_indices = @transform_19, window_bounds = array<i64: 16, 128>}, {pipeline_mode = #tpu.pipeline_mode<synchronous>, transform_indices = @transform_20, window_bounds = array<i64: 16, 1>}]} {
    %c0_i32 = arith.constant 0 : i32
    %0 = arith.cmpi eq, %arg0, %c0_i32 : i32
    %1 = arith.extui %0 : i1 to i32
    %c0_i32_0 = arith.constant 0 : i32
    %2 = arith.cmpi ne, %1, %c0_i32_0 : i32
    scf.if %2 {
      %c0_14 = arith.constant 0 : index
      %c0_15 = arith.constant 0 : index
      %35 = vector.load %arg1[%c0_14, %c0_15] : memref<16x32xbf16, #tpu.memory_space<vmem>>, vector<16x32xbf16>
      %36 = arith.extf %35 : vector<16x32xbf16> to vector<16x32xf32>
      %c0_16 = arith.constant 0 : index
      %c0_17 = arith.constant 0 : index
      %37 = vector.load %arg8[%c0_16, %c0_17] : memref<32x32xbf16, #tpu.memory_space<vmem>>, vector<32x32xbf16>
      %c0_18 = arith.constant 0 : index
      %c0_19 = arith.constant 0 : index
      %38 = vector.load %arg9[%c0_18, %c0_19] : memref<16x32xf32, #tpu.memory_space<vmem>>, vector<16x32xf32>
      %c0_20 = arith.constant 0 : index
      %c0_21 = arith.constant 0 : index
      %39 = vector.load %arg10[%c0_20, %c0_21] : memref<16x32xf32, #tpu.memory_space<vmem>>, vector<16x32xf32>
      %c0_22 = arith.constant 0 : index
      %c0_23 = arith.constant 0 : index
      %c0_24 = arith.constant 0 : index
      %40 = vector.load %arg11[%c0_22, %c0_23, %c0_24] : memref<2x8x8xf32, #tpu.memory_space<vmem>>, vector<2x8x8xf32>
      %c0_25 = arith.constant 0 : index
      %c0_26 = arith.constant 0 : index
      %c0_27 = arith.constant 0 : index
      %41 = vector.load %arg2[%c0_25, %c0_26, %c0_27] : memref<2x1x32xbf16, #tpu.memory_space<vmem>>, vector<1x1x32xbf16>
      %42 = vector.shape_cast %41 : vector<1x1x32xbf16> to vector<1x32xbf16>
      %43 = arith.mulf %36, %36 : vector<16x32xf32>
      %cst_28 = arith.constant dense<0.000000e+00> : vector<16xf32>
      %44 = vector.multi_reduction <add>, %43, %cst_28 [1] : vector<16x32xf32> to vector<16xf32>
      %45 = vector.shape_cast %44 : vector<16xf32> to vector<16x1xf32>
      %cst_29 = arith.constant 3.200000e+01 : f32
      %46 = vector.broadcast %cst_29 : f32 to vector<16x1xf32>
      %47 = arith.divf %45, %46 : vector<16x1xf32>
      %cst_30 = arith.constant 9.99999974E-6 : f32
      %48 = vector.broadcast %cst_30 : f32 to vector<16x1xf32>
      %49 = arith.addf %47, %48 : vector<16x1xf32>
      %50 = math.rsqrt %49 : vector<16x1xf32>
      %51 = vector.broadcast %50 : vector<16x1xf32> to vector<16x32xf32>
      %52 = arith.mulf %36, %51 : vector<16x32xf32>
      %53 = arith.extf %42 : vector<1x32xbf16> to vector<1x32xf32>
      %54 = vector.broadcast %53 : vector<1x32xf32> to vector<16x32xf32>
      %55 = arith.mulf %52, %54 : vector<16x32xf32>
      %56 = arith.truncf %55 : vector<16x32xf32> to vector<16x32xbf16>
      %c0_31 = arith.constant 0 : index
      %c0_32 = arith.constant 0 : index
      %c0_33 = arith.constant 0 : index
      %57 = vector.load %arg3[%c0_31, %c0_32, %c0_33] : memref<2x32x96xbf16, #tpu.memory_space<vmem>>, vector<1x32x96xbf16>
      %58 = vector.shape_cast %57 : vector<1x32x96xbf16> to vector<32x96xbf16>
      %cst_34 = arith.constant dense<0.000000e+00> : vector<16x96xf32>
      %59 = tpu.matmul %56, %58, %cst_34 {dimension_numbers = #tpu.dot_dimension_numbers<[1], [0], [0], [1], [0, 0, 1, 1], [], []>} : vector<16x32xbf16>, vector<32x96xbf16>, vector<16x96xf32> -> vector<16x96xf32>
      %60 = vector.extract_strided_slice %59 {offsets = [0, 0], sizes = [16, 32], strides = [1, 1]} : vector<16x96xf32> to vector<16x32xf32>
      %61 = vector.extract_strided_slice %59 {offsets = [0, 32], sizes = [16, 32], strides = [1, 1]} : vector<16x96xf32> to vector<16x32xf32>
      %62 = vector.extract_strided_slice %59 {offsets = [0, 64], sizes = [16, 32], strides = [1, 1]} : vector<16x96xf32> to vector<16x32xf32>
      %63 = arith.truncf %62 : vector<16x32xf32> to vector<16x32xbf16>
      %64 = arith.mulf %60, %38 : vector<16x32xf32>
      %65 = arith.truncf %60 : vector<16x32xf32> to vector<16x32xbf16>
      %cst_35 = arith.constant dense<0.000000e+00> : vector<16x32xf32>
      %66 = tpu.matmul %65, %37, %cst_35 {dimension_numbers = #tpu.dot_dimension_numbers<[1], [0], [0], [1], [0, 0, 1, 1], [], []>} : vector<16x32xbf16>, vector<32x32xbf16>, vector<16x32xf32> -> vector<16x32xf32>
      %67 = arith.mulf %66, %39 : vector<16x32xf32>
      %68 = arith.addf %64, %67 : vector<16x32xf32>
      %69 = arith.truncf %68 : vector<16x32xf32> to vector<16x32xbf16>
      %70 = arith.mulf %61, %38 : vector<16x32xf32>
      %71 = arith.truncf %61 : vector<16x32xf32> to vector<16x32xbf16>
      %cst_36 = arith.constant dense<0.000000e+00> : vector<16x32xf32>
      %72 = tpu.matmul %71, %37, %cst_36 {dimension_numbers = #tpu.dot_dimension_numbers<[1], [0], [0], [1], [0, 0, 1, 1], [], []>} : vector<16x32xbf16>, vector<32x32xbf16>, vector<16x32xf32> -> vector<16x32xf32>
      %73 = arith.mulf %72, %39 : vector<16x32xf32>
      %74 = arith.addf %70, %73 : vector<16x32xf32>
      %75 = arith.truncf %74 : vector<16x32xf32> to vector<16x32xbf16>
      %c0_37 = arith.constant 0 : index
      %c0_38 = arith.constant 0 : index
      %c0_39 = arith.constant 0 : index
      %76 = vector.load %arg4[%c0_37, %c0_38, %c0_39] : memref<2x32x32xbf16, #tpu.memory_space<vmem>>, vector<1x32x32xbf16>
      %77 = vector.shape_cast %76 : vector<1x32x32xbf16> to vector<32x32xbf16>
      %cst_40 = arith.constant 0.000000e+00 : f32
      %78 = vector.broadcast %cst_40 : f32 to vector<16x32xf32>
      %79 = vector.extract_strided_slice %69 {offsets = [0, 0], sizes = [16, 8], strides = [1, 1]} : vector<16x32xbf16> to vector<16x8xbf16>
      %80 = vector.shape_cast %79 : vector<16x8xbf16> to vector<2x8x8xbf16>
      %81 = vector.extract_strided_slice %75 {offsets = [0, 0], sizes = [16, 8], strides = [1, 1]} : vector<16x32xbf16> to vector<16x8xbf16>
      %82 = vector.shape_cast %81 : vector<16x8xbf16> to vector<2x8x8xbf16>
      %83 = vector.extract_strided_slice %63 {offsets = [0, 0], sizes = [16, 8], strides = [1, 1]} : vector<16x32xbf16> to vector<16x8xbf16>
      %84 = vector.shape_cast %83 : vector<16x8xbf16> to vector<2x8x8xbf16>
      "tpu.trace_start"() <{level = 10 : i32, message = "bqd,bkd->bqk"}> : () -> ()
      %cst_41 = arith.constant dense<0.000000e+00> : vector<2x8x8xf32>
      %85 = tpu.matmul %80, %82, %cst_41 {dimension_numbers = #tpu.dot_dimension_numbers<[2], [2], [1], [1], [0, 0, 0, 1, 1, 1], [0], [0]>} : vector<2x8x8xbf16>, vector<2x8x8xbf16>, vector<2x8x8xf32> -> vector<2x8x8xf32>
      "tpu.trace_stop"() : () -> ()
      %cst_42 = arith.constant 0.353553385 : f32
      %86 = vector.broadcast %cst_42 : f32 to vector<2x8x8xf32>
      %87 = arith.mulf %85, %86 : vector<2x8x8xf32>
      %88 = arith.addf %87, %40 : vector<2x8x8xf32>
      %cst_43 = arith.constant dense<0xFF800000> : vector<2x8xf32>
      %89 = vector.multi_reduction <maximumf>, %88, %cst_43 [2] : vector<2x8x8xf32> to vector<2x8xf32>
      %90 = vector.shape_cast %89 : vector<2x8xf32> to vector<2x8x1xf32>
      %91 = vector.broadcast %90 : vector<2x8x1xf32> to vector<2x8x8xf32>
      %92 = arith.subf %88, %91 : vector<2x8x8xf32>
      %93 = math.exp %92 : vector<2x8x8xf32>
      %cst_44 = arith.constant dense<0.000000e+00> : vector<2x8xf32>
      %94 = vector.multi_reduction <add>, %93, %cst_44 [2] : vector<2x8x8xf32> to vector<2x8xf32>
      %95 = vector.shape_cast %94 : vector<2x8xf32> to vector<2x8x1xf32>
      %96 = tpu.reciprocal %95 {approx = true} : vector<2x8x1xf32> -> vector<2x8x1xf32>
      %97 = vector.broadcast %96 : vector<2x8x1xf32> to vector<2x8x8xf32>
      %98 = arith.mulf %93, %97 : vector<2x8x8xf32>
      %99 = arith.truncf %98 : vector<2x8x8xf32> to vector<2x8x8xbf16>
      "tpu.trace_start"() <{level = 10 : i32, message = "bqk,bkd->bqd"}> : () -> ()
      %cst_45 = arith.constant dense<0.000000e+00> : vector<2x8x8xf32>
      %100 = tpu.matmul %99, %84, %cst_45 {dimension_numbers = #tpu.dot_dimension_numbers<[2], [1], [1], [2], [0, 0, 0, 1, 1, 2], [0], [0]>} : vector<2x8x8xbf16>, vector<2x8x8xbf16>, vector<2x8x8xf32> -> vector<2x8x8xf32>
      "tpu.trace_stop"() : () -> ()
      %101 = vector.shape_cast %100 : vector<2x8x8xf32> to vector<16x8xf32>
      %102 = arith.truncf %101 : vector<16x8xf32> to vector<16x8xbf16>
      %103 = vector.extract_strided_slice %77 {offsets = [0, 0], sizes = [8, 32], strides = [1, 1]} : vector<32x32xbf16> to vector<8x32xbf16>
      %cst_46 = arith.constant dense<0.000000e+00> : vector<16x32xf32>
      %104 = tpu.matmul %102, %103, %cst_46 {dimension_numbers = #tpu.dot_dimension_numbers<[1], [0], [0], [1], [0, 0, 1, 1], [], []>} : vector<16x8xbf16>, vector<8x32xbf16>, vector<16x32xf32> -> vector<16x32xf32>
      %105 = arith.addf %78, %104 : vector<16x32xf32>
      %106 = vector.extract_strided_slice %69 {offsets = [0, 8], sizes = [16, 8], strides = [1, 1]} : vector<16x32xbf16> to vector<16x8xbf16>
      %107 = vector.shape_cast %106 : vector<16x8xbf16> to vector<2x8x8xbf16>
      %108 = vector.extract_strided_slice %75 {offsets = [0, 8], sizes = [16, 8], strides = [1, 1]} : vector<16x32xbf16> to vector<16x8xbf16>
      %109 = vector.shape_cast %108 : vector<16x8xbf16> to vector<2x8x8xbf16>
      %110 = vector.extract_strided_slice %63 {offsets = [0, 8], sizes = [16, 8], strides = [1, 1]} : vector<16x32xbf16> to vector<16x8xbf16>
      %111 = vector.shape_cast %110 : vector<16x8xbf16> to vector<2x8x8xbf16>
      "tpu.trace_start"() <{level = 10 : i32, message = "bqd,bkd->bqk"}> : () -> ()
      %cst_47 = arith.constant dense<0.000000e+00> : vector<2x8x8xf32>
      %112 = tpu.matmul %107, %109, %cst_47 {dimension_numbers = #tpu.dot_dimension_numbers<[2], [2], [1], [1], [0, 0, 0, 1, 1, 1], [0], [0]>} : vector<2x8x8xbf16>, vector<2x8x8xbf16>, vector<2x8x8xf32> -> vector<2x8x8xf32>
      "tpu.trace_stop"() : () -> ()
      %cst_48 = arith.constant 0.353553385 : f32
      %113 = vector.broadcast %cst_48 : f32 to vector<2x8x8xf32>
      %114 = arith.mulf %112, %113 : vector<2x8x8xf32>
      %115 = arith.addf %114, %40 : vector<2x8x8xf32>
      %cst_49 = arith.constant dense<0xFF800000> : vector<2x8xf32>
      %116 = vector.multi_reduction <maximumf>, %115, %cst_49 [2] : vector<2x8x8xf32> to vector<2x8xf32>
      %117 = vector.shape_cast %116 : vector<2x8xf32> to vector<2x8x1xf32>
      %118 = vector.broadcast %117 : vector<2x8x1xf32> to vector<2x8x8xf32>
      %119 = arith.subf %115, %118 : vector<2x8x8xf32>
      %120 = math.exp %119 : vector<2x8x8xf32>
      %cst_50 = arith.constant dense<0.000000e+00> : vector<2x8xf32>
      %121 = vector.multi_reduction <add>, %120, %cst_50 [2] : vector<2x8x8xf32> to vector<2x8xf32>
      %122 = vector.shape_cast %121 : vector<2x8xf32> to vector<2x8x1xf32>
      %123 = tpu.reciprocal %122 {approx = true} : vector<2x8x1xf32> -> vector<2x8x1xf32>
      %124 = vector.broadcast %123 : vector<2x8x1xf32> to vector<2x8x8xf32>
      %125 = arith.mulf %120, %124 : vector<2x8x8xf32>
      %126 = arith.truncf %125 : vector<2x8x8xf32> to vector<2x8x8xbf16>
      "tpu.trace_start"() <{level = 10 : i32, message = "bqk,bkd->bqd"}> : () -> ()
      %cst_51 = arith.constant dense<0.000000e+00> : vector<2x8x8xf32>
      %127 = tpu.matmul %126, %111, %cst_51 {dimension_numbers = #tpu.dot_dimension_numbers<[2], [1], [1], [2], [0, 0, 0, 1, 1, 2], [0], [0]>} : vector<2x8x8xbf16>, vector<2x8x8xbf16>, vector<2x8x8xf32> -> vector<2x8x8xf32>
      "tpu.trace_stop"() : () -> ()
      %128 = vector.shape_cast %127 : vector<2x8x8xf32> to vector<16x8xf32>
      %129 = arith.truncf %128 : vector<16x8xf32> to vector<16x8xbf16>
      %130 = vector.extract_strided_slice %77 {offsets = [8, 0], sizes = [8, 32], strides = [1, 1]} : vector<32x32xbf16> to vector<8x32xbf16>
      %cst_52 = arith.constant dense<0.000000e+00> : vector<16x32xf32>
      %131 = tpu.matmul %129, %130, %cst_52 {dimension_numbers = #tpu.dot_dimension_numbers<[1], [0], [0], [1], [0, 0, 1, 1], [], []>} : vector<16x8xbf16>, vector<8x32xbf16>, vector<16x32xf32> -> vector<16x32xf32>
      %132 = arith.addf %105, %131 : vector<16x32xf32>
      %133 = vector.extract_strided_slice %69 {offsets = [0, 16], sizes = [16, 8], strides = [1, 1]} : vector<16x32xbf16> to vector<16x8xbf16>
      %134 = vector.shape_cast %133 : vector<16x8xbf16> to vector<2x8x8xbf16>
      %135 = vector.extract_strided_slice %75 {offsets = [0, 16], sizes = [16, 8], strides = [1, 1]} : vector<16x32xbf16> to vector<16x8xbf16>
      %136 = vector.shape_cast %135 : vector<16x8xbf16> to vector<2x8x8xbf16>
      %137 = vector.extract_strided_slice %63 {offsets = [0, 16], sizes = [16, 8], strides = [1, 1]} : vector<16x32xbf16> to vector<16x8xbf16>
      %138 = vector.shape_cast %137 : vector<16x8xbf16> to vector<2x8x8xbf16>
      "tpu.trace_start"() <{level = 10 : i32, message = "bqd,bkd->bqk"}> : () -> ()
      %cst_53 = arith.constant dense<0.000000e+00> : vector<2x8x8xf32>
      %139 = tpu.matmul %134, %136, %cst_53 {dimension_numbers = #tpu.dot_dimension_numbers<[2], [2], [1], [1], [0, 0, 0, 1, 1, 1], [0], [0]>} : vector<2x8x8xbf16>, vector<2x8x8xbf16>, vector<2x8x8xf32> -> vector<2x8x8xf32>
      "tpu.trace_stop"() : () -> ()
      %cst_54 = arith.constant 0.353553385 : f32
      %140 = vector.broadcast %cst_54 : f32 to vector<2x8x8xf32>
      %141 = arith.mulf %139, %140 : vector<2x8x8xf32>
      %142 = arith.addf %141, %40 : vector<2x8x8xf32>
      %cst_55 = arith.constant dense<0xFF800000> : vector<2x8xf32>
      %143 = vector.multi_reduction <maximumf>, %142, %cst_55 [2] : vector<2x8x8xf32> to vector<2x8xf32>
      %144 = vector.shape_cast %143 : vector<2x8xf32> to vector<2x8x1xf32>
      %145 = vector.broadcast %144 : vector<2x8x1xf32> to vector<2x8x8xf32>
      %146 = arith.subf %142, %145 : vector<2x8x8xf32>
      %147 = math.exp %146 : vector<2x8x8xf32>
      %cst_56 = arith.constant dense<0.000000e+00> : vector<2x8xf32>
      %148 = vector.multi_reduction <add>, %147, %cst_56 [2] : vector<2x8x8xf32> to vector<2x8xf32>
      %149 = vector.shape_cast %148 : vector<2x8xf32> to vector<2x8x1xf32>
      %150 = tpu.reciprocal %149 {approx = true} : vector<2x8x1xf32> -> vector<2x8x1xf32>
      %151 = vector.broadcast %150 : vector<2x8x1xf32> to vector<2x8x8xf32>
      %152 = arith.mulf %147, %151 : vector<2x8x8xf32>
      %153 = arith.truncf %152 : vector<2x8x8xf32> to vector<2x8x8xbf16>
      "tpu.trace_start"() <{level = 10 : i32, message = "bqk,bkd->bqd"}> : () -> ()
      %cst_57 = arith.constant dense<0.000000e+00> : vector<2x8x8xf32>
      %154 = tpu.matmul %153, %138, %cst_57 {dimension_numbers = #tpu.dot_dimension_numbers<[2], [1], [1], [2], [0, 0, 0, 1, 1, 2], [0], [0]>} : vector<2x8x8xbf16>, vector<2x8x8xbf16>, vector<2x8x8xf32> -> vector<2x8x8xf32>
      "tpu.trace_stop"() : () -> ()
      %155 = vector.shape_cast %154 : vector<2x8x8xf32> to vector<16x8xf32>
      %156 = arith.truncf %155 : vector<16x8xf32> to vector<16x8xbf16>
      %157 = vector.extract_strided_slice %77 {offsets = [16, 0], sizes = [8, 32], strides = [1, 1]} : vector<32x32xbf16> to vector<8x32xbf16>
      %cst_58 = arith.constant dense<0.000000e+00> : vector<16x32xf32>
      %158 = tpu.matmul %156, %157, %cst_58 {dimension_numbers = #tpu.dot_dimension_numbers<[1], [0], [0], [1], [0, 0, 1, 1], [], []>} : vector<16x8xbf16>, vector<8x32xbf16>, vector<16x32xf32> -> vector<16x32xf32>
      %159 = arith.addf %132, %158 : vector<16x32xf32>
      %160 = vector.extract_strided_slice %69 {offsets = [0, 24], sizes = [16, 8], strides = [1, 1]} : vector<16x32xbf16> to vector<16x8xbf16>
      %161 = vector.shape_cast %160 : vector<16x8xbf16> to vector<2x8x8xbf16>
      %162 = vector.extract_strided_slice %75 {offsets = [0, 24], sizes = [16, 8], strides = [1, 1]} : vector<16x32xbf16> to vector<16x8xbf16>
      %163 = vector.shape_cast %162 : vector<16x8xbf16> to vector<2x8x8xbf16>
      %164 = vector.extract_strided_slice %63 {offsets = [0, 24], sizes = [16, 8], strides = [1, 1]} : vector<16x32xbf16> to vector<16x8xbf16>
      %165 = vector.shape_cast %164 : vector<16x8xbf16> to vector<2x8x8xbf16>
      "tpu.trace_start"() <{level = 10 : i32, message = "bqd,bkd->bqk"}> : () -> ()
      %cst_59 = arith.constant dense<0.000000e+00> : vector<2x8x8xf32>
      %166 = tpu.matmul %161, %163, %cst_59 {dimension_numbers = #tpu.dot_dimension_numbers<[2], [2], [1], [1], [0, 0, 0, 1, 1, 1], [0], [0]>} : vector<2x8x8xbf16>, vector<2x8x8xbf16>, vector<2x8x8xf32> -> vector<2x8x8xf32>
      "tpu.trace_stop"() : () -> ()
      %cst_60 = arith.constant 0.353553385 : f32
      %167 = vector.broadcast %cst_60 : f32 to vector<2x8x8xf32>
      %168 = arith.mulf %166, %167 : vector<2x8x8xf32>
      %169 = arith.addf %168, %40 : vector<2x8x8xf32>
      %cst_61 = arith.constant dense<0xFF800000> : vector<2x8xf32>
      %170 = vector.multi_reduction <maximumf>, %169, %cst_61 [2] : vector<2x8x8xf32> to vector<2x8xf32>
      %171 = vector.shape_cast %170 : vector<2x8xf32> to vector<2x8x1xf32>
      %172 = vector.broadcast %171 : vector<2x8x1xf32> to vector<2x8x8xf32>
      %173 = arith.subf %169, %172 : vector<2x8x8xf32>
      %174 = math.exp %173 : vector<2x8x8xf32>
      %cst_62 = arith.constant dense<0.000000e+00> : vector<2x8xf32>
      %175 = vector.multi_reduction <add>, %174, %cst_62 [2] : vector<2x8x8xf32> to vector<2x8xf32>
      %176 = vector.shape_cast %175 : vector<2x8xf32> to vector<2x8x1xf32>
      %177 = tpu.reciprocal %176 {approx = true} : vector<2x8x1xf32> -> vector<2x8x1xf32>
      %178 = vector.broadcast %177 : vector<2x8x1xf32> to vector<2x8x8xf32>
      %179 = arith.mulf %174, %178 : vector<2x8x8xf32>
      %180 = arith.truncf %179 : vector<2x8x8xf32> to vector<2x8x8xbf16>
      "tpu.trace_start"() <{level = 10 : i32, message = "bqk,bkd->bqd"}> : () -> ()
      %cst_63 = arith.constant dense<0.000000e+00> : vector<2x8x8xf32>
      %181 = tpu.matmul %180, %165, %cst_63 {dimension_numbers = #tpu.dot_dimension_numbers<[2], [1], [1], [2], [0, 0, 0, 1, 1, 2], [0], [0]>} : vector<2x8x8xbf16>, vector<2x8x8xbf16>, vector<2x8x8xf32> -> vector<2x8x8xf32>
      "tpu.trace_stop"() : () -> ()
      %182 = vector.shape_cast %181 : vector<2x8x8xf32> to vector<16x8xf32>
      %183 = arith.truncf %182 : vector<16x8xf32> to vector<16x8xbf16>
      %184 = vector.extract_strided_slice %77 {offsets = [24, 0], sizes = [8, 32], strides = [1, 1]} : vector<32x32xbf16> to vector<8x32xbf16>
      %cst_64 = arith.constant dense<0.000000e+00> : vector<16x32xf32>
      %185 = tpu.matmul %183, %184, %cst_64 {dimension_numbers = #tpu.dot_dimension_numbers<[1], [0], [0], [1], [0, 0, 1, 1], [], []>} : vector<16x8xbf16>, vector<8x32xbf16>, vector<16x32xf32> -> vector<16x32xf32>
      %186 = arith.addf %159, %185 : vector<16x32xf32>
      %187 = arith.addf %36, %186 : vector<16x32xf32>
      %c0_65 = arith.constant 0 : index
      %c0_66 = arith.constant 0 : index
      %c0_67 = arith.constant 0 : index
      %188 = vector.load %arg5[%c0_65, %c0_66, %c0_67] : memref<2x1x32xbf16, #tpu.memory_space<vmem>>, vector<1x1x32xbf16>
      %189 = vector.shape_cast %188 : vector<1x1x32xbf16> to vector<1x32xbf16>
      %190 = arith.mulf %187, %187 : vector<16x32xf32>
      %cst_68 = arith.constant dense<0.000000e+00> : vector<16xf32>
      %191 = vector.multi_reduction <add>, %190, %cst_68 [1] : vector<16x32xf32> to vector<16xf32>
      %192 = vector.shape_cast %191 : vector<16xf32> to vector<16x1xf32>
      %cst_69 = arith.constant 3.200000e+01 : f32
      %193 = vector.broadcast %cst_69 : f32 to vector<16x1xf32>
      %194 = arith.divf %192, %193 : vector<16x1xf32>
      %cst_70 = arith.constant 9.99999974E-6 : f32
      %195 = vector.broadcast %cst_70 : f32 to vector<16x1xf32>
      %196 = arith.addf %194, %195 : vector<16x1xf32>
      %197 = math.rsqrt %196 : vector<16x1xf32>
      %198 = vector.broadcast %197 : vector<16x1xf32> to vector<16x32xf32>
      %199 = arith.mulf %187, %198 : vector<16x32xf32>
      %200 = arith.extf %189 : vector<1x32xbf16> to vector<1x32xf32>
      %201 = vector.broadcast %200 : vector<1x32xf32> to vector<16x32xf32>
      %202 = arith.mulf %199, %201 : vector<16x32xf32>
      %203 = arith.truncf %202 : vector<16x32xf32> to vector<16x32xbf16>
      %c0_71 = arith.constant 0 : index
      %c0_72 = arith.constant 0 : index
      %c0_73 = arith.constant 0 : index
      %204 = vector.load %arg6[%c0_71, %c0_72, %c0_73] : memref<2x32x128xbf16, #tpu.memory_space<vmem>>, vector<1x32x128xbf16>
      %205 = vector.shape_cast %204 : vector<1x32x128xbf16> to vector<32x128xbf16>
      %cst_74 = arith.constant dense<0.000000e+00> : vector<16x128xf32>
      %206 = tpu.matmul %203, %205, %cst_74 {dimension_numbers = #tpu.dot_dimension_numbers<[1], [0], [0], [1], [0, 0, 1, 1], [], []>} : vector<16x32xbf16>, vector<32x128xbf16>, vector<16x128xf32> -> vector<16x128xf32>
      %207 = vector.extract_strided_slice %206 {offsets = [0, 0], sizes = [16, 64], strides = [1, 1]} : vector<16x128xf32> to vector<16x64xf32>
      %208 = vector.extract_strided_slice %206 {offsets = [0, 64], sizes = [16, 64], strides = [1, 1]} : vector<16x128xf32> to vector<16x64xf32>
      %209 = arith.negf %207 : vector<16x64xf32>
      %210 = math.exp %209 : vector<16x64xf32>
      %cst_75 = arith.constant 1.000000e+00 : f32
      %211 = vector.broadcast %cst_75 : f32 to vector<16x64xf32>
      %212 = arith.addf %211, %210 : vector<16x64xf32>
      %213 = arith.divf %211, %212 : vector<16x64xf32>
      %214 = arith.mulf %207, %213 : vector<16x64xf32>
      %215 = arith.mulf %214, %208 : vector<16x64xf32>
      %216 = arith.truncf %215 : vector<16x64xf32> to vector<16x64xbf16>
      %c0_76 = arith.constant 0 : index
      %c0_77 = arith.constant 0 : index
      %c0_78 = arith.constant 0 : index
      %217 = vector.load %arg7[%c0_76, %c0_77, %c0_78] : memref<2x64x32xbf16, #tpu.memory_space<vmem>>, vector<1x64x32xbf16>
      %218 = vector.shape_cast %217 : vector<1x64x32xbf16> to vector<64x32xbf16>
      %cst_79 = arith.constant dense<0.000000e+00> : vector<16x32xf32>
      %219 = tpu.matmul %216, %218, %cst_79 {dimension_numbers = #tpu.dot_dimension_numbers<[1], [0], [0], [1], [0, 0, 1, 1], [], []>} : vector<16x64xbf16>, vector<64x32xbf16>, vector<16x32xf32> -> vector<16x32xf32>
      %220 = arith.addf %187, %219 : vector<16x32xf32>
      %c1 = arith.constant 1 : index
      %c0_80 = arith.constant 0 : index
      %c0_81 = arith.constant 0 : index
      %221 = vector.load %arg2[%c1, %c0_80, %c0_81] : memref<2x1x32xbf16, #tpu.memory_space<vmem>>, vector<1x1x32xbf16>
      %222 = vector.shape_cast %221 : vector<1x1x32xbf16> to vector<1x32xbf16>
      %223 = arith.mulf %220, %220 : vector<16x32xf32>
      %cst_82 = arith.constant dense<0.000000e+00> : vector<16xf32>
      %224 = vector.multi_reduction <add>, %223, %cst_82 [1] : vector<16x32xf32> to vector<16xf32>
      %225 = vector.shape_cast %224 : vector<16xf32> to vector<16x1xf32>
      %cst_83 = arith.constant 3.200000e+01 : f32
      %226 = vector.broadcast %cst_83 : f32 to vector<16x1xf32>
      %227 = arith.divf %225, %226 : vector<16x1xf32>
      %cst_84 = arith.constant 9.99999974E-6 : f32
      %228 = vector.broadcast %cst_84 : f32 to vector<16x1xf32>
      %229 = arith.addf %227, %228 : vector<16x1xf32>
      %230 = math.rsqrt %229 : vector<16x1xf32>
      %231 = vector.broadcast %230 : vector<16x1xf32> to vector<16x32xf32>
      %232 = arith.mulf %220, %231 : vector<16x32xf32>
      %233 = arith.extf %222 : vector<1x32xbf16> to vector<1x32xf32>
      %234 = vector.broadcast %233 : vector<1x32xf32> to vector<16x32xf32>
      %235 = arith.mulf %232, %234 : vector<16x32xf32>
      %236 = arith.truncf %235 : vector<16x32xf32> to vector<16x32xbf16>
      %c1_85 = arith.constant 1 : index
      %c0_86 = arith.constant 0 : index
      %c0_87 = arith.constant 0 : index
      %237 = vector.load %arg3[%c1_85, %c0_86, %c0_87] : memref<2x32x96xbf16, #tpu.memory_space<vmem>>, vector<1x32x96xbf16>
      %238 = vector.shape_cast %237 : vector<1x32x96xbf16> to vector<32x96xbf16>
      %cst_88 = arith.constant dense<0.000000e+00> : vector<16x96xf32>
      %239 = tpu.matmul %236, %238, %cst_88 {dimension_numbers = #tpu.dot_dimension_numbers<[1], [0], [0], [1], [0, 0, 1, 1], [], []>} : vector<16x32xbf16>, vector<32x96xbf16>, vector<16x96xf32> -> vector<16x96xf32>
      %240 = vector.extract_strided_slice %239 {offsets = [0, 0], sizes = [16, 32], strides = [1, 1]} : vector<16x96xf32> to vector<16x32xf32>
      %241 = vector.extract_strided_slice %239 {offsets = [0, 32], sizes = [16, 32], strides = [1, 1]} : vector<16x96xf32> to vector<16x32xf32>
      %242 = vector.extract_strided_slice %239 {offsets = [0, 64], sizes = [16, 32], strides = [1, 1]} : vector<16x96xf32> to vector<16x32xf32>
      %243 = arith.truncf %242 : vector<16x32xf32> to vector<16x32xbf16>
      %244 = arith.mulf %240, %38 : vector<16x32xf32>
      %245 = arith.truncf %240 : vector<16x32xf32> to vector<16x32xbf16>
      %cst_89 = arith.constant dense<0.000000e+00> : vector<16x32xf32>
      %246 = tpu.matmul %245, %37, %cst_89 {dimension_numbers = #tpu.dot_dimension_numbers<[1], [0], [0], [1], [0, 0, 1, 1], [], []>} : vector<16x32xbf16>, vector<32x32xbf16>, vector<16x32xf32> -> vector<16x32xf32>
      %247 = arith.mulf %246, %39 : vector<16x32xf32>
      %248 = arith.addf %244, %247 : vector<16x32xf32>
      %249 = arith.truncf %248 : vector<16x32xf32> to vector<16x32xbf16>
      %250 = arith.mulf %241, %38 : vector<16x32xf32>
      %251 = arith.truncf %241 : vector<16x32xf32> to vector<16x32xbf16>
      %cst_90 = arith.constant dense<0.000000e+00> : vector<16x32xf32>
      %252 = tpu.matmul %251, %37, %cst_90 {dimension_numbers = #tpu.dot_dimension_numbers<[1], [0], [0], [1], [0, 0, 1, 1], [], []>} : vector<16x32xbf16>, vector<32x32xbf16>, vector<16x32xf32> -> vector<16x32xf32>
      %253 = arith.mulf %252, %39 : vector<16x32xf32>
      %254 = arith.addf %250, %253 : vector<16x32xf32>
      %255 = arith.truncf %254 : vector<16x32xf32> to vector<16x32xbf16>
      %c1_91 = arith.constant 1 : index
      %c0_92 = arith.constant 0 : index
      %c0_93 = arith.constant 0 : index
      %256 = vector.load %arg4[%c1_91, %c0_92, %c0_93] : memref<2x32x32xbf16, #tpu.memory_space<vmem>>, vector<1x32x32xbf16>
      %257 = vector.shape_cast %256 : vector<1x32x32xbf16> to vector<32x32xbf16>
      %cst_94 = arith.constant 0.000000e+00 : f32
      %258 = vector.broadcast %cst_94 : f32 to vector<16x32xf32>
      %259 = vector.extract_strided_slice %249 {offsets = [0, 0], sizes = [16, 8], strides = [1, 1]} : vector<16x32xbf16> to vector<16x8xbf16>
      %260 = vector.shape_cast %259 : vector<16x8xbf16> to vector<2x8x8xbf16>
      %261 = vector.extract_strided_slice %255 {offsets = [0, 0], sizes = [16, 8], strides = [1, 1]} : vector<16x32xbf16> to vector<16x8xbf16>
      %262 = vector.shape_cast %261 : vector<16x8xbf16> to vector<2x8x8xbf16>
      %263 = vector.extract_strided_slice %243 {offsets = [0, 0], sizes = [16, 8], strides = [1, 1]} : vector<16x32xbf16> to vector<16x8xbf16>
      %264 = vector.shape_cast %263 : vector<16x8xbf16> to vector<2x8x8xbf16>
      "tpu.trace_start"() <{level = 10 : i32, message = "bqd,bkd->bqk"}> : () -> ()
      %cst_95 = arith.constant dense<0.000000e+00> : vector<2x8x8xf32>
      %265 = tpu.matmul %260, %262, %cst_95 {dimension_numbers = #tpu.dot_dimension_numbers<[2], [2], [1], [1], [0, 0, 0, 1, 1, 1], [0], [0]>} : vector<2x8x8xbf16>, vector<2x8x8xbf16>, vector<2x8x8xf32> -> vector<2x8x8xf32>
      "tpu.trace_stop"() : () -> ()
      %cst_96 = arith.constant 0.353553385 : f32
      %266 = vector.broadcast %cst_96 : f32 to vector<2x8x8xf32>
      %267 = arith.mulf %265, %266 : vector<2x8x8xf32>
      %268 = arith.addf %267, %40 : vector<2x8x8xf32>
      %cst_97 = arith.constant dense<0xFF800000> : vector<2x8xf32>
      %269 = vector.multi_reduction <maximumf>, %268, %cst_97 [2] : vector<2x8x8xf32> to vector<2x8xf32>
      %270 = vector.shape_cast %269 : vector<2x8xf32> to vector<2x8x1xf32>
      %271 = vector.broadcast %270 : vector<2x8x1xf32> to vector<2x8x8xf32>
      %272 = arith.subf %268, %271 : vector<2x8x8xf32>
      %273 = math.exp %272 : vector<2x8x8xf32>
      %cst_98 = arith.constant dense<0.000000e+00> : vector<2x8xf32>
      %274 = vector.multi_reduction <add>, %273, %cst_98 [2] : vector<2x8x8xf32> to vector<2x8xf32>
      %275 = vector.shape_cast %274 : vector<2x8xf32> to vector<2x8x1xf32>
      %276 = tpu.reciprocal %275 {approx = true} : vector<2x8x1xf32> -> vector<2x8x1xf32>
      %277 = vector.broadcast %276 : vector<2x8x1xf32> to vector<2x8x8xf32>
      %278 = arith.mulf %273, %277 : vector<2x8x8xf32>
      %279 = arith.truncf %278 : vector<2x8x8xf32> to vector<2x8x8xbf16>
      "tpu.trace_start"() <{level = 10 : i32, message = "bqk,bkd->bqd"}> : () -> ()
      %cst_99 = arith.constant dense<0.000000e+00> : vector<2x8x8xf32>
      %280 = tpu.matmul %279, %264, %cst_99 {dimension_numbers = #tpu.dot_dimension_numbers<[2], [1], [1], [2], [0, 0, 0, 1, 1, 2], [0], [0]>} : vector<2x8x8xbf16>, vector<2x8x8xbf16>, vector<2x8x8xf32> -> vector<2x8x8xf32>
      "tpu.trace_stop"() : () -> ()
      %281 = vector.shape_cast %280 : vector<2x8x8xf32> to vector<16x8xf32>
      %282 = arith.truncf %281 : vector<16x8xf32> to vector<16x8xbf16>
      %283 = vector.extract_strided_slice %257 {offsets = [0, 0], sizes = [8, 32], strides = [1, 1]} : vector<32x32xbf16> to vector<8x32xbf16>
      %cst_100 = arith.constant dense<0.000000e+00> : vector<16x32xf32>
      %284 = tpu.matmul %282, %283, %cst_100 {dimension_numbers = #tpu.dot_dimension_numbers<[1], [0], [0], [1], [0, 0, 1, 1], [], []>} : vector<16x8xbf16>, vector<8x32xbf16>, vector<16x32xf32> -> vector<16x32xf32>
      %285 = arith.addf %258, %284 : vector<16x32xf32>
      %286 = vector.extract_strided_slice %249 {offsets = [0, 8], sizes = [16, 8], strides = [1, 1]} : vector<16x32xbf16> to vector<16x8xbf16>
      %287 = vector.shape_cast %286 : vector<16x8xbf16> to vector<2x8x8xbf16>
      %288 = vector.extract_strided_slice %255 {offsets = [0, 8], sizes = [16, 8], strides = [1, 1]} : vector<16x32xbf16> to vector<16x8xbf16>
      %289 = vector.shape_cast %288 : vector<16x8xbf16> to vector<2x8x8xbf16>
      %290 = vector.extract_strided_slice %243 {offsets = [0, 8], sizes = [16, 8], strides = [1, 1]} : vector<16x32xbf16> to vector<16x8xbf16>
      %291 = vector.shape_cast %290 : vector<16x8xbf16> to vector<2x8x8xbf16>
      "tpu.trace_start"() <{level = 10 : i32, message = "bqd,bkd->bqk"}> : () -> ()
      %cst_101 = arith.constant dense<0.000000e+00> : vector<2x8x8xf32>
      %292 = tpu.matmul %287, %289, %cst_101 {dimension_numbers = #tpu.dot_dimension_numbers<[2], [2], [1], [1], [0, 0, 0, 1, 1, 1], [0], [0]>} : vector<2x8x8xbf16>, vector<2x8x8xbf16>, vector<2x8x8xf32> -> vector<2x8x8xf32>
      "tpu.trace_stop"() : () -> ()
      %cst_102 = arith.constant 0.353553385 : f32
      %293 = vector.broadcast %cst_102 : f32 to vector<2x8x8xf32>
      %294 = arith.mulf %292, %293 : vector<2x8x8xf32>
      %295 = arith.addf %294, %40 : vector<2x8x8xf32>
      %cst_103 = arith.constant dense<0xFF800000> : vector<2x8xf32>
      %296 = vector.multi_reduction <maximumf>, %295, %cst_103 [2] : vector<2x8x8xf32> to vector<2x8xf32>
      %297 = vector.shape_cast %296 : vector<2x8xf32> to vector<2x8x1xf32>
      %298 = vector.broadcast %297 : vector<2x8x1xf32> to vector<2x8x8xf32>
      %299 = arith.subf %295, %298 : vector<2x8x8xf32>
      %300 = math.exp %299 : vector<2x8x8xf32>
      %cst_104 = arith.constant dense<0.000000e+00> : vector<2x8xf32>
      %301 = vector.multi_reduction <add>, %300, %cst_104 [2] : vector<2x8x8xf32> to vector<2x8xf32>
      %302 = vector.shape_cast %301 : vector<2x8xf32> to vector<2x8x1xf32>
      %303 = tpu.reciprocal %302 {approx = true} : vector<2x8x1xf32> -> vector<2x8x1xf32>
      %304 = vector.broadcast %303 : vector<2x8x1xf32> to vector<2x8x8xf32>
      %305 = arith.mulf %300, %304 : vector<2x8x8xf32>
      %306 = arith.truncf %305 : vector<2x8x8xf32> to vector<2x8x8xbf16>
      "tpu.trace_start"() <{level = 10 : i32, message = "bqk,bkd->bqd"}> : () -> ()
      %cst_105 = arith.constant dense<0.000000e+00> : vector<2x8x8xf32>
      %307 = tpu.matmul %306, %291, %cst_105 {dimension_numbers = #tpu.dot_dimension_numbers<[2], [1], [1], [2], [0, 0, 0, 1, 1, 2], [0], [0]>} : vector<2x8x8xbf16>, vector<2x8x8xbf16>, vector<2x8x8xf32> -> vector<2x8x8xf32>
      "tpu.trace_stop"() : () -> ()
      %308 = vector.shape_cast %307 : vector<2x8x8xf32> to vector<16x8xf32>
      %309 = arith.truncf %308 : vector<16x8xf32> to vector<16x8xbf16>
      %310 = vector.extract_strided_slice %257 {offsets = [8, 0], sizes = [8, 32], strides = [1, 1]} : vector<32x32xbf16> to vector<8x32xbf16>
      %cst_106 = arith.constant dense<0.000000e+00> : vector<16x32xf32>
      %311 = tpu.matmul %309, %310, %cst_106 {dimension_numbers = #tpu.dot_dimension_numbers<[1], [0], [0], [1], [0, 0, 1, 1], [], []>} : vector<16x8xbf16>, vector<8x32xbf16>, vector<16x32xf32> -> vector<16x32xf32>
      %312 = arith.addf %285, %311 : vector<16x32xf32>
      %313 = vector.extract_strided_slice %249 {offsets = [0, 16], sizes = [16, 8], strides = [1, 1]} : vector<16x32xbf16> to vector<16x8xbf16>
      %314 = vector.shape_cast %313 : vector<16x8xbf16> to vector<2x8x8xbf16>
      %315 = vector.extract_strided_slice %255 {offsets = [0, 16], sizes = [16, 8], strides = [1, 1]} : vector<16x32xbf16> to vector<16x8xbf16>
      %316 = vector.shape_cast %315 : vector<16x8xbf16> to vector<2x8x8xbf16>
      %317 = vector.extract_strided_slice %243 {offsets = [0, 16], sizes = [16, 8], strides = [1, 1]} : vector<16x32xbf16> to vector<16x8xbf16>
      %318 = vector.shape_cast %317 : vector<16x8xbf16> to vector<2x8x8xbf16>
      "tpu.trace_start"() <{level = 10 : i32, message = "bqd,bkd->bqk"}> : () -> ()
      %cst_107 = arith.constant dense<0.000000e+00> : vector<2x8x8xf32>
      %319 = tpu.matmul %314, %316, %cst_107 {dimension_numbers = #tpu.dot_dimension_numbers<[2], [2], [1], [1], [0, 0, 0, 1, 1, 1], [0], [0]>} : vector<2x8x8xbf16>, vector<2x8x8xbf16>, vector<2x8x8xf32> -> vector<2x8x8xf32>
      "tpu.trace_stop"() : () -> ()
      %cst_108 = arith.constant 0.353553385 : f32
      %320 = vector.broadcast %cst_108 : f32 to vector<2x8x8xf32>
      %321 = arith.mulf %319, %320 : vector<2x8x8xf32>
      %322 = arith.addf %321, %40 : vector<2x8x8xf32>
      %cst_109 = arith.constant dense<0xFF800000> : vector<2x8xf32>
      %323 = vector.multi_reduction <maximumf>, %322, %cst_109 [2] : vector<2x8x8xf32> to vector<2x8xf32>
      %324 = vector.shape_cast %323 : vector<2x8xf32> to vector<2x8x1xf32>
      %325 = vector.broadcast %324 : vector<2x8x1xf32> to vector<2x8x8xf32>
      %326 = arith.subf %322, %325 : vector<2x8x8xf32>
      %327 = math.exp %326 : vector<2x8x8xf32>
      %cst_110 = arith.constant dense<0.000000e+00> : vector<2x8xf32>
      %328 = vector.multi_reduction <add>, %327, %cst_110 [2] : vector<2x8x8xf32> to vector<2x8xf32>
      %329 = vector.shape_cast %328 : vector<2x8xf32> to vector<2x8x1xf32>
      %330 = tpu.reciprocal %329 {approx = true} : vector<2x8x1xf32> -> vector<2x8x1xf32>
      %331 = vector.broadcast %330 : vector<2x8x1xf32> to vector<2x8x8xf32>
      %332 = arith.mulf %327, %331 : vector<2x8x8xf32>
      %333 = arith.truncf %332 : vector<2x8x8xf32> to vector<2x8x8xbf16>
      "tpu.trace_start"() <{level = 10 : i32, message = "bqk,bkd->bqd"}> : () -> ()
      %cst_111 = arith.constant dense<0.000000e+00> : vector<2x8x8xf32>
      %334 = tpu.matmul %333, %318, %cst_111 {dimension_numbers = #tpu.dot_dimension_numbers<[2], [1], [1], [2], [0, 0, 0, 1, 1, 2], [0], [0]>} : vector<2x8x8xbf16>, vector<2x8x8xbf16>, vector<2x8x8xf32> -> vector<2x8x8xf32>
      "tpu.trace_stop"() : () -> ()
      %335 = vector.shape_cast %334 : vector<2x8x8xf32> to vector<16x8xf32>
      %336 = arith.truncf %335 : vector<16x8xf32> to vector<16x8xbf16>
      %337 = vector.extract_strided_slice %257 {offsets = [16, 0], sizes = [8, 32], strides = [1, 1]} : vector<32x32xbf16> to vector<8x32xbf16>
      %cst_112 = arith.constant dense<0.000000e+00> : vector<16x32xf32>
      %338 = tpu.matmul %336, %337, %cst_112 {dimension_numbers = #tpu.dot_dimension_numbers<[1], [0], [0], [1], [0, 0, 1, 1], [], []>} : vector<16x8xbf16>, vector<8x32xbf16>, vector<16x32xf32> -> vector<16x32xf32>
      %339 = arith.addf %312, %338 : vector<16x32xf32>
      %340 = vector.extract_strided_slice %249 {offsets = [0, 24], sizes = [16, 8], strides = [1, 1]} : vector<16x32xbf16> to vector<16x8xbf16>
      %341 = vector.shape_cast %340 : vector<16x8xbf16> to vector<2x8x8xbf16>
      %342 = vector.extract_strided_slice %255 {offsets = [0, 24], sizes = [16, 8], strides = [1, 1]} : vector<16x32xbf16> to vector<16x8xbf16>
      %343 = vector.shape_cast %342 : vector<16x8xbf16> to vector<2x8x8xbf16>
      %344 = vector.extract_strided_slice %243 {offsets = [0, 24], sizes = [16, 8], strides = [1, 1]} : vector<16x32xbf16> to vector<16x8xbf16>
      %345 = vector.shape_cast %344 : vector<16x8xbf16> to vector<2x8x8xbf16>
      "tpu.trace_start"() <{level = 10 : i32, message = "bqd,bkd->bqk"}> : () -> ()
      %cst_113 = arith.constant dense<0.000000e+00> : vector<2x8x8xf32>
      %346 = tpu.matmul %341, %343, %cst_113 {dimension_numbers = #tpu.dot_dimension_numbers<[2], [2], [1], [1], [0, 0, 0, 1, 1, 1], [0], [0]>} : vector<2x8x8xbf16>, vector<2x8x8xbf16>, vector<2x8x8xf32> -> vector<2x8x8xf32>
      "tpu.trace_stop"() : () -> ()
      %cst_114 = arith.constant 0.353553385 : f32
      %347 = vector.broadcast %cst_114 : f32 to vector<2x8x8xf32>
      %348 = arith.mulf %346, %347 : vector<2x8x8xf32>
      %349 = arith.addf %348, %40 : vector<2x8x8xf32>
      %cst_115 = arith.constant dense<0xFF800000> : vector<2x8xf32>
      %350 = vector.multi_reduction <maximumf>, %349, %cst_115 [2] : vector<2x8x8xf32> to vector<2x8xf32>
      %351 = vector.shape_cast %350 : vector<2x8xf32> to vector<2x8x1xf32>
      %352 = vector.broadcast %351 : vector<2x8x1xf32> to vector<2x8x8xf32>
      %353 = arith.subf %349, %352 : vector<2x8x8xf32>
      %354 = math.exp %353 : vector<2x8x8xf32>
      %cst_116 = arith.constant dense<0.000000e+00> : vector<2x8xf32>
      %355 = vector.multi_reduction <add>, %354, %cst_116 [2] : vector<2x8x8xf32> to vector<2x8xf32>
      %356 = vector.shape_cast %355 : vector<2x8xf32> to vector<2x8x1xf32>
      %357 = tpu.reciprocal %356 {approx = true} : vector<2x8x1xf32> -> vector<2x8x1xf32>
      %358 = vector.broadcast %357 : vector<2x8x1xf32> to vector<2x8x8xf32>
      %359 = arith.mulf %354, %358 : vector<2x8x8xf32>
      %360 = arith.truncf %359 : vector<2x8x8xf32> to vector<2x8x8xbf16>
      "tpu.trace_start"() <{level = 10 : i32, message = "bqk,bkd->bqd"}> : () -> ()
      %cst_117 = arith.constant dense<0.000000e+00> : vector<2x8x8xf32>
      %361 = tpu.matmul %360, %345, %cst_117 {dimension_numbers = #tpu.dot_dimension_numbers<[2], [1], [1], [2], [0, 0, 0, 1, 1, 2], [0], [0]>} : vector<2x8x8xbf16>, vector<2x8x8xbf16>, vector<2x8x8xf32> -> vector<2x8x8xf32>
      "tpu.trace_stop"() : () -> ()
      %362 = vector.shape_cast %361 : vector<2x8x8xf32> to vector<16x8xf32>
      %363 = arith.truncf %362 : vector<16x8xf32> to vector<16x8xbf16>
      %364 = vector.extract_strided_slice %257 {offsets = [24, 0], sizes = [8, 32], strides = [1, 1]} : vector<32x32xbf16> to vector<8x32xbf16>
      %cst_118 = arith.constant dense<0.000000e+00> : vector<16x32xf32>
      %365 = tpu.matmul %363, %364, %cst_118 {dimension_numbers = #tpu.dot_dimension_numbers<[1], [0], [0], [1], [0, 0, 1, 1], [], []>} : vector<16x8xbf16>, vector<8x32xbf16>, vector<16x32xf32> -> vector<16x32xf32>
      %366 = arith.addf %339, %365 : vector<16x32xf32>
      %367 = arith.addf %220, %366 : vector<16x32xf32>
      %c1_119 = arith.constant 1 : index
      %c0_120 = arith.constant 0 : index
      %c0_121 = arith.constant 0 : index
      %368 = vector.load %arg5[%c1_119, %c0_120, %c0_121] : memref<2x1x32xbf16, #tpu.memory_space<vmem>>, vector<1x1x32xbf16>
      %369 = vector.shape_cast %368 : vector<1x1x32xbf16> to vector<1x32xbf16>
      %370 = arith.mulf %367, %367 : vector<16x32xf32>
      %cst_122 = arith.constant dense<0.000000e+00> : vector<16xf32>
      %371 = vector.multi_reduction <add>, %370, %cst_122 [1] : vector<16x32xf32> to vector<16xf32>
      %372 = vector.shape_cast %371 : vector<16xf32> to vector<16x1xf32>
      %cst_123 = arith.constant 3.200000e+01 : f32
      %373 = vector.broadcast %cst_123 : f32 to vector<16x1xf32>
      %374 = arith.divf %372, %373 : vector<16x1xf32>
      %cst_124 = arith.constant 9.99999974E-6 : f32
      %375 = vector.broadcast %cst_124 : f32 to vector<16x1xf32>
      %376 = arith.addf %374, %375 : vector<16x1xf32>
      %377 = math.rsqrt %376 : vector<16x1xf32>
      %378 = vector.broadcast %377 : vector<16x1xf32> to vector<16x32xf32>
      %379 = arith.mulf %367, %378 : vector<16x32xf32>
      %380 = arith.extf %369 : vector<1x32xbf16> to vector<1x32xf32>
      %381 = vector.broadcast %380 : vector<1x32xf32> to vector<16x32xf32>
      %382 = arith.mulf %379, %381 : vector<16x32xf32>
      %383 = arith.truncf %382 : vector<16x32xf32> to vector<16x32xbf16>
      %c1_125 = arith.constant 1 : index
      %c0_126 = arith.constant 0 : index
      %c0_127 = arith.constant 0 : index
      %384 = vector.load %arg6[%c1_125, %c0_126, %c0_127] : memref<2x32x128xbf16, #tpu.memory_space<vmem>>, vector<1x32x128xbf16>
      %385 = vector.shape_cast %384 : vector<1x32x128xbf16> to vector<32x128xbf16>
      %cst_128 = arith.constant dense<0.000000e+00> : vector<16x128xf32>
      %386 = tpu.matmul %383, %385, %cst_128 {dimension_numbers = #tpu.dot_dimension_numbers<[1], [0], [0], [1], [0, 0, 1, 1], [], []>} : vector<16x32xbf16>, vector<32x128xbf16>, vector<16x128xf32> -> vector<16x128xf32>
      %387 = vector.extract_strided_slice %386 {offsets = [0, 0], sizes = [16, 64], strides = [1, 1]} : vector<16x128xf32> to vector<16x64xf32>
      %388 = vector.extract_strided_slice %386 {offsets = [0, 64], sizes = [16, 64], strides = [1, 1]} : vector<16x128xf32> to vector<16x64xf32>
      %389 = arith.negf %387 : vector<16x64xf32>
      %390 = math.exp %389 : vector<16x64xf32>
      %cst_129 = arith.constant 1.000000e+00 : f32
      %391 = vector.broadcast %cst_129 : f32 to vector<16x64xf32>
      %392 = arith.addf %391, %390 : vector<16x64xf32>
      %393 = arith.divf %391, %392 : vector<16x64xf32>
      %394 = arith.mulf %387, %393 : vector<16x64xf32>
      %395 = arith.mulf %394, %388 : vector<16x64xf32>
      %396 = arith.truncf %395 : vector<16x64xf32> to vector<16x64xbf16>
      %c1_130 = arith.constant 1 : index
      %c0_131 = arith.constant 0 : index
      %c0_132 = arith.constant 0 : index
      %397 = vector.load %arg7[%c1_130, %c0_131, %c0_132] : memref<2x64x32xbf16, #tpu.memory_space<vmem>>, vector<1x64x32xbf16>
      %398 = vector.shape_cast %397 : vector<1x64x32xbf16> to vector<64x32xbf16>
      %cst_133 = arith.constant dense<0.000000e+00> : vector<16x32xf32>
      %399 = tpu.matmul %396, %398, %cst_133 {dimension_numbers = #tpu.dot_dimension_numbers<[1], [0], [0], [1], [0, 0, 1, 1], [], []>} : vector<16x64xbf16>, vector<64x32xbf16>, vector<16x32xf32> -> vector<16x32xf32>
      %400 = arith.addf %367, %399 : vector<16x32xf32>
      %c0_134 = arith.constant 0 : index
      %c0_135 = arith.constant 0 : index
      %401 = vector.load %arg12[%c0_134, %c0_135] : memref<1x32xbf16, #tpu.memory_space<vmem>>, vector<1x32xbf16>
      %402 = arith.mulf %400, %400 : vector<16x32xf32>
      %cst_136 = arith.constant dense<0.000000e+00> : vector<16xf32>
      %403 = vector.multi_reduction <add>, %402, %cst_136 [1] : vector<16x32xf32> to vector<16xf32>
      %404 = vector.shape_cast %403 : vector<16xf32> to vector<16x1xf32>
      %cst_137 = arith.constant 3.200000e+01 : f32
      %405 = vector.broadcast %cst_137 : f32 to vector<16x1xf32>
      %406 = arith.divf %404, %405 : vector<16x1xf32>
      %cst_138 = arith.constant 9.99999974E-6 : f32
      %407 = vector.broadcast %cst_138 : f32 to vector<16x1xf32>
      %408 = arith.addf %406, %407 : vector<16x1xf32>
      %409 = math.rsqrt %408 : vector<16x1xf32>
      %410 = vector.broadcast %409 : vector<16x1xf32> to vector<16x32xf32>
      %411 = arith.mulf %400, %410 : vector<16x32xf32>
      %412 = arith.extf %401 : vector<1x32xbf16> to vector<1x32xf32>
      %413 = vector.broadcast %412 : vector<1x32xf32> to vector<16x32xf32>
      %414 = arith.mulf %411, %413 : vector<16x32xf32>
      %415 = arith.truncf %414 : vector<16x32xf32> to vector<16x32xbf16>
      %c0_139 = arith.constant 0 : index
      %c0_140 = arith.constant 0 : index
      %416 = vector.load %arg13[%c0_139, %c0_140] : memref<32x128xbf16, #tpu.memory_space<vmem>>, vector<32x128xbf16>
      %cst_141 = arith.constant dense<0.000000e+00> : vector<16x128xf32>
      %417 = tpu.matmul %415, %416, %cst_141 {dimension_numbers = #tpu.dot_dimension_numbers<[1], [0], [0], [1], [0, 0, 1, 1], [], []>} : vector<16x32xbf16>, vector<32x128xbf16>, vector<16x128xf32> -> vector<16x128xf32>
      %cst_142 = arith.constant 1.42857146 : f32
      %418 = vector.broadcast %cst_142 : f32 to vector<16x128xf32>
      %419 = arith.mulf %417, %418 : vector<16x128xf32>
      %c0_143 = arith.constant 0 : index
      %c0_144 = arith.constant 0 : index
      %420 = vector.load %arg20[%c0_143, %c0_144] : memref<16x128xf32, #tpu.memory_space<vmem>>, vector<16x128xf32>
      tpu.vector_store %arg20[%c0_143, %c0_144], %419 {strides = array<i32>} : memref<16x128xf32, #tpu.memory_space<vmem>>, vector<16x128xf32>,
      %c0_145 = arith.constant 0 : index
      %c0_146 = arith.constant 0 : index
      %421 = vector.load %arg14[%c0_145, %c0_146] : memref<32x2048xbf16, #tpu.memory_space<vmem>>, vector<32x2048xbf16>
      %cst_147 = arith.constant dense<0.000000e+00> : vector<16x2048xf32>
      %422 = tpu.matmul %415, %421, %cst_147 {dimension_numbers = #tpu.dot_dimension_numbers<[1], [0], [0], [1], [0, 0, 1, 1], [], []>} : vector<16x32xbf16>, vector<32x2048xbf16>, vector<16x2048xf32> -> vector<16x2048xf32>
      %c0_148 = arith.constant 0 : index
      %c0_149 = arith.constant 0 : index
      %423 = vector.load %arg15[%c0_148, %c0_149] : memref<1x2048xf32, #tpu.memory_space<vmem>>, vector<1x2048xf32>
      %424 = vector.broadcast %423 : vector<1x2048xf32> to vector<16x2048xf32>
      %425 = arith.addf %422, %424 : vector<16x2048xf32>
      %cst_150 = arith.constant 0.000000e+00 : f32
      %426 = vector.broadcast %cst_150 : f32 to vector<16x2048xf32>
      %427 = arith.maximumf %425, %426 : vector<16x2048xf32>
      %428 = arith.truncf %427 : vector<16x2048xf32> to vector<16x2048xbf16>
      %c0_151 = arith.constant 0 : index
      %c0_152 = arith.constant 0 : index
      %429 = vector.load %arg22[%c0_151, %c0_152] : memref<16x2048xbf16, #tpu.memory_space<vmem>>, vector<16x2048xbf16>
      tpu.vector_store %arg22[%c0_151, %c0_152], %428 {strides = array<i32>} : memref<16x2048xbf16, #tpu.memory_space<vmem>>, vector<16x2048xbf16>,
      %cst_153 = arith.constant 0.000000e+00 : f32
      %430 = vector.broadcast %cst_153 : f32 to vector<16x128xf32>
      %c0_154 = arith.constant 0 : index
      %c0_155 = arith.constant 0 : index
      %431 = vector.load %arg23[%c0_154, %c0_155] : memref<16x128xf32, #tpu.memory_space<vmem>>, vector<16x128xf32>
      tpu.vector_store %arg23[%c0_154, %c0_155], %430 {strides = array<i32>} : memref<16x128xf32, #tpu.memory_space<vmem>>, vector<16x128xf32>,
    } else {
    }
    %c0 = arith.constant 0 : index
    %c0_1 = arith.constant 0 : index
    %3 = vector.load %arg22[%c0, %c0_1] : memref<16x2048xbf16, #tpu.memory_space<vmem>>, vector<16x2048xbf16>
    %c0_2 = arith.constant 0 : index
    %c0_3 = arith.constant 0 : index
    %4 = vector.load %arg16[%c0_2, %c0_3] : memref<2048x1024xbf16, #tpu.memory_space<vmem>>, vector<2048x1024xbf16>
    %cst = arith.constant dense<0.000000e+00> : vector<16x1024xf32>
    %5 = tpu.matmul %3, %4, %cst {dimension_numbers = #tpu.dot_dimension_numbers<[1], [0], [0], [1], [0, 0, 1, 1], [], []>} : vector<16x2048xbf16>, vector<2048x1024xbf16>, vector<16x1024xf32> -> vector<16x1024xf32>
    %c0_4 = arith.constant 0 : index
    %c0_5 = arith.constant 0 : index
    %6 = vector.load %arg17[%c0_4, %c0_5] : memref<1x1024xf32, #tpu.memory_space<vmem>>, vector<1x1024xf32>
    %7 = vector.broadcast %6 : vector<1x1024xf32> to vector<16x1024xf32>
    %8 = arith.addf %5, %7 : vector<16x1024xf32>
    %cst_6 = arith.constant 0.000000e+00 : f32
    %9 = vector.broadcast %cst_6 : f32 to vector<16x1024xf32>
    %10 = arith.maximumf %8, %9 : vector<16x1024xf32>
    %c0_7 = arith.constant 0 : index
    %c0_8 = arith.constant 0 : index
    %11 = vector.load %arg18[%c0_7, %c0_8] : memref<1x1024xf32, #tpu.memory_space<vmem>>, vector<1x1024xf32>
    %12 = vector.broadcast %11 : vector<1x1024xf32> to vector<16x1024xf32>
    %13 = arith.mulf %10, %12 : vector<16x1024xf32>
    %14 = vector.extract_strided_slice %13 {offsets = [0, 0], sizes = [16, 128], strides = [1, 1]} : vector<16x1024xf32> to vector<16x128xf32>
    %15 = vector.extract_strided_slice %13 {offsets = [0, 128], sizes = [16, 128], strides = [1, 1]} : vector<16x1024xf32> to vector<16x128xf32>
    %16 = arith.addf %14, %15 : vector<16x128xf32>
    %17 = vector.extract_strided_slice %13 {offsets = [0, 256], sizes = [16, 128], strides = [1, 1]} : vector<16x1024xf32> to vector<16x128xf32>
    %18 = arith.addf %16, %17 : vector<16x128xf32>
    %19 = vector.extract_strided_slice %13 {offsets = [0, 384], sizes = [16, 128], strides = [1, 1]} : vector<16x1024xf32> to vector<16x128xf32>
    %20 = arith.addf %18, %19 : vector<16x128xf32>
    %21 = vector.extract_strided_slice %13 {offsets = [0, 512], sizes = [16, 128], strides = [1, 1]} : vector<16x1024xf32> to vector<16x128xf32>
    %22 = arith.addf %20, %21 : vector<16x128xf32>
    %23 = vector.extract_strided_slice %13 {offsets = [0, 640], sizes = [16, 128], strides = [1, 1]} : vector<16x1024xf32> to vector<16x128xf32>
    %24 = arith.addf %22, %23 : vector<16x128xf32>
    %25 = vector.extract_strided_slice %13 {offsets = [0, 768], sizes = [16, 128], strides = [1, 1]} : vector<16x1024xf32> to vector<16x128xf32>
    %26 = arith.addf %24, %25 : vector<16x128xf32>
    %27 = vector.extract_strided_slice %13 {offsets = [0, 896], sizes = [16, 128], strides = [1, 1]} : vector<16x1024xf32> to vector<16x128xf32>
    %28 = arith.addf %26, %27 : vector<16x128xf32>
    %c0_9 = arith.constant 0 : index
    %c0_10 = arith.constant 0 : index
    %29 = vector.load %arg23[%c0_9, %c0_10] : memref<16x128xf32, #tpu.memory_space<vmem>>, vector<16x128xf32>
    %30 = arith.addf %29, %28 : vector<16x128xf32>
    %c0_11 = arith.constant 0 : index
    %c0_12 = arith.constant 0 : index
    %31 = vector.load %arg23[%c0_11, %c0_12] : memref<16x128xf32, #tpu.memory_space<vmem>>, vector<16x128xf32>
    tpu.vector_store %arg23[%c0_11, %c0_12], %30 {strides = array<i32>} : memref<16x128xf32, #tpu.memory_space<vmem>>, vector<16x128xf32>,
    %c1_i32 = arith.constant 1 : i32
    %32 = arith.cmpi eq, %arg0, %c1_i32 : i32
    %33 = arith.extui %32 : i1 to i32
    %c0_i32_13 = arith.constant 0 : i32
    %34 = arith.cmpi ne, %33, %c0_i32_13 : i32
    scf.if %34 {
      %c0_14 = arith.constant 0 : index
      %c0_15 = arith.constant 0 : index
      %35 = vector.load %arg23[%c0_14, %c0_15] : memref<16x128xf32, #tpu.memory_space<vmem>>, vector<16x128xf32>
      %cst_16 = arith.constant dense<0.000000e+00> : vector<16xf32>
      %36 = vector.multi_reduction <add>, %35, %cst_16 [1] : vector<16x128xf32> to vector<16xf32>
      %37 = vector.shape_cast %36 : vector<16xf32> to vector<16x1xf32>
      %c0_17 = arith.constant 0 : index
      %c0_18 = arith.constant 0 : index
      %38 = vector.load %arg19[%c0_17, %c0_18] : memref<1x1xf32, #tpu.memory_space<vmem>>, vector<1x1xf32>
      %39 = vector.broadcast %38 : vector<1x1xf32> to vector<16x1xf32>
      %40 = arith.addf %37, %39 : vector<16x1xf32>
      %c0_19 = arith.constant 0 : index
      %c0_20 = arith.constant 0 : index
      %41 = vector.load %arg21[%c0_19, %c0_20] : memref<16x1xf32, #tpu.memory_space<vmem>>, vector<16x1xf32>
      tpu.vector_store %arg21[%c0_19, %c0_20], %40 {strides = array<i32>} : memref<16x1xf32, #tpu.memory_space<vmem>>, vector<16x1xf32>,
    } else {
    }
    return
  }
  func.func @transform_0(%arg0: i32) -> (i32, i32) {
    %c0_i32 = arith.constant 0 : i32
    %c0_i32_0 = arith.constant 0 : i32
    %c0_i32_1 = arith.constant 0 : i32
    return %c0_i32, %c0_i32_0 : i32, i32
  }
  func.func @transform_1(%arg0: i32) -> (i32, i32, i32) {
    %c0_i32 = arith.constant 0 : i32
    %c0_i32_0 = arith.constant 0 : i32
    %c0_i32_1 = arith.constant 0 : i32
    %c0_i32_2 = arith.constant 0 : i32
    return %c0_i32, %c0_i32_0, %c0_i32_1 : i32, i32, i32
  }
  func.func @transform_2(%arg0: i32) -> (i32, i32, i32) {
    %c0_i32 = arith.constant 0 : i32
    %c0_i32_0 = arith.constant 0 : i32
    %c0_i32_1 = arith.constant 0 : i32
    %c0_i32_2 = arith.constant 0 : i32
    return %c0_i32, %c0_i32_0, %c0_i32_1 : i32, i32, i32
  }
  func.func @transform_3(%arg0: i32) -> (i32, i32, i32) {
    %c0_i32 = arith.constant 0 : i32
    %c0_i32_0 = arith.constant 0 : i32
    %c0_i32_1 = arith.constant 0 : i32
    %c0_i32_2 = arith.constant 0 : i32
    return %c0_i32, %c0_i32_0, %c0_i32_1 : i32, i32, i32
  }
  func.func @transform_4(%arg0: i32) -> (i32, i32, i32) {
    %c0_i32 = arith.constant 0 : i32
    %c0_i32_0 = arith.constant 0 : i32
    %c0_i32_1 = arith.constant 0 : i32
    %c0_i32_2 = arith.constant 0 : i32
    return %c0_i32, %c0_i32_0, %c0_i32_1 : i32, i32, i32
  }
  func.func @transform_5(%arg0: i32) -> (i32, i32, i32) {
    %c0_i32 = arith.constant 0 : i32
    %c0_i32_0 = arith.constant 0 : i32
    %c0_i32_1 = arith.constant 0 : i32
    %c0_i32_2 = arith.constant 0 : i32
    return %c0_i32, %c0_i32_0, %c0_i32_1 : i32, i32, i32
  }
  func.func @transform_6(%arg0: i32) -> (i32, i32, i32) {
    %c0_i32 = arith.constant 0 : i32
    %c0_i32_0 = arith.constant 0 : i32
    %c0_i32_1 = arith.constant 0 : i32
    %c0_i32_2 = arith.constant 0 : i32
    return %c0_i32, %c0_i32_0, %c0_i32_1 : i32, i32, i32
  }
  func.func @transform_7(%arg0: i32) -> (i32, i32) {
    %c0_i32 = arith.constant 0 : i32
    %c0_i32_0 = arith.constant 0 : i32
    %c0_i32_1 = arith.constant 0 : i32
    return %c0_i32, %c0_i32_0 : i32, i32
  }
  func.func @transform_8(%arg0: i32) -> (i32, i32) {
    %c0_i32 = arith.constant 0 : i32
    %c0_i32_0 = arith.constant 0 : i32
    %c0_i32_1 = arith.constant 0 : i32
    return %c0_i32, %c0_i32_0 : i32, i32
  }
  func.func @transform_9(%arg0: i32) -> (i32, i32) {
    %c0_i32 = arith.constant 0 : i32
    %c0_i32_0 = arith.constant 0 : i32
    %c0_i32_1 = arith.constant 0 : i32
    return %c0_i32, %c0_i32_0 : i32, i32
  }
  func.func @transform_10(%arg0: i32) -> (i32, i32, i32) {
    %c0_i32 = arith.constant 0 : i32
    %c0_i32_0 = arith.constant 0 : i32
    %c0_i32_1 = arith.constant 0 : i32
    %c0_i32_2 = arith.constant 0 : i32
    return %c0_i32, %c0_i32_0, %c0_i32_1 : i32, i32, i32
  }
  func.func @transform_11(%arg0: i32) -> (i32, i32) {
    %c0_i32 = arith.constant 0 : i32
    %c0_i32_0 = arith.constant 0 : i32
    %c0_i32_1 = arith.constant 0 : i32
    return %c0_i32, %c0_i32_0 : i32, i32
  }
  func.func @transform_12(%arg0: i32) -> (i32, i32) {
    %c0_i32 = arith.constant 0 : i32
    %c0_i32_0 = arith.constant 0 : i32
    %c0_i32_1 = arith.constant 0 : i32
    return %c0_i32, %c0_i32_0 : i32, i32
  }
  func.func @transform_13(%arg0: i32) -> (i32, i32) {
    %c0_i32 = arith.constant 0 : i32
    %c0_i32_0 = arith.constant 0 : i32
    %c0_i32_1 = arith.constant 0 : i32
    return %c0_i32, %c0_i32_0 : i32, i32
  }
  func.func @transform_14(%arg0: i32) -> (i32, i32) {
    %c0_i32 = arith.constant 0 : i32
    %c0_i32_0 = arith.constant 0 : i32
    %c0_i32_1 = arith.constant 0 : i32
    return %c0_i32, %c0_i32_0 : i32, i32
  }
  func.func @transform_15(%arg0: i32) -> (i32, i32) {
    %c0_i32 = arith.constant 0 : i32
    %c0_i32_0 = arith.constant 0 : i32
    return %c0_i32, %arg0 : i32, i32
  }
  func.func @transform_16(%arg0: i32) -> (i32, i32) {
    %c0_i32 = arith.constant 0 : i32
    %c0_i32_0 = arith.constant 0 : i32
    return %c0_i32, %arg0 : i32, i32
  }
  func.func @transform_17(%arg0: i32) -> (i32, i32) {
    %c0_i32 = arith.constant 0 : i32
    %c0_i32_0 = arith.constant 0 : i32
    return %c0_i32, %arg0 : i32, i32
  }
  func.func @transform_18(%arg0: i32) -> (i32, i32) {
    %c0_i32 = arith.constant 0 : i32
    %c0_i32_0 = arith.constant 0 : i32
    %c0_i32_1 = arith.constant 0 : i32
    return %c0_i32, %c0_i32_0 : i32, i32
  }
  func.func @transform_19(%arg0: i32) -> (i32, i32) {
    %c0_i32 = arith.constant 0 : i32
    %c0_i32_0 = arith.constant 0 : i32
    %c0_i32_1 = arith.constant 0 : i32
    return %c0_i32, %c0_i32_0 : i32, i32
  }
  func.func @transform_20(%arg0: i32) -> (i32, i32) {
    %c0_i32 = arith.constant 0 : i32
    %c0_i32_0 = arith.constant 0 : i32
    %c0_i32_1 = arith.constant 0 : i32
    return %c0_i32, %c0_i32_0 : i32, i32
  }
}

</mosaic_0001>

<bundles_post_ra>
// kernel: tile.18
= control target key start
LH: loop header
LB: loop body
LE: loop exit
PB: predicated region body
PF: predicated region fallthrough
CT: control target
= control target key end

     0   :  { %s154_s0 = inlined_call_operand.vmem [shape: f32[8,8], index: 0, kind: input, shape index: {}]   ;;  %s155_s1 = inlined_call_operand.vmem [shape: f32[2,8,4,8], index: 1, kind: output, shape index: {}]  }
   0x1   :  { %v4_v0 = vld [vmem:[%s154_s0] ss:$0 sm:$0xff]  ;;  %v51_v1 = vld [vmem:[%s154_s0 + $0x1] ss:$0 sm:$0xff]  ;;  %v54_v2 = vld [vmem:[%s154_s0 + $0x2] ss:$0 sm:$0xff] }
   0x2   :  { %5 = vst [vmem:[%s155_s1] sm:$0xf] %v4_v0  ;;  %50 = vst [vmem:[%s155_s1 + $0x20] sm:$0xf] %v4_v0  ;;  %v57_v3 = vld [vmem:[%s154_s0 + $0x3] ss:$0 sm:$0xff] }
   0x3   :  { %52 = vst [vmem:[%s155_s1 + $0x4] sm:$0xf] %v51_v1  ;;  %53 = vst [vmem:[%s155_s1 + $0x24] sm:$0xf] %v51_v1  ;;  %v60_v4 = vld [vmem:[%s154_s0 + $0x4] ss:$0 sm:$0xff] }
   0x4   :  { %55 = vst [vmem:[%s155_s1 + $0x8] sm:$0xf] %v54_v2  ;;  %56 = vst [vmem:[%s155_s1 + $0x28] sm:$0xf] %v54_v2  ;;  %v63_v5 = vld [vmem:[%s154_s0 + $0x5] ss:$0 sm:$0xff] }
   0x5   :  { %58 = vst [vmem:[%s155_s1 + $0xc] sm:$0xf] %v57_v3  ;;  %59 = vst [vmem:[%s155_s1 + $0x2c] sm:$0xf] %v57_v3  ;;  %v66_v6 = vld [vmem:[%s154_s0 + $0x6] ss:$0 sm:$0xff] }
   0x6   :  { %61 = vst [vmem:[%s155_s1 + $0x10] sm:$0xf] %v60_v4  ;;  %62 = vst [vmem:[%s155_s1 + $0x30] sm:$0xf] %v60_v4  ;;  %v69_v7 = vld [vmem:[%s154_s0 + $0x7] ss:$0 sm:$0xff] }
   0x7   :  { %64 = vst [vmem:[%s155_s1 + $0x14] sm:$0xf] %v63_v5  ;;  %65 = vst [vmem:[%s155_s1 + $0x34] sm:$0xf] %v63_v5 }
   0x8   :  { %67 = vst [vmem:[%s155_s1 + $0x18] sm:$0xf] %v66_v6  ;;  %68 = vst [vmem:[%s155_s1 + $0x38] sm:$0xf] %v66_v6 }
   0x9   :  { %70 = vst [vmem:[%s155_s1 + $0x1c] sm:$0xf] %v69_v7  ;;  %71 = vst [vmem:[%s155_s1 + $0x3c] sm:$0xf] %v69_v7 }

// kernel: tile.19
= control target key start
LH: loop header
LB: loop body
LE: loop exit
PB: predicated region body
PF: predicated region fallthrough
CT: control target
= control target key end

     0   :  { %vm83_vm0 = vcmask 1047556   ;;  %vm85_vm1 = vcmask 64512   ;;  %s196_s9 = smov 24   ;;  %s197_s14 = smov 8   ;;  %vm104_vm2 = vcmask 261312   ;;  %vm125_vm3 = vcmask 195712   ;;  %s290_s0 = inlined_call_operand.vmem [shape: f32[2,8,4,8], index: 0, kind: input, shape index: {}]   ;;  %s291_s1 = inlined_call_operand.vmem [shape: f32[16,32], index: 1, kind: output, shape index: {}]  }
   0x1   :  { %v181_v0 = vld [vmem:[%s290_s0 + $0x1c] sm:$0xf]  ;;  %v182_v1 = vld [vmem:[%s290_s0 + $0x18] sm:$0xf]  ;;  %v183_v2 = vld [vmem:[%s290_s0 + $0x14] sm:$0xf] }
   0x2   :  { %49 = vst [vmem:[#allocation0 + $0x38] sm:$0xf] %v181_v0  ;;  %54 = vst [vmem:[#allocation0 + $0x30] sm:$0xf] %v182_v1  ;;  %v184_v3 = vld [vmem:[%s290_s0 + $0x10] sm:$0xf] }
   0x3   :  { %59 = vst [vmem:[#allocation0 + $0x28] sm:$0xf] %v183_v2  ;;  %v185_v4 = vld [vmem:[%s290_s0 + $0xc] sm:$0xf]  ;;  %v186_v5 = vld [vmem:[%s290_s0 + $0x8] sm:$0xf] }
   0x4   :  { %64 = vst [vmem:[#allocation0 + $0x20] sm:$0xf] %v184_v3  ;;  %69 = vst [vmem:[#allocation0 + $0x18] sm:$0xf] %v185_v4  ;;  %v187_v6 = vld [vmem:[%s290_s0 + $0x4] sm:$0xf] }
   0x5   :  { %74 = vst [vmem:[#allocation0 + $0x10] sm:$0xf] %v186_v5  ;;  %v79_v7 = vld [vmem:[%s290_s0] sm:$0xf]  ;;  %78 = vst [vmem:[#allocation0 + $0x8] sm:$0xf] %v187_v6 }
   0x6   :  { %80 = vst [vmem:[#allocation0] sm:$0xf] %v79_v7  ;;  %v173_v8 = vld [vmem:[%s290_s0 + $0x3c] sm:$0xf]  ;;  %v174_v9 = vld [vmem:[%s290_s0 + $0x38] sm:$0xf] }
   0x7   :  { %9 = vst [vmem:[#allocation0 + $0x78] sm:$0xf] %v173_v8  ;;  %14 = vst [vmem:[#allocation0 + $0x70] sm:$0xf] %v174_v9  ;;  %v175_v10 = vld [vmem:[%s290_s0 + $0x34] sm:$0xf] }
   0x8   :  { %v176_v11 = vld [vmem:[%s290_s0 + $0x30] sm:$0xf]  ;;  %v177_v12 = vld [vmem:[%s290_s0 + $0x2c] sm:$0xf]  ;;  %19 = vst [vmem:[#allocation0 + $0x68] sm:$0xf] %v175_v10 }
   0x9   :  { %24 = vst [vmem:[#allocation0 + $0x60] sm:$0xf] %v176_v11  ;;  %29 = vst [vmem:[#allocation0 + $0x58] sm:$0xf] %v177_v12  ;;  %v178_v13 = vld [vmem:[%s290_s0 + $0x28] sm:$0xf] }
   0xa   :  { %v179_v14 = vld [vmem:[%s290_s0 + $0x24] sm:$0xf]  ;;  %v180_v15 = vld [vmem:[%s290_s0 + $0x20] sm:$0xf]  ;;  %34 = vst [vmem:[#allocation0 + $0x50] sm:$0xf] %v178_v13 }
   0xb   :  { %39 = vst [vmem:[#allocation0 + $0x48] sm:$0xf] %v179_v14  ;;  %44 = vst [vmem:[#allocation0 + $0x40] sm:$0xf] %v180_v15  ;;  %s195_s0 = smov 16   ;;  %vm146_vm4 = vcmask 130112  }
   0xc   :  { %v120_v16 = vld [vmem:[#allocation0 + $0x2] ss:$8 sm:$0xf0]   ;;  %v99_v17 = vld [vmem:[#allocation0 + $0x3] ss:$8 sm:$0xf0]  }
   0xd   :  { %v118_v18 = vld [vmem:[#allocation0 + $0x2] ss:$8 sm:$0xf]   ;;  %v97_v19 = vld [vmem:[#allocation0 + $0x3] ss:$8 sm:$0xf]  }
   0xe   :  { %v122_v20 = vsel %vm83_vm0, %v120_v16, %v118_v18  ;;  %v101_v21 = vsel %vm83_vm0, %v99_v17, %v97_v19  ;;  %v139_v24 = vld [vmem:[#allocation0 + $0x1] ss:$8 sm:$0xf]   ;;  %v81_v32 = vld [vmem:[#allocation0] ss:$8 sm:$0xf]  }
   0xf   :  { %123 = vrot.lane.b32.xlu1 %v122_v20, %s195_s0  ;;  %102 = vrot.lane.b32.xlu0 %v101_v21, %s196_s9  ;;  %v141_v25 = vld [vmem:[#allocation0 + $0x1] ss:$8 sm:$0xf0]   ;;  %v82_v33 = vld [vmem:[#allocation0] ss:$8 sm:$0xf0]  }
  0x10   :  { %v130_v22 = vld [vmem:[#allocation0 + $0x42] ss:$8 sm:$0xf0]   ;;  %v109_v23 = vld [vmem:[#allocation0 + $0x43] ss:$8 sm:$0xf0]   ;;  %v84_v34 = vsel %vm83_vm0, %v82_v33, %v81_v32  ;;  %v143_v38 = vsel %vm83_vm0, %v141_v25, %v139_v24 }
  0x11   :  { %v151_v31 = vld [vmem:[#allocation0 + $0x41] ss:$8 sm:$0xf0]   ;;  %v90_v36 = vld [vmem:[#allocation0 + $0x40] ss:$8 sm:$0xf0]  }
  0x12   :  { %v128_v26 = vld [vmem:[#allocation0 + $0x42] ss:$8 sm:$0xf]   ;;  %v107_v27 = vld [vmem:[#allocation0 + $0x43] ss:$8 sm:$0xf]  }
  0x13   :  { %v132_v28 = vsel %vm83_vm0, %v130_v22, %v128_v26  ;;  %v111_v29 = vsel %vm83_vm0, %v109_v23, %v107_v27  ;;  %v149_v30 = vld [vmem:[#allocation0 + $0x41] ss:$8 sm:$0xf]   ;;  %v88_v35 = vld [vmem:[#allocation0 + $0x40] ss:$8 sm:$0xf]  }
  0x14   :  { %133 = vrot.lane.b32.xlu1 %v132_v28, %s195_s0  ;;  %112 = vrot.lane.b32.xlu0 %v111_v29, %s196_s9  ;;  %v153_v37 = vsel %vm83_vm0, %v151_v31, %v149_v30  ;;  %86 = vst.msk [vmem:[%s291_s1] sm:$0xff] %vm85_vm1, %v84_v34   ;;  %v92_v39 = vsel %vm83_vm0, %v90_v36, %v88_v35 }
  0x15   :  { %188 = vst.msk [vmem:[%s291_s1 + $0x8] sm:$0xff] %vm85_vm1, %v92_v39  }
  0x18   :  { %154 = vrot.lane.b32.xlu1 %v153_v37, %s197_s14  ;;  %144 = vrot.lane.b32.xlu0 %v143_v38, %s197_s14 }
  0x81   :  { %v124_v40 = vpop.permute.xlu1 %123   ;;  %v103_v41 = vpop.permute.xlu0 %102  }
  0x82   :  { %105 = vst.msk [vmem:[%s291_s1] sm:$0xff] %vm104_vm2, %v103_v41  }
  0x83   :  { %126 = vst.msk [vmem:[%s291_s1] sm:$0xff] %vm125_vm3, %v124_v40  }
  0x86   :  { %v134_v42 = vpop.permute.xlu1 %133   ;;  %v113_v43 = vpop.permute.xlu0 %112  }
  0x87   :  { %189 = vst.msk [vmem:[%s291_s1 + $0x8] sm:$0xff] %vm104_vm2, %v113_v43  }
  0x88   :  { %190 = vst.msk [vmem:[%s291_s1 + $0x8] sm:$0xff] %vm125_vm3, %v134_v42  }
  0x8a   :  { %v155_v44 = vpop.permute.xlu1 %154   ;;  %v145_v45 = vpop.permute.xlu0 %144  }
  0x8b   :  { %191 = vst.msk [vmem:[%s291_s1 + $0x8] sm:$0xff] %vm146_vm4, %v155_v44   ;;  %147 = vst.msk [vmem:[%s291_s1] sm:$0xff] %vm146_vm4, %v145_v45  }

// kernel: actor_critic_forward.1
= control target key start
LH: loop header
LB: loop body
LE: loop exit
PB: predicated region body
PF: predicated region fallthrough
CT: control target
= control target key end

     0   :  { %s17478_s0 = inlined_call_operand.vmem [shape: bf16[16,32], index: 0, kind: input, shape index: {}]   ;;  %s17479_s1 = inlined_call_operand.vmem [shape: bf16[2,1,32], index: 1, kind: input, shape index: {}]   ;;  %s17480_s2 = inlined_call_operand.hbm [shape: bf16[2,32,96], index: 2, kind: input, shape index: {}]   ;;  %s17481_s3 = inlined_call_operand.hbm [shape: bf16[2,32,32], index: 3, kind: input, shape index: {}]   ;;  %s17482_s4 = inlined_call_operand.vmem [shape: bf16[2,1,32], index: 4, kind: input, shape index: {}]   ;;  %s17483_s5 = inlined_call_operand.hbm [shape: bf16[2,32,128], index: 5, kind: input, shape index: {}]   ;;  %s17484_s6 = inlined_call_operand.vmem [shape: bf16[2,64,32], index: 6, kind: input, shape index: {}]   ;;  %s17485_s7 = inlined_call_operand.hbm [shape: bf16[32,32], index: 7, kind: input, shape index: {}]   ;;  %s17486_s8 = inlined_call_operand.vmem [shape: f32[16,32], index: 8, kind: input, shape index: {}]   ;;  %s17487_s9 = inlined_call_operand.vmem [shape: f32[16,32], index: 9, kind: input, shape index: {}]   ;;  %s17488_s10 = inlined_call_operand.vmem [shape: f32[2,8,8], index: 10, kind: input, shape index: {}]   ;;  %s17489_s11 = inlined_call_operand.hbm [shape: bf16[1,32], index: 11, kind: input, shape index: {}]   ;;  %s17490_s12 = inlined_call_operand.hbm [shape: bf16[32,128], index: 12, kind: input, shape index: {}]   ;;  %s17491_s13 = inlined_call_operand.hbm [shape: bf16[32,2048], index: 13, kind: input, shape index: {}]   ;;  %s17492_s14 = inlined_call_operand.hbm [shape: f32[1,2048], index: 14, kind: input, shape index: {}]   ;;  %s17493_s15 = inlined_call_operand.hbm [shape: bf16[2048,2048], index: 15, kind: input, shape index: {}]   ;;  %s17494_s16 = inlined_call_operand.hbm [shape: f32[1,2048], index: 16, kind: input, shape index: {}]   ;;  %s17495_s17 = inlined_call_operand.hbm [shape: f32[1,2048], index: 17, kind: input, shape index: {}]   ;;  %s17496_s18 = inlined_call_operand.<no memory space> [shape: f32[1,1], index: 18, kind: input, shape index: {}]   ;;  %s17497_s19 = inlined_call_operand.vmem [shape: f32[16,128], index: 19, kind: output, shape index: {0}]   ;;  %s17498_s20 = inlined_call_operand.vmem [shape: f32[16,1], index: 20, kind: output, shape index: {1}]  }
   0x1   :  { %17542 = sst [smem:[#allocation31_spill]] %s17478_s0  ;;  %v26_v0 = vstv %s17496_s18 }
   0x2   :  { %17543 = sst [smem:[#allocation32_spill]] %s17479_s1  ;;  %27 = vst [vmem:[#allocation4] sm:$0x1] %v26_v0 }
   0x3   :  { %17544 = sst [smem:[#allocation33_spill]] %s17480_s2 }
   0x4   :  { %17545 = sst [smem:[#allocation34_spill]] %s17481_s3 }
   0x5   :  { %17546 = sst [smem:[#allocation35_spill]] %s17482_s4 }
   0x6   :  { %17547 = sst [smem:[#allocation36_spill]] %s17484_s6 }
   0x7   :  { %17548 = sst [smem:[#allocation37_spill]] %s17485_s7 }
   0x8   :  { %17549 = sst [smem:[#allocation38_spill]] %s17486_s8 }
   0x9   :  { %17550 = sst [smem:[#allocation39_spill]] %s17487_s9 }
   0xa   :  { %17551 = sst [smem:[#allocation40_spill]] %s17488_s10 }
   0xb   :  { %17552 = sst [smem:[#allocation41_spill]] %s17493_s15 }
   0xc   :  { %17553 = sst [smem:[#allocation42_spill]] %s17497_s19 }
   0xd   :  { %17554 = sst [smem:[#allocation43_spill]] %s17498_s20 }
   0xe   :  { %28 = vsyncpa [#allocation6], 0 }
   0xf   :  { %29 = vsyncpa [#allocation8], 0 }
  0x10   :  { %30 = vsyncpa [#allocation11], 0 }
  0x11   :  { %31 = vsyncpa [#allocation14], 0 }
  0x12   :  { %32 = vsyncpa [#allocation17], 0  ;;  %s15182_s23 = smov 0   ;;  %s15184_s24 = smov 0  }
  0x13   :  { %s15186_s2 = smov 0   ;;  %s15188_s25 = smov 0  }
  0x14 LB: > { %17555 = sst [smem:[#allocation27_spill]] %s15037_s2  ;;  %s15043_s18 = smov [#allocation5]   ;;  %s15041_s25 = sphi %s15188_s25, %s17611_s25   ;;  %s15037_s2 = sphi %s15186_s2, %s17613_s2   ;;  %s15033_s24 = sphi %s15184_s24, %s17615_s24   ;;  %s15029_s23 = sphi %s15182_s23, %s17614_s23  }
  0x15   : > { %s517_s3 = sshll.u32 %s15043_s18, 4  ;;  %s15203_s26 = sadd.s32 4294967295, %s15041_s25   ;;  %s518_s3 = int_to_ptr.vmem [resolvable:$true] %s517_s3 }
  0x16   : > { %p12649_p0 = scmp.ge.s32.totalorder %s15041_s25, 1  ;;  %p17511_p1 = scmp.eq.s32.totalorder %s15203_s26, 0 }
  0x17   : > { %p499_p2 = scmp.lt.s32.totalorder %s15041_s25, 3  ;;  %s15222_s4 = sadd.s32 1, %s15041_s25  }
  0x18   : > { %17558 = sst [smem:[#allocation28_spill]] %s15222_s4  ;;  %s14706_s30 = scalar_lea.vmem %s518_s3, 512 }
  0x19   : > { %p15209_p4 = pnand %p12649_p0, %p499_p2  ;;  %p14707_p8 = scmp.ne.s32.totalorder %s518_s3, %s14706_s30 }
  0x1a   : > { %p14714_p11 = scmp.lt.s32.totalorder %s518_s3, %s518_s3  ;;  %p14715_p12 = scmp.lt.s32.totalorder %s14706_s30, %s14706_s30 }
  0x1b   : > { %s17556_s27 = scalar_select %p15209_p4, 1, 0 }
  0x1c   : > { %p14404_p5 = pneg %p15209_p4  ;;  %p14716_p13 = por %p14715_p12, %p14714_p11 }
  0x1e   : > { %p15217_p6 = pnand %p14404_p5, %p17511_p1 }
  0x20   : > { %s17557_s28 = scalar_select %p15217_p6, 1, 0 }
  0x21   : > { %p15226_p7 = pneg %p15217_p6 }
  0x23   : > { %s17559_s29 = scalar_select %p15226_p7, 1, 0 }
  0x24   : > { %p14709_p9 = pnand %p14707_p8, %p15226_p7 }
  0x26   : > { %p14710_p10 = pneg %p14709_p9 }
  0x28   : > { %p14717_p0 = pnand %p14716_p13, %p14710_p10 }
  0x2a   : > { %14720 = shalt.err (!%p14717_p0)
}
  0x2b   : > { %s17506_s0 = smov 64   ;;  %s17508_s21 = smov 4  }
  0x2c   : > { %s17560_s18 = sld [smem:[#allocation33_spill]]  ;;  %s357_s30 = ssub.s32 %s15041_s25, %s15222_s4 }
  0x2d   : > { %s360_s20 = sadd.s32 1, %s15037_s2  ;;  %p358_p2 = scmp.eq.s32.totalorder %s357_s30, 0 }
  0x2e   : > { %p367_p5 = scmp.ne.s32.totalorder %s15037_s2, %s15033_s24  ;;  %p368_p8 = scmp.eq.s32.totalorder %s15041_s25, 0 }
  0x2f   : > { %p373_p9 = scmp.ne.s32.totalorder %s15033_s24, %s15029_s23  ;;  %p14447_p12 = scmp.lt.s32.totalorder %s15041_s25, 2 }
  0x30   : > { %s15249_s19 = scalar_select %p358_p2, %s15037_s2, %s360_s20  }
  0x31   : > { %p369_p10 = por %p368_p8, %p367_p5  ;;  %p15253_p11 = por %p17511_p1, %p373_p9 }
  0x32   : > { %14407 = dma.hbm_to_vmem [thread:$0]  (!%p15217_p6), %s17560_s18, 512, %s518_s3, [#allocation6], %s17506_s0, %s17506_s0, %s17508_s21  }
  0x33   : > { %17561 = sst [smem:[#allocation29_spill]] %s15249_s19  ;;  %s636_s10 = sand.u32 1, %s15041_s25  }
  0x34   : > { %s17562_s6 = scalar_select %p15253_p11, 1, 0 }
  0x35   : > { %s17510_s9 = sand.u32 1, %s15037_s2   ;;  %s13878_s3 = sshll.u32 %s15041_s25, 9 }
  0x36   : > { %17563 = sst [smem:[#allocation30_spill]] %s17562_s6  ;;  %s12659_s1 = sshll.u32 %s17510_s9, 13 }
  0x37   : > { %s17564_s15 = sld [smem:[#allocation41_spill]]  ;;  %s640_s20 = scalar_lea.vmem [#allocation18], %s12659_s1 }
  0x38   : > { %s647_s23 = sshll.u32 %s640_s20, 4  ;;  %p15270_p13 = pnand %p14447_p12, %p369_p10  ;;  %s15268_s23 = int_to_ptr.vmem [resolvable:$true] %s647_s23 }
  0x39   : > { %s15274_s21 = scalar_lea.sflag [#allocation6], %s636_s10 }
  0x3a   : > { %p15280_p2 = pneg %p15270_p13 }
  0x3d   : > { %s15266_s30 = scalar_lea.hbm %s17564_s15, %s13878_s3  ;;  %s14726_s18 = scalar_lea.hbm %s17564_s15, 262144 }
  0x3e   : > { %s14721_s9 = scalar_lea.hbm %s15266_s30, 131072  ;;  %p14727_p9 = scmp.lt.s32.totalorder %s15266_s30, %s17564_s15 }
  0x3f   : > { %p14722_p0 = scmp.ne.s32.totalorder %s15266_s30, %s14721_s9  ;;  %p14728_p10 = scmp.lt.s32.totalorder %s14726_s18, %s14721_s9 }
  0x41   : > { %p14724_p5 = pnand %p15280_p2, %p14722_p0  ;;  %p14729_p12 = por %p14728_p10, %p14727_p9 }
  0x43   : > { %p14725_p8 = pneg %p14724_p5 }
  0x45   : > { %p14730_p3 = pnand %p14729_p12, %p14725_p8 }
  0x47   : > { %14733 = shalt.err (!%p14730_p3)
}
  0x48   : > { %s14734_s10 = scalar_lea.vmem %s15268_s23, 131072  ;;  %s15046_s4 = smov [#allocation18]  }
  0x49   : > { %p14735_p1 = scmp.ne.s32.totalorder %s15268_s23, %s14734_s10  ;;  %s14739_s1 = sshll.u32 %s15046_s4, 4  ;;  %s14740_s1 = int_to_ptr.vmem [resolvable:$false] %s14739_s1 }
  0x4a   : > { %s14741_s22 = scalar_lea.vmem %s14740_s1, 262144  ;;  %p14742_p11 = scmp.lt.s32.totalorder %s15268_s23, %s14740_s1 }
  0x4b   : > { %p14737_p0 = pnand %p14735_p1, %p15280_p2  ;;  %p14743_p4 = scmp.lt.s32.totalorder %s14741_s22, %s14734_s10 }
  0x4d   : > { %p14738_p5 = pneg %p14737_p0  ;;  %p14744_p6 = por %p14743_p4, %p14742_p11 }
  0x4f   : > { %p14745_p7 = pnand %p14744_p6, %p14738_p5 }
  0x51   : > { %14748 = shalt.err (!%p14745_p7)
}
  0x52   : > { %s17521_s9 = smov 1024   ;;  %s15048_s19 = smov 512  }
  0x53   : > { %s15049_s18 = smov 32   ;;  %s15050_s20 = smov [#allocation7]  }
  0x54   : > { %14432 = dma.hbm_to_vmem [thread:$0]  (!%p15270_p13), %s15266_s30, 131072, %s15268_s23, %s15274_s21, %s17521_s9, %s15048_s19, %s15049_s18  }
  0x55   : > { %s530_s4 = sshll.u32 %s15050_s20, 4  ;;  %s15051_s15 = smov [#allocation10]   ;;  %s531_s4 = int_to_ptr.vmem [resolvable:$true] %s530_s4 }
  0x56   : > { %s562_s1 = sshll.u32 %s15051_s15, 4  ;;  %s14760_s10 = scalar_lea.vmem %s531_s4, 512  ;;  %s563_s1 = int_to_ptr.vmem [resolvable:$true] %s562_s1 }
  0x57   : > { %p14761_p1 = scmp.ne.s32.totalorder %s531_s4, %s14760_s10  ;;  %p17567_p3 = scmp.ne.s32.totalorder %s17559_s29, 0 }
  0x58   : > { %p14768_p7 = scmp.lt.s32.totalorder %s531_s4, %s531_s4  ;;  %p14769_p11 = scmp.lt.s32.totalorder %s14760_s10, %s14760_s10 }
  0x59   : > { %p14763_p4 = pnand %p14761_p1, %p17567_p3 }
  0x5a   : > { %p14770_p8 = por %p14769_p11, %p14768_p7 }
  0x5b   : > { %p14764_p6 = pneg %p14763_p4 }
  0x5d   : > { %p14771_p9 = pnand %p14770_p8, %p14764_p6 }
  0x5f   : > { %14774 = shalt.err (!%p14771_p9)
}
  0x60   : > { %p17568_p10 = scmp.ne.s32.totalorder %s17557_s28, 0  ;;  %s17569_s22 = smov 4  }
  0x61   : > { %s17570_s8 = smov 64   ;;  %s17571_s19 = sld [smem:[#allocation34_spill]] }
  0x62   : > { %s14786_s15 = scalar_lea.vmem %s563_s1, 256  ;;  %p14794_p1 = scmp.lt.s32.totalorder %s563_s1, %s563_s1 }
  0x63   : > { %p14787_p12 = scmp.ne.s32.totalorder %s563_s1, %s14786_s15  ;;  %p14795_p4 = scmp.lt.s32.totalorder %s14786_s15, %s14786_s15 }
  0x65   : > { %p14789_p0 = pnand %p14787_p12, %p17567_p3  ;;  %p14796_p6 = por %p14795_p4, %p14794_p1 }
  0x67   : > { %14410 = dma.hbm_to_vmem [thread:$0]  (!%p17568_p10), %s17571_s19, 512, %s531_s4, [#allocation8], %s17570_s8, %s17570_s8, %s17569_s22  }
  0x68   : > { %p14790_p5 = pneg %p14789_p0 }
  0x6a   : > { %p14797_p7 = pnand %p14796_p6, %p14790_p5 }
  0x6c   : > { %14800 = shalt.err (!%p14797_p7)
}
  0x6d   : > { %s17572_s7 = sld [smem:[#allocation37_spill]]  ;;  %s15052_s4 = smov [#allocation13]  }
  0x6e   : > { %s595_s10 = sshll.u32 %s15052_s4, 4  ;;  %s17573_s30 = sand.u32 1, %s15037_s2   ;;  %s596_s10 = int_to_ptr.vmem [resolvable:$true] %s595_s10 }
  0x6f   : > { %s15326_s23 = sshll.u32 %s17573_s30, 3  ;;  %s14812_s19 = scalar_lea.vmem %s596_s10, 256 }
  0x70   : > { %p14813_p11 = scmp.ne.s32.totalorder %s596_s10, %s14812_s19  ;;  %p14820_p12 = scmp.lt.s32.totalorder %s596_s10, %s596_s10 }
  0x71   : > { %p14821_p0 = scmp.lt.s32.totalorder %s14812_s19, %s14812_s19 }
  0x72   : > { %p14815_p8 = pnand %p14813_p11, %p17567_p3 }
  0x73   : > { %14416 = dma.hbm_to_vmem [thread:$0]  (!%p17568_p10), %s17572_s7, 256, %s563_s1, [#allocation11], %s17570_s8, %s17570_s8, %s17569_s22  }
  0x74   : > { %p14816_p9 = pneg %p14815_p8  ;;  %p14822_p5 = por %p14821_p0, %p14820_p12 }
  0x76   : > { %p14823_p1 = pnand %p14822_p5, %p14816_p9 }
  0x78   : > { %14826 = shalt.err (!%p14823_p1)
}
  0x79   : > { %14422 = dma.hbm_to_vmem [thread:$0]  (!%p17568_p10), %s17490_s12, 256, %s596_s10, [#allocation14], %s17570_s8, %s17570_s8, %s17569_s22  }
  0x7a   : > { %s17525_s18 = sshll.u32 %s15041_s25, 7  ;;  %s661_s20 = scalar_lea.vmem [#allocation19], %s15326_s23 }
  0x7b   : > { %s669_s4 = sshll.u32 %s661_s20, 4  ;;  %s667_s9 = scalar_lea.hbm %s17494_s16, %s17525_s18  ;;  %s670_s4 = int_to_ptr.vmem [resolvable:$true] %s669_s4 }
  0x7c   : > { %s14827_s7 = scalar_lea.hbm %s667_s9, 128  ;;  %s14832_s2 = scalar_lea.hbm %s17494_s16, 256 }
  0x7d   : > { %p14828_p4 = scmp.ne.s32.totalorder %s667_s9, %s14827_s7  ;;  %p14833_p11 = scmp.lt.s32.totalorder %s667_s9, %s17494_s16 }
  0x7e   : > { %p14834_p8 = scmp.lt.s32.totalorder %s14832_s2, %s14827_s7 }
  0x7f   : > { %p14830_p6 = pnand %p14828_p4, %p15280_p2 }
  0x80   : > { %p14835_p9 = por %p14834_p8, %p14833_p11 }
  0x81   : > { %p14831_p7 = pneg %p14830_p6 }
  0x83   : > { %p14836_p12 = pnand %p14835_p9, %p14831_p7 }
  0x85   : > { %14839 = shalt.err (!%p14836_p12)
}
  0x86   : > { %s14840_s20 = scalar_lea.vmem %s670_s4, 128  ;;  %s15053_s30 = smov [#allocation19]  }
  0x87   : > { %p14841_p0 = scmp.ne.s32.totalorder %s670_s4, %s14840_s20  ;;  %s14845_s19 = sshll.u32 %s15053_s30, 4  ;;  %s14846_s19 = int_to_ptr.vmem [resolvable:$false] %s14845_s19 }
  0x88   : > { %s14847_s18 = scalar_lea.vmem %s14846_s19, 256  ;;  %p14848_p4 = scmp.lt.s32.totalorder %s670_s4, %s14846_s19 }
  0x89   : > { %p14843_p5 = pnand %p14841_p0, %p15280_p2  ;;  %p14849_p6 = scmp.lt.s32.totalorder %s14847_s18, %s14840_s20 }
  0x8b   : > { %p14844_p1 = pneg %p14843_p5  ;;  %p14850_p10 = por %p14849_p6, %p14848_p4 }
  0x8d   : > { %p14851_p3 = pnand %p14850_p10, %p14844_p1 }
  0x8f   : > { %14854 = shalt.err (!%p14851_p3)
}
  0x90   : > { %14435 = dma.hbm_to_vmem [thread:$0]  (!%p15270_p13), %s667_s9, 128, %s670_s4, %s15274_s21  }
  0x91   : > { %s15054_s6 = smov [#allocation9]   ;;  %s15055_s2 = smov [#allocation12]  }
  0x92   : > { %s546_s7 = sshll.u32 %s15054_s6, 4  ;;  %s585_s1 = sshll.u32 %s15055_s2, 4  ;;  %s547_s7 = int_to_ptr.vmem [resolvable:$true] %s546_s7  ;;  %s586_s1 = int_to_ptr.vmem [resolvable:$true] %s585_s1 }
  0x93   : > { %s14866_s15 = scalar_lea.vmem %s547_s7, 512  ;;  %p17574_p11 = scmp.ne.s32.totalorder %s17559_s29, 0 }
  0x94   : > { %p14867_p7 = scmp.ne.s32.totalorder %s547_s7, %s14866_s15  ;;  %p14874_p12 = scmp.lt.s32.totalorder %s547_s7, %s547_s7 }
  0x95   : > { %p14875_p0 = scmp.lt.s32.totalorder %s14866_s15, %s14866_s15 }
  0x96   : > { %p14869_p8 = pnand %p14867_p7, %p17574_p11 }
  0x97   : > { %p14876_p10 = por %p14875_p0, %p14874_p12 }
  0x98   : > { %p14870_p9 = pneg %p14869_p8 }
  0x9a   : > { %p14877_p3 = pnand %p14876_p10, %p14870_p9 }
  0x9c   : > { %14880 = shalt.err (!%p14877_p3)
}
  0x9d   : > { %p17575_p5 = scmp.ne.s32.totalorder %s17557_s28, 0  ;;  %s14892_s4 = scalar_lea.vmem %s586_s1, 16 }
  0x9e   : > { %p14893_p1 = scmp.ne.s32.totalorder %s586_s1, %s14892_s4  ;;  %s14899_s10 = scalar_lea.vmem %s586_s1, 32 }
  0x9f   : > { %14413 = dma.hbm_to_vmem [thread:$0]  (!%p17575_p5), %s17483_s5, 512, %s547_s7, [#allocation8], %s17570_s8, %s17570_s8, %s17569_s22  }
  0xa0   : > { %p14895_p4 = pnand %p14893_p1, %p17574_p11  ;;  %p14900_p7 = scmp.lt.s32.totalorder %s586_s1, %s586_s1 }
  0xa1   : > { %p14901_p8 = scmp.lt.s32.totalorder %s14899_s10, %s14892_s4 }
  0xa2   : > { %p14896_p6 = pneg %p14895_p4 }
  0xa3   : > { %p14902_p9 = por %p14901_p8, %p14900_p7 }
  0xa5   : > { %p14903_p12 = pnand %p14902_p9, %p14896_p6 }
  0xa7   : > { %14906 = shalt.err (!%p14903_p12)
}
  0xa8   : > { %14419 = dma.hbm_to_vmem [thread:$0]  (!%p17575_p5), %s17489_s11, 16, %s586_s1, [#allocation11]  }
  0xa9   : > { %s15056_s19 = smov [#allocation15]   ;;  %s15057_s6 = smov [#allocation16]  }
  0xaa   : > { %s608_s22 = sshll.u32 %s15056_s19, 4  ;;  %s622_s7 = sshll.u32 %s15057_s6, 4  ;;  %s609_s22 = int_to_ptr.vmem [resolvable:$true] %s608_s22  ;;  %s623_s7 = int_to_ptr.vmem [resolvable:$true] %s622_s7 }
  0xab   : > { %s14918_s2 = scalar_lea.vmem %s609_s22, 4096  ;;  %p14926_p1 = scmp.lt.s32.totalorder %s609_s22, %s609_s22 }
  0xac   : > { %p14919_p0 = scmp.ne.s32.totalorder %s609_s22, %s14918_s2  ;;  %p14927_p4 = scmp.lt.s32.totalorder %s14918_s2, %s14918_s2 }
  0xae   : > { %p14921_p10 = pnand %p14919_p0, %p17574_p11  ;;  %p14928_p6 = por %p14927_p4, %p14926_p1 }
  0xb0   : > { %p14922_p3 = pneg %p14921_p10 }
  0xb2   : > { %p14929_p7 = pnand %p14928_p6, %p14922_p3 }
  0xb4   : > { %14932 = shalt.err (!%p14929_p7)
}
  0xb5   : > { %s17576_s1 = smov 1024   ;;  %s14944_s18 = scalar_lea.vmem %s623_s7, 256 }
  0xb6   : > { %14425 = dma.hbm_to_vmem [thread:$0]  (!%p17575_p5), %s17491_s13, 4096, %s609_s22, [#allocation14], %s17576_s1, %s17576_s1, %s17570_s8  }
  0xb7   : > { %p14945_p8 = scmp.ne.s32.totalorder %s623_s7, %s14944_s18  ;;  %p14952_p0 = scmp.lt.s32.totalorder %s623_s7, %s623_s7 }
  0xb8   : > { %p14953_p10 = scmp.lt.s32.totalorder %s14944_s18, %s14944_s18 }
  0xb9   : > { %p14947_p9 = pnand %p14945_p8, %p17574_p11 }
  0xba   : > { %p14954_p1 = por %p14953_p10, %p14952_p0 }
  0xbb   : > { %p14948_p12 = pneg %p14947_p9 }
  0xbd   : > { %p14955_p3 = pnand %p14954_p1, %p14948_p12 }
  0xbf   : > { %14958 = shalt.err (!%p14955_p3)
}
  0xc0   : > { %14428 = dma.hbm_to_vmem [thread:$0]  (!%p17575_p5), %s17492_s14, 256, %s623_s7, [#allocation17]  }
  0xc1   : > { %s17577_s8 = sshll.u32 %s15041_s25, 7  ;;  %s680_s19 = scalar_lea.vmem [#allocation20], %s15326_s23 }
  0xc2   : > { %s686_s29 = scalar_lea.hbm %s17495_s17, %s17577_s8  ;;  %s688_s22 = sshll.u32 %s680_s19, 4  ;;  %s689_s22 = int_to_ptr.vmem [resolvable:$true] %s688_s22 }
  0xc3   : > { %s14959_s6 = scalar_lea.hbm %s686_s29, 128  ;;  %s14964_s1 = scalar_lea.hbm %s17495_s17, 256 }
  0xc4   : > { %p14960_p11 = scmp.ne.s32.totalorder %s686_s29, %s14959_s6  ;;  %p14965_p5 = scmp.lt.s32.totalorder %s686_s29, %s17495_s17 }
  0xc5   : > { %p14966_p7 = scmp.lt.s32.totalorder %s14964_s1, %s14959_s6 }
  0xc6   : > { %p14962_p4 = pnand %p14960_p11, %p15280_p2 }
  0xc7   : > { %p14967_p8 = por %p14966_p7, %p14965_p5 }
  0xc8   : > { %p14963_p6 = pneg %p14962_p4 }
  0xca   : > { %p14968_p9 = pnand %p14967_p8, %p14963_p6 }
  0xcc   : > { %14971 = shalt.err (!%p14968_p9)
}
  0xcd   : > { %s14972_s25 = scalar_lea.vmem %s689_s22, 128  ;;  %s15058_s23 = smov [#allocation20]  }
  0xce   : > { %p14973_p12 = scmp.ne.s32.totalorder %s689_s22, %s14972_s25  ;;  %s14977_s7 = sshll.u32 %s15058_s23, 4  ;;  %s14978_s7 = int_to_ptr.vmem [resolvable:$false] %s14977_s7 }
  0xcf   : > { %s14979_s18 = scalar_lea.vmem %s14978_s7, 256  ;;  %p14980_p1 = scmp.lt.s32.totalorder %s689_s22, %s14978_s7 }
  0xd0   : > { %p14975_p0 = pnand %p14973_p12, %p15280_p2  ;;  %p14981_p3 = scmp.lt.s32.totalorder %s14979_s18, %s14972_s25 }
  0xd2   : > { %p14976_p10 = pneg %p14975_p0  ;;  %p14982_p11 = por %p14981_p3, %p14980_p1 }
  0xd4   : > { %p14983_p4 = pnand %p14982_p11, %p14976_p10 }
  0xd6   : > { %14986 = shalt.err (!%p14983_p4)
}
  0xd7   : > { %14438 = dma.hbm_to_vmem [thread:$0]  (!%p15270_p13), %s686_s29, 128, %s689_s22, %s15274_s21  }
  0xd8   : > { %p17578_p6 = scmp.ne.s32.totalorder %s17556_s27, 0 }
  0xd9   : > { %p17579_p5 = scmp.eq.s32.totalorder (!%p17578_p6), %s15203_s26, 0 }
  0xda   : > { %697 = sbr.rel (%p17578_p6) target bundleno = 10969 (0x2ad9), region = 96 }
  0xdf   : > { %15004 = dma.done.wait (%p17579_p5), [#allocation6], 512   ;;  %p17580_p2 = pmov %p17579_p5 }
  0xe1   : > { %15006 = vsyncadd (%p17580_p2), [#allocation6], 4294966784  ;;  %p17581_p7 = pmov %p17580_p2 }
  0xe2   : > { %p17582_p8 = pmov %p17580_p2 }
  0xe3   : > { %15008 = dma.done.wait (%p17581_p7), [#allocation8], 1024  }
  0xe4   : > { %15010 = vsyncadd (%p17582_p8), [#allocation8], 4294966272  ;;  %p17583_p9 = pmov %p17580_p2 }
  0xe5   : > { %p17584_p13 = pmov %p17580_p2 }
  0xe6   : > { %15012 = dma.done.wait (%p17583_p9), [#allocation11], 272  }
  0xe7   : > { %15014 = vsyncadd (%p17584_p13), [#allocation11], 4294967024  ;;  %p17585_p12 = pmov %p17580_p2 }
  0xe8   : > { %p17586_p0 = pmov %p17580_p2 }
  0xe9   : > { %15016 = dma.done.wait (%p17585_p12), [#allocation14], 4352  }
  0xea   : > { %15018 = vsyncadd (%p17586_p0), [#allocation14], 4294962944  ;;  %p17587_p10 = pmov %p17586_p0 }
  0xeb   : > { %p17588_p1 = pmov %p17586_p0 }
  0xec   : > { %15020 = dma.done.wait (%p17587_p10), [#allocation17], 256  }
  0xed   : > { %15022 = vsyncadd (%p17588_p1), [#allocation17], 4294967040  ;;  %s17589_s27 = sld [smem:[#allocation30_spill]]  ;;  %s731_s0 = sand.u32 1, %s15203_s26  }
  0xee   : > { %s733_s21 = sand.u32 1, %s15033_s24   ;;  %s732_s4 = scalar_lea.sflag [#allocation6], %s731_s0 }
  0xef   : > { %s12677_s3 = sshll.u32 %s733_s21, 13 }
  0xf0   : > { %s15435_s10 = scalar_lea.vmem [#allocation18], %s12677_s3 }
  0xf3   : > { %p17590_p3 = scmp.ne.s32.totalorder %s17589_s27, 0 }
  0xf5   : > { %15024 = dma.done.wait (%p17590_p3), %s732_s4, 131328  }
  0xf6   : > { %15026 = vsyncadd (%p17590_p3), %s732_s4, 4294835968  ;;  %s12678_s8 = sshll.u32 %s733_s21, 3  ;;  %p17591_p11 = scmp.ne.s32.totalorder %s15203_s26, 0 }
  0xf7   : > { %s15441_s20 = scalar_lea.vmem [#allocation19], %s12678_s8  ;;  %s15443_s30 = scalar_lea.vmem [#allocation20], %s12678_s8 }
  0xf8   : > { %822 = sbr.rel (%p17591_p11) target bundleno = 9572 (0x2564), region = 144  ;;  %s17592_s22 = sld [smem:[#allocation31_spill]] (!%p17591_p11) }
  0xf9   : > { %s17593_s2 = sld [smem:[#allocation38_spill]] (!%p17591_p11)  ;;  %s15061_s15 = smov (!%p17591_p11), 32  }
  0xfa   : > { %s17595_s23 = sld [smem:[#allocation32_spill]] (!%p17591_p11)  ;;  %s15062_s18 = smov (!%p17591_p11), 96  }
  0xfb   : > { %s17597_s4 = sld [smem:[#allocation39_spill]] (!%p17591_p11)  ;;  %s15063_s9 = smov (!%p17591_p11), 64  }
  0xfc   : > { %s17598_s6 = sld [smem:[#allocation40_spill]] (!%p17591_p11)  ;;  %s15064_s25 = smov (!%p17591_p11), 88  }
  0xfd   : > { %vm840_vm0 = vcmask 261120   ;;  %v14516_v8 = vld [vmem:[#allocation5 + $0x8] sm:$0xff]   ;;  %v15059_v9 = vmov 0.0   ;;  %vm15060_vm1 = vmmov 0   ;;  %v14517_v10 = vld [vmem:[#allocation5] sm:$0xff]   ;;  %v857_v18 = vlaneseq  ;;  %s17540_s27 = smov 56  }
  0xfe   : > { %v13910_v1 = vld [vmem:[%s17592_s22] sm:$0xff]   ;;  %14030 = vmatprep.subr.bf16.mxu0 %v15059_v9  ;;  %4711 = vst [vmem:[#allocation3 + $0x8] sm:$0xff] %v15059_v9  ;;  %4712 = vst [vmem:[#allocation3] sm:$0xff] %v15059_v9  ;;  %14034 = vmatprep.mubr.msk.bf16.mxu0 %vm15060_vm1, %v15059_v9  ;;  %v15494_v32 = vld [vmem:[#allocation10] sm:$0xff]   ;;  %vm1075_vm2 = vcmask 64512   ;;  %vm1205_vm3 = vcmask 1043456  }
  0xff   : > { %v15450_v2 = vunpack.c.l.bf16 %v13910_v1  ;;  %v15452_v3 = vunpack.c.h.bf16 %v13910_v1  ;;  %14031 = vmatpush3.bf16.msra.mxu0 %v14516_v8  ;;  %14038 = vmatprep.subr.bf16.mxu1 %v15059_v9  ;;  %s17594_s1 = smov %s17593_s2  ;;  %v832_v11 = vld [vmem:[%s17593_s2 + $0x8] sm:$0xff]  ;;  %v15474_v19 = vshrl.u32 %v857_v18, 7  ;;  %v15488_v31 = vld [vmem:[#allocation10 + $0x8] sm:$0xff]   ;;  %s17538_s0 = smov 80   ;;  %vm2310_vm4 = vcmask 523264  }
 0x100   : > { %14032 = vmatprep.subr.bf16.mxu0 %v15059_v9  ;;  %14042 = vmatprep.mubr.msk.bf16.mxu1 %vm15060_vm1, %v15059_v9  ;;  %s17596_s7 = smov %s17595_s23  ;;  %v837_v20 = vld [vmem:[%s17595_s23] sm:$0x1]  ;;  %s15065_s23 = smov 120  }
 0x101   : > { %v838_v4 = vmul.f32 %v15450_v2, %v15450_v2  ;;  %v839_v5 = vmul.f32 %v15452_v3, %v15452_v3  ;;  %v856_v21 = vunpack.c.l.bf16 %v837_v20  ;;  %v15480_v22 = vsub.s32 0, %v15474_v19  ;;  %14039 = vmatpush3.bf16.msra.mxu1 %v15488_v31  ;;  %v831_v38 = vld [vmem:[%s17594_s1] sm:$0xff]  ;;  %v834_v42 = vld [vmem:[%s17597_s4 + $0x8] sm:$0xff]  ;;  %s17536_s21 = smov 112   ;;  %s17534_s3 = smov 48  }
 0x102   : > { %14040 = vmatprep.subr.bf16.mxu1 %v15059_v9  ;;  %v833_v48 = vld [vmem:[%s17597_s4] sm:$0xff]  ;;  %s17532_s8 = smov 72   ;;  %s17530_s29 = smov 104  }
 0x103   : > { %v841_v6 = vsel %vm840_vm0, %v838_v4, 0.0  ;;  %v844_v7 = vsel %vm840_vm0, %v839_v5, 0.0  ;;  %14033 = vmatpush3.bf16.msra.mxu0 %v14517_v10  ;;  %v860_v25 = vrot.slane %v856_v21, %v15480_v22  ;;  %v15568_v21 = vld [vmem:[%s17598_s6 + $0x8] sm:$0xff]  ;;  %s17528_s19 = smov 40   ;;  %s17599_s2 = sld [smem:[#allocation35_spill]] }
 0x104   : > { %842 = vadd.xlane.f32.xlu0 %v841_v6  ;;  %14046 = vmatprep.subr.bf16.mxu0 %v15059_v9  ;;  %s17601_s28 = sld [smem:[#allocation36_spill]]  ;;  %s17607_s22 = smov 104  }
 0x105   : > { %14041 = vmatpush3.bf16.msra.mxu1 %v15494_v32 }
 0x106   : > { %14054 = vmatprep.subr.bf16.mxu1 %v15059_v9 }
 0x108   : > { %845 = vadd.xlane.f32.xlu0 %v844_v7 }
 0x11e   : > { %992 = vrot.lane.b32.xlu0 %v832_v11, %s15061_s15 }
 0x18d   : > { %v843_v12 = vpop.xlane.xlu0 %842 }
 0x18e   : > { %v848_v13 = vmul.f32 0.03125, %v843_v12 }
 0x190   : > { %v850_v14 = vadd.f32 1e-05, %v848_v13 }
 0x191   : > { %v846_v15 = vpop.xlane.xlu0 %845 }
 0x192   : > { %14536 = vrsqrt.f32 %v850_v14  ;;  %v849_v16 = vmul.f32 0.03125, %v846_v15  ;;  %v15562_v14 = vld [vmem:[%s17598_s6] sm:$0xff] }
 0x194   : > { %v851_v17 = vadd.f32 1e-05, %v849_v16 }
 0x195   : > { %v15530_v57 = vpop.permute.xlu0 %992 }
 0x196   : > { %14538 = vrsqrt.f32 %v851_v17 }
 0x19f   : > { %v14537_v23 = vpop.eup %14536 }
 0x1a0   : > { %v854_v24 = vmul.f32 %v14537_v23, %v15450_v2 }
 0x1a2   : > { %v861_v28 = vmul.f32 %v860_v25, %v854_v24 }
 0x1a3   : > { %v14539_v26 = vpop.eup %14538 }
 0x1a4   : > { %v855_v27 = vmul.f32 %v14539_v26, %v15452_v3 }
 0x1a6   : > { %v862_v29 = vmul.f32 %v860_v25, %v855_v27 }
 0x1a8   : > { %v863_v30 = vpack.c.bf16 %v862_v29, %v861_v28 }
 0x1aa   : > { %14035 = vmatmul.mubr.msk.bf16.vlgmr.msra.gmra.mxu0 %vm840_vm0, %v863_v30 }
 0x1ab   : > { %14050 = vmatprep.mubr.msk.bf16.mxu0 %vm15060_vm1, %v15059_v9  ;;  %14047 = vmatpush3.bf16.msra.mxu0 %v15488_v31 }
 0x1ac   : > { %14048 = vmatprep.subr.bf16.mxu0 %v15059_v9 }
 0x1af   : > { %14049 = vmatpush3.bf16.msra.mxu0 %v15494_v32 }
 0x1b0   : > { %14060 = vmatprep.subr.bf16.mxu0 %v15059_v9 }
 0x26a   : > { %v15500_v33 = vpop.f32.mrf.mxu0 }
 0x26b   : > { %v925_v5 = vmul.f32 %v15500_v33, %v831_v38 }
 0x26c   : > { %v14036_v34 = vpop.f32.mrf.mxu0 }
 0x26d   : > { %v15575_v34 = vpack.c.bf16 %v15500_v33, %v15500_v33 }
 0x26e   : > { %v15502_v35 = vpop.f32.mrf.mxu0 }
 0x26f   : > { %v924_v36 = vpack.c.bf16 %v15502_v35, %v15500_v33  ;;  %v926_v44 = vmul.f32 %v15502_v35, %v832_v11  ;;  %v997_v60 = vmul.f32 %v15530_v57, %v15502_v35 }
 0x270   : > { %v14037_v37 = vpop.f32.mrf.mxu0 }
 0x271   : > { %999 = vrot.lane.b32.xlu1 %v924_v36, %s15062_s18  ;;  %14043 = vmatmul.mubr.msk.bf16.vlgmr.msra.gmra.mxu1 %vm840_vm0, %v924_v36 }
 0x272   : > { %14056 = vmatprep.mubr.msk.bf16.mxu1 %vm15060_vm1, %v15059_v9 }
 0x275   : > { %990 = vrot.lane.b32.xlu1 %v831_v38, %s15061_s15 }
 0x2e3   : > { %v1000_v39 = vpop.permute.xlu1 %999 }
 0x2e4   : > { %14051 = vmatmul.mubr.msk.bf16.vlgmr.msra.gmra.mxu0 %vm840_vm0, %v1000_v39 }
 0x2e5   : > { %14062 = vmatprep.mubr.msk.bf16.mxu0 %vm15060_vm1, %v15059_v9 }
 0x2e7   : > { %v15526_v55 = vpop.permute.xlu1 %990 }
 0x2e8   : > { %v996_v56 = vmul.f32 %v15526_v55, %v15500_v33 }
 0x331   : > { %v976_v40 = vpop.f32.mrf.mxu1 }
 0x332   : > { %v983_v1 = vmul.f32 %v976_v40, %v833_v48 }
 0x333   : > { %v14044_v41 = vpop.f32.mrf.mxu1 }
 0x334   : > { %v985_v7 = vadd.f32 %v983_v1, %v925_v5 }
 0x335   : > { %v979_v43 = vpop.f32.mrf.mxu1 }
 0x336   : > { %v984_v45 = vmul.f32 %v979_v43, %v834_v42  ;;  %v15546_v11 = vpack.c.bf16 %v985_v7, %v985_v7 }
 0x337   : > { %v14045_v46 = vpop.f32.mrf.mxu1 }
 0x338   : > { %v986_v47 = vadd.f32 %v984_v45, %v926_v44 }
 0x33a   : > { %v15553_v12 = vpack.c.bf16 %v986_v47, %v986_v47  ;;  %v15589_v47 = vpack.c.bf16 %v15502_v35, %v15502_v35 }
 0x3a4   : > { %v1038_v49 = vpop.f32.mrf.mxu0 }
 0x3a5   : > { %v1045_v50 = vmul.f32 %v1038_v49, %v833_v48 }
 0x3a6   : > { %v14052_v51 = vpop.f32.mrf.mxu0 }
 0x3a7   : > { %1049 = vrot.lane.b32.xlu1 %v1045_v50, %s15061_s15 }
 0x3a8   : > { %v1041_v52 = vpop.f32.mrf.mxu0 }
 0x3a9   : > { %v1046_v53 = vmul.f32 %v1041_v52, %v834_v42 }
 0x3aa   : > { %v14053_v54 = vpop.f32.mrf.mxu0 }
 0x3ab   : > { %1051 = vrot.lane.b32.xlu1 %v1046_v53, %s15061_s15 }
 0x419   : > { %v1050_v58 = vpop.permute.xlu1 %1049 }
 0x41a   : > { %v1055_v59 = vadd.f32 %v1050_v58, %v996_v56 }
 0x41c   : > { %v15534_v61 = vpack.c.bf16 %v1055_v59, %v1055_v59 }
 0x41d   : > { %v1052_v62 = vpop.permute.xlu1 %1051 }
 0x41e   : > { %v1056_v63 = vadd.f32 %v1052_v62, %v997_v60  ;;  %1073 = vrot.lane.b32.xlu1 %v15534_v61, %s15062_s18 }
 0x420   : > { %v15538_v0 = vpack.c.bf16 %v1056_v63, %v1056_v63 }
 0x422   : > { %1123 = vrot.lane.b32.xlu1 %v15538_v0, %s15062_s18 }
 0x490   : > { %v1074_v4 = vpop.permute.xlu1 %1073 }
 0x491   : > { %v1080_v6 = vsel %vm1075_vm2, %v1074_v4, 0 }
 0x492   : > { %14055 = vmatpush3.bf16.xpose.msra.mxu1 %v1080_v6 }
 0x493   : > { %14066 = vmatprep.subr.bf16.mxu1 %v15059_v9 }
 0x494   : > { %v1124_v8 = vpop.permute.xlu1 %1123 }
 0x495   : > { %v1129_v10 = vsel %vm1075_vm2, %v1124_v8, 0 }
 0x496   : > { %14061 = vmatpush3.bf16.xpose.msra.mxu0 %v1129_v10 }
 0x497   : > { %14072 = vmatprep.subr.bf16.mxu0 %v15059_v9 }
 0x499   : > { %14057 = vmatmul.mubr.msk.bf16.vlgmr.msra.gmra.mxu1 %vm1075_vm2, %v15546_v11 }
 0x49a   : > { %14068 = vmatprep.mubr.msk.bf16.mxu1 %vm15060_vm1, %v15059_v9 }
 0x49d   : > { %14063 = vmatmul.mubr.msk.bf16.vlgmr.msra.gmra.mxu0 %vm1075_vm2, %v15553_v12 }
 0x49e   : > { %14074 = vmatprep.mubr.msk.bf16.mxu0 %vm15060_vm1, %v15059_v9 }
 0x559   : > { %v1116_v13 = vpop.f32.mrf.mxu1 }
 0x55a   : > { %v1171_v15 = vmul.f32 0.35355338, %v1116_v13 }
 0x55b   : > { %v14058_v16 = vpop.f32.mrf.mxu1 }
 0x55c   : > { %v1173_v17 = vadd.f32 %v1171_v15, %v15562_v14 }
 0x55d   : > { %v1119_v18 = vpop.f32.mrf.mxu1  ;;  %v1165_v20 = vpop.f32.mrf.mxu0 }
 0x55e   : > { %v1172_v23 = vmul.f32 0.35355338, %v1165_v20  ;;  %v1175_v24 = vsel %vm1075_vm2, %v1173_v17, -inf }
 0x55f   : > { %v14059_v25 = vpop.f32.mrf.mxu1  ;;  %1176 = vmax.xlane.f32.xlu1 %v1175_v24  ;;  %v14064_v26 = vpop.f32.mrf.mxu0 }
 0x560   : > { %v1174_v27 = vadd.f32 %v1172_v23, %v15568_v21 }
 0x561   : > { %v1168_v28 = vpop.f32.mrf.mxu0 }
 0x562   : > { %v1178_v29 = vsel %vm1075_vm2, %v1174_v27, -inf }
 0x563   : > { %1179 = vmax.xlane.f32.xlu0 %v1178_v29  ;;  %v14065_v30 = vpop.f32.mrf.mxu0 }
 0x570   : > { %1200 = vrot.lane.b32.xlu1 %v15575_v34, %s15063_s9 }
 0x5e8   : > { %v1177_v36 = vpop.xlane.xlu1 %1176 }
 0x5e9   : > { %v1181_v37 = vsub.f32 %v1173_v17, %v1177_v36 }
 0x5eb   : > { %v1183_v38 = vmul.f32 1.442695, %v1181_v37 }
 0x5ec   : > { %v1180_v39 = vpop.xlane.xlu0 %1179  ;;  %v1201_v40 = vpop.permute.xlu1 %1200 }
 0x5ed   : > { %14540 = vpow2.f32 %v1183_v38  ;;  %v1182_v41 = vsub.f32 %v1174_v27, %v1180_v39  ;;  %v1207_v42 = vsel %vm1205_vm3, %v1201_v40, 0 }
 0x5ee   : > { %14067 = vmatpush3.bf16.msra.mxu1 %v1207_v42 }
 0x5ef   : > { %v1185_v43 = vmul.f32 1.442695, %v1182_v41  ;;  %14078 = vmatprep.subr.bf16.mxu1 %v15059_v9 }
 0x5f1   : > { %14542 = vpow2.f32 %v1185_v43 }
 0x5fa   : > { %v14541_v33 = vpop.eup %14540 }
 0x5fb   : > { %v1187_v44 = vsel %vm1075_vm2, %v14541_v33, 0.0 }
 0x5fc   : > { %1188 = vadd.xlane.f32.xlu1 %v1187_v44 }
 0x5fe   : > { %v14543_v45 = vpop.eup %14542 }
 0x5ff   : > { %v1190_v46 = vsel %vm1075_vm2, %v14543_v45, 0.0 }
 0x600   : > { %1191 = vadd.xlane.f32.xlu0 %v1190_v46 }
 0x60d   : > { %1301 = vrot.lane.b32.xlu1 %v15534_v61, %s15064_s25 }
 0x611   : > { %1351 = vrot.lane.b32.xlu1 %v15538_v0, %s15064_s25 }
 0x615   : > { %1349 = vrot.lane.b32.xlu1 %v15553_v12, %s15065_s23 }
 0x616   : > { %1250 = vrot.lane.b32.xlu0 %v15589_v47, %s15063_s9 }
 0x61a   : > { %1299 = vrot.lane.b32.xlu0 %v15546_v11, %s15065_s23 }
 0x685   : > { %v1189_v48 = vpop.xlane.xlu1 %1188 }
 0x686   : > { %14544 = vrcp.f32 %v1189_v48 }
 0x689   : > { %v1192_v49 = vpop.xlane.xlu0 %1191  ;;  %v1302_v52 = vpop.permute.xlu1 %1301 }
 0x68a   : > { %14546 = vrcp.f32 %v1192_v49  ;;  %v1307_v58 = vsel %vm1075_vm2, %v1302_v52, 0 }
 0x68d   : > { %v1251_v50 = vpop.permute.xlu0 %1250  ;;  %v1352_v60 = vpop.permute.xlu1 %1351 }
 0x68e   : > { %v1256_v51 = vsel %vm1205_vm3, %v1251_v50, 0  ;;  %v1357_v63 = vsel %vm1075_vm2, %v1352_v60, 0 }
 0x68f   : > { %14073 = vmatpush3.bf16.msra.mxu0 %v1256_v51 }
 0x690   : > { %14084 = vmatprep.subr.bf16.mxu0 %v15059_v9 }
 0x691   : > { %v1300_v1 = vpop.permute.xlu0 %1299  ;;  %v1350_v4 = vpop.permute.xlu1 %1349 }
 0x693   : > { %v14545_v35 = vpop.eup %14544 }
 0x694   : > { %v1195_v53 = vmul.f32 %v14545_v35, %v14541_v33 }
 0x696   : > { %v1197_v54 = vpack.c.bf16 %v1195_v53, %v1195_v53 }
 0x697   : > { %v14547_v56 = vpop.eup %14546 }
 0x698   : > { %14069 = vmatmul.mubr.msk.bf16.vlgmr.msra.gmra.mxu1 %vm1075_vm2, %v1197_v54  ;;  %v1196_v59 = vmul.f32 %v14547_v56, %v14543_v45 }
 0x699   : > { %14079 = vmatpush3.bf16.xpose.msra.mxu1 %v1307_v58  ;;  %14080 = vmatprep.mubr.msk.bf16.mxu1 %vm15060_vm1, %v15059_v9 }
 0x69a   : > { %v1198_v62 = vpack.c.bf16 %v1196_v59, %v1196_v59  ;;  %14090 = vmatprep.subr.bf16.mxu1 %v15059_v9 }
 0x69c   : > { %14075 = vmatmul.mubr.msk.bf16.vlgmr.msra.gmra.mxu0 %vm1075_vm2, %v1198_v62  ;;  %v1058_v62 = vld [vmem:[#allocation7] sm:$0xf] }
 0x69d   : > { %14085 = vmatpush3.bf16.xpose.msra.mxu0 %v1357_v63  ;;  %14086 = vmatprep.mubr.msk.bf16.mxu0 %vm15060_vm1, %v15059_v9 }
 0x69e   : > { %14096 = vmatprep.subr.bf16.mxu0 %v15059_v9 }
 0x6a0   : > { %14081 = vmatmul.mubr.msk.bf16.vlgmr.msra.gmra.mxu1 %vm1075_vm2, %v1300_v1 }
 0x6a1   : > { %14092 = vmatprep.mubr.msk.bf16.mxu1 %vm15060_vm1, %v15059_v9 }
 0x6a4   : > { %14087 = vmatmul.mubr.msk.bf16.vlgmr.msra.gmra.mxu0 %vm1075_vm2, %v1350_v4  ;;  %v1575_v4 = vsel %vm1205_vm3, %v1058_v62, 0 }
 0x6a5   : > { %14098 = vmatprep.mubr.msk.bf16.mxu0 %vm15060_vm1, %v15059_v9 }
 0x758   : > { %v15615_v5 = vpop.f32.mrf.mxu1 }
 0x75a   : > { %v14070_v6 = vpop.f32.mrf.mxu1 }
 0x75c   : > { %v1246_v7 = vpop.f32.mrf.mxu1  ;;  %v15617_v8 = vpop.f32.mrf.mxu0 }
 0x75d   : > { %v1298_v10 = vpack.c.bf16 %v15617_v8, %v15615_v5 }
 0x75e   : > { %v14071_v13 = vpop.f32.mrf.mxu1  ;;  %v14076_v15 = vpop.f32.mrf.mxu0 }
 0x760   : > { %v1295_v16 = vpop.f32.mrf.mxu0  ;;  %v1343_v17 = vpop.f32.mrf.mxu1 }
 0x761   : > { %v1399_v18 = vmul.f32 0.35355338, %v1343_v17  ;;  %v1059_v16 = vld [vmem:[#allocation7 + $0x4] sm:$0xf] }
 0x762   : > { %v14077_v20 = vpop.f32.mrf.mxu0  ;;  %v14082_v23 = vpop.f32.mrf.mxu1  ;;  %v1528_v17 = vsel %vm1205_vm3, %v1059_v16, 0 }
 0x763   : > { %v1401_v24 = vadd.f32 %v1399_v18, %v15562_v14 }
 0x764   : > { %v1346_v25 = vpop.f32.mrf.mxu1  ;;  %v1393_v26 = vpop.f32.mrf.mxu0 }
 0x765   : > { %v1400_v27 = vmul.f32 0.35355338, %v1393_v26  ;;  %v1403_v28 = vsel %vm1075_vm2, %v1401_v24, -inf }
 0x766   : > { %1404 = vmax.xlane.f32.xlu0 %v1403_v28  ;;  %v14083_v29 = vpop.f32.mrf.mxu1  ;;  %v14088_v30 = vpop.f32.mrf.mxu0 }
 0x767   : > { %v1402_v36 = vadd.f32 %v1400_v27, %v15568_v21 }
 0x768   : > { %v1396_v37 = vpop.f32.mrf.mxu0 }
 0x769   : > { %v1406_v38 = vsel %vm1075_vm2, %v1402_v36, -inf }
 0x76a   : > { %1407 = vmax.xlane.f32.xlu1 %v1406_v38  ;;  %v14089_v39 = vpop.f32.mrf.mxu0 }
 0x77b   : > { %1427 = vrot.lane.b32.xlu1 %v15575_v34, %s17540_s27 }
 0x77f   : > { %1620 = vrot.lane.b32.xlu1 %v15534_v61, %s17538_s0 }
 0x783   : > { %1670 = vrot.lane.b32.xlu1 %v15538_v0, %s17538_s0 }
 0x787   : > { %1668 = vrot.lane.b32.xlu1 %v15553_v12, %s17536_s21 }
 0x7ef   : > { %v1405_v40 = vpop.xlane.xlu0 %1404 }
 0x7f0   : > { %v1409_v41 = vsub.f32 %v1401_v24, %v1405_v40 }
 0x7f2   : > { %v1411_v42 = vmul.f32 1.442695, %v1409_v41 }
 0x7f3   : > { %v1408_v43 = vpop.xlane.xlu1 %1407 }
 0x7f4   : > { %14548 = vpow2.f32 %v1411_v42  ;;  %v1410_v33 = vsub.f32 %v1402_v36, %v1408_v43 }
 0x7f6   : > { %v1413_v44 = vmul.f32 1.442695, %v1410_v33 }
 0x7f7   : > { %v1428_v45 = vpop.permute.xlu1 %1427 }
 0x7f8   : > { %14550 = vpow2.f32 %v1413_v44  ;;  %v1433_v46 = vsel %vm1205_vm3, %v1428_v45, 0 }
 0x7f9   : > { %14091 = vmatpush3.bf16.msra.mxu1 %v1433_v46 }
 0x7fa   : > { %14102 = vmatprep.subr.bf16.mxu1 %v15059_v9 }
 0x7fb   : > { %v1621_v6 = vpop.permute.xlu1 %1620 }
 0x7fc   : > { %v1626_v25 = vsel %vm1075_vm2, %v1621_v6, 0 }
 0x7ff   : > { %v1671_v7 = vpop.permute.xlu1 %1670 }
 0x800   : > { %v1676_v13 = vsel %vm1075_vm2, %v1671_v7, 0 }
 0x801   : > { %v14549_v48 = vpop.eup %14548 }
 0x802   : > { %v1415_v49 = vsel %vm1075_vm2, %v14549_v48, 0.0 }
 0x803   : > { %1416 = vadd.xlane.f32.xlu0 %v1415_v49  ;;  %v1669_v15 = vpop.permute.xlu1 %1668 }
 0x805   : > { %v14551_v50 = vpop.eup %14550 }
 0x806   : > { %v1418_v51 = vsel %vm1075_vm2, %v14551_v50, 0.0 }
 0x807   : > { %1419 = vadd.xlane.f32.xlu0 %v1418_v51 }
 0x81d   : > { %1475 = vrot.lane.b32.xlu0 %v15589_v47, %s17540_s27 }
 0x821   : > { %1618 = vrot.lane.b32.xlu0 %v15546_v11, %s17536_s21  ;;  %s17608_s21 = smov 40  }
 0x88c   : > { %v1417_v35 = vpop.xlane.xlu0 %1416 }
 0x88d   : > { %14552 = vrcp.f32 %v1417_v35 }
 0x890   : > { %v1420_v52 = vpop.xlane.xlu0 %1419 }
 0x891   : > { %14554 = vrcp.f32 %v1420_v52 }
 0x894   : > { %v1476_v53 = vpop.permute.xlu0 %1475 }
 0x895   : > { %v1481_v54 = vsel %vm1205_vm3, %v1476_v53, 0 }
 0x896   : > { %14097 = vmatpush3.bf16.msra.mxu0 %v1481_v54 }
 0x897   : > { %14108 = vmatprep.subr.bf16.mxu0 %v15059_v9 }
 0x898   : > { %v1619_v29 = vpop.permute.xlu0 %1618 }
 0x89a   : > { %v14553_v56 = vpop.eup %14552 }
 0x89b   : > { %v1423_v58 = vmul.f32 %v14553_v56, %v14549_v48 }
 0x89d   : > { %v1425_v59 = vpack.c.bf16 %v1423_v58, %v1423_v58 }
 0x89e   : > { %v14555_v60 = vpop.eup %14554 }
 0x89f   : > { %14093 = vmatmul.mubr.msk.bf16.vlgmr.msra.gmra.mxu1 %vm1075_vm2, %v1425_v59  ;;  %v1424_v63 = vmul.f32 %v14555_v60, %v14551_v50 }
 0x8a0   : > { %14104 = vmatprep.mubr.msk.bf16.mxu1 %vm15060_vm1, %v15059_v9  ;;  %14103 = vmatpush3.bf16.msra.mxu1 %v1528_v17 }
 0x8a1   : > { %v1426_v1 = vpack.c.bf16 %v1424_v63, %v1424_v63  ;;  %14114 = vmatprep.subr.bf16.mxu1 %v15059_v9 }
 0x8a3   : > { %14099 = vmatmul.mubr.msk.bf16.vlgmr.msra.gmra.mxu0 %vm1075_vm2, %v1426_v1 }
 0x8a4   : > { %14109 = vmatpush3.bf16.msra.mxu0 %v1575_v4  ;;  %14110 = vmatprep.mubr.msk.bf16.mxu0 %vm15060_vm1, %v15059_v9 }
 0x8a5   : > { %14120 = vmatprep.subr.bf16.mxu0 %v15059_v9 }
 0x8ab   : > { %14111 = vmatmul.mubr.msk.bf16.vlgmr.msra.gmra.mxu0 %vm1075_vm2, %v1298_v10 }
 0x8ac   : > { %14121 = vmatpush3.bf16.xpose.msra.mxu0 %v1676_v13  ;;  %14122 = vmatprep.mubr.msk.bf16.mxu0 %vm15060_vm1, %v15059_v9 }
 0x8ad   : > { %14132 = vmatprep.subr.bf16.mxu0 %v15059_v9 }
 0x8b3   : > { %14123 = vmatmul.mubr.msk.bf16.vlgmr.msra.gmra.mxu0 %vm1075_vm2, %v1669_v15 }
 0x8b4   : > { %14134 = vmatprep.mubr.msk.bf16.mxu0 %vm15060_vm1, %v15059_v9 }
 0x95f   : > { %v1469_v5 = vpop.f32.mrf.mxu1 }
 0x961   : > { %v14094_v8 = vpop.f32.mrf.mxu1 }
 0x963   : > { %v1472_v10 = vpop.f32.mrf.mxu1  ;;  %v1517_v18 = vpop.f32.mrf.mxu0 }
 0x964   : > { %v1523_v20 = vpack.c.bf16 %v1517_v18, %v1469_v5 }
 0x965   : > { %v14095_v23 = vpop.f32.mrf.mxu1  ;;  %v14100_v24 = vpop.f32.mrf.mxu0 }
 0x966   : > { %14105 = vmatmul.mubr.msk.bf16.vlgmr.msra.gmra.mxu1 %vm1075_vm2, %v1523_v20 }
 0x967   : > { %14115 = vmatpush3.bf16.xpose.msra.mxu1 %v1626_v25  ;;  %v1520_v26 = vpop.f32.mrf.mxu0  ;;  %14116 = vmatprep.mubr.msk.bf16.mxu1 %vm15060_vm1, %v15059_v9  ;;  %v1060_v25 = vld [vmem:[#allocation7 + $0x8] sm:$0xf] }
 0x968   : > { %14126 = vmatprep.subr.bf16.mxu1 %v15059_v9  ;;  %v1847_v26 = vsel %vm1205_vm3, %v1060_v25, 0 }
 0x969   : > { %v14101_v27 = vpop.f32.mrf.mxu0 }
 0x96b   : > { %v15669_v28 = vpop.f32.mrf.mxu0 }
 0x96d   : > { %v14112_v30 = vpop.f32.mrf.mxu0 }
 0x96e   : > { %14117 = vmatmul.mubr.msk.bf16.vlgmr.msra.gmra.mxu1 %vm1075_vm2, %v1619_v29 }
 0x96f   : > { %v15672_v36 = vpop.f32.mrf.mxu0  ;;  %14128 = vmatprep.mubr.msk.bf16.mxu1 %vm15060_vm1, %v15059_v9 }
 0x971   : > { %v14113_v37 = vpop.f32.mrf.mxu0 }
 0x973   : > { %v1712_v38 = vpop.f32.mrf.mxu0 }
 0x974   : > { %v1719_v39 = vmul.f32 0.35355338, %v1712_v38 }
 0x975   : > { %v14124_v40 = vpop.f32.mrf.mxu0 }
 0x976   : > { %v1721_v41 = vadd.f32 %v1719_v39, %v15568_v21 }
 0x977   : > { %v1715_v42 = vpop.f32.mrf.mxu0 }
 0x978   : > { %v1725_v43 = vsel %vm1075_vm2, %v1721_v41, -inf }
 0x979   : > { %1726 = vmax.xlane.f32.xlu1 %v1725_v43  ;;  %v14125_v33 = vpop.f32.mrf.mxu0 }
 0x98a   : > { %1746 = vrot.lane.b32.xlu1 %v15575_v34, %s17534_s3 }
 0x98e   : > { %1894 = vrot.lane.b32.xlu1 %v15534_v61, %s17532_s8 }
 0x992   : > { %1944 = vrot.lane.b32.xlu1 %v15538_v0, %s17532_s8  ;;  %s17604_s8 = smov 112  }
 0x996   : > { %1942 = vrot.lane.b32.xlu1 %v15553_v12, %s17530_s29 }
 0xa02   : > { %v1727_v44 = vpop.xlane.xlu1 %1726 }
 0xa03   : > { %v1729_v48 = vsub.f32 %v1721_v41, %v1727_v44 }
 0xa05   : > { %v1732_v49 = vmul.f32 1.442695, %v1729_v48 }
 0xa06   : > { %v1747_v45 = vpop.permute.xlu1 %1746 }
 0xa07   : > { %v1752_v46 = vsel %vm1205_vm3, %v1747_v45, 0  ;;  %14556 = vpow2.f32 %v1732_v49 }
 0xa08   : > { %14127 = vmatpush3.bf16.msra.mxu1 %v1752_v46 }
 0xa09   : > { %14138 = vmatprep.subr.bf16.mxu1 %v15059_v9 }
 0xa0a   : > { %v1895_v8 = vpop.permute.xlu1 %1894 }
 0xa0b   : > { %v1900_v18 = vsel %vm1075_vm2, %v1895_v8, 0 }
 0xa0e   : > { %v1945_v39 = vpop.permute.xlu1 %1944 }
 0xa0f   : > { %v1950_v46 = vsel %vm1075_vm2, %v1945_v39, 0 }
 0xa14   : > { %v14557_v58 = vpop.eup %14556 }
 0xa15   : > { %v1737_v60 = vsel %vm1075_vm2, %v14557_v58, 0.0 }
 0xa26   : > { %v15688_v50 = vpop.f32.mrf.mxu1 }
 0xa28   : > { %v14106_v61 = vpop.f32.mrf.mxu1 }
 0xa2a   : > { %v15690_v51 = vpop.f32.mrf.mxu1 }
 0xa2c   : > { %v14107_v0 = vpop.f32.mrf.mxu1 }
 0xa2e   : > { %v1662_v35 = vpop.f32.mrf.mxu1 }
 0xa2f   : > { %v1718_v52 = vmul.f32 0.35355338, %v1662_v35  ;;  %v1943_v35 = vpop.permute.xlu1 %1942 }
 0xa30   : > { %v14118_v53 = vpop.f32.mrf.mxu1 }
 0xa31   : > { %v1720_v12 = vadd.f32 %v1718_v52, %v15562_v14 }
 0xa32   : > { %v1665_v54 = vpop.f32.mrf.mxu1 }
 0xa33   : > { %v1722_v56 = vsel %vm1075_vm2, %v1720_v12, -inf }
 0xa34   : > { %1723 = vmax.xlane.f32.xlu0 %v1722_v56  ;;  %v14119_v59 = vpop.f32.mrf.mxu1  ;;  %v1612_v56 = vadd.f32 %v15669_v28, %v15688_v50 }
 0xa38   : > { %1738 = vadd.xlane.f32.xlu0 %v1737_v60 }
 0xabd   : > { %v1724_v62 = vpop.xlane.xlu0 %1723 }
 0xabe   : > { %v1728_v63 = vsub.f32 %v1720_v12, %v1724_v62  ;;  %v1615_v62 = vadd.f32 %v15672_v36, %v15690_v51 }
 0xac0   : > { %v1730_v1 = vmul.f32 1.442695, %v1728_v63 }
 0xac1   : > { %v1739_v7 = vpop.xlane.xlu0 %1738 }
 0xac2   : > { %14558 = vpow2.f32 %v1730_v1 }
 0xac3   : > { %14560 = vrcp.f32 %v1739_v7 }
 0xacf   : > { %v14559_v4 = vpop.eup %14558 }
 0xad0   : > { %v1734_v6 = vsel %vm1075_vm2, %v14559_v4, 0.0  ;;  %v14561_v13 = vpop.eup %14560 }
 0xad1   : > { %1735 = vadd.xlane.f32.xlu0 %v1734_v6  ;;  %v1743_v16 = vmul.f32 %v14561_v13, %v14557_v58 }
 0xad3   : > { %v1745_v10 = vpack.c.bf16 %v1743_v16, %v1743_v16 }
 0xae7   : > { %1794 = vrot.lane.b32.xlu0 %v15589_v47, %s17534_s3 }
 0xaeb   : > { %1892 = vrot.lane.b32.xlu0 %v15546_v11, %s17530_s29  ;;  %s17606_s29 = smov 72  }
 0xb5a   : > { %v1736_v15 = vpop.xlane.xlu0 %1735 }
 0xb5b   : > { %14562 = vrcp.f32 %v1736_v15 }
 0xb5e   : > { %v1795_v17 = vpop.permute.xlu0 %1794 }
 0xb5f   : > { %v1800_v5 = vsel %vm1205_vm3, %v1795_v17, 0 }
 0xb60   : > { %14133 = vmatpush3.bf16.msra.mxu0 %v1800_v5 }
 0xb61   : > { %14144 = vmatprep.subr.bf16.mxu0 %v15059_v9 }
 0xb62   : > { %v1893_v23 = vpop.permute.xlu0 %1892 }
 0xb63   : > { %14135 = vmatmul.mubr.msk.bf16.vlgmr.msra.gmra.mxu0 %vm1075_vm2, %v1745_v10 }
 0xb64   : > { %14145 = vmatpush3.bf16.xpose.msra.mxu0 %v1900_v18  ;;  %14146 = vmatprep.mubr.msk.bf16.mxu0 %vm15060_vm1, %v15059_v9 }
 0xb65   : > { %14156 = vmatprep.subr.bf16.mxu0 %v15059_v9 }
 0xb68   : > { %v14563_v11 = vpop.eup %14562 }
 0xb69   : > { %v1742_v20 = vmul.f32 %v14563_v11, %v14559_v4 }
 0xb6b   : > { %14147 = vmatmul.mubr.msk.bf16.vlgmr.msra.gmra.mxu0 %vm1075_vm2, %v1893_v23  ;;  %v1744_v24 = vpack.c.bf16 %v1742_v20, %v1742_v20  ;;  %v1061_v23 = vld [vmem:[#allocation7 + $0xc] sm:$0xf] }
 0xb6c   : > { %14158 = vmatprep.mubr.msk.bf16.mxu0 %vm15060_vm1, %v15059_v9 }
 0xb6d   : > { %14129 = vmatmul.mubr.msk.bf16.vlgmr.msra.gmra.mxu1 %vm1075_vm2, %v1744_v24  ;;  %v2121_v24 = vsel %vm1205_vm3, %v1061_v23, 0 }
 0xb6e   : > { %14140 = vmatprep.mubr.msk.bf16.mxu1 %vm15060_vm1, %v15059_v9  ;;  %14139 = vmatpush3.bf16.msra.mxu1 %v1847_v26 }
 0xb6f   : > { %14150 = vmatprep.subr.bf16.mxu1 %v15059_v9 }
 0xc23   : > { %v1836_v27 = vpop.f32.mrf.mxu0 }
 0xc25   : > { %v14136_v29 = vpop.f32.mrf.mxu0 }
 0xc27   : > { %v1839_v30 = vpop.f32.mrf.mxu0 }
 0xc29   : > { %v14137_v37 = vpop.f32.mrf.mxu0 }
 0xc2b   : > { %v1936_v38 = vpop.f32.mrf.mxu0 }
 0xc2c   : > { %v1992_v40 = vmul.f32 0.35355338, %v1936_v38 }
 0xc2d   : > { %v1788_v41 = vpop.f32.mrf.mxu1  ;;  %v14148_v42 = vpop.f32.mrf.mxu0 }
 0xc2e   : > { %v1842_v43 = vpack.c.bf16 %v1836_v27, %v1788_v41  ;;  %v1994_v33 = vadd.f32 %v1992_v40, %v15562_v14 }
 0xc2f   : > { %v14130_v44 = vpop.f32.mrf.mxu1  ;;  %v1939_v45 = vpop.f32.mrf.mxu0 }
 0xc30   : > { %14141 = vmatmul.mubr.msk.bf16.vlgmr.msra.gmra.mxu1 %vm1075_vm2, %v1842_v43  ;;  %v1996_v48 = vsel %vm1075_vm2, %v1994_v33, -inf }
 0xc31   : > { %14151 = vmatpush3.bf16.xpose.msra.mxu1 %v1950_v46  ;;  %v1791_v49 = vpop.f32.mrf.mxu1  ;;  %1997 = vmax.xlane.f32.xlu0 %v1996_v48  ;;  %v14149_v61 = vpop.f32.mrf.mxu0 }
 0xc32   : > { %14152 = vmatprep.mubr.msk.bf16.mxu1 %vm15060_vm1, %v15059_v9  ;;  %14162 = vmatprep.subr.bf16.mxu1 %v15059_v9 }
 0xc33   : > { %v14131_v0 = vpop.f32.mrf.mxu1 }
 0xc38   : > { %14153 = vmatmul.mubr.msk.bf16.vlgmr.msra.gmra.mxu1 %vm1075_vm2, %v1943_v35 }
 0xc39   : > { %14164 = vmatprep.mubr.msk.bf16.mxu1 %vm15060_vm1, %v15059_v9 }
 0xcba   : > { %v1998_v14 = vpop.xlane.xlu0 %1997 }
 0xcbb   : > { %v2002_v52 = vsub.f32 %v1994_v33, %v1998_v14 }
 0xcbd   : > { %v2004_v53 = vmul.f32 1.442695, %v2002_v52 }
 0xcbf   : > { %14564 = vpow2.f32 %v2004_v53 }
 0xccc   : > { %v14565_v12 = vpop.eup %14564 }
 0xccd   : > { %v2008_v54 = vsel %vm1075_vm2, %v14565_v12, 0.0 }
 0xcce   : > { %2009 = vadd.xlane.f32.xlu0 %v2008_v54 }
 0xcf0   : > { %v1883_v58 = vpop.f32.mrf.mxu1 }
 0xcf1   : > { %v1890_v59 = vadd.f32 %v1883_v58, %v1612_v56  ;;  %v14521_v56 = vld [vmem:[#allocation9] sm:$0xff]  }
 0xcf2   : > { %v14142_v60 = vpop.f32.mrf.mxu1 }
 0xcf4   : > { %v1886_v63 = vpop.f32.mrf.mxu1 }
 0xcf5   : > { %v1891_v1 = vadd.f32 %v1886_v63, %v1615_v62 }
 0xcf6   : > { %v14143_v4 = vpop.f32.mrf.mxu1 }
 0xcf8   : > { %v1986_v6 = vpop.f32.mrf.mxu1 }
 0xcf9   : > { %v1993_v7 = vmul.f32 0.35355338, %v1986_v6 }
 0xcfa   : > { %v14154_v13 = vpop.f32.mrf.mxu1 }
 0xcfb   : > { %v1995_v15 = vadd.f32 %v1993_v7, %v15568_v21 }
 0xcfc   : > { %v1989_v16 = vpop.f32.mrf.mxu1 }
 0xcfd   : > { %v1999_v17 = vsel %vm1075_vm2, %v1995_v15, -inf }
 0xcfe   : > { %2000 = vmax.xlane.f32.xlu1 %v1999_v17  ;;  %v14155_v5 = vpop.f32.mrf.mxu1 }
 0xd0f   : > { %2020 = vrot.lane.b32.xlu1 %v15575_v34, %s17528_s19 }
 0xd57   : > { %v2010_v28 = vpop.xlane.xlu0 %2009 }
 0xd58   : > { %14566 = vrcp.f32 %v2010_v28 }
 0xd65   : > { %v14567_v36 = vpop.eup %14566 }
 0xd66   : > { %v2016_v10 = vmul.f32 %v14567_v36, %v14565_v12  ;;  %v14522_v36 = vld [vmem:[%s17601_s28 + $0x18] sm:$0xff]  }
 0xd68   : > { %v2018_v11 = vpack.c.bf16 %v2016_v10, %v2016_v10  ;;  %v14525_v10 = vld [vmem:[%s17601_s28] sm:$0xff]  }
 0xd87   : > { %v2001_v50 = vpop.xlane.xlu1 %2000 }
 0xd88   : > { %v2003_v51 = vsub.f32 %v1995_v15, %v2001_v50  ;;  %v14523_v50 = vld [vmem:[%s17601_s28 + $0x10] sm:$0xff]  }
 0xd8a   : > { %v2006_v8 = vmul.f32 1.442695, %v2003_v51  ;;  %v15782_v51 = vld [vmem:[#allocation3 + $0x8] sm:$0xff] }
 0xd8b   : > { %v2021_v18 = vpop.permute.xlu1 %2020 }
 0xd8c   : > { %14568 = vpow2.f32 %v2006_v8  ;;  %v2026_v21 = vsel %vm1205_vm3, %v2021_v18, 0  ;;  %v14524_v8 = vld [vmem:[%s17601_s28 + $0x8] sm:$0xff]  }
 0xd8d   : > { %14157 = vmatpush3.bf16.msra.mxu0 %v2026_v21 }
 0xd8e   : > { %14168 = vmatprep.subr.bf16.mxu0 %v15059_v9 }
 0xd90   : > { %14159 = vmatmul.mubr.msk.bf16.vlgmr.msra.gmra.mxu0 %vm1075_vm2, %v2018_v11 }
 0xd91   : > { %14170 = vmatprep.mubr.msk.bf16.mxu0 %vm15060_vm1, %v15059_v9  ;;  %14169 = vmatpush3.bf16.msra.mxu0 %v2121_v24 }
 0xd92   : > { %14182 = vmatprep.subr.bf16.mxu0 %v15059_v9 }
 0xd99   : > { %v14569_v34 = vpop.eup %14568 }
 0xd9a   : > { %v2011_v20 = vsel %vm1075_vm2, %v14569_v34, 0.0 }
 0xd9b   : > { %2012 = vadd.xlane.f32.xlu0 %v2011_v20 }
 0xdb1   : > { %2068 = vrot.lane.b32.xlu0 %v15589_v47, %s17528_s19  ;;  %s17600_s19 = smov %s17599_s2 }
 0xe24   : > { %v2013_v25 = vpop.xlane.xlu0 %2012 }
 0xe25   : > { %14570 = vrcp.f32 %v2013_v25 }
 0xe28   : > { %v2069_v26 = vpop.permute.xlu0 %2068 }
 0xe29   : > { %v2074_v27 = vsel %vm1205_vm3, %v2069_v26, 0 }
 0xe2a   : > { %14163 = vmatpush3.bf16.msra.mxu1 %v2074_v27 }
 0xe2b   : > { %14174 = vmatprep.subr.bf16.mxu1 %v15059_v9 }
 0xe32   : > { %v14571_v29 = vpop.eup %14570 }
 0xe33   : > { %v2017_v30 = vmul.f32 %v14571_v29, %v14569_v34 }
 0xe35   : > { %v2019_v37 = vpack.c.bf16 %v2017_v30, %v2017_v30 }
 0xe37   : > { %14165 = vmatmul.mubr.msk.bf16.vlgmr.msra.gmra.mxu1 %vm1075_vm2, %v2019_v37 }
 0xe38   : > { %14178 = vmatprep.mubr.msk.bf16.mxu1 %vm15060_vm1, %v15059_v9 }
 0xe50   : > { %v2062_v47 = vpop.f32.mrf.mxu0 }
 0xe52   : > { %v14160_v38 = vpop.f32.mrf.mxu0 }
 0xe54   : > { %v2065_v39 = vpop.f32.mrf.mxu0 }
 0xe56   : > { %v14161_v40 = vpop.f32.mrf.mxu0 }
 0xef7   : > { %v2110_v41 = vpop.f32.mrf.mxu1 }
 0xef8   : > { %v2116_v42 = vpack.c.bf16 %v2110_v41, %v2062_v47 }
 0xef9   : > { %v14166_v43 = vpop.f32.mrf.mxu1 }
 0xefa   : > { %14171 = vmatmul.mubr.msk.bf16.vlgmr.msra.gmra.mxu0 %vm1075_vm2, %v2116_v42 }
 0xefb   : > { %v2113_v33 = vpop.f32.mrf.mxu1  ;;  %14190 = vmatprep.mubr.msk.bf16.mxu0 %vm15060_vm1, %v15059_v9  ;;  %14183 = vmatpush3.bf16.msra.mxu0 %v14522_v36 }
 0xefc   : > { %14184 = vmatprep.subr.bf16.mxu0 %v15059_v9 }
 0xefd   : > { %v14167_v44 = vpop.f32.mrf.mxu1 }
 0xeff   : > { %14185 = vmatpush3.bf16.msra.mxu0 %v14523_v50  ;;  %v14639_v50 = vld [vmem:[%s17594_s1] sm:$0xff] }
 0xf00   : > { %14186 = vmatprep.subr.bf16.mxu0 %v15782_v51 }
 0xf03   : > { %14187 = vmatpush3.bf16.msra.mxu0 %v14524_v8 }
 0xf04   : > { %14188 = vmatprep.subr.bf16.mxu0 %v15782_v51 }
 0xf07   : > { %14189 = vmatpush3.bf16.msra.mxu0 %v14525_v10  ;;  %v14640_v10 = vld [vmem:[%s17597_s4] sm:$0xff] }
 0xf08   : > { %14210 = vmatprep.subr.bf16.mxu0 %v15782_v51 }
 0xfba   : > { %v2157_v45 = vpop.f32.mrf.mxu0 }
 0xfbb   : > { %v2164_v46 = vadd.f32 %v2157_v45, %v1890_v59 }
 0xfbc   : > { %v14172_v48 = vpop.f32.mrf.mxu0 }
 0xfbd   : > { %v15753_v49 = vadd.f32 %v15450_v2, %v2164_v46  ;;  %v14520_v2 = vld [vmem:[#allocation9 + $0x8] sm:$0xff]  }
 0xfbe   : > { %v2160_v61 = vpop.f32.mrf.mxu0  ;;  %14175 = vmatpush3.bf16.msra.mxu1 %v14520_v2  ;;  %v12724_v2 = vld [vmem:[%s17596_s7 + $0x1] sm:$0x1] }
 0xfbf   : > { %v2165_v0 = vadd.f32 %v2160_v61, %v1891_v1  ;;  %v2169_v35 = vmul.f32 %v15753_v49, %v15753_v49  ;;  %14176 = vmatprep.subr.bf16.mxu1 %v15059_v9  ;;  %v2168_v1 = vld [vmem:[%s17599_s2] sm:$0x1]  ;;  %s17605_s2 = smov 48  }
 0xfc0   : > { %v14173_v14 = vpop.f32.mrf.mxu0  ;;  %v2185_v4 = vunpack.c.l.bf16 %v2168_v1 }
 0xfc1   : > { %v15758_v52 = vadd.f32 %v15452_v3, %v2165_v0  ;;  %v2171_v53 = vsel %vm840_vm0, %v2169_v35, 0.0  ;;  %v14527_v0 = vld [vmem:[#allocation5 + $0x10] sm:$0xff]  }
 0xfc2   : > { %2172 = vadd.xlane.f32.xlu1 %v2171_v53  ;;  %14177 = vmatpush3.bf16.msra.mxu1 %v14521_v56  ;;  %v2189_v13 = vrot.slane %v2185_v4, %v15480_v22  ;;  %v2375_v56 = vunpack.c.l.bf16 %v12724_v2 }
 0xfc3   : > { %v2170_v12 = vmul.f32 %v15758_v52, %v15758_v52  ;;  %14194 = vmatprep.subr.bf16.mxu1 %v15059_v9 }
 0xfc5   : > { %v2174_v54 = vsel %vm840_vm0, %v2170_v12, 0.0 }
 0xfc6   : > { %2175 = vadd.xlane.f32.xlu0 %v2174_v54 }
0x104b   : > { %v2173_v58 = vpop.xlane.xlu1 %2172 }
0x104c   : > { %v2177_v3 = vmul.f32 0.03125, %v2173_v58 }
0x104e   : > { %v2179_v59 = vadd.f32 1e-05, %v2177_v3 }
0x104f   : > { %v2176_v60 = vpop.xlane.xlu0 %2175 }
0x1050   : > { %14572 = vrsqrt.f32 %v2179_v59  ;;  %v2178_v62 = vmul.f32 0.03125, %v2176_v60  ;;  %v2379_v59 = vrot.slane %v2375_v56, %v15480_v22 }
0x1052   : > { %v2180_v63 = vadd.f32 1e-05, %v2178_v62 }
0x1054   : > { %14574 = vrsqrt.f32 %v2180_v63 }
0x105d   : > { %v14573_v6 = vpop.eup %14572 }
0x105e   : > { %v2183_v7 = vmul.f32 %v14573_v6, %v15753_v49  ;;  %v14637_v6 = vld [vmem:[#allocation10 + $0x8] sm:$0xff]  }
0x1060   : > { %v2190_v17 = vmul.f32 %v2189_v13, %v2183_v7  ;;  %v14638_v7 = vld [vmem:[#allocation10] sm:$0xff]  }
0x1061   : > { %v14575_v15 = vpop.eup %14574 }
0x1062   : > { %v2184_v16 = vmul.f32 %v14575_v15, %v15758_v52 }
0x1064   : > { %v2191_v5 = vmul.f32 %v2189_v13, %v2184_v16 }
0x1066   : > { %v2192_v28 = vpack.c.bf16 %v2191_v5, %v2190_v17 }
0x1068   : > { %14179 = vmatmul.mubr.msk.bf16.vlgmr.msra.gmra.mxu1 %vm840_vm0, %v2192_v28 }
0x1069   : > { %14198 = vmatprep.mubr.msk.bf16.mxu1 %vm15060_vm1, %v15059_v9 }
0x1128   : > { %v2246_v9 = vpop.f32.mrf.mxu1 }
0x1129   : > { %2269 = vrot.lane.b32.xlu1 %v2246_v9, %s15063_s9  ;;  %v12717_v34 = vmul.f32 -1.442695, %v2246_v9 }
0x112a   : > { %v14180_v18 = vpop.f32.mrf.mxu1 }
0x112b   : > { %14576 = vpow2.f32 %v12717_v34  ;;  %v14641_v34 = vld [vmem:[%s17594_s1 + $0x8] sm:$0xff] }
0x112c   : > { %v2249_v21 = vpop.f32.mrf.mxu1 }
0x112d   : > { %2271 = vrot.lane.b32.xlu0 %v2249_v21, %s15063_s9  ;;  %v12718_v20 = vmul.f32 -1.442695, %v2249_v21 }
0x112e   : > { %v14181_v11 = vpop.f32.mrf.mxu1 }
0x112f   : > { %14578 = vpow2.f32 %v12718_v20 }
0x1138   : > { %v14577_v23 = vpop.eup %14576 }
0x1139   : > { %v2259_v25 = vadd.f32 1.0, %v14577_v23  ;;  %v14642_v23 = vld [vmem:[%s17597_s4 + $0x8] sm:$0xff] }
0x113b   : > { %14580 = vrcp.f32 %v2259_v25 }
0x113c   : > { %v14579_v24 = vpop.eup %14578 }
0x113d   : > { %v2260_v26 = vadd.f32 1.0, %v14579_v24 }
0x113f   : > { %14582 = vrcp.f32 %v2260_v26 }
0x1148   : > { %v14581_v27 = vpop.eup %14580 }
0x1149   : > { %v2265_v37 = vmul.f32 %v14581_v27, %v2246_v9 }
0x114c   : > { %v14583_v29 = vpop.eup %14582 }
0x114d   : > { %v2266_v47 = vmul.f32 %v14583_v29, %v2249_v21 }
0x119b   : > { %v2270_v30 = vpop.permute.xlu1 %2269 }
0x119c   : > { %v2275_v39 = vmul.f32 %v2270_v30, %v2265_v37 }
0x119f   : > { %v2272_v38 = vpop.permute.xlu0 %2271 }
0x11a0   : > { %v2276_v40 = vmul.f32 %v2272_v38, %v2266_v47 }
0x11a2   : > { %v2277_v41 = vpack.c.bf16 %v2276_v40, %v2275_v39 }
0x11a4   : > { %14191 = vmatmul.mubr.msk.bf16.vlgmr.msra.gmra.mxu0 %vm2310_vm4, %v2277_v41 }
0x11a5   : > { %14211 = vmatpush3.bf16.msra.mxu0 %v15488_v31  ;;  %14214 = vmatprep.mubr.msk.bf16.mxu0 %vm15060_vm1, %v15782_v51 }
0x11a6   : > { %14212 = vmatprep.subr.bf16.mxu0 %v15782_v51 }
0x11a9   : > { %14213 = vmatpush3.bf16.msra.mxu0 %v15494_v32 }
0x11aa   : > { %14224 = vmatprep.subr.bf16.mxu0 %v15782_v51 }
0x1264   : > { %v2348_v42 = vpop.f32.mrf.mxu0 }
0x1265   : > { %v15803_v43 = vadd.f32 %v2348_v42, %v15753_v49  ;;  %v14526_v49 = vld [vmem:[#allocation5 + $0x18] sm:$0xff]  }
0x1266   : > { %v14192_v33 = vpop.f32.mrf.mxu0  ;;  %14195 = vmatpush3.bf16.msra.mxu1 %v14526_v49 }
0x1267   : > { %v2359_v44 = vmul.f32 %v15803_v43, %v15803_v43  ;;  %14196 = vmatprep.subr.bf16.mxu1 %v15782_v51 }
0x1268   : > { %v2351_v45 = vpop.f32.mrf.mxu0 }
0x1269   : > { %v15808_v31 = vadd.f32 %v2351_v45, %v15758_v52  ;;  %v2361_v46 = vsel %vm840_vm0, %v2359_v44, 0.0 }
0x126a   : > { %2362 = vadd.xlane.f32.xlu1 %v2361_v46  ;;  %v14193_v48 = vpop.f32.mrf.mxu0  ;;  %14197 = vmatpush3.bf16.msra.mxu1 %v14527_v0 }
0x126b   : > { %v2360_v32 = vmul.f32 %v15808_v31, %v15808_v31  ;;  %14202 = vmatprep.subr.bf16.mxu1 %v15782_v51 }
0x126d   : > { %v2364_v61 = vsel %vm840_vm0, %v2360_v32, 0.0 }
0x126e   : > { %2365 = vadd.xlane.f32.xlu0 %v2364_v61 }
0x12f3   : > { %v2363_v35 = vpop.xlane.xlu1 %2362 }
0x12f4   : > { %v2367_v14 = vmul.f32 0.03125, %v2363_v35 }
0x12f6   : > { %v2369_v52 = vadd.f32 1e-05, %v2367_v14 }
0x12f7   : > { %v2366_v53 = vpop.xlane.xlu0 %2365 }
0x12f8   : > { %14584 = vrsqrt.f32 %v2369_v52  ;;  %v2368_v12 = vmul.f32 0.03125, %v2366_v53  ;;  %v15887_v52 = vld [vmem:[%s17598_s6] sm:$0xff] }
0x12fa   : > { %v2370_v54 = vadd.f32 1e-05, %v2368_v12 }
0x12fc   : > { %14586 = vrsqrt.f32 %v2370_v54 }
0x1305   : > { %v14585_v58 = vpop.eup %14584 }
0x1306   : > { %v2373_v3 = vmul.f32 %v14585_v58, %v15803_v43 }
0x1308   : > { %v2380_v63 = vmul.f32 %v2379_v59, %v2373_v3 }
0x1309   : > { %v14587_v60 = vpop.eup %14586 }
0x130a   : > { %v2374_v62 = vmul.f32 %v14587_v60, %v15808_v31 }
0x130c   : > { %v2381_v1 = vmul.f32 %v2379_v59, %v2374_v62  ;;  %v15894_v59 = vld [vmem:[%s17598_s6 + $0x8] sm:$0xff] }
0x130e   : > { %v2382_v4 = vpack.c.bf16 %v2381_v1, %v2380_v63 }
0x1310   : > { %14199 = vmatmul.mubr.msk.bf16.vlgmr.msra.gmra.mxu1 %vm840_vm0, %v2382_v4 }
0x1311   : > { %14203 = vmatpush3.bf16.msra.mxu1 %v14637_v6  ;;  %14206 = vmatprep.mubr.msk.bf16.mxu1 %vm15060_vm1, %v15782_v51 }
0x1312   : > { %14204 = vmatprep.subr.bf16.mxu1 %v15782_v51 }
0x1315   : > { %14205 = vmatpush3.bf16.msra.mxu1 %v14638_v7 }
0x1316   : > { %14218 = vmatprep.subr.bf16.mxu1 %v15782_v51 }
0x13d0   : > { %v15827_v13 = vpop.f32.mrf.mxu1 }
0x13d1   : > { %v2445_v8 = vmul.f32 %v14639_v50, %v15827_v13  ;;  %v2496_v39 = vmul.f32 %v15827_v13, %v15526_v55  ;;  %v15906_v6 = vpack.c.bf16 %v15827_v13, %v15827_v13 }
0x13d2   : > { %v14200_v15 = vpop.f32.mrf.mxu1 }
0x13d4   : > { %v15829_v16 = vpop.f32.mrf.mxu1 }
0x13d5   : > { %v2444_v17 = vpack.c.bf16 %v15829_v16, %v15827_v13  ;;  %v2446_v20 = vmul.f32 %v14641_v34, %v15829_v16  ;;  %v2497_v33 = vmul.f32 %v15829_v16, %v15530_v57  ;;  %v15900_v4 = vpack.c.bf16 %v15829_v16, %v15829_v16 }
0x13d6   : > { %v14201_v5 = vpop.f32.mrf.mxu1 }
0x13d7   : > { %2499 = vrot.lane.b32.xlu1 %v2444_v17, %s15062_s18  ;;  %14207 = vmatmul.mubr.msk.bf16.vlgmr.msra.gmra.mxu1 %vm840_vm0, %v2444_v17 }
0x13d8   : > { %14220 = vmatprep.mubr.msk.bf16.mxu1 %vm15060_vm1, %v15782_v51 }
0x1449   : > { %v2500_v28 = vpop.permute.xlu1 %2499 }
0x144a   : > { %14215 = vmatmul.mubr.msk.bf16.vlgmr.msra.gmra.mxu0 %vm840_vm0, %v2500_v28 }
0x144b   : > { %14226 = vmatprep.mubr.msk.bf16.mxu0 %vm15060_vm1, %v15782_v51 }
0x1497   : > { %v2484_v36 = vpop.f32.mrf.mxu1 }
0x1498   : > { %v2491_v9 = vmul.f32 %v14640_v10, %v2484_v36 }
0x1499   : > { %v14208_v18 = vpop.f32.mrf.mxu1 }
0x149a   : > { %v2493_v21 = vadd.f32 %v2491_v9, %v2445_v8 }
0x149b   : > { %v2487_v11 = vpop.f32.mrf.mxu1 }
0x149c   : > { %v2492_v24 = vmul.f32 %v14642_v23, %v2487_v11  ;;  %v15871_v57 = vpack.c.bf16 %v2493_v21, %v2493_v21 }
0x149d   : > { %v14209_v25 = vpop.f32.mrf.mxu1 }
0x149e   : > { %v2494_v26 = vadd.f32 %v2492_v24, %v2446_v20 }
0x14a0   : > { %v15878_v49 = vpack.c.bf16 %v2494_v26, %v2494_v26 }
0x150a   : > { %v2538_v27 = vpop.f32.mrf.mxu0 }
0x150b   : > { %v2545_v29 = vmul.f32 %v14640_v10, %v2538_v27 }
0x150c   : > { %v14216_v30 = vpop.f32.mrf.mxu0 }
0x150d   : > { %2549 = vrot.lane.b32.xlu0 %v2545_v29, %s15061_s15 }
0x150e   : > { %v2541_v37 = vpop.f32.mrf.mxu0 }
0x150f   : > { %v2546_v47 = vmul.f32 %v14642_v23, %v2541_v37 }
0x1510   : > { %v14217_v38 = vpop.f32.mrf.mxu0 }
0x1511   : > { %2551 = vrot.lane.b32.xlu1 %v2546_v47, %s15061_s15 }
0x157f   : > { %v2550_v40 = vpop.permute.xlu0 %2549 }
0x1580   : > { %v2555_v41 = vadd.f32 %v2550_v40, %v2496_v39 }
0x1582   : > { %v15858_v42 = vpack.c.bf16 %v2555_v41, %v2555_v41 }
0x1583   : > { %v2552_v44 = vpop.permute.xlu1 %2551 }
0x1584   : > { %v2556_v45 = vadd.f32 %v2552_v44, %v2497_v33  ;;  %2574 = vrot.lane.b32.xlu1 %v15858_v42, %s15062_s18 }
0x1586   : > { %v15864_v46 = vpack.c.bf16 %v2556_v45, %v2556_v45 }
0x1588   : > { %2623 = vrot.lane.b32.xlu0 %v15864_v46, %s15062_s18 }
0x15f6   : > { %v2575_v48 = vpop.permute.xlu1 %2574 }
0x15f7   : > { %v2580_v55 = vsel %vm1075_vm2, %v2575_v48, 0 }
0x15f8   : > { %14219 = vmatpush3.bf16.xpose.msra.mxu1 %v2580_v55 }
0x15f9   : > { %14230 = vmatprep.subr.bf16.mxu1 %v15782_v51 }
0x15fa   : > { %v2624_v32 = vpop.permute.xlu0 %2623 }
0x15fb   : > { %v2629_v61 = vsel %vm1075_vm2, %v2624_v32, 0 }
0x15fc   : > { %14225 = vmatpush3.bf16.xpose.msra.mxu0 %v2629_v61 }
0x15fd   : > { %14236 = vmatprep.subr.bf16.mxu0 %v15782_v51 }
0x15ff   : > { %14221 = vmatmul.mubr.msk.bf16.vlgmr.msra.gmra.mxu1 %vm1075_vm2, %v15871_v57 }
0x1600   : > { %14232 = vmatprep.mubr.msk.bf16.mxu1 %vm15060_vm1, %v15782_v51 }
0x1603   : > { %14227 = vmatmul.mubr.msk.bf16.vlgmr.msra.gmra.mxu0 %vm1075_vm2, %v15878_v49 }
0x1604   : > { %14238 = vmatprep.mubr.msk.bf16.mxu0 %vm15060_vm1, %v15782_v51 }
0x16bf   : > { %v2616_v0 = vpop.f32.mrf.mxu1 }
0x16c0   : > { %v2671_v35 = vmul.f32 0.35355338, %v2616_v0 }
0x16c1   : > { %v14222_v14 = vpop.f32.mrf.mxu1 }
0x16c2   : > { %v2673_v53 = vadd.f32 %v15887_v52, %v2671_v35 }
0x16c3   : > { %v2619_v12 = vpop.f32.mrf.mxu1  ;;  %v2665_v54 = vpop.f32.mrf.mxu0 }
0x16c4   : > { %v2672_v2 = vmul.f32 0.35355338, %v2665_v54  ;;  %v2675_v56 = vsel %vm1075_vm2, %v2673_v53, -inf }
0x16c5   : > { %2676 = vmax.xlane.f32.xlu1 %v2675_v56  ;;  %v14223_v58 = vpop.f32.mrf.mxu1  ;;  %v14228_v3 = vpop.f32.mrf.mxu0 }
0x16c6   : > { %v2674_v60 = vadd.f32 %v15894_v59, %v2672_v2 }
0x16c7   : > { %v2668_v62 = vpop.f32.mrf.mxu0 }
0x16c8   : > { %v2678_v63 = vsel %vm1075_vm2, %v2674_v60, -inf }
0x16c9   : > { %2679 = vmax.xlane.f32.xlu0 %v2678_v63  ;;  %v14229_v1 = vpop.f32.mrf.mxu0 }
0x16d6   : > { %2749 = vrot.lane.b32.xlu1 %v15900_v4, %s15063_s9 }
0x16df   : > { %2700 = vrot.lane.b32.xlu0 %v15906_v6, %s15063_s9 }
0x174e   : > { %v2677_v7 = vpop.xlane.xlu1 %2676 }
0x174f   : > { %v2681_v15 = vsub.f32 %v2673_v53, %v2677_v7 }
0x1751   : > { %v2683_v17 = vmul.f32 1.442695, %v2681_v15 }
0x1752   : > { %v2750_v5 = vpop.permute.xlu1 %2749  ;;  %v2680_v28 = vpop.xlane.xlu0 %2679 }
0x1753   : > { %14588 = vpow2.f32 %v2683_v17  ;;  %v2755_v36 = vsel %vm1205_vm3, %v2750_v5, 0  ;;  %v2682_v16 = vsub.f32 %v2674_v60, %v2680_v28 }
0x1754   : > { %14237 = vmatpush3.bf16.msra.mxu0 %v2755_v36 }
0x1755   : > { %v2685_v50 = vmul.f32 1.442695, %v2682_v16  ;;  %14248 = vmatprep.subr.bf16.mxu0 %v15782_v51 }
0x1756   : > { %v2701_v8 = vpop.permute.xlu0 %2700 }
0x1757   : > { %14590 = vpow2.f32 %v2685_v50  ;;  %v2706_v13 = vsel %vm1205_vm3, %v2701_v8, 0 }
0x1758   : > { %14231 = vmatpush3.bf16.msra.mxu1 %v2706_v13 }
0x1759   : > { %14242 = vmatprep.subr.bf16.mxu1 %v15782_v51 }
0x1760   : > { %v14589_v10 = vpop.eup %14588 }
0x1761   : > { %v2687_v9 = vsel %vm1075_vm2, %v14589_v10, 0.0 }
0x1762   : > { %2688 = vadd.xlane.f32.xlu0 %v2687_v9 }
0x1764   : > { %v14591_v18 = vpop.eup %14590 }
0x1765   : > { %v2690_v21 = vsel %vm1075_vm2, %v14591_v18, 0.0 }
0x1766   : > { %2691 = vadd.xlane.f32.xlu1 %v2690_v21 }
0x1777   : > { %2800 = vrot.lane.b32.xlu1 %v15858_v42, %s15064_s25 }
0x1778   : > { %2850 = vrot.lane.b32.xlu0 %v15864_v46, %s15064_s25  ;;  %s17602_s25 = smov 56  }
0x177b   : > { %2798 = vrot.lane.b32.xlu1 %v15871_v57, %s15065_s23 }
0x177c   : > { %2848 = vrot.lane.b32.xlu0 %v15878_v49, %s15065_s23  ;;  %s17603_s23 = smov 80  }
0x17eb   : > { %v2689_v11 = vpop.xlane.xlu0 %2688 }
0x17ec   : > { %14592 = vrcp.f32 %v2689_v11 }
0x17ef   : > { %v2692_v34 = vpop.xlane.xlu1 %2691  ;;  %v2851_v30 = vpop.permute.xlu0 %2850 }
0x17f0   : > { %14594 = vrcp.f32 %v2692_v34  ;;  %v2856_v47 = vsel %vm1075_vm2, %v2851_v30, 0 }
0x17f3   : > { %v2801_v24 = vpop.permute.xlu1 %2800  ;;  %v2849_v39 = vpop.permute.xlu0 %2848 }
0x17f4   : > { %v2806_v27 = vsel %vm1075_vm2, %v2801_v24, 0 }
0x17f7   : > { %v2799_v38 = vpop.permute.xlu1 %2798 }
0x17f9   : > { %v14593_v20 = vpop.eup %14592 }
0x17fa   : > { %v2695_v23 = vmul.f32 %v14593_v20, %v14589_v10 }
0x17fc   : > { %v2697_v25 = vpack.c.bf16 %v2695_v23, %v2695_v23 }
0x17fd   : > { %v14595_v26 = vpop.eup %14594 }
0x17fe   : > { %14233 = vmatmul.mubr.msk.bf16.vlgmr.msra.gmra.mxu1 %vm1075_vm2, %v2697_v25  ;;  %v2696_v29 = vmul.f32 %v14595_v26, %v14591_v18  ;;  %v2559_v26 = vld [vmem:[#allocation7 + $0x10] sm:$0xf] }
0x17ff   : > { %14243 = vmatpush3.bf16.xpose.msra.mxu1 %v2806_v27  ;;  %14244 = vmatprep.mubr.msk.bf16.mxu1 %vm15060_vm1, %v15782_v51  ;;  %v3074_v30 = vsel %vm1205_vm3, %v2559_v26, 0 }
0x1800   : > { %v2698_v37 = vpack.c.bf16 %v2696_v29, %v2696_v29  ;;  %14254 = vmatprep.subr.bf16.mxu1 %v15782_v51 }
0x1802   : > { %14239 = vmatmul.mubr.msk.bf16.vlgmr.msra.gmra.mxu0 %vm1075_vm2, %v2698_v37 }
0x1803   : > { %14249 = vmatpush3.bf16.xpose.msra.mxu0 %v2856_v47  ;;  %14250 = vmatprep.mubr.msk.bf16.mxu0 %vm15060_vm1, %v15782_v51 }
0x1804   : > { %14260 = vmatprep.subr.bf16.mxu0 %v15782_v51 }
0x1806   : > { %14245 = vmatmul.mubr.msk.bf16.vlgmr.msra.gmra.mxu1 %vm1075_vm2, %v2799_v38 }
0x1807   : > { %14256 = vmatprep.mubr.msk.bf16.mxu1 %vm15060_vm1, %v15782_v51 }
0x180a   : > { %14251 = vmatmul.mubr.msk.bf16.vlgmr.msra.gmra.mxu0 %vm1075_vm2, %v2849_v39  ;;  %v2560_v39 = vld [vmem:[#allocation7 + $0x14] sm:$0xf] }
0x180b   : > { %14262 = vmatprep.mubr.msk.bf16.mxu0 %vm15060_vm1, %v15782_v51 }
0x18be   : > { %v15940_v40 = vpop.f32.mrf.mxu1 }
0x18c0   : > { %v14234_v41 = vpop.f32.mrf.mxu1 }
0x18c1   : > { %v3027_v41 = vsel %vm1205_vm3, %v2560_v39, 0 }
0x18c2   : > { %v2745_v33 = vpop.f32.mrf.mxu1  ;;  %v15942_v44 = vpop.f32.mrf.mxu0 }
0x18c3   : > { %v2797_v45 = vpack.c.bf16 %v15942_v44, %v15940_v40 }
0x18c4   : > { %v14235_v48 = vpop.f32.mrf.mxu1  ;;  %v14240_v55 = vpop.f32.mrf.mxu0 }
0x18c6   : > { %v2794_v32 = vpop.f32.mrf.mxu0  ;;  %v2842_v61 = vpop.f32.mrf.mxu1 }
0x18c7   : > { %v2898_v0 = vmul.f32 0.35355338, %v2842_v61 }
0x18c8   : > { %v14241_v35 = vpop.f32.mrf.mxu0  ;;  %v14246_v14 = vpop.f32.mrf.mxu1 }
0x18c9   : > { %v2900_v53 = vadd.f32 %v15887_v52, %v2898_v0 }
0x18ca   : > { %v2845_v12 = vpop.f32.mrf.mxu1  ;;  %v2892_v54 = vpop.f32.mrf.mxu0 }
0x18cb   : > { %v2899_v2 = vmul.f32 0.35355338, %v2892_v54  ;;  %v2902_v56 = vsel %vm1075_vm2, %v2900_v53, -inf }
0x18cc   : > { %2903 = vmax.xlane.f32.xlu1 %v2902_v56  ;;  %v14247_v58 = vpop.f32.mrf.mxu1  ;;  %v14252_v3 = vpop.f32.mrf.mxu0 }
0x18cd   : > { %v2901_v60 = vadd.f32 %v15894_v59, %v2899_v2 }
0x18ce   : > { %v2895_v62 = vpop.f32.mrf.mxu0 }
0x18cf   : > { %v2905_v63 = vsel %vm1075_vm2, %v2901_v60, -inf }
0x18d0   : > { %2906 = vmax.xlane.f32.xlu0 %v2905_v63  ;;  %v14253_v1 = vpop.f32.mrf.mxu0 }
0x1955   : > { %v2904_v7 = vpop.xlane.xlu1 %2903 }
0x1956   : > { %v2908_v15 = vsub.f32 %v2900_v53, %v2904_v7 }
0x1958   : > { %v2910_v17 = vmul.f32 1.442695, %v2908_v15 }
0x1959   : > { %v2907_v5 = vpop.xlane.xlu0 %2906 }
0x195a   : > { %14596 = vpow2.f32 %v2910_v17  ;;  %v2909_v28 = vsub.f32 %v2901_v60, %v2907_v5 }
0x195c   : > { %v2912_v36 = vmul.f32 1.442695, %v2909_v28 }
0x195e   : > { %14598 = vpow2.f32 %v2912_v36 }
0x1967   : > { %v14597_v16 = vpop.eup %14596 }
0x1968   : > { %v2914_v50 = vsel %vm1075_vm2, %v14597_v16, 0.0 }
0x1969   : > { %2915 = vadd.xlane.f32.xlu0 %v2914_v50 }
0x196b   : > { %v14599_v8 = vpop.eup %14598 }
0x196c   : > { %v2917_v13 = vsel %vm1075_vm2, %v14599_v8, 0.0 }
0x196d   : > { %2918 = vadd.xlane.f32.xlu1 %v2917_v13 }
0x197e   : > { %2974 = vrot.lane.b32.xlu1 %v15900_v4, %s17602_s25 }
0x197f   : > { %2926 = vrot.lane.b32.xlu0 %v15906_v6, %s17602_s25 }
0x1982   : > { %3119 = vrot.lane.b32.xlu1 %v15858_v42, %s17603_s23 }
0x1983   : > { %3169 = vrot.lane.b32.xlu0 %v15864_v46, %s17603_s23 }
0x1986   : > { %3117 = vrot.lane.b32.xlu1 %v15871_v57, %s17604_s8 }
0x1987   : > { %3167 = vrot.lane.b32.xlu0 %v15878_v49, %s17604_s8 }
0x19f2   : > { %v2916_v10 = vpop.xlane.xlu0 %2915 }
0x19f3   : > { %14600 = vrcp.f32 %v2916_v10 }
0x19f6   : > { %v2919_v9 = vpop.xlane.xlu1 %2918  ;;  %v2927_v18 = vpop.permute.xlu0 %2926 }
0x19f7   : > { %14602 = vrcp.f32 %v2919_v9  ;;  %v2932_v21 = vsel %vm1205_vm3, %v2927_v18, 0 }
0x19f8   : > { %14255 = vmatpush3.bf16.msra.mxu1 %v2932_v21 }
0x19f9   : > { %14266 = vmatprep.subr.bf16.mxu1 %v15782_v51 }
0x19fa   : > { %v2975_v11 = vpop.permute.xlu1 %2974  ;;  %v3170_v37 = vpop.permute.xlu0 %3169 }
0x19fb   : > { %v2980_v34 = vsel %vm1205_vm3, %v2975_v11, 0  ;;  %v3175_v47 = vsel %vm1075_vm2, %v3170_v37, 0 }
0x19fc   : > { %14261 = vmatpush3.bf16.msra.mxu0 %v2980_v34 }
0x19fd   : > { %14272 = vmatprep.subr.bf16.mxu0 %v15782_v51 }
0x19fe   : > { %v3168_v38 = vpop.permute.xlu0 %3167  ;;  %v3120_v44 = vpop.permute.xlu1 %3119 }
0x19ff   : > { %v3125_v0 = vsel %vm1075_vm2, %v3120_v44, 0 }
0x1a00   : > { %v14601_v20 = vpop.eup %14600 }
0x1a01   : > { %v2922_v23 = vmul.f32 %v14601_v20, %v14597_v16 }
0x1a02   : > { %v3118_v12 = vpop.permute.xlu1 %3117 }
0x1a03   : > { %v2924_v24 = vpack.c.bf16 %v2922_v23, %v2922_v23 }
0x1a04   : > { %v14603_v25 = vpop.eup %14602 }
0x1a05   : > { %14257 = vmatmul.mubr.msk.bf16.vlgmr.msra.gmra.mxu1 %vm1075_vm2, %v2924_v24  ;;  %v2923_v27 = vmul.f32 %v14603_v25, %v14599_v8 }
0x1a06   : > { %14268 = vmatprep.mubr.msk.bf16.mxu1 %vm15060_vm1, %v15782_v51  ;;  %14267 = vmatpush3.bf16.msra.mxu1 %v3027_v41 }
0x1a07   : > { %v2925_v29 = vpack.c.bf16 %v2923_v27, %v2923_v27  ;;  %14278 = vmatprep.subr.bf16.mxu1 %v15782_v51 }
0x1a09   : > { %14263 = vmatmul.mubr.msk.bf16.vlgmr.msra.gmra.mxu0 %vm1075_vm2, %v2925_v29 }
0x1a0a   : > { %14273 = vmatpush3.bf16.msra.mxu0 %v3074_v30  ;;  %14274 = vmatprep.mubr.msk.bf16.mxu0 %vm15060_vm1, %v15782_v51 }
0x1a0b   : > { %14284 = vmatprep.subr.bf16.mxu0 %v15782_v51 }
0x1a11   : > { %14275 = vmatmul.mubr.msk.bf16.vlgmr.msra.gmra.mxu0 %vm1075_vm2, %v2797_v45 }
0x1a12   : > { %14285 = vmatpush3.bf16.xpose.msra.mxu0 %v3175_v47  ;;  %14286 = vmatprep.mubr.msk.bf16.mxu0 %vm15060_vm1, %v15782_v51 }
0x1a13   : > { %14296 = vmatprep.subr.bf16.mxu0 %v15782_v51 }
0x1a19   : > { %14287 = vmatmul.mubr.msk.bf16.vlgmr.msra.gmra.mxu0 %vm1075_vm2, %v3168_v38 }
0x1a1a   : > { %14298 = vmatprep.mubr.msk.bf16.mxu0 %vm15060_vm1, %v15782_v51 }
0x1ac5   : > { %v2968_v40 = vpop.f32.mrf.mxu1 }
0x1ac7   : > { %v14258_v33 = vpop.f32.mrf.mxu1 }
0x1ac9   : > { %v2971_v45 = vpop.f32.mrf.mxu1  ;;  %v3016_v48 = vpop.f32.mrf.mxu0 }
0x1aca   : > { %v3022_v55 = vpack.c.bf16 %v3016_v48, %v2968_v40  ;;  %v2561_v48 = vld [vmem:[#allocation7 + $0x18] sm:$0xf] }
0x1acb   : > { %v14259_v32 = vpop.f32.mrf.mxu1  ;;  %v14264_v61 = vpop.f32.mrf.mxu0 }
0x1acc   : > { %14269 = vmatmul.mubr.msk.bf16.vlgmr.msra.gmra.mxu1 %vm1075_vm2, %v3022_v55  ;;  %v3346_v61 = vsel %vm1205_vm3, %v2561_v48, 0 }
0x1acd   : > { %14279 = vmatpush3.bf16.xpose.msra.mxu1 %v3125_v0  ;;  %v3019_v35 = vpop.f32.mrf.mxu0  ;;  %14280 = vmatprep.mubr.msk.bf16.mxu1 %vm15060_vm1, %v15782_v51 }
0x1ace   : > { %14290 = vmatprep.subr.bf16.mxu1 %v15782_v51 }
0x1acf   : > { %v14265_v14 = vpop.f32.mrf.mxu0 }
0x1ad1   : > { %v15994_v53 = vpop.f32.mrf.mxu0 }
0x1ad3   : > { %v14276_v54 = vpop.f32.mrf.mxu0 }
0x1ad4   : > { %14281 = vmatmul.mubr.msk.bf16.vlgmr.msra.gmra.mxu1 %vm1075_vm2, %v3118_v12 }
0x1ad5   : > { %v15997_v2 = vpop.f32.mrf.mxu0  ;;  %14292 = vmatprep.mubr.msk.bf16.mxu1 %vm15060_vm1, %v15782_v51 }
0x1ad7   : > { %v14277_v56 = vpop.f32.mrf.mxu0 }
0x1ad9   : > { %v3211_v58 = vpop.f32.mrf.mxu0 }
0x1ada   : > { %v3218_v3 = vmul.f32 0.35355338, %v3211_v58 }
0x1adb   : > { %v14288_v60 = vpop.f32.mrf.mxu0 }
0x1adc   : > { %v3220_v62 = vadd.f32 %v15894_v59, %v3218_v3 }
0x1add   : > { %v3214_v63 = vpop.f32.mrf.mxu0 }
0x1ade   : > { %v3224_v1 = vsel %vm1075_vm2, %v3220_v62, -inf }
0x1adf   : > { %3225 = vmax.xlane.f32.xlu0 %v3224_v1  ;;  %v14289_v7 = vpop.f32.mrf.mxu0 }
0x1b68   : > { %v3226_v15 = vpop.xlane.xlu0 %3225 }
0x1b69   : > { %v3228_v17 = vsub.f32 %v3220_v62, %v3226_v15 }
0x1b6b   : > { %v3231_v5 = vmul.f32 1.442695, %v3228_v17 }
0x1b6d   : > { %14604 = vpow2.f32 %v3231_v5 }
0x1b7a   : > { %v14605_v11 = vpop.eup %14604 }
0x1b7b   : > { %v3236_v20 = vsel %vm1075_vm2, %v14605_v11, 0.0 }
0x1b8c   : > { %v16003_v28 = vpop.f32.mrf.mxu1 }
0x1b8e   : > { %v14270_v36 = vpop.f32.mrf.mxu1 }
0x1b90   : > { %v16005_v16 = vpop.f32.mrf.mxu1 }
0x1b92   : > { %v14271_v50 = vpop.f32.mrf.mxu1 }
0x1b94   : > { %v3161_v8 = vpop.f32.mrf.mxu1 }
0x1b95   : > { %v3217_v13 = vmul.f32 0.35355338, %v3161_v8 }
0x1b96   : > { %v14282_v10 = vpop.f32.mrf.mxu1 }
0x1b97   : > { %v3219_v9 = vadd.f32 %v15887_v52, %v3217_v13  ;;  %v3111_v13 = vadd.f32 %v15994_v53, %v16003_v28 }
0x1b98   : > { %v3164_v18 = vpop.f32.mrf.mxu1 }
0x1b99   : > { %v3221_v21 = vsel %vm1075_vm2, %v3219_v9, -inf }
0x1b9a   : > { %3222 = vmax.xlane.f32.xlu1 %v3221_v21  ;;  %v14283_v34 = vpop.f32.mrf.mxu1  ;;  %v3114_v21 = vadd.f32 %v15997_v2, %v16005_v16 }
0x1b9e   : > { %3237 = vadd.xlane.f32.xlu1 %v3236_v20 }
0x1baf   : > { %3293 = vrot.lane.b32.xlu1 %v15900_v4, %s17605_s2 }
0x1bb3   : > { %3393 = vrot.lane.b32.xlu1 %v15858_v42, %s17606_s29 }
0x1bb7   : > { %3391 = vrot.lane.b32.xlu1 %v15871_v57, %s17607_s22 }
0x1c23   : > { %v3223_v23 = vpop.xlane.xlu1 %3222 }
0x1c24   : > { %v3227_v24 = vsub.f32 %v3219_v9, %v3223_v23 }
0x1c26   : > { %v3229_v25 = vmul.f32 1.442695, %v3227_v24 }
0x1c27   : > { %v3238_v26 = vpop.xlane.xlu1 %3237 }
0x1c28   : > { %14606 = vpow2.f32 %v3229_v25 }
0x1c29   : > { %14608 = vrcp.f32 %v3238_v26 }
0x1c2b   : > { %v3294_v27 = vpop.permute.xlu1 %3293 }
0x1c2c   : > { %v3299_v29 = vsel %vm1205_vm3, %v3294_v27, 0 }
0x1c2d   : > { %14297 = vmatpush3.bf16.msra.mxu0 %v3299_v29 }
0x1c2e   : > { %14308 = vmatprep.subr.bf16.mxu0 %v15782_v51 }
0x1c2f   : > { %v3394_v38 = vpop.permute.xlu1 %3393 }
0x1c30   : > { %v3399_v39 = vsel %vm1075_vm2, %v3394_v38, 0 }
0x1c33   : > { %v3392_v41 = vpop.permute.xlu1 %3391 }
0x1c35   : > { %v14607_v30 = vpop.eup %14606 }
0x1c36   : > { %v14609_v37 = vpop.eup %14608  ;;  %v3233_v47 = vsel %vm1075_vm2, %v14607_v30, 0.0 }
0x1c37   : > { %3234 = vadd.xlane.f32.xlu0 %v3233_v47  ;;  %v3242_v42 = vmul.f32 %v14609_v37, %v14605_v11 }
0x1c39   : > { %v3244_v57 = vpack.c.bf16 %v3242_v42, %v3242_v42 }
0x1c3b   : > { %14299 = vmatmul.mubr.msk.bf16.vlgmr.msra.gmra.mxu0 %vm1075_vm2, %v3244_v57 }
0x1c3c   : > { %14309 = vmatpush3.bf16.xpose.msra.mxu0 %v3399_v39  ;;  %14310 = vmatprep.mubr.msk.bf16.mxu0 %vm15060_vm1, %v15782_v51 }
0x1c3d   : > { %14320 = vmatprep.subr.bf16.mxu0 %v15782_v51 }
0x1c43   : > { %14311 = vmatmul.mubr.msk.bf16.vlgmr.msra.gmra.mxu0 %vm1075_vm2, %v3392_v41 }
0x1c44   : > { %14322 = vmatprep.mubr.msk.bf16.mxu0 %vm15060_vm1, %v15782_v51 }
0x1c4d   : > { %3245 = vrot.lane.b32.xlu0 %v15906_v6, %s17605_s2 }
0x1c51   : > { %3443 = vrot.lane.b32.xlu0 %v15864_v46, %s17606_s29 }
0x1c55   : > { %3441 = vrot.lane.b32.xlu0 %v15878_v49, %s17607_s22 }
0x1cc0   : > { %v3235_v40 = vpop.xlane.xlu0 %3234 }
0x1cc1   : > { %14610 = vrcp.f32 %v3235_v40 }
0x1cc4   : > { %v3246_v33 = vpop.permute.xlu0 %3245 }
0x1cc5   : > { %v3251_v44 = vsel %vm1205_vm3, %v3246_v33, 0 }
0x1cc6   : > { %14291 = vmatpush3.bf16.msra.mxu1 %v3251_v44 }
0x1cc7   : > { %14302 = vmatprep.subr.bf16.mxu1 %v15782_v51 }
0x1cc8   : > { %v3444_v62 = vpop.permute.xlu0 %3443 }
0x1cc9   : > { %v3449_v15 = vsel %vm1075_vm2, %v3444_v62, 0 }
0x1ccc   : > { %v3442_v5 = vpop.permute.xlu0 %3441 }
0x1cce   : > { %v14611_v45 = vpop.eup %14610 }
0x1ccf   : > { %v3241_v55 = vmul.f32 %v14611_v45, %v14607_v30 }
0x1cd1   : > { %v3243_v32 = vpack.c.bf16 %v3241_v55, %v3241_v55 }
0x1cd3   : > { %14293 = vmatmul.mubr.msk.bf16.vlgmr.msra.gmra.mxu1 %vm1075_vm2, %v3243_v32 }
0x1cd4   : > { %14303 = vmatpush3.bf16.msra.mxu1 %v3346_v61  ;;  %14304 = vmatprep.mubr.msk.bf16.mxu1 %vm15060_vm1, %v15782_v51 }
0x1cd5   : > { %14314 = vmatprep.subr.bf16.mxu1 %v15782_v51 }
0x1cfb   : > { %v3335_v46 = vpop.f32.mrf.mxu0 }
0x1cfd   : > { %v14300_v49 = vpop.f32.mrf.mxu0 }
0x1cff   : > { %v3338_v0 = vpop.f32.mrf.mxu0 }
0x1d01   : > { %v14301_v35 = vpop.f32.mrf.mxu0 }
0x1d03   : > { %v3435_v14 = vpop.f32.mrf.mxu0 }
0x1d04   : > { %v3491_v12 = vmul.f32 0.35355338, %v3435_v14 }
0x1d05   : > { %v14312_v54 = vpop.f32.mrf.mxu0 }
0x1d06   : > { %v3493_v56 = vadd.f32 %v15887_v52, %v3491_v12 }
0x1d07   : > { %v3438_v58 = vpop.f32.mrf.mxu0 }
0x1d08   : > { %v3495_v3 = vsel %vm1075_vm2, %v3493_v56, -inf }
0x1d09   : > { %3496 = vmax.xlane.f32.xlu1 %v3495_v3  ;;  %v14313_v60 = vpop.f32.mrf.mxu0 }
0x1d92   : > { %v3497_v36 = vpop.xlane.xlu1 %3496 }
0x1d93   : > { %v3287_v63 = vpop.f32.mrf.mxu1  ;;  %v3501_v50 = vsub.f32 %v3493_v56, %v3497_v36 }
0x1d94   : > { %v3341_v1 = vpack.c.bf16 %v3335_v46, %v3287_v63 }
0x1d95   : > { %v14294_v7 = vpop.f32.mrf.mxu1  ;;  %v3503_v8 = vmul.f32 1.442695, %v3501_v50  ;;  %v14529_v50 = vld [vmem:[#allocation9 + $0x10] sm:$0xff]  }
0x1d96   : > { %14305 = vmatmul.mubr.msk.bf16.vlgmr.msra.gmra.mxu1 %vm1075_vm2, %v3341_v1 }
0x1d97   : > { %14315 = vmatpush3.bf16.xpose.msra.mxu1 %v3449_v15  ;;  %v3290_v17 = vpop.f32.mrf.mxu1  ;;  %14316 = vmatprep.mubr.msk.bf16.mxu1 %vm15060_vm1, %v15782_v51  ;;  %14612 = vpow2.f32 %v3503_v8 }
0x1d98   : > { %14326 = vmatprep.subr.bf16.mxu1 %v15782_v51 }
0x1d99   : > { %v14295_v52 = vpop.f32.mrf.mxu1 }
0x1d9e   : > { %14317 = vmatmul.mubr.msk.bf16.vlgmr.msra.gmra.mxu1 %vm1075_vm2, %v3442_v5 }
0x1d9f   : > { %14328 = vmatprep.mubr.msk.bf16.mxu1 %vm15060_vm1, %v15782_v51 }
0x1da4   : > { %v14613_v28 = vpop.eup %14612 }
0x1da5   : > { %v3507_v30 = vsel %vm1075_vm2, %v14613_v28, 0.0 }
0x1e56   : > { %v3382_v10 = vpop.f32.mrf.mxu1 }
0x1e57   : > { %v16052_v9 = vadd.f32 %v3382_v10, %v3111_v13 }
0x1e58   : > { %v14306_v18 = vpop.f32.mrf.mxu1 }
0x1e5a   : > { %v3385_v11 = vpop.f32.mrf.mxu1 }
0x1e5b   : > { %v16056_v34 = vadd.f32 %v3385_v11, %v3114_v21  ;;  %v12756_v21 = vld [vmem:[%s17600_s19 + $0x1] sm:$0x1] }
0x1e5c   : > { %v14307_v20 = vpop.f32.mrf.mxu1  ;;  %v3685_v11 = vunpack.c.l.bf16 %v12756_v21 }
0x1e5e   : > { %v3485_v23 = vpop.f32.mrf.mxu1 }
0x1e5f   : > { %v3492_v24 = vmul.f32 0.35355338, %v3485_v23  ;;  %v3689_v23 = vrot.slane %v3685_v11, %v15480_v22 }
0x1e60   : > { %v14318_v25 = vpop.f32.mrf.mxu1 }
0x1e61   : > { %v3494_v26 = vadd.f32 %v15894_v59, %v3492_v24 }
0x1e62   : > { %v3488_v27 = vpop.f32.mrf.mxu1 }
0x1e63   : > { %v3498_v53 = vsel %vm1075_vm2, %v3494_v26, -inf }
0x1e64   : > { %3499 = vmax.xlane.f32.xlu0 %v3498_v53  ;;  %v14319_v29 = vpop.f32.mrf.mxu1  ;;  %v14645_v53 = vld [vmem:[#allocation3 + $0x8] sm:$0xff] }
0x1e65   : > { %v14531_v29 = vld [vmem:[%s17601_s28 + $0x30] sm:$0xff]  }
0x1e68   : > { %3508 = vadd.xlane.f32.xlu0 %v3507_v30  ;;  %v14532_v30 = vld [vmem:[%s17601_s28 + $0x28] sm:$0xff]  }
0x1e7e   : > { %3519 = vrot.lane.b32.xlu0 %v15906_v6, %s17608_s21  ;;  %v2562_v6 = vld [vmem:[#allocation7 + $0x1c] sm:$0xf] }
0x1e7f   : > { %v3620_v33 = vsel %vm1205_vm3, %v2562_v6, 0 }
0x1eed   : > { %v3500_v2 = vpop.xlane.xlu0 %3499 }
0x1eee   : > { %v3502_v16 = vsub.f32 %v3494_v26, %v3500_v2  ;;  %v14533_v2 = vld [vmem:[%s17601_s28 + $0x20] sm:$0xff]  }
0x1ef0   : > { %v3505_v37 = vmul.f32 1.442695, %v3502_v16 }
0x1ef1   : > { %v3509_v47 = vpop.xlane.xlu0 %3508 }
0x1ef2   : > { %14614 = vpow2.f32 %v3505_v37 }
0x1ef3   : > { %14616 = vrcp.f32 %v3509_v47 }
0x1ef5   : > { %v3520_v42 = vpop.permute.xlu0 %3519 }
0x1ef6   : > { %v3525_v59 = vsel %vm1205_vm3, %v3520_v42, 0 }
0x1ef7   : > { %14321 = vmatpush3.bf16.msra.mxu0 %v3525_v59 }
0x1ef8   : > { %14332 = vmatprep.subr.bf16.mxu0 %v15782_v51 }
0x1eff   : > { %v14615_v38 = vpop.eup %14614 }
0x1f00   : > { %v14617_v57 = vpop.eup %14616  ;;  %v3510_v39 = vsel %vm1075_vm2, %v14615_v38, 0.0 }
0x1f01   : > { %3511 = vadd.xlane.f32.xlu1 %v3510_v39  ;;  %v3515_v41 = vmul.f32 %v14617_v57, %v14613_v28  ;;  %v14530_v28 = vld [vmem:[%s17601_s28 + $0x38] sm:$0xff]  }
0x1f03   : > { %v3517_v40 = vpack.c.bf16 %v3515_v41, %v3515_v41 }
0x1f05   : > { %14323 = vmatmul.mubr.msk.bf16.vlgmr.msra.gmra.mxu0 %vm1075_vm2, %v3517_v40 }
0x1f06   : > { %14334 = vmatprep.mubr.msk.bf16.mxu0 %vm15060_vm1, %v15782_v51  ;;  %14333 = vmatpush3.bf16.msra.mxu0 %v3620_v33 }
0x1f07   : > { %14346 = vmatprep.subr.bf16.mxu0 %v15782_v51 }
0x1f12   : > { %3567 = vrot.lane.b32.xlu1 %v15900_v4, %s17608_s21  ;;  %s17609_s21 = sld [smem:[#allocation42_spill]] }
0x1f8a   : > { %v3512_v44 = vpop.xlane.xlu1 %3511 }
0x1f8b   : > { %14618 = vrcp.f32 %v3512_v44 }
0x1f8e   : > { %v3568_v45 = vpop.permute.xlu1 %3567 }
0x1f8f   : > { %v3573_v48 = vsel %vm1205_vm3, %v3568_v45, 0 }
0x1f90   : > { %14327 = vmatpush3.bf16.msra.mxu1 %v3573_v48 }
0x1f91   : > { %14338 = vmatprep.subr.bf16.mxu1 %v15782_v51 }
0x1f98   : > { %v14619_v55 = vpop.eup %14618 }
0x1f99   : > { %v3516_v32 = vmul.f32 %v14619_v55, %v14615_v38 }
0x1f9b   : > { %v3518_v61 = vpack.c.bf16 %v3516_v32, %v3516_v32 }
0x1f9d   : > { %14329 = vmatmul.mubr.msk.bf16.vlgmr.msra.gmra.mxu1 %vm1075_vm2, %v3518_v61 }
0x1f9e   : > { %14342 = vmatprep.mubr.msk.bf16.mxu1 %vm15060_vm1, %v15782_v51 }
0x1fc5   : > { %v3561_v4 = vpop.f32.mrf.mxu0 }
0x1fc7   : > { %v14324_v46 = vpop.f32.mrf.mxu0 }
0x1fc9   : > { %v3564_v49 = vpop.f32.mrf.mxu0 }
0x1fcb   : > { %v14325_v0 = vpop.f32.mrf.mxu0 }
0x205d   : > { %v3609_v35 = vpop.f32.mrf.mxu1 }
0x205e   : > { %v3615_v14 = vpack.c.bf16 %v3609_v35, %v3561_v4 }
0x205f   : > { %v14330_v12 = vpop.f32.mrf.mxu1 }
0x2060   : > { %14335 = vmatmul.mubr.msk.bf16.vlgmr.msra.gmra.mxu0 %vm1075_vm2, %v3615_v14 }
0x2061   : > { %v3612_v54 = vpop.f32.mrf.mxu1  ;;  %14354 = vmatprep.mubr.msk.bf16.mxu0 %vm15060_vm1, %v15782_v51  ;;  %14347 = vmatpush3.bf16.msra.mxu0 %v14530_v28 }
0x2062   : > { %14348 = vmatprep.subr.bf16.mxu0 %v14645_v53 }
0x2063   : > { %v14331_v56 = vpop.f32.mrf.mxu1 }
0x2065   : > { %14349 = vmatpush3.bf16.msra.mxu0 %v14531_v29 }
0x2066   : > { %14350 = vmatprep.subr.bf16.mxu0 %v14645_v53 }
0x2069   : > { %14351 = vmatpush3.bf16.msra.mxu0 %v14532_v30 }
0x206a   : > { %14352 = vmatprep.subr.bf16.mxu0 %v14645_v53 }
0x206d   : > { %14353 = vmatpush3.bf16.msra.mxu0 %v14533_v2  ;;  %v3947_v2 = vld [vmem:[#allocation15] sm:$0xff] }
0x2120   : > { %v3656_v58 = vpop.f32.mrf.mxu0 }
0x2121   : > { %v3663_v3 = vadd.f32 %v3656_v58, %v16052_v9 }
0x2122   : > { %v14336_v60 = vpop.f32.mrf.mxu0 }
0x2123   : > { %v16083_v62 = vadd.f32 %v3663_v3, %v15803_v43  ;;  %v14528_v43 = vld [vmem:[#allocation9 + $0x18] sm:$0xff]   ;;  %v3964_v60 = vld [vmem:[#allocation15 + $0x88] sm:$0xff] }
0x2124   : > { %v3659_v63 = vpop.f32.mrf.mxu0  ;;  %14339 = vmatpush3.bf16.msra.mxu1 %v14528_v43  ;;  %v3963_v43 = vld [vmem:[#allocation15 + $0x80] sm:$0xff] }
0x2125   : > { %v3664_v1 = vadd.f32 %v3659_v63, %v16056_v34  ;;  %v3669_v7 = vmul.f32 %v16083_v62, %v16083_v62  ;;  %14340 = vmatprep.subr.bf16.mxu1 %v15782_v51  ;;  %v3972_v63 = vld [vmem:[#allocation15 + $0xc8] sm:$0xff] }
0x2126   : > { %v14337_v15 = vpop.f32.mrf.mxu0 }
0x2127   : > { %v16089_v17 = vadd.f32 %v3664_v1, %v15808_v31  ;;  %v3671_v52 = vsel %vm840_vm0, %v3669_v7, 0.0  ;;  %v12797_v1 = vcombine.high %v3964_v60, %v3972_v63  ;;  %v12796_v7 = vcombine.low %v3964_v60, %v3972_v63  ;;  %v14534_v15 = vld [vmem:[#allocation13 + $0x8] sm:$0xff]  }
0x2128   : > { %3672 = vadd.xlane.f32.xlu1 %v3671_v52  ;;  %14341 = vmatpush3.bf16.msra.mxu1 %v14529_v50  ;;  %v3956_v52 = vld [vmem:[#allocation15 + $0x48] sm:$0xff]  ;;  %v3971_v50 = vld [vmem:[#allocation15 + $0xc0] sm:$0xff] }
0x2129   : > { %v3670_v5 = vmul.f32 %v16089_v17, %v16089_v17  ;;  %14358 = vmatprep.subr.bf16.mxu1 %v15782_v51  ;;  %4278 = vmatprep.subr.bf16.mxu0 %v12797_v1 }
0x212b   : > { %v3674_v36 = vsel %vm840_vm0, %v3670_v5, 0.0 }
0x212c   : > { %3675 = vadd.xlane.f32.xlu0 %v3674_v36  ;;  %v14535_v36 = vld [vmem:[#allocation13] sm:$0xff]  }
0x21b1   : > { %v3673_v8 = vpop.xlane.xlu1 %3672 }
0x21b2   : > { %v3677_v31 = vmul.f32 0.03125, %v3673_v8  ;;  %v3966_v8 = vld [vmem:[#allocation15 + $0x98] sm:$0xff] }
0x21b4   : > { %v3679_v13 = vadd.f32 1e-05, %v3677_v31  ;;  %v15073_v31 = vmov 0  }
0x21b5   : > { %v3676_v10 = vpop.xlane.xlu0 %3675 }
0x21b6   : > { %14620 = vrsqrt.f32 %v3679_v13  ;;  %v3678_v9 = vmul.f32 0.03125, %v3676_v10  ;;  %v12794_v13 = vcombine.low %v3963_v43, %v3971_v50  ;;  %v12795_v10 = vcombine.high %v3963_v43, %v3971_v50  ;;  %v3969_v50 = vld [vmem:[#allocation15 + $0xb0] sm:$0xff] }
0x21b8   : > { %v3680_v18 = vadd.f32 1e-05, %v3678_v9  ;;  %v3974_v9 = vld [vmem:[#allocation15 + $0xd8] sm:$0xff] }
0x21b9   : > { %v12801_v21 = vcombine.high %v3966_v8, %v3974_v9 }
0x21ba   : > { %14622 = vrsqrt.f32 %v3680_v18  ;;  %v12800_v18 = vcombine.low %v3966_v8, %v3974_v9  ;;  %v3977_v8 = vld [vmem:[#allocation15 + $0xf0] sm:$0xff] }
0x21bb   : > { %v12807_v9 = vcombine.high %v3969_v50, %v3977_v8 }
0x21c3   : > { %v14621_v34 = vpop.eup %14620 }
0x21c4   : > { %v3683_v20 = vmul.f32 %v14621_v34, %v16083_v62 }
0x21c6   : > { %v3690_v25 = vmul.f32 %v3689_v23, %v3683_v20 }
0x21c7   : > { %v14623_v24 = vpop.eup %14622 }
0x21c8   : > { %v3684_v51 = vmul.f32 %v14623_v24, %v16089_v17 }
0x21ca   : > { %v3691_v26 = vmul.f32 %v3689_v23, %v3684_v51 }
0x21cc   : > { %v3692_v27 = vpack.c.bf16 %v3691_v26, %v3690_v25  ;;  %v3858_v25 = vld [vmem:[#allocation12] sm:$0x1] }
0x21cd   : > { %v3875_v26 = vunpack.c.l.bf16 %v3858_v25 }
0x21ce   : > { %14343 = vmatmul.mubr.msk.bf16.vlgmr.msra.gmra.mxu1 %vm840_vm0, %v3692_v27 }
0x21cf   : > { %14362 = vmatprep.mubr.msk.bf16.mxu1 %vm15060_vm1, %v14645_v53  ;;  %14359 = vmatpush3.bf16.msra.mxu1 %v14534_v15  ;;  %v3959_v15 = vld [vmem:[#allocation15 + $0x60] sm:$0xff] }
0x21d0   : > { %14360 = vmatprep.subr.bf16.mxu1 %v14645_v53  ;;  %v3879_v53 = vrot.slane %v3875_v26, %v15480_v22 }
0x21d3   : > { %14361 = vmatpush3.bf16.msra.mxu1 %v14535_v36 }
0x21d4   : > { %4235 = vmatprep.subr.bf16.mxu1 %v12795_v10 }
0x228e   : > { %v3747_v16 = vpop.f32.mrf.mxu1 }
0x228f   : > { %3770 = vrot.lane.b32.xlu0 %v3747_v16, %s15063_s9  ;;  %v12760_v59 = vmul.f32 -1.442695, %v3747_v16 }
0x2290   : > { %v14344_v37 = vpop.f32.mrf.mxu1 }
0x2291   : > { %14624 = vpow2.f32 %v12760_v59  ;;  %v3950_v37 = vld [vmem:[#allocation15 + $0x18] sm:$0xff] }
0x2292   : > { %v3750_v47 = vpop.f32.mrf.mxu1 }
0x2293   : > { %3772 = vrot.lane.b32.xlu1 %v3750_v47, %s15063_s9  ;;  %v12761_v38 = vmul.f32 -1.442695, %v3750_v47 }
0x2294   : > { %v14345_v42 = vpop.f32.mrf.mxu1 }
0x2295   : > { %14626 = vpow2.f32 %v12761_v38 }
0x229e   : > { %v14625_v57 = vpop.eup %14624 }
0x229f   : > { %v3760_v41 = vadd.f32 1.0, %v14625_v57 }
0x22a1   : > { %14628 = vrcp.f32 %v3760_v41  ;;  %v3965_v41 = vld [vmem:[#allocation15 + $0x90] sm:$0xff] }
0x22a2   : > { %v14627_v39 = vpop.eup %14626 }
0x22a3   : > { %v3761_v40 = vadd.f32 1.0, %v14627_v39 }
0x22a5   : > { %14630 = vrcp.f32 %v3761_v40  ;;  %v3973_v40 = vld [vmem:[#allocation15 + $0xd0] sm:$0xff] }
0x22ae   : > { %v14629_v6 = vpop.eup %14628 }
0x22af   : > { %v3766_v45 = vmul.f32 %v14629_v6, %v3747_v16  ;;  %v3955_v16 = vld [vmem:[#allocation15 + $0x40] sm:$0xff]  ;;  %v3968_v6 = vld [vmem:[#allocation15 + $0xa8] sm:$0xff] }
0x22b0   : > { %v12779_v57 = vcombine.high %v3947_v2, %v3955_v16 }
0x22b2   : > { %v14631_v33 = vpop.eup %14630 }
0x22b3   : > { %v3767_v48 = vmul.f32 %v14631_v33, %v3750_v47  ;;  %v3958_v47 = vld [vmem:[#allocation15 + $0x58] sm:$0xff]  ;;  %v3976_v33 = vld [vmem:[#allocation15 + $0xe8] sm:$0xff] }
0x22b4   : > { %v12785_v39 = vcombine.high %v3950_v37, %v3958_v47 }
0x2301   : > { %v3771_v44 = vpop.permute.xlu0 %3770 }
0x2302   : > { %v3776_v32 = vmul.f32 %v3771_v44, %v3766_v45  ;;  %v12778_v44 = vcombine.low %v3947_v2, %v3955_v16  ;;  %v12784_v45 = vcombine.low %v3950_v37, %v3958_v47  ;;  %v4009_v2 = vsub.s32 6, %v15474_v19 }
0x2303   : > { %v3989_v37 = vsub.s32 1, %v15474_v19 }
0x2305   : > { %v3773_v55 = vpop.permute.xlu1 %3772 }
0x2306   : > { %v3777_v61 = vmul.f32 %v3773_v55, %v3767_v48  ;;  %v12799_v48 = vcombine.high %v3965_v41, %v3973_v40  ;;  %v12805_v55 = vcombine.high %v3968_v6, %v3976_v33 }
0x2308   : > { %v3778_v4 = vpack.c.bf16 %v3777_v61, %v3776_v32  ;;  %v3949_v32 = vld [vmem:[#allocation15 + $0x10] sm:$0xff] }
0x2309   : > { %v3957_v61 = vld [vmem:[#allocation15 + $0x50] sm:$0xff] }
0x230a   : > { %14355 = vmatmul.mubr.msk.bf16.vlgmr.msra.gmra.mxu0 %vm2310_vm4, %v3778_v4  ;;  %v3952_v4 = vld [vmem:[#allocation15 + $0x28] sm:$0xff] }
0x230b   : > { %4279 = vmatpush1.bf16.msra.mxu0 %v12796_v7  ;;  %4298 = vmatprep.mubr.bf16.mxu0 %v15073_v31  ;;  %v3951_v7 = vld [vmem:[#allocation15 + $0x20] sm:$0xff] }
0x230c   : > { %v12787_v36 = vcombine.high %v3951_v7, %v3959_v15 }
0x23ca   : > { %v3849_v46 = vpop.f32.mrf.mxu0 }
0x23cb   : > { %v3856_v49 = vadd.f32 %v3849_v46, %v16083_v62  ;;  %v3948_v62 = vld [vmem:[#allocation15 + $0x8] sm:$0xff] }
0x23cc   : > { %v14356_v0 = vpop.f32.mrf.mxu0  ;;  %v12780_v5 = vcombine.low %v3948_v62, %v3956_v52  ;;  %v3960_v46 = vld [vmem:[#allocation15 + $0x68] sm:$0xff] }
0x23cd   : > { %v3859_v35 = vmul.f32 %v3856_v49, %v3856_v49  ;;  %v12804_v0 = vcombine.low %v3968_v6, %v3976_v33  ;;  %v12788_v60 = vcombine.low %v3952_v4, %v3960_v46 }
0x23ce   : > { %v3852_v14 = vpop.f32.mrf.mxu0 }
0x23cf   : > { %v3857_v12 = vadd.f32 %v3852_v14, %v16089_v17  ;;  %v3861_v54 = vsel %vm840_vm0, %v3859_v35, 0.0  ;;  %v12781_v17 = vcombine.high %v3948_v62, %v3956_v52  ;;  %v12783_v35 = vcombine.high %v3949_v32, %v3957_v61  ;;  %v3954_v62 = vld [vmem:[#allocation15 + $0x38] sm:$0xff] }
0x23d0   : > { %3862 = vadd.xlane.f32.xlu1 %v3861_v54  ;;  %v14357_v56 = vpop.f32.mrf.mxu0  ;;  %v12789_v14 = vcombine.high %v3952_v4, %v3960_v46  ;;  %v3975_v54 = vld [vmem:[#allocation15 + $0xe0] sm:$0xff]  ;;  %v3962_v52 = vld [vmem:[#allocation15 + $0x78] sm:$0xff] }
0x23d1   : > { %v3860_v58 = vmul.f32 %v3857_v12, %v3857_v12  ;;  %4280 = vmatprep.subr.bf16.mxu0 %v12781_v17  ;;  %v3970_v56 = vld [vmem:[#allocation15 + $0xb8] sm:$0xff]  ;;  %v12793_v43 = vcombine.high %v3954_v62, %v3962_v52  ;;  %v12792_v10 = vcombine.low %v3954_v62, %v3962_v52 }
0x23d2   : > { %4281 = vmatpush1.bf16.msra.mxu0 %v12780_v5 }
0x23d3   : > { %v3864_v3 = vsel %vm840_vm0, %v3860_v58, 0.0  ;;  %4364 = vmatprep.subr.bf16.mxu0 %v12801_v21  ;;  %v3978_v58 = vld [vmem:[#allocation15 + $0xf8] sm:$0xff]  ;;  %v3961_v21 = vld [vmem:[#allocation15 + $0x70] sm:$0xff] }
0x23d4   : > { %3865 = vadd.xlane.f32.xlu0 %v3864_v3  ;;  %v12782_v3 = vcombine.low %v3949_v32, %v3957_v61  ;;  %v12809_v1 = vcombine.high %v3970_v56, %v3978_v58  ;;  %v12808_v5 = vcombine.low %v3970_v56, %v3978_v58 }
0x2459   : > { %v3863_v11 = vpop.xlane.xlu1 %3862 }
0x245a   : > { %v3867_v34 = vmul.f32 0.03125, %v3863_v11  ;;  %v12806_v11 = vcombine.low %v3969_v50, %v3977_v8 }
0x245c   : > { %v3869_v20 = vadd.f32 1e-05, %v3867_v34 }
0x245d   : > { %v3866_v23 = vpop.xlane.xlu0 %3865 }
0x245e   : > { %14632 = vrsqrt.f32 %v3869_v20  ;;  %v3868_v24 = vmul.f32 0.03125, %v3866_v23  ;;  %v3993_v23 = vsub.s32 2, %v15474_v19 }
0x2460   : > { %v3870_v51 = vadd.f32 1e-05, %v3868_v24  ;;  %v3979_v24 = vld [vmem:[#allocation16] sm:$0xff] }
0x2461   : > { %v3994_v25 = vrot.slane %v3979_v24, %v3993_v23 }
0x2462   : > { %14634 = vrsqrt.f32 %v3870_v51  ;;  %v3997_v51 = vsub.s32 3, %v15474_v19 }
0x2464   : > { %v3998_v26 = vrot.slane %v3979_v24, %v3997_v51 }
0x246b   : > { %v14633_v27 = vpop.eup %14632 }
0x246c   : > { %v3873_v28 = vmul.f32 %v14633_v27, %v3856_v49  ;;  %v12798_v49 = vcombine.low %v3965_v41, %v3973_v40 }
0x246e   : > { %v3880_v42 = vmul.f32 %v3879_v53, %v3873_v28 }
0x246f   : > { %v14635_v29 = vpop.eup %14634 }
0x2470   : > { %v3874_v30 = vmul.f32 %v14635_v29, %v3857_v12  ;;  %v3967_v12 = vld [vmem:[#allocation15 + $0xa0] sm:$0xff] }
0x2471   : > { %v12803_v63 = vcombine.high %v3967_v12, %v3975_v54  ;;  %v12802_v17 = vcombine.low %v3967_v12, %v3975_v54 }
0x2472   : > { %v3881_v59 = vmul.f32 %v3879_v53, %v3874_v30 }
0x2474   : > { %v16126_v38 = vpack.c.bf16 %v3881_v59, %v3880_v42  ;;  %v3986_v59 = vrot.slane %v3979_v24, %v15480_v22 }
0x2476   : > { %14363 = vmatmul.mubr.msk.bf16.vlgmr.msra.gmra.mxu1 %vm840_vm0, %v16126_v38  ;;  %12811 = vmatmul.mubr.msk.bf16.vlgmr.msra.gmra.mxu0 %vm840_vm0, %v16126_v38 }
0x2477   : > { %4236 = vmatpush1.bf16.msra.mxu1 %v12794_v13  ;;  %4365 = vmatpush1.bf16.msra.mxu0 %v12800_v18  ;;  %v12786_v13 = vcombine.low %v3951_v7, %v3959_v15  ;;  %v3953_v18 = vld [vmem:[#allocation15 + $0x30] sm:$0xff] }
0x2478   : > { %4237 = vmatprep.subr.bf16.mxu1 %v12779_v57  ;;  %4366 = vmatprep.subr.bf16.mxu0 %v12785_v39  ;;  %v12791_v34 = vcombine.high %v3953_v18, %v3961_v21  ;;  %v12790_v20 = vcombine.low %v3953_v18, %v3961_v21 }
0x2479   : > { %4255 = vmatprep.mubr.bf16.mxu1 %v15073_v31  ;;  %4384 = vmatprep.mubr.bf16.mxu0 %v15073_v31 }
0x247b   : > { %4238 = vmatpush1.bf16.msra.mxu1 %v12778_v44  ;;  %4367 = vmatpush1.bf16.msra.mxu0 %v12784_v45  ;;  %v4010_v44 = vrot.slane %v3979_v24, %v4009_v2 }
0x247c   : > { %4321 = vmatprep.subr.bf16.mxu1 %v12799_v48  ;;  %4450 = vmatprep.subr.bf16.mxu0 %v12805_v55  ;;  %v3990_v55 = vrot.slane %v3979_v24, %v3989_v37 }
0x247e   : > { %12810 = vmatmul.mubr.msk.bf16.vlgmr.msra.gmra.mxu1 %vm840_vm0, %v16126_v38  ;;  %12813 = vmatmul.mubr.msk.bf16.vlgmr.msra.gmra.mxu0 %vm840_vm0, %v16126_v38 }
0x247f   : > { %4322 = vmatpush1.bf16.msra.mxu1 %v12798_v49  ;;  %4451 = vmatpush1.bf16.msra.mxu0 %v12804_v0 }
0x2480   : > { %4323 = vmatprep.subr.bf16.mxu1 %v12783_v35  ;;  %4452 = vmatprep.subr.bf16.mxu0 %v12789_v14  ;;  %v4001_v35 = vsub.s32 4, %v15474_v19 }
0x2481   : > { %4341 = vmatprep.mubr.bf16.mxu1 %v15073_v31  ;;  %4470 = vmatprep.mubr.bf16.mxu0 %v15073_v31 }
0x2483   : > { %4324 = vmatpush1.bf16.msra.mxu1 %v12782_v3  ;;  %4453 = vmatpush1.bf16.msra.mxu0 %v12788_v60  ;;  %v16174_v3 = vld [vmem:[#allocation16 + $0x8] sm:$0xff]  ;;  %v4005_v60 = vsub.s32 5, %v15474_v19 }
0x2484   : > { %4407 = vmatprep.subr.bf16.mxu1 %v12803_v63  ;;  %4536 = vmatprep.subr.bf16.mxu0 %v12809_v1 }
0x2485   : > { %v4006_v18 = vrot.slane %v3979_v24, %v4005_v60 }
0x2486   : > { %12812 = vmatmul.mubr.msk.bf16.vlgmr.msra.gmra.mxu1 %vm840_vm0, %v16126_v38  ;;  %12815 = vmatmul.mubr.msk.bf16.vlgmr.msra.gmra.mxu0 %vm840_vm0, %v16126_v38 }
0x2487   : > { %4408 = vmatpush1.bf16.msra.mxu1 %v12802_v17  ;;  %4537 = vmatpush1.bf16.msra.mxu0 %v12808_v5  ;;  %v4002_v17 = vrot.slane %v3979_v24, %v4001_v35 }
0x2488   : > { %4409 = vmatprep.subr.bf16.mxu1 %v12787_v36  ;;  %4538 = vmatprep.subr.bf16.mxu0 %v12793_v43 }
0x2489   : > { %4427 = vmatprep.mubr.bf16.mxu1 %v15073_v31  ;;  %4556 = vmatprep.mubr.bf16.mxu0 %v15073_v31 }
0x248b   : > { %4410 = vmatpush1.bf16.msra.mxu1 %v12786_v13  ;;  %4539 = vmatpush1.bf16.msra.mxu0 %v12792_v10  ;;  %v4026_v13 = vrot.slane %v16174_v3, %v3993_v23 }
0x248c   : > { %4493 = vmatprep.subr.bf16.mxu1 %v12807_v9 }
0x248e   : > { %12814 = vmatmul.mubr.msk.bf16.vlgmr.msra.gmra.mxu1 %vm840_vm0, %v16126_v38  ;;  %12817 = vmatmul.mubr.msk.bf16.vlgmr.msra.gmra.mxu0 %vm840_vm0, %v16126_v38 }
0x248f   : > { %4494 = vmatpush1.bf16.msra.mxu1 %v12806_v11  ;;  %4513 = vmatprep.mubr.bf16.mxu1 %v15073_v31 }
0x2490   : > { %4495 = vmatprep.subr.bf16.mxu1 %v12791_v34 }
0x2493   : > { %4496 = vmatpush1.bf16.msra.mxu1 %v12790_v20 }
0x2496   : > { %12816 = vmatmul.mubr.msk.bf16.vlgmr.msra.gmra.mxu1 %vm840_vm0, %v16126_v38  ;;  %v4013_v38 = vsub.s32 7, %v15474_v19 }
0x2498   : > { %v4014_v4 = vrot.slane %v3979_v24, %v4013_v38 }
0x2536   : > { %v3936_v27 = vpop.f32.mrf.mxu1  ;;  %v4300_v53 = vpop.f32.mrf.mxu0 }
0x2537   : > { %v3943_v28 = vmul.f32 1.4285715, %v3936_v27  ;;  %v4301_v29 = vadd.f32 %v4300_v53, %v3994_v25 }
0x2538   : > { %v14364_v30 = vpop.f32.mrf.mxu1  ;;  %v4302_v31 = vpop.f32.mrf.mxu0 }
0x2539   : > { %3945 = vst [vmem:[%s17609_s21] sm:$0xff] %v3943_v28  ;;  %v4303_v16 = vadd.f32 %v4302_v31, %v3998_v26  ;;  %v4569_v57 = vmax.f32 %v4301_v29, 0.0 }
0x253a   : > { %v3939_v47 = vpop.f32.mrf.mxu1  ;;  %v4304_v42 = vpop.f32.mrf.mxu0 }
0x253b   : > { %v4570_v39 = vmax.f32 %v4303_v16, 0.0  ;;  %v3944_v41 = vmul.f32 1.4285715, %v3939_v47  ;;  %v4305_v40 = vadd.f32 %v4304_v42, %v3994_v25  ;;  %v4030_v25 = vrot.slane %v16174_v3, %v3997_v51 }
0x253c   : > { %v14365_v6 = vpop.f32.mrf.mxu1  ;;  %v4306_v33 = vpop.f32.mrf.mxu0 }
0x253d   : > { %v13894_v45 = vpack.c.bf16 %v4570_v39, %v4569_v57  ;;  %3946 = vst [vmem:[%s17609_s21 + $0x8] sm:$0xff] %v3944_v41  ;;  %v4307_v48 = vadd.f32 %v4306_v33, %v3998_v26  ;;  %v4585_v46 = vmax.f32 %v4305_v40, 0.0  ;;  %v4018_v40 = vrot.slane %v16174_v3, %v15480_v22 }
0x253e   : > { %v4257_v32 = vpop.f32.mrf.mxu1  ;;  %v4386_v61 = vpop.f32.mrf.mxu0 }
0x253f   : > { %4696 = vst [vmem:[#allocation2] sm:$0xff] %v13894_v45  ;;  %v4586_v49 = vmax.f32 %v4307_v48, 0.0  ;;  %v4258_v0 = vadd.f32 %v4257_v32, %v3986_v59  ;;  %v4387_v14 = vadd.f32 %v4386_v61, %v4010_v44 }
0x2540   : > { %v4259_v12 = vpop.f32.mrf.mxu1  ;;  %v4388_v54 = vpop.f32.mrf.mxu0 }
0x2541   : > { %v13902_v56 = vpack.c.bf16 %v4586_v49, %v4585_v46  ;;  %v4260_v58 = vadd.f32 %v4259_v12, %v3990_v55  ;;  %v4389_v63 = vadd.f32 %v4388_v54, %v4014_v4  ;;  %v4567_v15 = vmax.f32 %v4258_v0, 0.0 }
0x2542   : > { %v4261_v1 = vpop.f32.mrf.mxu1  ;;  %v4390_v7 = vpop.f32.mrf.mxu0  ;;  %v4573_v5 = vmax.f32 %v4387_v14, 0.0  ;;  %v4046_v14 = vrot.slane %v16174_v3, %v4013_v38 }
0x2543   : > { %4704 = vst [vmem:[#allocation2 + $0x20] sm:$0xff] %v13902_v56  ;;  %v4568_v62 = vmax.f32 %v4260_v58, 0.0  ;;  %v4262_v52 = vadd.f32 %v4261_v1, %v3986_v59  ;;  %v4574_v36 = vmax.f32 %v4389_v63, 0.0  ;;  %v4391_v43 = vadd.f32 %v4390_v7, %v4010_v44 }
0x2544   : > { %v4263_v50 = vpop.f32.mrf.mxu1  ;;  %v4392_v8 = vpop.f32.mrf.mxu0 }
0x2545   : > { %v13893_v10 = vpack.c.bf16 %v4568_v62, %v4567_v15  ;;  %v4264_v9 = vadd.f32 %v4263_v50, %v3990_v55  ;;  %v13896_v21 = vpack.c.bf16 %v4574_v36, %v4573_v5  ;;  %v4393_v11 = vadd.f32 %v4392_v8, %v4014_v4 }
0x2546   : > { %v4343_v34 = vpop.f32.mrf.mxu1  ;;  %v4472_v20 = vpop.f32.mrf.mxu0  ;;  %v4583_v26 = vmax.f32 %v4262_v52, 0.0  ;;  %v4589_v28 = vmax.f32 %v4391_v43, 0.0  ;;  %v4042_v55 = vrot.slane %v16174_v3, %v4009_v2  ;;  %v4022_v4 = vrot.slane %v16174_v3, %v3989_v37 }
0x2547   : > { %4695 = vst [vmem:[#allocation2 + $0x30] sm:$0xff] %v13893_v10  ;;  %v4584_v27 = vmax.f32 %v4264_v9, 0.0  ;;  %v4344_v53 = vadd.f32 %v4343_v34, %v4002_v17  ;;  %4698 = vst [vmem:[#allocation2 + $0x18] sm:$0xff] %v13896_v21  ;;  %v4590_v23 = vmax.f32 %v4393_v11, 0.0  ;;  %v4473_v29 = vadd.f32 %v4472_v20, %v4026_v13 }
0x2548   : > { %v4345_v30 = vpop.f32.mrf.mxu1  ;;  %v4474_v31 = vpop.f32.mrf.mxu0  ;;  %v4034_v50 = vrot.slane %v16174_v3, %v4001_v35  ;;  %v4038_v34 = vrot.slane %v16174_v3, %v4005_v60 }
0x2549   : > { %v13901_v16 = vpack.c.bf16 %v4584_v27, %v4583_v26  ;;  %v4346_v24 = vadd.f32 %v4345_v30, %v4006_v18  ;;  %v13904_v47 = vpack.c.bf16 %v4590_v23, %v4589_v28  ;;  %v4475_v42 = vadd.f32 %v4474_v31, %v4030_v25 }
0x254a   : > { %v4347_v59 = vpop.f32.mrf.mxu1  ;;  %v4476_v57 = vpop.f32.mrf.mxu0  ;;  %v4571_v39 = vmax.f32 %v4344_v53, 0.0  ;;  %v4577_v6 = vmax.f32 %v4473_v29, 0.0 }
0x254b   : > { %4703 = vst [vmem:[#allocation2 + $0x40] sm:$0xff] %v13901_v16  ;;  %v4572_v41 = vmax.f32 %v4346_v24, 0.0  ;;  %v4348_v51 = vadd.f32 %v4347_v59, %v4002_v17  ;;  %4706 = vst [vmem:[#allocation2 + $0x38] sm:$0xff] %v13904_v47  ;;  %v4578_v33 = vmax.f32 %v4475_v42, 0.0  ;;  %v4477_v44 = vadd.f32 %v4476_v57, %v4026_v13 }
0x254c   : > { %v4349_v45 = vpop.f32.mrf.mxu1  ;;  %v4478_v48 = vpop.f32.mrf.mxu0 }
0x254d   : > { %v13895_v32 = vpack.c.bf16 %v4572_v41, %v4571_v39  ;;  %v4350_v61 = vadd.f32 %v4349_v45, %v4006_v18  ;;  %v13898_v46 = vpack.c.bf16 %v4578_v33, %v4577_v6  ;;  %v4479_v49 = vadd.f32 %v4478_v48, %v4030_v25 }
0x254e   : > { %v4429_v0 = vpop.f32.mrf.mxu1  ;;  %v4558_v22 = vpop.f32.mrf.mxu0  ;;  %v4587_v12 = vmax.f32 %v4348_v51, 0.0  ;;  %v4593_v2 = vmax.f32 %v4477_v44, 0.0 }
0x254f   : > { %4697 = vst [vmem:[#allocation2 + $0x58] sm:$0xff] %v13895_v32  ;;  %v4588_v54 = vmax.f32 %v4350_v61, 0.0  ;;  %v4430_v56 = vadd.f32 %v4429_v0, %v4018_v40  ;;  %4700 = vst [vmem:[#allocation2 + $0x68] sm:$0xff] %v13898_v46  ;;  %v4594_v58 = vmax.f32 %v4479_v49, 0.0  ;;  %v4559_v63 = vadd.f32 %v4558_v22, %v4042_v55 }
0x2550   : > { %v4431_v1 = vpop.f32.mrf.mxu1  ;;  %v4560_v7 = vpop.f32.mrf.mxu0 }
0x2551   : > { %v13903_v15 = vpack.c.bf16 %v4588_v54, %v4587_v12  ;;  %v4432_v37 = vadd.f32 %v4431_v1, %v4022_v4  ;;  %v13906_v62 = vpack.c.bf16 %v4594_v58, %v4593_v2  ;;  %v4561_v52 = vadd.f32 %v4560_v7, %v4046_v14 }
0x2552   : > { %v4433_v17 = vpop.f32.mrf.mxu1  ;;  %v4562_v5 = vpop.f32.mrf.mxu0  ;;  %v4575_v36 = vmax.f32 %v4430_v56, 0.0  ;;  %v4581_v8 = vmax.f32 %v4559_v63, 0.0 }
0x2553   : > { %4705 = vst [vmem:[#allocation2 + $0x10] sm:$0xff] %v13903_v15  ;;  %v4576_v43 = vmax.f32 %v4432_v37, 0.0  ;;  %v4434_v38 = vadd.f32 %v4433_v17, %v4018_v40  ;;  %4708 = vst [vmem:[#allocation2 + $0x70] sm:$0xff] %v13906_v62  ;;  %v4582_v13 = vmax.f32 %v4561_v52, 0.0  ;;  %v4563_v10 = vadd.f32 %v4562_v5, %v4042_v55 }
0x2554   : > { %v4435_v9 = vpop.f32.mrf.mxu1  ;;  %v4564_v18 = vpop.f32.mrf.mxu0 }
0x2555   : > { %v13897_v21 = vpack.c.bf16 %v4576_v43, %v4575_v36  ;;  %v4436_v11 = vadd.f32 %v4435_v9, %v4022_v4  ;;  %v13900_v20 = vpack.c.bf16 %v4582_v13, %v4581_v8  ;;  %v4565_v25 = vadd.f32 %v4564_v18, %v4046_v14 }
0x2556   : > { %v4515_v26 = vpop.f32.mrf.mxu1  ;;  %v4591_v27 = vmax.f32 %v4434_v38, 0.0  ;;  %v4597_v35 = vmax.f32 %v4563_v10, 0.0 }
0x2557   : > { %4699 = vst [vmem:[#allocation2 + $0x50] sm:$0xff] %v13897_v21  ;;  %v4592_v53 = vmax.f32 %v4436_v11, 0.0  ;;  %v4516_v28 = vadd.f32 %v4515_v26, %v4034_v50  ;;  %4702 = vst [vmem:[#allocation2 + $0x48] sm:$0xff] %v13900_v20  ;;  %v4598_v23 = vmax.f32 %v4565_v25, 0.0 }
0x2558   : > { %v4517_v29 = vpop.f32.mrf.mxu1 }
0x2559   : > { %v13905_v30 = vpack.c.bf16 %v4592_v53, %v4591_v27  ;;  %v4518_v31 = vadd.f32 %v4517_v29, %v4038_v34  ;;  %v13908_v16 = vpack.c.bf16 %v4598_v23, %v4597_v35  ;;  %v4579_v47 = vmax.f32 %v4516_v28, 0.0 }
0x255a   : > { %v4519_v24 = vpop.f32.mrf.mxu1 }
0x255b   : > { %4707 = vst [vmem:[#allocation2 + $0x60] sm:$0xff] %v13905_v30  ;;  %v4580_v19 = vmax.f32 %v4518_v31, 0.0  ;;  %v4520_v42 = vadd.f32 %v4519_v24, %v4034_v50  ;;  %4710 = vst [vmem:[#allocation2 + $0x28] sm:$0xff] %v13908_v16 }
0x255c   : > { %v4521_v3 = vpop.f32.mrf.mxu1 }
0x255d   : > { %v13899_v60 = vpack.c.bf16 %v4580_v19, %v4579_v47  ;;  %v4522_v59 = vadd.f32 %v4521_v3, %v4038_v34  ;;  %v4595_v57 = vmax.f32 %v4520_v42, 0.0 }
0x255f   : > { %4701 = vst [vmem:[#allocation2 + $0x8] sm:$0xff] %v13899_v60  ;;  %v4596_v39 = vmax.f32 %v4522_v59, 0.0 }
0x2561   : > { %v13907_v41 = vpack.c.bf16 %v4596_v39, %v4595_v57 }
0x2563   : > { %4709 = vst [vmem:[#allocation2 + $0x78] sm:$0xff] %v13907_v41 }
0x2564 PF: > { %v4785_v51 = vld [vmem:[%s15435_s10 + $0x1c0] sm:$0xff]  ;;  %p13874_p4 = scmp.ne.s32.totalorder %s15203_s26, 1 }
0x2565   : > { %v4789_v40 = vld [vmem:[%s15435_s10 + $0x1e0] sm:$0xff] }
0x2566   : > { %v4913_v6 = vld [vmem:[%s15435_s10 + $0x5c0] sm:$0xff]  ;;  %v12907_v33 = vcombine.high %v4785_v51, %v4789_v40  ;;  %v12906_v45 = vcombine.low %v4785_v51, %v4789_v40 }
0x2567   : > { %v4917_v44 = vld [vmem:[%s15435_s10 + $0x5e0] sm:$0xff] }
0x2568   : > { %v4777_v48 = vld [vmem:[%s15435_s10 + $0x180] sm:$0xff]  ;;  %v13035_v32 = vcombine.high %v4913_v6, %v4917_v44  ;;  %v13034_v61 = vcombine.low %v4913_v6, %v4917_v44  ;;  %10995 = vmatprep.subr.bf16.mxu0 %v12907_v33 }
0x2569   : > { %v4781_v55 = vld [vmem:[%s15435_s10 + $0x1a0] sm:$0xff]  ;;  %10996 = vmatpush1.bf16.msra.mxu0 %v12906_v45 }
0x256a   : > { %v12899_v4 = vcombine.high %v4777_v48, %v4781_v55  ;;  %v4905_v46 = vld [vmem:[%s15435_s10 + $0x580] sm:$0xff]  ;;  %11038 = vmatprep.subr.bf16.mxu1 %v13035_v32  ;;  %v12898_v56 = vcombine.low %v4777_v48, %v4781_v55 }
0x256b   : > { %v4909_v49 = vld [vmem:[%s15435_s10 + $0x5a0] sm:$0xff]  ;;  %11039 = vmatpush1.bf16.msra.mxu1 %v13034_v61 }
0x256c   : > { %v4769_v0 = vld [vmem:[%s15435_s10 + $0x140] sm:$0xff]  ;;  %v13027_v22 = vcombine.high %v4905_v46, %v4909_v49  ;;  %10997 = vmatprep.subr.bf16.mxu0 %v12899_v4  ;;  %v13026_v2 = vcombine.low %v4905_v46, %v4909_v49 }
0x256d   : > { %v4773_v14 = vld [vmem:[%s15435_s10 + $0x160] sm:$0xff]  ;;  %10998 = vmatpush1.bf16.msra.mxu0 %v12898_v56 }
0x256e   : > { %v4897_v12 = vld [vmem:[%s15435_s10 + $0x540] sm:$0xff]  ;;  %v12891_v58 = vcombine.high %v4769_v0, %v4773_v14  ;;  %11040 = vmatprep.subr.bf16.mxu1 %v13027_v22  ;;  %v12890_v62 = vcombine.low %v4769_v0, %v4773_v14 }
0x256f   : > { %v4901_v54 = vld [vmem:[%s15435_s10 + $0x560] sm:$0xff]  ;;  %11041 = vmatpush1.bf16.msra.mxu1 %v13026_v2 }
0x2570   : > { %v13019_v63 = vcombine.high %v4897_v12, %v4901_v54  ;;  %v4761_v1 = vld [vmem:[%s15435_s10 + $0x100] sm:$0xff]  ;;  %10999 = vmatprep.subr.bf16.mxu0 %v12891_v58  ;;  %v13018_v52 = vcombine.low %v4897_v12, %v4901_v54 }
0x2571   : > { %v4765_v7 = vld [vmem:[%s15435_s10 + $0x120] sm:$0xff]  ;;  %11000 = vmatpush1.bf16.msra.mxu0 %v12890_v62 }
0x2572   : > { %v4889_v15 = vld [vmem:[%s15435_s10 + $0x500] sm:$0xff]  ;;  %v12883_v17 = vcombine.high %v4761_v1, %v4765_v7  ;;  %11042 = vmatprep.subr.bf16.mxu1 %v13019_v63  ;;  %v12882_v8 = vcombine.low %v4761_v1, %v4765_v7 }
0x2573   : > { %v4893_v37 = vld [vmem:[%s15435_s10 + $0x520] sm:$0xff]  ;;  %11043 = vmatpush1.bf16.msra.mxu1 %v13018_v52 }
0x2574   : > { %v13011_v5 = vcombine.high %v4889_v15, %v4893_v37  ;;  %v4753_v36 = vld [vmem:[%s15435_s10 + $0xc0] sm:$0xff]  ;;  %11001 = vmatprep.subr.bf16.mxu0 %v12883_v17  ;;  %v13010_v13 = vcombine.low %v4889_v15, %v4893_v37 }
0x2575   : > { %v4757_v43 = vld [vmem:[%s15435_s10 + $0xe0] sm:$0xff]  ;;  %11002 = vmatpush1.bf16.msra.mxu0 %v12882_v8 }
0x2576   : > { %v4881_v38 = vld [vmem:[%s15435_s10 + $0x4c0] sm:$0xff]  ;;  %v12875_v10 = vcombine.high %v4753_v36, %v4757_v43  ;;  %11044 = vmatprep.subr.bf16.mxu1 %v13011_v5  ;;  %v12874_v20 = vcombine.low %v4753_v36, %v4757_v43 }
0x2577   : > { %v4885_v50 = vld [vmem:[%s15435_s10 + $0x4e0] sm:$0xff]  ;;  %11045 = vmatpush1.bf16.msra.mxu1 %v13010_v13 }
0x2578   : > { %v13003_v9 = vcombine.high %v4881_v38, %v4885_v50  ;;  %v4745_v18 = vld [vmem:[%s15435_s10 + $0x80] sm:$0xff]  ;;  %11003 = vmatprep.subr.bf16.mxu0 %v12875_v10  ;;  %v13002_v25 = vcombine.low %v4881_v38, %v4885_v50 }
0x2579   : > { %v4749_v21 = vld [vmem:[%s15435_s10 + $0xa0] sm:$0xff]  ;;  %11004 = vmatpush1.bf16.msra.mxu0 %v12874_v20 }
0x257a   : > { %v4873_v11 = vld [vmem:[%s15435_s10 + $0x480] sm:$0xff]  ;;  %v12867_v26 = vcombine.high %v4745_v18, %v4749_v21  ;;  %11046 = vmatprep.subr.bf16.mxu1 %v13003_v9  ;;  %v12866_v29 = vcombine.low %v4745_v18, %v4749_v21 }
0x257b   : > { %v4877_v34 = vld [vmem:[%s15435_s10 + $0x4a0] sm:$0xff]  ;;  %11047 = vmatpush1.bf16.msra.mxu1 %v13002_v25 }
0x257c   : > { %v12995_v27 = vcombine.high %v4873_v11, %v4877_v34  ;;  %v4737_v53 = vld [vmem:[%s15435_s10 + $0x40] sm:$0xff]  ;;  %11005 = vmatprep.subr.bf16.mxu0 %v12867_v26  ;;  %v12994_v31 = vcombine.low %v4873_v11, %v4877_v34 }
0x257d   : > { %v4741_v28 = vld [vmem:[%s15435_s10 + $0x60] sm:$0xff]  ;;  %11006 = vmatpush1.bf16.msra.mxu0 %v12866_v29 }
0x257e   : > { %v4865_v35 = vld [vmem:[%s15435_s10 + $0x440] sm:$0xff]  ;;  %v12859_v16 = vcombine.high %v4737_v53, %v4741_v28  ;;  %11048 = vmatprep.subr.bf16.mxu1 %v12995_v27  ;;  %v12858_v39 = vcombine.low %v4737_v53, %v4741_v28 }
0x257f   : > { %v4869_v23 = vld [vmem:[%s15435_s10 + $0x460] sm:$0xff]  ;;  %11049 = vmatpush1.bf16.msra.mxu1 %v12994_v31 }
0x2580   : > { %v4729_v30 = vld [vmem:[%s15435_s10] sm:$0xff]  ;;  %v12987_v47 = vcombine.high %v4865_v35, %v4869_v23  ;;  %11007 = vmatprep.subr.bf16.mxu0 %v12859_v16  ;;  %v12986_v41 = vcombine.low %v4865_v35, %v4869_v23 }
0x2581   : > { %v4733_v24 = vld [vmem:[%s15435_s10 + $0x20] sm:$0xff]  ;;  %11008 = vmatpush1.bf16.msra.mxu0 %v12858_v39 }
0x2582   : > { %v14646_v19 = vld [vmem:[#allocation2 + $0x34] ss:$16 sps:$4 sm:$0xff]   ;;  %v12851_v51 = vcombine.high %v4729_v30, %v4733_v24  ;;  %11050 = vmatprep.subr.bf16.mxu1 %v12987_v47  ;;  %v12850_v48 = vcombine.low %v4729_v30, %v4733_v24 }
0x2583   : > { %v16232_v42 = vld [vmem:[#allocation2] sm:$0xff]  ;;  %11027 = vmatprep.mubr.bf16.mxu0 %v14646_v19  ;;  %11051 = vmatpush1.bf16.msra.mxu1 %v12986_v41 }
0x2584   : > { %v16234_v3 = vld [vmem:[#allocation2 + $0x20] sm:$0xff]  ;;  %11009 = vmatprep.subr.bf16.mxu0 %v12851_v51 }
0x2585   : > { %v4857_v60 = vld [vmem:[%s15435_s10 + $0x400] sm:$0xff]  ;;  %v16240_v57 = vcombine.high %v16232_v42, %v16234_v3  ;;  %11010 = vmatpush1.bf16.msra.mxu0 %v12850_v48 }
0x2586   : > { %v4861_v59 = vld [vmem:[%s15435_s10 + $0x420] sm:$0xff] }
0x2587   : > { %v12979_v40 = vcombine.high %v4857_v60, %v4861_v59  ;;  %v4849_v6 = vld [vmem:[%s15435_s10 + $0x3c0] sm:$0xff]  ;;  %11070 = vmatprep.mubr.bf16.mxu1 %v16240_v57  ;;  %v12978_v55 = vcombine.low %v4857_v60, %v4861_v59 }
0x2588   : > { %v4853_v33 = vld [vmem:[%s15435_s10 + $0x3e0] sm:$0xff] }
0x2589   : > { %v4977_v44 = vld [vmem:[%s15435_s10 + $0x7c0] sm:$0xff]  ;;  %v12971_v32 = vcombine.high %v4849_v6, %v4853_v33  ;;  %11052 = vmatprep.subr.bf16.mxu1 %v12979_v40  ;;  %v12970_v22 = vcombine.low %v4849_v6, %v4853_v33 }
0x258a   : > { %v4981_v45 = vld [vmem:[%s15435_s10 + $0x7e0] sm:$0xff]  ;;  %11053 = vmatpush1.bf16.msra.mxu1 %v12978_v55 }
0x258b   : > { %v13099_v61 = vcombine.high %v4977_v44, %v4981_v45  ;;  %v4841_v4 = vld [vmem:[%s15435_s10 + $0x380] sm:$0xff]  ;;  %11011 = vmatprep.subr.bf16.mxu0 %v12971_v32  ;;  %v13098_v14 = vcombine.low %v4977_v44, %v4981_v45 }
0x258c   : > { %v4845_v46 = vld [vmem:[%s15435_s10 + $0x3a0] sm:$0xff]  ;;  %11012 = vmatpush2.bf16.msra.mxu0 %v12970_v22 }
0x258d   : > { %v4969_v49 = vld [vmem:[%s15435_s10 + $0x780] sm:$0xff]  ;;  %v12963_v12 = vcombine.high %v4841_v4, %v4845_v46  ;;  %11054 = vmatprep.subr.bf16.mxu1 %v13099_v61  ;;  %v12962_v1 = vcombine.low %v4841_v4, %v4845_v46 }
0x258e   : > { %v4973_v0 = vld [vmem:[%s15435_s10 + $0x7a0] sm:$0xff]  ;;  %11055 = vmatpush2.bf16.msra.mxu1 %v13098_v14 }
0x258f   : > { %v13091_v54 = vcombine.high %v4969_v49, %v4973_v0  ;;  %v4833_v56 = vld [vmem:[%s15435_s10 + $0x340] sm:$0xff]  ;;  %11013 = vmatprep.subr.bf16.mxu0 %v12963_v12  ;;  %v13090_v7 = vcombine.low %v4969_v49, %v4973_v0 }
0x2590   : > { %v4837_v2 = vld [vmem:[%s15435_s10 + $0x360] sm:$0xff]  ;;  %11014 = vmatpush2.bf16.msra.mxu0 %v12962_v1 }
0x2591   : > { %v4961_v58 = vld [vmem:[%s15435_s10 + $0x740] sm:$0xff]  ;;  %v12955_v15 = vcombine.high %v4833_v56, %v4837_v2  ;;  %11056 = vmatprep.subr.bf16.mxu1 %v13091_v54  ;;  %v12954_v36 = vcombine.low %v4833_v56, %v4837_v2  ;;  %v16285_v56 = vcombine.low %v16232_v42, %v16234_v3 }
0x2592   : > { %v4965_v63 = vld [vmem:[%s15435_s10 + $0x760] sm:$0xff]  ;;  %11057 = vmatpush2.bf16.msra.mxu1 %v13090_v7 }
0x2593   : > { %v13083_v37 = vcombine.high %v4961_v58, %v4965_v63  ;;  %v4825_v62 = vld [vmem:[%s15435_s10 + $0x300] sm:$0xff]  ;;  %11015 = vmatprep.subr.bf16.mxu0 %v12955_v15  ;;  %v13082_v43 = vcombine.low %v4961_v58, %v4965_v63  ;;  %v16287_v58 = vld [vmem:[#allocation2 + $0x18] sm:$0xff] }
0x2594   : > { %v4829_v52 = vld [vmem:[%s15435_s10 + $0x320] sm:$0xff]  ;;  %11016 = vmatpush2.bf16.msra.mxu0 %v12954_v36  ;;  %v16289_v63 = vld [vmem:[#allocation2 + $0x38] sm:$0xff] }
0x2595   : > { %v4953_v17 = vld [vmem:[%s15435_s10 + $0x700] sm:$0xff]  ;;  %v12947_v38 = vcombine.high %v4825_v62, %v4829_v52  ;;  %11058 = vmatprep.subr.bf16.mxu1 %v13083_v37  ;;  %v12946_v18 = vcombine.low %v4825_v62, %v4829_v52  ;;  %v14649_v52 = vld [vmem:[#allocation2 + $0x5c] ss:$-72 sps:$4 sm:$0xff]  }
0x2596   : > { %v4957_v5 = vld [vmem:[%s15435_s10 + $0x720] sm:$0xff]  ;;  %11059 = vmatpush2.bf16.msra.mxu1 %v13082_v43 }
0x2597   : > { %v13075_v50 = vcombine.high %v4953_v17, %v4957_v5  ;;  %v4817_v8 = vld [vmem:[%s15435_s10 + $0x2c0] sm:$0xff]  ;;  %11017 = vmatprep.subr.bf16.mxu0 %v12947_v38  ;;  %v13074_v21 = vcombine.low %v4953_v17, %v4957_v5  ;;  %v16297_v17 = vcombine.high %v16287_v58, %v16289_v63 }
0x2598   : > { %v4821_v13 = vld [vmem:[%s15435_s10 + $0x2e0] sm:$0xff]  ;;  %11018 = vmatpush2.bf16.msra.mxu0 %v12946_v18 }
0x2599   : > { %v4945_v10 = vld [vmem:[%s15435_s10 + $0x6c0] sm:$0xff]  ;;  %v12939_v11 = vcombine.high %v4817_v8, %v4821_v13  ;;  %11060 = vmatprep.subr.bf16.mxu1 %v13075_v50  ;;  %v12938_v53 = vcombine.low %v4817_v8, %v4821_v13 }
0x259a   : > { %v4949_v9 = vld [vmem:[%s15435_s10 + $0x6e0] sm:$0xff]  ;;  %11061 = vmatpush2.bf16.msra.mxu1 %v13074_v21 }
0x259b   : > { %v13067_v34 = vcombine.high %v4945_v10, %v4949_v9  ;;  %v4809_v20 = vld [vmem:[%s15435_s10 + $0x280] sm:$0xff]  ;;  %11019 = vmatprep.subr.bf16.mxu0 %v12939_v11  ;;  %v13066_v28 = vcombine.low %v4945_v10, %v4949_v9 }
0x259c   : > { %v4813_v25 = vld [vmem:[%s15435_s10 + $0x2a0] sm:$0xff]  ;;  %11020 = vmatpush2.bf16.msra.mxu0 %v12938_v53 }
0x259d   : > { %v4937_v26 = vld [vmem:[%s15435_s10 + $0x680] sm:$0xff]  ;;  %v12931_v35 = vcombine.high %v4809_v20, %v4813_v25  ;;  %11062 = vmatprep.subr.bf16.mxu1 %v13067_v34  ;;  %v12930_v24 = vcombine.low %v4809_v20, %v4813_v25 }
0x259e   : > { %v4941_v27 = vld [vmem:[%s15435_s10 + $0x6a0] sm:$0xff]  ;;  %11063 = vmatpush2.bf16.msra.mxu1 %v13066_v28 }
0x259f   : > { %v13059_v23 = vcombine.high %v4937_v26, %v4941_v27  ;;  %v4801_v29 = vld [vmem:[%s15435_s10 + $0x240] sm:$0xff]  ;;  %11021 = vmatprep.subr.bf16.mxu0 %v12931_v35  ;;  %v13058_v47 = vcombine.low %v4937_v26, %v4941_v27 }
0x25a0   : > { %v4805_v30 = vld [vmem:[%s15435_s10 + $0x260] sm:$0xff]  ;;  %11022 = vmatpush2.bf16.msra.mxu0 %v12930_v24 }
0x25a1   : > { %v4929_v31 = vld [vmem:[%s15435_s10 + $0x640] sm:$0xff]  ;;  %v12923_v19 = vcombine.high %v4801_v29, %v4805_v30  ;;  %11064 = vmatprep.subr.bf16.mxu1 %v13059_v23  ;;  %v12922_v40 = vcombine.low %v4801_v29, %v4805_v30 }
0x25a2   : > { %v4933_v16 = vld [vmem:[%s15435_s10 + $0x660] sm:$0xff]  ;;  %11065 = vmatpush2.bf16.msra.mxu1 %v13058_v47 }
0x25a3   : > { %v13051_v60 = vcombine.high %v4929_v31, %v4933_v16  ;;  %v4793_v59 = vld [vmem:[%s15435_s10 + $0x200] sm:$0xff]  ;;  %11023 = vmatprep.subr.bf16.mxu0 %v12923_v19  ;;  %v13050_v6 = vcombine.low %v4929_v31, %v4933_v16 }
0x25a4   : > { %v4797_v39 = vld [vmem:[%s15435_s10 + $0x220] sm:$0xff]  ;;  %11024 = vmatpush2.bf16.msra.mxu0 %v12922_v40 }
0x25a5   : > { %v4921_v41 = vld [vmem:[%s15435_s10 + $0x600] sm:$0xff]  ;;  %v12915_v33 = vcombine.high %v4793_v59, %v4797_v39  ;;  %11066 = vmatprep.subr.bf16.mxu1 %v13051_v60  ;;  %v12914_v61 = vcombine.low %v4793_v59, %v4797_v39 }
0x25a6   : > { %v4925_v51 = vld [vmem:[%s15435_s10 + $0x620] sm:$0xff]  ;;  %11067 = vmatpush2.bf16.msra.mxu1 %v13050_v6 }
0x25a7   : > { %v13043_v44 = vcombine.high %v4921_v41, %v4925_v51  ;;  %v5041_v45 = vld [vmem:[%s15435_s10 + $0x9c0] sm:$0xff]  ;;  %11025 = vmatprep.subr.bf16.mxu0 %v12915_v33  ;;  %v13042_v4 = vcombine.low %v4921_v41, %v4925_v51 }
0x25a8   : > { %v5045_v48 = vld [vmem:[%s15435_s10 + $0x9e0] sm:$0xff]  ;;  %11026 = vmatpush2.bf16.msra.mxu0 %v12914_v61 }
0x25a9   : > { %v5169_v55 = vld [vmem:[%s15435_s10 + $0xdc0] sm:$0xff]  ;;  %v13163_v46 = vcombine.high %v5041_v45, %v5045_v48  ;;  %11068 = vmatprep.subr.bf16.mxu1 %v13043_v44  ;;  %v13162_v2 = vcombine.low %v5041_v45, %v5045_v48 }
0x25aa   : > { %v5173_v32 = vld [vmem:[%s15435_s10 + $0xde0] sm:$0xff]  ;;  %11069 = vmatpush2.bf16.msra.mxu1 %v13042_v4 }
0x25ab   : > { %v13291_v49 = vcombine.high %v5169_v55, %v5173_v32  ;;  %v5033_v0 = vld [vmem:[%s15435_s10 + $0x980] sm:$0xff]  ;;  %11081 = vmatprep.subr.bf16.mxu0 %v13163_v46  ;;  %v13290_v1 = vcombine.low %v5169_v55, %v5173_v32 }
0x25ac   : > { %v5037_v22 = vld [vmem:[%s15435_s10 + $0x9a0] sm:$0xff] }
0x25ad   : > { %v14648_v14 = vld [vmem:[#allocation2 + $0x30] ss:$16 sps:$4 sm:$0xff]   ;;  %v13155_v7 = vcombine.high %v5033_v0, %v5037_v22  ;;  %11124 = vmatprep.subr.bf16.mxu1 %v13291_v49  ;;  %11071 = vmatmul.mubr.bf16.vlgmr.msra.gmra.mxu1 %v16285_v56  ;;  %v13154_v5 = vcombine.low %v5033_v0, %v5037_v22 }
0x25ae   : > { %v5161_v12 = vld [vmem:[%s15435_s10 + $0xd80] sm:$0xff]  ;;  %11028 = vmatmul.mubr.bf16.vlgmr.msra.gmra.mxu0 %v14648_v14  ;;  %11125 = vmatpush1.bf16.msra.mxu1 %v13290_v1 }
0x25af   : > { %v5165_v54 = vld [vmem:[%s15435_s10 + $0xda0] sm:$0xff]  ;;  %11082 = vmatpush1.bf16.msra.mxu0 %v13162_v2  ;;  %11113 = vmatprep.mubr.bf16.mxu0 %v14649_v52 }
0x25b0   : > { %v13283_v15 = vcombine.high %v5161_v12, %v5165_v54  ;;  %v5025_v37 = vld [vmem:[%s15435_s10 + $0x940] sm:$0xff]  ;;  %11083 = vmatprep.subr.bf16.mxu0 %v13155_v7  ;;  %v13282_v36 = vcombine.low %v5161_v12, %v5165_v54  ;;  %11156 = vmatprep.mubr.bf16.mxu1 %v16297_v17 }
0x25b1   : > { %v5029_v62 = vld [vmem:[%s15435_s10 + $0x960] sm:$0xff] }
0x25b2   : > { %v5153_v42 = vld [vmem:[%s15435_s10 + $0xd40] sm:$0xff]  ;;  %v13147_v43 = vcombine.high %v5025_v37, %v5029_v62  ;;  %11126 = vmatprep.subr.bf16.mxu1 %v13283_v15  ;;  %v13146_v9 = vcombine.low %v5025_v37, %v5029_v62 }
0x25b3   : > { %v5157_v3 = vld [vmem:[%s15435_s10 + $0xd60] sm:$0xff]  ;;  %11084 = vmatpush1.bf16.msra.mxu0 %v13154_v5  ;;  %11127 = vmatpush1.bf16.msra.mxu1 %v13282_v36 }
0x25b4   : > { %v13275_v38 = vcombine.high %v5153_v42, %v5157_v3  ;;  %v5017_v50 = vld [vmem:[%s15435_s10 + $0x900] sm:$0xff]  ;;  %11085 = vmatprep.subr.bf16.mxu0 %v13147_v43  ;;  %v13274_v18 = vcombine.low %v5153_v42, %v5157_v3 }
0x25b5   : > { %v5021_v8 = vld [vmem:[%s15435_s10 + $0x920] sm:$0xff] }
0x25b6   : > { %v5145_v13 = vld [vmem:[%s15435_s10 + $0xd00] sm:$0xff]  ;;  %v13139_v21 = vcombine.high %v5017_v50, %v5021_v8  ;;  %11128 = vmatprep.subr.bf16.mxu1 %v13275_v38  ;;  %v13138_v27 = vcombine.low %v5017_v50, %v5021_v8 }
0x25b7   : > { %v5149_v10 = vld [vmem:[%s15435_s10 + $0xd20] sm:$0xff]  ;;  %11086 = vmatpush1.bf16.msra.mxu0 %v13146_v9  ;;  %11129 = vmatpush1.bf16.msra.mxu1 %v13274_v18 }
0x25b8   : > { %v13267_v11 = vcombine.high %v5145_v13, %v5149_v10  ;;  %v5009_v34 = vld [vmem:[%s15435_s10 + $0x8c0] sm:$0xff]  ;;  %11087 = vmatprep.subr.bf16.mxu0 %v13139_v21  ;;  %v13266_v53 = vcombine.low %v5145_v13, %v5149_v10 }
0x25b9   : > { %v5013_v20 = vld [vmem:[%s15435_s10 + $0x8e0] sm:$0xff] }
0x25ba   : > { %v5137_v25 = vld [vmem:[%s15435_s10 + $0xcc0] sm:$0xff]  ;;  %v13131_v28 = vcombine.high %v5009_v34, %v5013_v20  ;;  %11130 = vmatprep.subr.bf16.mxu1 %v13267_v11  ;;  %v13130_v16 = vcombine.low %v5009_v34, %v5013_v20 }
0x25bb   : > { %v5141_v26 = vld [vmem:[%s15435_s10 + $0xce0] sm:$0xff]  ;;  %11088 = vmatpush1.bf16.msra.mxu0 %v13138_v27  ;;  %11131 = vmatpush1.bf16.msra.mxu1 %v13266_v53 }
0x25bc   : > { %v13259_v35 = vcombine.high %v5137_v25, %v5141_v26  ;;  %v5001_v23 = vld [vmem:[%s15435_s10 + $0x880] sm:$0xff]  ;;  %11089 = vmatprep.subr.bf16.mxu0 %v13131_v28  ;;  %v13258_v24 = vcombine.low %v5137_v25, %v5141_v26 }
0x25bd   : > { %v5005_v29 = vld [vmem:[%s15435_s10 + $0x8a0] sm:$0xff] }
0x25be   : > { %v5129_v30 = vld [vmem:[%s15435_s10 + $0xc80] sm:$0xff]  ;;  %v13123_v47 = vcombine.high %v5001_v23, %v5005_v29  ;;  %11132 = vmatprep.subr.bf16.mxu1 %v13259_v35  ;;  %v13122_v51 = vcombine.low %v5001_v23, %v5005_v29 }
0x25bf   : > { %v5133_v31 = vld [vmem:[%s15435_s10 + $0xca0] sm:$0xff]  ;;  %11090 = vmatpush1.bf16.msra.mxu0 %v13130_v16  ;;  %11133 = vmatpush1.bf16.msra.mxu1 %v13258_v24 }
0x25c0   : > { %v13251_v19 = vcombine.high %v5129_v30, %v5133_v31  ;;  %v4993_v60 = vld [vmem:[%s15435_s10 + $0x840] sm:$0xff]  ;;  %11091 = vmatprep.subr.bf16.mxu0 %v13123_v47  ;;  %v13250_v40 = vcombine.low %v5129_v30, %v5133_v31 }
0x25c1   : > { %v4997_v59 = vld [vmem:[%s15435_s10 + $0x860] sm:$0xff] }
0x25c2   : > { %v5121_v39 = vld [vmem:[%s15435_s10 + $0xc40] sm:$0xff]  ;;  %v13115_v6 = vcombine.high %v4993_v60, %v4997_v59  ;;  %11134 = vmatprep.subr.bf16.mxu1 %v13251_v19  ;;  %v13114_v32 = vcombine.low %v4993_v60, %v4997_v59 }
0x25c3   : > { %v5125_v41 = vld [vmem:[%s15435_s10 + $0xc60] sm:$0xff]  ;;  %11092 = vmatpush1.bf16.msra.mxu0 %v13122_v51  ;;  %11135 = vmatpush1.bf16.msra.mxu1 %v13250_v40 }
0x25c4   : > { %v13243_v33 = vcombine.high %v5121_v39, %v5125_v41  ;;  %v4985_v44 = vld [vmem:[%s15435_s10 + $0x800] sm:$0xff]  ;;  %11093 = vmatprep.subr.bf16.mxu0 %v13115_v6  ;;  %v13242_v61 = vcombine.low %v5121_v39, %v5125_v41 }
0x25c5   : > { %v4989_v45 = vld [vmem:[%s15435_s10 + $0x820] sm:$0xff] }
0x25c6   : > { %v5113_v48 = vld [vmem:[%s15435_s10 + $0xc00] sm:$0xff]  ;;  %v13107_v4 = vcombine.high %v4985_v44, %v4989_v45  ;;  %11136 = vmatprep.subr.bf16.mxu1 %v13243_v33  ;;  %v13106_v12 = vcombine.low %v4985_v44, %v4989_v45 }
0x25c7   : > { %v5117_v55 = vld [vmem:[%s15435_s10 + $0xc20] sm:$0xff]  ;;  %11094 = vmatpush1.bf16.msra.mxu0 %v13114_v32  ;;  %11137 = vmatpush1.bf16.msra.mxu1 %v13242_v61 }
0x25c8   : > { %v13235_v46 = vcombine.high %v5113_v48, %v5117_v55  ;;  %v5105_v49 = vld [vmem:[%s15435_s10 + $0xbc0] sm:$0xff]  ;;  %11095 = vmatprep.subr.bf16.mxu0 %v13107_v4  ;;  %v13234_v54 = vcombine.low %v5113_v48, %v5117_v55 }
0x25c9   : > { %v5109_v0 = vld [vmem:[%s15435_s10 + $0xbe0] sm:$0xff] }
0x25ca   : > { %v5233_v22 = vld [vmem:[%s15435_s10 + $0xfc0] sm:$0xff]  ;;  %v13227_v2 = vcombine.high %v5105_v49, %v5109_v0  ;;  %11138 = vmatprep.subr.bf16.mxu1 %v13235_v46  ;;  %v13226_v52 = vcombine.low %v5105_v49, %v5109_v0 }
0x25cb   : > { %v5237_v14 = vld [vmem:[%s15435_s10 + $0xfe0] sm:$0xff]  ;;  %11096 = vmatpush1.bf16.msra.mxu0 %v13106_v12  ;;  %11139 = vmatpush1.bf16.msra.mxu1 %v13234_v54 }
0x25cc   : > { %v13355_v1 = vcombine.high %v5233_v22, %v5237_v14  ;;  %v5097_v7 = vld [vmem:[%s15435_s10 + $0xb80] sm:$0xff]  ;;  %11097 = vmatprep.subr.bf16.mxu0 %v13227_v2  ;;  %v13354_v42 = vcombine.low %v5233_v22, %v5237_v14 }
0x25cd   : > { %v5101_v15 = vld [vmem:[%s15435_s10 + $0xba0] sm:$0xff] }
0x25ce   : > { %v5225_v37 = vld [vmem:[%s15435_s10 + $0xf80] sm:$0xff]  ;;  %v13219_v3 = vcombine.high %v5097_v7, %v5101_v15  ;;  %11140 = vmatprep.subr.bf16.mxu1 %v13355_v1  ;;  %v13218_v8 = vcombine.low %v5097_v7, %v5101_v15 }
0x25cf   : > { %v5229_v62 = vld [vmem:[%s15435_s10 + $0xfa0] sm:$0xff]  ;;  %11098 = vmatpush2.bf16.msra.mxu0 %v13226_v52  ;;  %11141 = vmatpush2.bf16.msra.mxu1 %v13354_v42 }
0x25d0   : > { %v13347_v5 = vcombine.high %v5225_v37, %v5229_v62  ;;  %v5089_v36 = vld [vmem:[%s15435_s10 + $0xb40] sm:$0xff]  ;;  %11099 = vmatprep.subr.bf16.mxu0 %v13219_v3  ;;  %v13346_v13 = vcombine.low %v5225_v37, %v5229_v62 }
0x25d1   : > { %v5093_v43 = vld [vmem:[%s15435_s10 + $0xb60] sm:$0xff] }
0x25d2   : > { %v5217_v38 = vld [vmem:[%s15435_s10 + $0xf40] sm:$0xff]  ;;  %v13211_v10 = vcombine.high %v5089_v36, %v5093_v43  ;;  %11142 = vmatprep.subr.bf16.mxu1 %v13347_v5  ;;  %v13210_v20 = vcombine.low %v5089_v36, %v5093_v43  ;;  %v14651_v5 = vld [vmem:[#allocation2 + $0x58] ss:$-72 sps:$4 sm:$0xff]  }
0x25d3   : > { %v5221_v50 = vld [vmem:[%s15435_s10 + $0xf60] sm:$0xff]  ;;  %11100 = vmatpush2.bf16.msra.mxu0 %v13218_v8  ;;  %11143 = vmatpush2.bf16.msra.mxu1 %v13346_v13 }
0x25d4   : > { %v13339_v9 = vcombine.high %v5217_v38, %v5221_v50  ;;  %v5081_v18 = vld [vmem:[%s15435_s10 + $0xb00] sm:$0xff]  ;;  %11101 = vmatprep.subr.bf16.mxu0 %v13211_v10  ;;  %v13338_v25 = vcombine.low %v5217_v38, %v5221_v50  ;;  %v16363_v38 = vcombine.low %v16287_v58, %v16289_v63 }
0x25d5   : > { %v5085_v21 = vld [vmem:[%s15435_s10 + $0xb20] sm:$0xff] }
0x25d6   : > { %v5209_v11 = vld [vmem:[%s15435_s10 + $0xf00] sm:$0xff]  ;;  %v13203_v26 = vcombine.high %v5081_v18, %v5085_v21  ;;  %11144 = vmatprep.subr.bf16.mxu1 %v13339_v9  ;;  %v13202_v29 = vcombine.low %v5081_v18, %v5085_v21 }
0x25d7   : > { %v5213_v34 = vld [vmem:[%s15435_s10 + $0xf20] sm:$0xff]  ;;  %11102 = vmatpush2.bf16.msra.mxu0 %v13210_v20  ;;  %11145 = vmatpush2.bf16.msra.mxu1 %v13338_v25  ;;  %v14654_v20 = vld [vmem:[#allocation2 + $0x6c] ss:$8 sps:$4 sm:$0xff]  }
0x25d8   : > { %v13331_v27 = vcombine.high %v5209_v11, %v5213_v34  ;;  %v5073_v53 = vld [vmem:[%s15435_s10 + $0xac0] sm:$0xff]  ;;  %11103 = vmatprep.subr.bf16.mxu0 %v13203_v26  ;;  %v13330_v30 = vcombine.low %v5209_v11, %v5213_v34 }
0x25d9   : > { %v5077_v28 = vld [vmem:[%s15435_s10 + $0xae0] sm:$0xff] }
0x25da   : > { %v5201_v35 = vld [vmem:[%s15435_s10 + $0xec0] sm:$0xff]  ;;  %v13195_v31 = vcombine.high %v5073_v53, %v5077_v28  ;;  %11146 = vmatprep.subr.bf16.mxu1 %v13331_v27  ;;  %v13194_v59 = vcombine.low %v5073_v53, %v5077_v28 }
0x25db   : > { %v5205_v23 = vld [vmem:[%s15435_s10 + $0xee0] sm:$0xff]  ;;  %11104 = vmatpush2.bf16.msra.mxu0 %v13202_v29  ;;  %11147 = vmatpush2.bf16.msra.mxu1 %v13330_v30 }
0x25dc   : > { %v13323_v16 = vcombine.high %v5201_v35, %v5205_v23  ;;  %v5065_v24 = vld [vmem:[%s15435_s10 + $0xa80] sm:$0xff]  ;;  %11105 = vmatprep.subr.bf16.mxu0 %v13195_v31  ;;  %v13322_v39 = vcombine.low %v5201_v35, %v5205_v23 }
0x25dd   : > { %v5069_v47 = vld [vmem:[%s15435_s10 + $0xaa0] sm:$0xff] }
0x25de   : > { %v5193_v19 = vld [vmem:[%s15435_s10 + $0xe80] sm:$0xff]  ;;  %v13187_v41 = vcombine.high %v5065_v24, %v5069_v47  ;;  %11148 = vmatprep.subr.bf16.mxu1 %v13323_v16  ;;  %v13186_v45 = vcombine.low %v5065_v24, %v5069_v47 }
0x25df   : > { %v5197_v60 = vld [vmem:[%s15435_s10 + $0xea0] sm:$0xff]  ;;  %11106 = vmatpush2.bf16.msra.mxu0 %v13194_v59  ;;  %11149 = vmatpush2.bf16.msra.mxu1 %v13322_v39 }
0x25e0   : > { %v13315_v51 = vcombine.high %v5193_v19, %v5197_v60  ;;  %v5057_v40 = vld [vmem:[%s15435_s10 + $0xa40] sm:$0xff]  ;;  %11107 = vmatprep.subr.bf16.mxu0 %v13187_v41  ;;  %v13314_v48 = vcombine.low %v5193_v19, %v5197_v60 }
0x25e1   : > { %v5061_v6 = vld [vmem:[%s15435_s10 + $0xa60] sm:$0xff] }
0x25e2   : > { %v5185_v33 = vld [vmem:[%s15435_s10 + $0xe40] sm:$0xff]  ;;  %v13179_v55 = vcombine.high %v5057_v40, %v5061_v6  ;;  %11150 = vmatprep.subr.bf16.mxu1 %v13315_v51  ;;  %v13178_v0 = vcombine.low %v5057_v40, %v5061_v6 }
0x25e3   : > { %v5189_v44 = vld [vmem:[%s15435_s10 + $0xe60] sm:$0xff]  ;;  %11108 = vmatpush2.bf16.msra.mxu0 %v13186_v45  ;;  %11151 = vmatpush2.bf16.msra.mxu1 %v13314_v48 }
0x25e4   : > { %v13307_v32 = vcombine.high %v5185_v33, %v5189_v44  ;;  %v5049_v61 = vld [vmem:[%s15435_s10 + $0xa00] sm:$0xff]  ;;  %11109 = vmatprep.subr.bf16.mxu0 %v13179_v55  ;;  %v13306_v22 = vcombine.low %v5185_v33, %v5189_v44 }
0x25e5   : > { %v5053_v4 = vld [vmem:[%s15435_s10 + $0xa20] sm:$0xff] }
0x25e6   : > { %v5177_v46 = vld [vmem:[%s15435_s10 + $0xe00] sm:$0xff]  ;;  %v13171_v14 = vcombine.high %v5049_v61, %v5053_v4  ;;  %11152 = vmatprep.subr.bf16.mxu1 %v13307_v32  ;;  %v13170_v15 = vcombine.low %v5049_v61, %v5053_v4 }
0x25e7   : > { %v5181_v49 = vld [vmem:[%s15435_s10 + $0xe20] sm:$0xff]  ;;  %11110 = vmatpush2.bf16.msra.mxu0 %v13178_v0  ;;  %11153 = vmatpush2.bf16.msra.mxu1 %v13306_v22 }
0x25e8   : > { %v13299_v12 = vcombine.high %v5177_v46, %v5181_v49  ;;  %v5297_v54 = vld [vmem:[%s15435_s10 + $0x11c0] sm:$0xff]  ;;  %11111 = vmatprep.subr.bf16.mxu0 %v13171_v14  ;;  %v13298_v37 = vcombine.low %v5177_v46, %v5181_v49 }
0x25e9   : > { %v5301_v2 = vld [vmem:[%s15435_s10 + $0x11e0] sm:$0xff] }
0x25ea   : > { %v5425_v1 = vld [vmem:[%s15435_s10 + $0x15c0] sm:$0xff]  ;;  %v13419_v62 = vcombine.high %v5297_v54, %v5301_v2  ;;  %11154 = vmatprep.subr.bf16.mxu1 %v13299_v12  ;;  %v13418_v50 = vcombine.low %v5297_v54, %v5301_v2 }
0x25eb   : > { %v5429_v7 = vld [vmem:[%s15435_s10 + $0x15e0] sm:$0xff]  ;;  %11112 = vmatpush2.bf16.msra.mxu0 %v13170_v15  ;;  %11155 = vmatpush2.bf16.msra.mxu1 %v13298_v37 }
0x25ec   : > { %v13547_v52 = vcombine.high %v5425_v1, %v5429_v7  ;;  %v5289_v42 = vld [vmem:[%s15435_s10 + $0x1180] sm:$0xff]  ;;  %11167 = vmatprep.subr.bf16.mxu0 %v13419_v62  ;;  %v13546_v8 = vcombine.low %v5425_v1, %v5429_v7 }
0x25ed   : > { %v5293_v3 = vld [vmem:[%s15435_s10 + $0x11a0] sm:$0xff] }
0x25ee   : > { %v5417_v36 = vld [vmem:[%s15435_s10 + $0x1580] sm:$0xff]  ;;  %v13411_v13 = vcombine.high %v5289_v42, %v5293_v3  ;;  %11210 = vmatprep.subr.bf16.mxu1 %v13547_v52  ;;  %11114 = vmatmul.mubr.bf16.vlgmr.msra.gmra.mxu0 %v14651_v5  ;;  %v13410_v58 = vcombine.low %v5289_v42, %v5293_v3 }
0x25ef   : > { %v5421_v43 = vld [vmem:[%s15435_s10 + $0x15a0] sm:$0xff]  ;;  %11157 = vmatmul.mubr.bf16.vlgmr.msra.gmra.mxu1 %v16363_v38  ;;  %11168 = vmatpush1.bf16.msra.mxu0 %v13418_v50 }
0x25f0   : > { %v13539_v10 = vcombine.high %v5417_v36, %v5421_v43  ;;  %v5281_v9 = vld [vmem:[%s15435_s10 + $0x1140] sm:$0xff]  ;;  %11211 = vmatpush1.bf16.msra.mxu1 %v13546_v8  ;;  %11169 = vmatprep.subr.bf16.mxu0 %v13411_v13  ;;  %v13538_v63 = vcombine.low %v5417_v36, %v5421_v43 }
0x25f1   : > { %v5285_v18 = vld [vmem:[%s15435_s10 + $0x1160] sm:$0xff]  ;;  %11242 = vmatprep.mubr.bf16.mxu1 %v14654_v20 }
0x25f2   : > { %v14652_v21 = vld [vmem:[#allocation2 + $0x54] ss:$16 sps:$4 sm:$0xff]   ;;  %v13403_v25 = vcombine.high %v5281_v9, %v5285_v18  ;;  %11212 = vmatprep.subr.bf16.mxu1 %v13539_v10  ;;  %v13402_v23 = vcombine.low %v5281_v9, %v5285_v18 }
0x25f3   : > { %v5409_v11 = vld [vmem:[%s15435_s10 + $0x1540] sm:$0xff]  ;;  %11199 = vmatprep.mubr.bf16.mxu0 %v14652_v21  ;;  %11170 = vmatpush1.bf16.msra.mxu0 %v13410_v58 }
0x25f4   : > { %v5413_v34 = vld [vmem:[%s15435_s10 + $0x1560] sm:$0xff]  ;;  %11213 = vmatpush1.bf16.msra.mxu1 %v13538_v63  ;;  %11171 = vmatprep.subr.bf16.mxu0 %v13403_v25 }
0x25f5   : > { %v13531_v26 = vcombine.high %v5409_v11, %v5413_v34  ;;  %v5273_v27 = vld [vmem:[%s15435_s10 + $0x1100] sm:$0xff]  ;;  %v13530_v29 = vcombine.low %v5409_v11, %v5413_v34 }
0x25f6   : > { %v5277_v53 = vld [vmem:[%s15435_s10 + $0x1120] sm:$0xff] }
0x25f7   : > { %v5401_v28 = vld [vmem:[%s15435_s10 + $0x1500] sm:$0xff]  ;;  %v13395_v30 = vcombine.high %v5273_v27, %v5277_v53  ;;  %11214 = vmatprep.subr.bf16.mxu1 %v13531_v26  ;;  %11172 = vmatpush1.bf16.msra.mxu0 %v13402_v23  ;;  %v13394_v60 = vcombine.low %v5273_v27, %v5277_v53 }
0x25f8   : > { %v5405_v35 = vld [vmem:[%s15435_s10 + $0x1520] sm:$0xff]  ;;  %11215 = vmatpush1.bf16.msra.mxu1 %v13530_v29 }
0x25f9   : > { %v13523_v31 = vcombine.high %v5401_v28, %v5405_v35  ;;  %v5265_v16 = vld [vmem:[%s15435_s10 + $0x10c0] sm:$0xff]  ;;  %11173 = vmatprep.subr.bf16.mxu0 %v13395_v30  ;;  %v13522_v59 = vcombine.low %v5401_v28, %v5405_v35 }
0x25fa   : > { %v5269_v24 = vld [vmem:[%s15435_s10 + $0x10e0] sm:$0xff] }
0x25fb   : > { %v5393_v47 = vld [vmem:[%s15435_s10 + $0x14c0] sm:$0xff]  ;;  %v13387_v39 = vcombine.high %v5265_v16, %v5269_v24  ;;  %11216 = vmatprep.subr.bf16.mxu1 %v13523_v31  ;;  %11174 = vmatpush1.bf16.msra.mxu0 %v13394_v60  ;;  %v13386_v44 = vcombine.low %v5265_v16, %v5269_v24 }
0x25fc   : > { %v5397_v19 = vld [vmem:[%s15435_s10 + $0x14e0] sm:$0xff]  ;;  %11217 = vmatpush1.bf16.msra.mxu1 %v13522_v59 }
0x25fd   : > { %v13515_v41 = vcombine.high %v5393_v47, %v5397_v19  ;;  %v5257_v51 = vld [vmem:[%s15435_s10 + $0x1080] sm:$0xff]  ;;  %11175 = vmatprep.subr.bf16.mxu0 %v13387_v39  ;;  %v13514_v45 = vcombine.low %v5393_v47, %v5397_v19 }
0x25fe   : > { %v5261_v40 = vld [vmem:[%s15435_s10 + $0x10a0] sm:$0xff] }
0x25ff   : > { %v5385_v6 = vld [vmem:[%s15435_s10 + $0x1480] sm:$0xff]  ;;  %v13379_v48 = vcombine.high %v5257_v51, %v5261_v40  ;;  %11218 = vmatprep.subr.bf16.mxu1 %v13515_v41  ;;  %11176 = vmatpush1.bf16.msra.mxu0 %v13386_v44  ;;  %v13378_v49 = vcombine.low %v5257_v51, %v5261_v40 }
0x2600   : > { %v5389_v33 = vld [vmem:[%s15435_s10 + $0x14a0] sm:$0xff]  ;;  %11219 = vmatpush1.bf16.msra.mxu1 %v13514_v45 }
0x2601   : > { %v13507_v55 = vcombine.high %v5385_v6, %v5389_v33  ;;  %v5249_v32 = vld [vmem:[%s15435_s10 + $0x1040] sm:$0xff]  ;;  %11177 = vmatprep.subr.bf16.mxu0 %v13379_v48  ;;  %v13506_v0 = vcombine.low %v5385_v6, %v5389_v33 }
0x2602   : > { %v5253_v61 = vld [vmem:[%s15435_s10 + $0x1060] sm:$0xff] }
0x2603   : > { %v5377_v4 = vld [vmem:[%s15435_s10 + $0x1440] sm:$0xff]  ;;  %v13371_v22 = vcombine.high %v5249_v32, %v5253_v61  ;;  %11220 = vmatprep.subr.bf16.mxu1 %v13507_v55  ;;  %11178 = vmatpush1.bf16.msra.mxu0 %v13378_v49  ;;  %v13370_v7 = vcombine.low %v5249_v32, %v5253_v61 }
0x2604   : > { %v5381_v46 = vld [vmem:[%s15435_s10 + $0x1460] sm:$0xff]  ;;  %11221 = vmatpush1.bf16.msra.mxu1 %v13506_v0 }
0x2605   : > { %v13499_v14 = vcombine.high %v5377_v4, %v5381_v46  ;;  %v5241_v12 = vld [vmem:[%s15435_s10 + $0x1000] sm:$0xff]  ;;  %11179 = vmatprep.subr.bf16.mxu0 %v13371_v22  ;;  %v13498_v15 = vcombine.low %v5377_v4, %v5381_v46 }
0x2606   : > { %v5245_v54 = vld [vmem:[%s15435_s10 + $0x1020] sm:$0xff] }
0x2607   : > { %v5369_v2 = vld [vmem:[%s15435_s10 + $0x1400] sm:$0xff]  ;;  %v13363_v37 = vcombine.high %v5241_v12, %v5245_v54  ;;  %11222 = vmatprep.subr.bf16.mxu1 %v13499_v14  ;;  %11180 = vmatpush1.bf16.msra.mxu0 %v13370_v7  ;;  %v13362_v36 = vcombine.low %v5241_v12, %v5245_v54 }
0x2608   : > { %v5373_v1 = vld [vmem:[%s15435_s10 + $0x1420] sm:$0xff]  ;;  %11223 = vmatpush1.bf16.msra.mxu1 %v13498_v15 }
0x2609   : > { %v13491_v62 = vcombine.high %v5369_v2, %v5373_v1  ;;  %v5361_v52 = vld [vmem:[%s15435_s10 + $0x13c0] sm:$0xff]  ;;  %11181 = vmatprep.subr.bf16.mxu0 %v13363_v37  ;;  %v13490_v43 = vcombine.low %v5369_v2, %v5373_v1 }
0x260a   : > { %v5365_v42 = vld [vmem:[%s15435_s10 + $0x13e0] sm:$0xff] }
0x260b   : > { %v5489_v3 = vld [vmem:[%s15435_s10 + $0x17c0] sm:$0xff]  ;;  %v13483_v50 = vcombine.high %v5361_v52, %v5365_v42  ;;  %11224 = vmatprep.subr.bf16.mxu1 %v13491_v62  ;;  %11182 = vmatpush1.bf16.msra.mxu0 %v13362_v36  ;;  %v13482_v21 = vcombine.low %v5361_v52, %v5365_v42 }
0x260c   : > { %v5493_v5 = vld [vmem:[%s15435_s10 + $0x17e0] sm:$0xff]  ;;  %11225 = vmatpush1.bf16.msra.mxu1 %v13490_v43 }
0x260d   : > { %v13611_v8 = vcombine.high %v5489_v3, %v5493_v5  ;;  %v5353_v13 = vld [vmem:[%s15435_s10 + $0x1380] sm:$0xff]  ;;  %11183 = vmatprep.subr.bf16.mxu0 %v13483_v50  ;;  %v13610_v11 = vcombine.low %v5489_v3, %v5493_v5 }
0x260e   : > { %v5357_v10 = vld [vmem:[%s15435_s10 + $0x13a0] sm:$0xff] }
0x260f   : > { %v5481_v9 = vld [vmem:[%s15435_s10 + $0x1780] sm:$0xff]  ;;  %v13475_v34 = vcombine.high %v5353_v13, %v5357_v10  ;;  %11226 = vmatprep.subr.bf16.mxu1 %v13611_v8  ;;  %11184 = vmatpush2.bf16.msra.mxu0 %v13482_v21  ;;  %v13474_v27 = vcombine.low %v5353_v13, %v5357_v10 }
0x2610   : > { %v5485_v18 = vld [vmem:[%s15435_s10 + $0x17a0] sm:$0xff]  ;;  %11227 = vmatpush2.bf16.msra.mxu1 %v13610_v11 }
0x2611   : > { %v13603_v20 = vcombine.high %v5481_v9, %v5485_v18  ;;  %v5345_v58 = vld [vmem:[%s15435_s10 + $0x1340] sm:$0xff]  ;;  %11185 = vmatprep.subr.bf16.mxu0 %v13475_v34  ;;  %v13602_v53 = vcombine.low %v5481_v9, %v5485_v18 }
0x2612   : > { %v5349_v63 = vld [vmem:[%s15435_s10 + $0x1360] sm:$0xff] }
0x2613   : > { %v5473_v25 = vld [vmem:[%s15435_s10 + $0x1740] sm:$0xff]  ;;  %v13467_v28 = vcombine.high %v5345_v58, %v5349_v63  ;;  %11228 = vmatprep.subr.bf16.mxu1 %v13603_v20  ;;  %11186 = vmatpush2.bf16.msra.mxu0 %v13474_v27  ;;  %v13466_v16 = vcombine.low %v5345_v58, %v5349_v63 }
0x2614   : > { %v5477_v26 = vld [vmem:[%s15435_s10 + $0x1760] sm:$0xff]  ;;  %11229 = vmatpush2.bf16.msra.mxu1 %v13602_v53 }
0x2615   : > { %v13595_v35 = vcombine.high %v5473_v25, %v5477_v26  ;;  %v5337_v23 = vld [vmem:[%s15435_s10 + $0x1300] sm:$0xff]  ;;  %11187 = vmatprep.subr.bf16.mxu0 %v13467_v28  ;;  %v13594_v24 = vcombine.low %v5473_v25, %v5477_v26 }
0x2616   : > { %v5341_v29 = vld [vmem:[%s15435_s10 + $0x1320] sm:$0xff] }
0x2617   : > { %v5465_v30 = vld [vmem:[%s15435_s10 + $0x1700] sm:$0xff]  ;;  %v13459_v47 = vcombine.high %v5337_v23, %v5341_v29  ;;  %11230 = vmatprep.subr.bf16.mxu1 %v13595_v35  ;;  %11188 = vmatpush2.bf16.msra.mxu0 %v13466_v16  ;;  %v13458_v51 = vcombine.low %v5337_v23, %v5341_v29 }
0x2618   : > { %v5469_v31 = vld [vmem:[%s15435_s10 + $0x1720] sm:$0xff]  ;;  %11231 = vmatpush2.bf16.msra.mxu1 %v13594_v24 }
0x2619   : > { %v13587_v19 = vcombine.high %v5465_v30, %v5469_v31  ;;  %v5329_v60 = vld [vmem:[%s15435_s10 + $0x12c0] sm:$0xff]  ;;  %11189 = vmatprep.subr.bf16.mxu0 %v13459_v47  ;;  %v13586_v40 = vcombine.low %v5465_v30, %v5469_v31  ;;  %v14658_v30 = vld [vmem:[#allocation2 + $0xc] ss:$112 sps:$4 sm:$0xff]  }
0x261a   : > { %v5333_v59 = vld [vmem:[%s15435_s10 + $0x12e0] sm:$0xff] }
0x261b   : > { %v5457_v39 = vld [vmem:[%s15435_s10 + $0x16c0] sm:$0xff]  ;;  %v13451_v6 = vcombine.high %v5329_v60, %v5333_v59  ;;  %11232 = vmatprep.subr.bf16.mxu1 %v13587_v19  ;;  %11190 = vmatpush2.bf16.msra.mxu0 %v13458_v51  ;;  %v13450_v32 = vcombine.low %v5329_v60, %v5333_v59 }
0x261c   : > { %v5461_v41 = vld [vmem:[%s15435_s10 + $0x16e0] sm:$0xff]  ;;  %11233 = vmatpush2.bf16.msra.mxu1 %v13586_v40 }
0x261d   : > { %v13579_v33 = vcombine.high %v5457_v39, %v5461_v41  ;;  %v5321_v44 = vld [vmem:[%s15435_s10 + $0x1280] sm:$0xff]  ;;  %11191 = vmatprep.subr.bf16.mxu0 %v13451_v6  ;;  %v13578_v61 = vcombine.low %v5457_v39, %v5461_v41 }
0x261e   : > { %v5325_v45 = vld [vmem:[%s15435_s10 + $0x12a0] sm:$0xff] }
0x261f   : > { %v5449_v48 = vld [vmem:[%s15435_s10 + $0x1680] sm:$0xff]  ;;  %v13443_v4 = vcombine.high %v5321_v44, %v5325_v45  ;;  %11234 = vmatprep.subr.bf16.mxu1 %v13579_v33  ;;  %11192 = vmatpush2.bf16.msra.mxu0 %v13450_v32  ;;  %v13442_v12 = vcombine.low %v5321_v44, %v5325_v45 }
0x2620   : > { %v5453_v55 = vld [vmem:[%s15435_s10 + $0x16a0] sm:$0xff]  ;;  %11235 = vmatpush2.bf16.msra.mxu1 %v13578_v61 }
0x2621   : > { %v13571_v46 = vcombine.high %v5449_v48, %v5453_v55  ;;  %v5313_v49 = vld [vmem:[%s15435_s10 + $0x1240] sm:$0xff]  ;;  %11193 = vmatprep.subr.bf16.mxu0 %v13443_v4  ;;  %v13570_v54 = vcombine.low %v5449_v48, %v5453_v55 }
0x2622   : > { %v5317_v0 = vld [vmem:[%s15435_s10 + $0x1260] sm:$0xff] }
0x2623   : > { %v5441_v22 = vld [vmem:[%s15435_s10 + $0x1640] sm:$0xff]  ;;  %v13435_v2 = vcombine.high %v5313_v49, %v5317_v0  ;;  %11236 = vmatprep.subr.bf16.mxu1 %v13571_v46  ;;  %11194 = vmatpush2.bf16.msra.mxu0 %v13442_v12  ;;  %v13434_v52 = vcombine.low %v5313_v49, %v5317_v0 }
0x2624   : > { %v5445_v14 = vld [vmem:[%s15435_s10 + $0x1660] sm:$0xff]  ;;  %11237 = vmatpush2.bf16.msra.mxu1 %v13570_v54 }
0x2625   : > { %v13563_v1 = vcombine.high %v5441_v22, %v5445_v14  ;;  %v5305_v7 = vld [vmem:[%s15435_s10 + $0x1200] sm:$0xff]  ;;  %11195 = vmatprep.subr.bf16.mxu0 %v13435_v2  ;;  %v13562_v42 = vcombine.low %v5441_v22, %v5445_v14 }
0x2626   : > { %v5309_v15 = vld [vmem:[%s15435_s10 + $0x1220] sm:$0xff] }
0x2627   : > { %v5433_v37 = vld [vmem:[%s15435_s10 + $0x1600] sm:$0xff]  ;;  %v13427_v3 = vcombine.high %v5305_v7, %v5309_v15  ;;  %11238 = vmatprep.subr.bf16.mxu1 %v13563_v1  ;;  %11196 = vmatpush2.bf16.msra.mxu0 %v13434_v52  ;;  %v13426_v13 = vcombine.low %v5305_v7, %v5309_v15 }
0x2628   : > { %v5437_v62 = vld [vmem:[%s15435_s10 + $0x1620] sm:$0xff]  ;;  %11239 = vmatpush2.bf16.msra.mxu1 %v13562_v42 }
0x2629   : > { %v13555_v5 = vcombine.high %v5433_v37, %v5437_v62  ;;  %v5553_v36 = vld [vmem:[%s15435_s10 + $0x19c0] sm:$0xff]  ;;  %11197 = vmatprep.subr.bf16.mxu0 %v13427_v3  ;;  %v13554_v10 = vcombine.low %v5433_v37, %v5437_v62 }
0x262a   : > { %v5557_v43 = vld [vmem:[%s15435_s10 + $0x19e0] sm:$0xff] }
0x262b   : > { %v5681_v50 = vld [vmem:[%s15435_s10 + $0x1dc0] sm:$0xff]  ;;  %v13675_v9 = vcombine.high %v5553_v36, %v5557_v43  ;;  %11240 = vmatprep.subr.bf16.mxu1 %v13555_v5  ;;  %11198 = vmatpush2.bf16.msra.mxu0 %v13426_v13  ;;  %v13674_v25 = vcombine.low %v5553_v36, %v5557_v43 }
0x262c   : > { %v5685_v8 = vld [vmem:[%s15435_s10 + $0x1de0] sm:$0xff]  ;;  %11241 = vmatpush2.bf16.msra.mxu1 %v13554_v10 }
0x262d   : > { %v13803_v18 = vcombine.high %v5681_v50, %v5685_v8  ;;  %v5545_v21 = vld [vmem:[%s15435_s10 + $0x1980] sm:$0xff]  ;;  %11253 = vmatprep.subr.bf16.mxu0 %v13675_v9  ;;  %v13802_v53 = vcombine.low %v5681_v50, %v5685_v8 }
0x262e   : > { %v5549_v11 = vld [vmem:[%s15435_s10 + $0x19a0] sm:$0xff] }
0x262f   : > { %v14656_v34 = vld [vmem:[#allocation2 + $0x50] ss:$16 sps:$4 sm:$0xff]   ;;  %v16430_v26 = vld [vmem:[#allocation2 + $0x48] sm:$0xff]  ;;  %v13667_v28 = vcombine.high %v5545_v21, %v5549_v11  ;;  %11296 = vmatprep.subr.bf16.mxu1 %v13803_v18  ;;  %v13666_v47 = vcombine.low %v5545_v21, %v5549_v11 }
0x2630   : > { %v5673_v20 = vld [vmem:[%s15435_s10 + $0x1d80] sm:$0xff]  ;;  %11200 = vmatmul.mubr.bf16.vlgmr.msra.gmra.mxu0 %v14656_v34 }
0x2631   : > { %v5677_v58 = vld [vmem:[%s15435_s10 + $0x1da0] sm:$0xff]  ;;  %11254 = vmatpush1.bf16.msra.mxu0 %v13674_v25  ;;  %11285 = vmatprep.mubr.bf16.mxu0 %v14658_v30 }
0x2632   : > { %v14657_v63 = vld [vmem:[#allocation2 + $0x68] ss:$8 sps:$4 sm:$0xff]   ;;  %v13795_v35 = vcombine.high %v5673_v20, %v5677_v58  ;;  %11255 = vmatprep.subr.bf16.mxu0 %v13667_v28  ;;  %v13794_v19 = vcombine.low %v5673_v20, %v5677_v58 }
0x2633   : > { %v16432_v27 = vld [vmem:[#allocation2 + $0x28] sm:$0xff]  ;;  %11243 = vmatmul.mubr.bf16.vlgmr.msra.gmra.mxu1 %v14657_v63 }
0x2634   : > { %v5537_v23 = vld [vmem:[%s15435_s10 + $0x1940] sm:$0xff]  ;;  %v16440_v24 = vcombine.high %v16430_v26, %v16432_v27  ;;  %11297 = vmatpush1.bf16.msra.mxu1 %v13802_v53 }
0x2635   : > { %v5541_v29 = vld [vmem:[%s15435_s10 + $0x1960] sm:$0xff]  ;;  %11298 = vmatprep.subr.bf16.mxu1 %v13795_v35  ;;  %11256 = vmatpush1.bf16.msra.mxu0 %v13666_v47 }
0x2636   : > { %v5665_v31 = vld [vmem:[%s15435_s10 + $0x1d40] sm:$0xff]  ;;  %v13659_v60 = vcombine.high %v5537_v23, %v5541_v29  ;;  %11328 = vmatprep.mubr.bf16.mxu1 %v16440_v24  ;;  %v13658_v6 = vcombine.low %v5537_v23, %v5541_v29 }
0x2637   : > { %v5669_v16 = vld [vmem:[%s15435_s10 + $0x1d60] sm:$0xff] }
0x2638   : > { %v13787_v59 = vcombine.high %v5665_v31, %v5669_v16  ;;  %v5529_v39 = vld [vmem:[%s15435_s10 + $0x1900] sm:$0xff]  ;;  %11299 = vmatpush1.bf16.msra.mxu1 %v13794_v19  ;;  %11257 = vmatprep.subr.bf16.mxu0 %v13659_v60  ;;  %v13786_v33 = vcombine.low %v5665_v31, %v5669_v16 }
0x2639   : > { %v5533_v41 = vld [vmem:[%s15435_s10 + $0x1920] sm:$0xff]  ;;  %11258 = vmatpush1.bf16.msra.mxu0 %v13658_v6 }
0x263a   : > { %v5657_v51 = vld [vmem:[%s15435_s10 + $0x1d00] sm:$0xff]  ;;  %v13651_v44 = vcombine.high %v5529_v39, %v5533_v41  ;;  %11300 = vmatprep.subr.bf16.mxu1 %v13787_v59  ;;  %v13650_v4 = vcombine.low %v5529_v39, %v5533_v41 }
0x263b   : > { %v5661_v40 = vld [vmem:[%s15435_s10 + $0x1d20] sm:$0xff] }
0x263c   : > { %v13779_v45 = vcombine.high %v5657_v51, %v5661_v40  ;;  %v5521_v48 = vld [vmem:[%s15435_s10 + $0x18c0] sm:$0xff]  ;;  %11301 = vmatpush1.bf16.msra.mxu1 %v13786_v33  ;;  %11259 = vmatprep.subr.bf16.mxu0 %v13651_v44  ;;  %v13778_v46 = vcombine.low %v5657_v51, %v5661_v40 }
0x263d   : > { %v5525_v55 = vld [vmem:[%s15435_s10 + $0x18e0] sm:$0xff]  ;;  %11260 = vmatpush1.bf16.msra.mxu0 %v13650_v4 }
0x263e   : > { %v5649_v32 = vld [vmem:[%s15435_s10 + $0x1cc0] sm:$0xff]  ;;  %v13643_v49 = vcombine.high %v5521_v48, %v5525_v55  ;;  %11302 = vmatprep.subr.bf16.mxu1 %v13779_v45  ;;  %v13642_v2 = vcombine.low %v5521_v48, %v5525_v55 }
0x263f   : > { %v5653_v61 = vld [vmem:[%s15435_s10 + $0x1ce0] sm:$0xff] }
0x2640   : > { %v13771_v0 = vcombine.high %v5649_v32, %v5653_v61  ;;  %v5513_v22 = vld [vmem:[%s15435_s10 + $0x1880] sm:$0xff]  ;;  %11303 = vmatpush1.bf16.msra.mxu1 %v13778_v46  ;;  %11261 = vmatprep.subr.bf16.mxu0 %v13643_v49  ;;  %v13770_v1 = vcombine.low %v5649_v32, %v5653_v61 }
0x2641   : > { %v5517_v14 = vld [vmem:[%s15435_s10 + $0x18a0] sm:$0xff]  ;;  %11262 = vmatpush1.bf16.msra.mxu0 %v13642_v2 }
0x2642   : > { %v5641_v12 = vld [vmem:[%s15435_s10 + $0x1c80] sm:$0xff]  ;;  %v13635_v7 = vcombine.high %v5513_v22, %v5517_v14  ;;  %11304 = vmatprep.subr.bf16.mxu1 %v13771_v0  ;;  %v13634_v3 = vcombine.low %v5513_v22, %v5517_v14 }
0x2643   : > { %v5645_v54 = vld [vmem:[%s15435_s10 + $0x1ca0] sm:$0xff] }
0x2644   : > { %v13763_v15 = vcombine.high %v5641_v12, %v5645_v54  ;;  %v5505_v37 = vld [vmem:[%s15435_s10 + $0x1840] sm:$0xff]  ;;  %11305 = vmatpush1.bf16.msra.mxu1 %v13770_v1  ;;  %11263 = vmatprep.subr.bf16.mxu0 %v13635_v7  ;;  %v13762_v5 = vcombine.low %v5641_v12, %v5645_v54 }
0x2645   : > { %v5509_v62 = vld [vmem:[%s15435_s10 + $0x1860] sm:$0xff]  ;;  %11264 = vmatpush1.bf16.msra.mxu0 %v13634_v3 }
0x2646   : > { %v5633_v52 = vld [vmem:[%s15435_s10 + $0x1c40] sm:$0xff]  ;;  %v13627_v36 = vcombine.high %v5505_v37, %v5509_v62  ;;  %11306 = vmatprep.subr.bf16.mxu1 %v13763_v15  ;;  %v13626_v9 = vcombine.low %v5505_v37, %v5509_v62 }
0x2647   : > { %v5637_v42 = vld [vmem:[%s15435_s10 + $0x1c60] sm:$0xff] }
0x2648   : > { %v13755_v43 = vcombine.high %v5633_v52, %v5637_v42  ;;  %v5497_v50 = vld [vmem:[%s15435_s10 + $0x1800] sm:$0xff]  ;;  %11307 = vmatpush1.bf16.msra.mxu1 %v13762_v5  ;;  %11265 = vmatprep.subr.bf16.mxu0 %v13627_v36  ;;  %v13754_v18 = vcombine.low %v5633_v52, %v5637_v42 }
0x2649   : > { %v5501_v8 = vld [vmem:[%s15435_s10 + $0x1820] sm:$0xff]  ;;  %11266 = vmatpush1.bf16.msra.mxu0 %v13626_v9  ;;  %v5755_v9 = vlaneseq }
0x264a   : > { %v5625_v13 = vld [vmem:[%s15435_s10 + $0x1c00] sm:$0xff]  ;;  %v13619_v21 = vcombine.high %v5497_v50, %v5501_v8  ;;  %11308 = vmatprep.subr.bf16.mxu1 %v13755_v43  ;;  %v13618_v25 = vcombine.low %v5497_v50, %v5501_v8 }
0x264b   : > { %v5629_v10 = vld [vmem:[%s15435_s10 + $0x1c20] sm:$0xff] }
0x264c   : > { %v13747_v11 = vcombine.high %v5625_v13, %v5629_v10  ;;  %v5617_v34 = vld [vmem:[%s15435_s10 + $0x1bc0] sm:$0xff]  ;;  %11309 = vmatpush1.bf16.msra.mxu1 %v13754_v18  ;;  %11267 = vmatprep.subr.bf16.mxu0 %v13619_v21  ;;  %v13746_v53 = vcombine.low %v5625_v13, %v5629_v10 }
0x264d   : > { %v5621_v20 = vld [vmem:[%s15435_s10 + $0x1be0] sm:$0xff]  ;;  %11268 = vmatpush1.bf16.msra.mxu0 %v13618_v25 }
0x264e   : > { %v5745_v58 = vld [vmem:[%s15435_s10 + $0x1fc0] sm:$0xff]  ;;  %v13739_v28 = vcombine.high %v5617_v34, %v5621_v20  ;;  %11310 = vmatprep.subr.bf16.mxu1 %v13747_v11  ;;  %v13738_v16 = vcombine.low %v5617_v34, %v5621_v20 }
0x264f   : > { %v5749_v63 = vld [vmem:[%s15435_s10 + $0x1fe0] sm:$0xff] }
0x2650   : > { %v13867_v35 = vcombine.high %v5745_v58, %v5749_v63  ;;  %v5609_v23 = vld [vmem:[%s15435_s10 + $0x1b80] sm:$0xff]  ;;  %11311 = vmatpush1.bf16.msra.mxu1 %v13746_v53  ;;  %11269 = vmatprep.subr.bf16.mxu0 %v13739_v28  ;;  %v13866_v47 = vcombine.low %v5745_v58, %v5749_v63  ;;  %v16495_v53 = vshrl.u32 %v5755_v9, 7 }
0x2651   : > { %v5613_v29 = vld [vmem:[%s15435_s10 + $0x1ba0] sm:$0xff]  ;;  %11270 = vmatpush2.bf16.msra.mxu0 %v13738_v16  ;;  %v4918_v16 = vld [vmem:[%s15435_s10 + $0x5e8] sm:$0xff] }
0x2652   : > { %v5737_v30 = vld [vmem:[%s15435_s10 + $0x1f80] sm:$0xff]  ;;  %v13731_v19 = vcombine.high %v5609_v23, %v5613_v29  ;;  %11312 = vmatprep.subr.bf16.mxu1 %v13867_v35  ;;  %v13730_v40 = vcombine.low %v5609_v23, %v5613_v29  ;;  %v4786_v29 = vld [vmem:[%s15435_s10 + $0x1c8] sm:$0xff] }
0x2653   : > { %v5741_v31 = vld [vmem:[%s15435_s10 + $0x1fa0] sm:$0xff] }
0x2654   : > { %v13859_v60 = vcombine.high %v5737_v30, %v5741_v31  ;;  %v5601_v59 = vld [vmem:[%s15435_s10 + $0x1b40] sm:$0xff]  ;;  %11313 = vmatpush2.bf16.msra.mxu1 %v13866_v47  ;;  %11271 = vmatprep.subr.bf16.mxu0 %v13731_v19  ;;  %v13858_v6 = vcombine.low %v5737_v30, %v5741_v31  ;;  %v4790_v30 = vld [vmem:[%s15435_s10 + $0x1e8] sm:$0xff]  ;;  %v5757_v19 = vsub.s32 0, %v16495_v53 }
0x2655   : > { %v5605_v39 = vld [vmem:[%s15435_s10 + $0x1b60] sm:$0xff]  ;;  %11272 = vmatpush2.bf16.msra.mxu0 %v13730_v40  ;;  %v4914_v31 = vld [vmem:[%s15435_s10 + $0x5c8] sm:$0xff] }
0x2656   : > { %v5729_v41 = vld [vmem:[%s15435_s10 + $0x1f40] sm:$0xff]  ;;  %v13723_v33 = vcombine.high %v5601_v59, %v5605_v39  ;;  %11314 = vmatprep.subr.bf16.mxu1 %v13859_v60  ;;  %v13722_v61 = vcombine.low %v5601_v59, %v5605_v39  ;;  %v12909_v39 = vcombine.high %v4786_v29, %v4790_v30  ;;  %v4778_v40 = vld [vmem:[%s15435_s10 + $0x188] sm:$0xff] }
0x2657   : > { %v5733_v51 = vld [vmem:[%s15435_s10 + $0x1f60] sm:$0xff] }
0x2658   : > { %v13851_v44 = vcombine.high %v5729_v41, %v5733_v51  ;;  %v5593_v45 = vld [vmem:[%s15435_s10 + $0x1b00] sm:$0xff]  ;;  %11315 = vmatpush2.bf16.msra.mxu1 %v13858_v6  ;;  %11273 = vmatprep.subr.bf16.mxu0 %v13723_v33  ;;  %v13850_v4 = vcombine.low %v5729_v41, %v5733_v51  ;;  %v13037_v41 = vcombine.high %v4914_v31, %v4918_v16  ;;  %v5761_v51 = vsub.s32 1, %v16495_v53  ;;  %v4782_v6 = vld [vmem:[%s15435_s10 + $0x1a8] sm:$0xff] }
0x2659   : > { %v5597_v48 = vld [vmem:[%s15435_s10 + $0x1b20] sm:$0xff]  ;;  %11274 = vmatpush2.bf16.msra.mxu0 %v13722_v61  ;;  %v13036_v61 = vcombine.low %v4914_v31, %v4918_v16 }
0x265a   : > { %v5721_v55 = vld [vmem:[%s15435_s10 + $0x1f00] sm:$0xff]  ;;  %v13715_v46 = vcombine.high %v5593_v45, %v5597_v48  ;;  %11316 = vmatprep.subr.bf16.mxu1 %v13851_v44  ;;  %v13714_v54 = vcombine.low %v5593_v45, %v5597_v48  ;;  %v4906_v44 = vld [vmem:[%s15435_s10 + $0x588] sm:$0xff] }
0x265b   : > { %v5725_v32 = vld [vmem:[%s15435_s10 + $0x1f20] sm:$0xff]  ;;  %v4910_v45 = vld [vmem:[%s15435_s10 + $0x5a8] sm:$0xff] }
0x265c   : > { %v13843_v49 = vcombine.high %v5721_v55, %v5725_v32  ;;  %v5585_v0 = vld [vmem:[%s15435_s10 + $0x1ac0] sm:$0xff]  ;;  %11317 = vmatpush2.bf16.msra.mxu1 %v13850_v4  ;;  %11275 = vmatprep.subr.bf16.mxu0 %v13715_v46  ;;  %v13842_v2 = vcombine.low %v5721_v55, %v5725_v32  ;;  %v16512_v55 = vcombine.low %v16430_v26, %v16432_v27 }
0x265d   : > { %v5589_v22 = vld [vmem:[%s15435_s10 + $0x1ae0] sm:$0xff]  ;;  %11276 = vmatpush2.bf16.msra.mxu0 %v13714_v54  ;;  %v12908_v32 = vcombine.low %v4786_v29, %v4790_v30  ;;  %v12901_v4 = vcombine.high %v4778_v40, %v4782_v6  ;;  %v4902_v54 = vld [vmem:[%s15435_s10 + $0x568] sm:$0xff]  ;;  %v12900_v27 = vcombine.low %v4778_v40, %v4782_v6 }
0x265e   : > { %v5713_v14 = vld [vmem:[%s15435_s10 + $0x1ec0] sm:$0xff]  ;;  %v13707_v1 = vcombine.high %v5585_v0, %v5589_v22  ;;  %11318 = vmatprep.subr.bf16.mxu1 %v13843_v49  ;;  %v13706_v42 = vcombine.low %v5585_v0, %v5589_v22  ;;  %v13029_v49 = vcombine.high %v4906_v44, %v4910_v45  ;;  %v4770_v0 = vld [vmem:[%s15435_s10 + $0x148] sm:$0xff] }
0x265f   : > { %v5717_v12 = vld [vmem:[%s15435_s10 + $0x1ee0] sm:$0xff]  ;;  %v4774_v22 = vld [vmem:[%s15435_s10 + $0x168] sm:$0xff] }
0x2660   : > { %v13835_v7 = vcombine.high %v5713_v14, %v5717_v12  ;;  %v5577_v15 = vld [vmem:[%s15435_s10 + $0x1a80] sm:$0xff]  ;;  %11319 = vmatpush2.bf16.msra.mxu1 %v13842_v2  ;;  %11277 = vmatprep.subr.bf16.mxu0 %v13707_v1  ;;  %v13834_v3 = vcombine.low %v5713_v14, %v5717_v12  ;;  %v4898_v12 = vld [vmem:[%s15435_s10 + $0x548] sm:$0xff] }
0x2661   : > { %v5581_v37 = vld [vmem:[%s15435_s10 + $0x1aa0] sm:$0xff]  ;;  %11278 = vmatpush2.bf16.msra.mxu0 %v13706_v42  ;;  %v13021_v42 = vcombine.high %v4898_v12, %v4902_v54  ;;  %v4886_v29 = vld [vmem:[%s15435_s10 + $0x4e8] sm:$0xff] }
0x2662   : > { %v5705_v62 = vld [vmem:[%s15435_s10 + $0x1e80] sm:$0xff]  ;;  %v13699_v5 = vcombine.high %v5577_v15, %v5581_v37  ;;  %11320 = vmatprep.subr.bf16.mxu1 %v13835_v7  ;;  %v13698_v10 = vcombine.low %v5577_v15, %v5581_v37  ;;  %v13028_v7 = vcombine.low %v4906_v44, %v4910_v45  ;;  %v12893_v15 = vcombine.high %v4770_v0, %v4774_v22  ;;  %v4878_v40 = vld [vmem:[%s15435_s10 + $0x4a8] sm:$0xff] }
0x2663   : > { %v5709_v52 = vld [vmem:[%s15435_s10 + $0x1ea0] sm:$0xff] }
0x2664   : > { %v13827_v36 = vcombine.high %v5705_v62, %v5709_v52  ;;  %v5569_v43 = vld [vmem:[%s15435_s10 + $0x1a40] sm:$0xff]  ;;  %11321 = vmatpush2.bf16.msra.mxu1 %v13834_v3  ;;  %11279 = vmatprep.subr.bf16.mxu0 %v13699_v5  ;;  %v13826_v18 = vcombine.low %v5705_v62, %v5709_v52  ;;  %v4762_v3 = vld [vmem:[%s15435_s10 + $0x108] sm:$0xff] }
0x2665   : > { %v5573_v50 = vld [vmem:[%s15435_s10 + $0x1a60] sm:$0xff]  ;;  %11280 = vmatpush2.bf16.msra.mxu0 %v13698_v10  ;;  %v4766_v5 = vld [vmem:[%s15435_s10 + $0x128] sm:$0xff] }
0x2666   : > { %v5697_v8 = vld [vmem:[%s15435_s10 + $0x1e40] sm:$0xff]  ;;  %v13691_v21 = vcombine.high %v5569_v43, %v5573_v50  ;;  %11322 = vmatprep.subr.bf16.mxu1 %v13827_v36  ;;  %v13690_v25 = vcombine.low %v5569_v43, %v5573_v50  ;;  %v4890_v50 = vld [vmem:[%s15435_s10 + $0x508] sm:$0xff]  ;;  %v12884_v31 = vcombine.low %v4762_v3, %v4766_v5 }
0x2667   : > { %v5701_v13 = vld [vmem:[%s15435_s10 + $0x1e60] sm:$0xff] }
0x2668   : > { %v13819_v11 = vcombine.high %v5697_v8, %v5701_v13  ;;  %v5561_v34 = vld [vmem:[%s15435_s10 + $0x1a00] sm:$0xff]  ;;  %11323 = vmatpush2.bf16.msra.mxu1 %v13826_v18  ;;  %11281 = vmatprep.subr.bf16.mxu0 %v13691_v21  ;;  %v13818_v28 = vcombine.low %v5697_v8, %v5701_v13  ;;  %v4894_v8 = vld [vmem:[%s15435_s10 + $0x528] sm:$0xff]  ;;  %v12892_v18 = vcombine.low %v4770_v0, %v4774_v22 }
0x2669   : > { %v5565_v20 = vld [vmem:[%s15435_s10 + $0x1a20] sm:$0xff]  ;;  %11282 = vmatpush2.bf16.msra.mxu0 %v13690_v25  ;;  %v4754_v25 = vld [vmem:[%s15435_s10 + $0xc8] sm:$0xff]  ;;  %v13012_v16 = vcombine.low %v4890_v50, %v4894_v8 }
0x266a   : > { %v5689_v58 = vld [vmem:[%s15435_s10 + $0x1e00] sm:$0xff]  ;;  %v13683_v35 = vcombine.high %v5561_v34, %v5565_v20  ;;  %11324 = vmatprep.subr.bf16.mxu1 %v13819_v11  ;;  %v13682_v47 = vcombine.low %v5561_v34, %v5565_v20  ;;  %v13020_v11 = vcombine.low %v4898_v12, %v4902_v54  ;;  %v12885_v34 = vcombine.high %v4762_v3, %v4766_v5  ;;  %v4734_v12 = vld [vmem:[%s15435_s10 + $0x28] sm:$0xff] }
0x266b   : > { %v5693_v63 = vld [vmem:[%s15435_s10 + $0x1e20] sm:$0xff]  ;;  %v4858_v54 = vld [vmem:[%s15435_s10 + $0x408] sm:$0xff] }
0x266c   : > { %v13811_v23 = vcombine.high %v5689_v58, %v5693_v63  ;;  %11325 = vmatpush2.bf16.msra.mxu1 %v13818_v28  ;;  %11283 = vmatprep.subr.bf16.mxu0 %v13683_v35  ;;  %v13810_v60 = vcombine.low %v5689_v58, %v5693_v63  ;;  %v5753_v59 = vld [vmem:[%s15441_s20] sm:$0xff]  ;;  %v13013_v63 = vcombine.high %v4890_v50, %v4894_v8 }
0x266d   : > { %v14660_v33 = vld [vmem:[#allocation2 + $0x8] ss:$112 sps:$4 sm:$0xff]   ;;  %11284 = vmatpush2.bf16.msra.mxu0 %v13682_v47  ;;  %v5758_v48 = vrot.slane %v5753_v59, %v5757_v19  ;;  %v5762_v46 = vrot.slane %v5753_v59, %v5761_v51  ;;  %v11072_v26 = vpop.f32.mrf.mxu1  ;;  %v14661_v36 = vld [vmem:[#allocation2 + $0x34] ss:$16 sps:$4 sm:$0xff]  }
0x266e   : > { %11326 = vmatprep.subr.bf16.mxu1 %v13811_v23  ;;  %11339 = vmatprep.subr.bf16.mxu0 %v12909_v39  ;;  %v11029_v14 = vpop.f32.mrf.mxu0  ;;  %v4758_v28 = vld [vmem:[%s15435_s10 + $0xe8] sm:$0xff] }
0x266f   : > { %v11030_v2 = vadd.f32 %v11029_v14, %v5758_v48  ;;  %v11074_v52 = vpop.f32.mrf.mxu1  ;;  %v4882_v23 = vld [vmem:[%s15435_s10 + $0x4c8] sm:$0xff]  ;;  %v12877_v47 = vcombine.high %v4754_v25, %v4758_v28  ;;  %v12876_v6 = vcombine.low %v4754_v25, %v4758_v28 }
0x2670   : > { %11327 = vmatpush2.bf16.msra.mxu1 %v13810_v60  ;;  %11286 = vmatmul.mubr.bf16.vlgmr.msra.gmra.mxu0 %v14660_v33  ;;  %v11031_v1 = vpop.f32.mrf.mxu0  ;;  %v13005_v60 = vcombine.high %v4882_v23, %v4886_v29  ;;  %v4746_v59 = vld [vmem:[%s15435_s10 + $0x88] sm:$0xff]  ;;  %v13004_v33 = vcombine.low %v4882_v23, %v4886_v29 }
0x2671   : > { %11382 = vmatprep.subr.bf16.mxu1 %v13037_v41  ;;  %11340 = vmatpush1.bf16.msra.mxu0 %v12908_v32  ;;  %v16521_v37 = vadd.f32 %v11072_v26, %v11030_v2  ;;  %v11032_v62 = vadd.f32 %v11031_v1, %v5762_v46  ;;  %v11076_v9 = vpop.f32.mrf.mxu1  ;;  %v4750_v39 = vld [vmem:[%s15435_s10 + $0xa8] sm:$0xff] }
0x2672   : > { %11341 = vmatprep.subr.bf16.mxu0 %v12901_v4  ;;  %11371 = vmatprep.mubr.bf16.mxu0 %v14661_v36  ;;  %v11033_v43 = vpop.f32.mrf.mxu0  ;;  %v4874_v41 = vld [vmem:[%s15435_s10 + $0x488] sm:$0xff]  ;;  %v12869_v44 = vcombine.high %v4746_v59, %v4750_v39 }
0x2673   : > { %11329 = vmatmul.mubr.bf16.vlgmr.msra.gmra.mxu1 %v16512_v55  ;;  %v16528_v13 = vadd.f32 %v11074_v52, %v11032_v62  ;;  %v11034_v10 = vadd.f32 %v11033_v43, %v5758_v48  ;;  %v11078_v35 = vpop.f32.mrf.mxu1  ;;  %v12997_v45 = vcombine.high %v4874_v41, %v4878_v40  ;;  %v4738_v48 = vld [vmem:[%s15435_s10 + $0x48] sm:$0xff] }
0x2674   : > { %11383 = vmatpush1.bf16.msra.mxu1 %v13036_v61  ;;  %11414 = vmatprep.mubr.bf16.mxu1 %v16240_v57  ;;  %v11035_v21 = vpop.f32.mrf.mxu0  ;;  %v4742_v32 = vld [vmem:[%s15435_s10 + $0x68] sm:$0xff] }
0x2675   : > { %11384 = vmatprep.subr.bf16.mxu1 %v13029_v49  ;;  %11342 = vmatpush1.bf16.msra.mxu0 %v12900_v27  ;;  %v16530_v20 = vadd.f32 %v11076_v9, %v11034_v10  ;;  %v11036_v58 = vadd.f32 %v11035_v21, %v5762_v46  ;;  %v4866_v61 = vld [vmem:[%s15435_s10 + $0x448] sm:$0xff]  ;;  %v12868_v46 = vcombine.low %v4746_v59, %v4750_v39 }
0x2676   : > { %11343 = vmatprep.subr.bf16.mxu0 %v12893_v15  ;;  %v4870_v4 = vld [vmem:[%s15435_s10 + $0x468] sm:$0xff]  ;;  %v12996_v49 = vcombine.low %v4874_v41, %v4878_v40  ;;  %v12861_v0 = vcombine.high %v4738_v48, %v4742_v32  ;;  %v12860_v26 = vcombine.low %v4738_v48, %v4742_v32 }
0x2677   : > { %v16536_v30 = vadd.f32 %v11078_v35, %v11036_v58  ;;  %v12989_v22 = vcombine.high %v4866_v61, %v4870_v4  ;;  %v4730_v14 = vld [vmem:[%s15435_s10 + $0x8] sm:$0xff]  ;;  %v12988_v27 = vcombine.low %v4866_v61, %v4870_v4 }
0x2678   : > { %11385 = vmatpush1.bf16.msra.mxu1 %v13028_v7  ;;  %v4862_v2 = vld [vmem:[%s15435_s10 + $0x428] sm:$0xff]  ;;  %v12853_v1 = vcombine.high %v4730_v14, %v4734_v12  ;;  %v12852_v3 = vcombine.low %v4730_v14, %v4734_v12 }
0x2679   : > { %11386 = vmatprep.subr.bf16.mxu1 %v13021_v42  ;;  %11344 = vmatpush1.bf16.msra.mxu0 %v12892_v18  ;;  %v12981_v7 = vcombine.high %v4858_v54, %v4862_v2  ;;  %v4850_v15 = vld [vmem:[%s15435_s10 + $0x3c8] sm:$0xff]  ;;  %v12980_v5 = vcombine.low %v4858_v54, %v4862_v2 }
0x267a   : > { %11345 = vmatprep.subr.bf16.mxu0 %v12885_v34  ;;  %v4854_v62 = vld [vmem:[%s15435_s10 + $0x3e8] sm:$0xff] }
0x267b   : > { %v4978_v52 = vld [vmem:[%s15435_s10 + $0x7c8] sm:$0xff]  ;;  %v12973_v36 = vcombine.high %v4850_v15, %v4854_v62  ;;  %v12972_v18 = vcombine.low %v4850_v15, %v4854_v62 }
0x267c   : > { %11387 = vmatpush1.bf16.msra.mxu1 %v13020_v11  ;;  %v4982_v42 = vld [vmem:[%s15435_s10 + $0x7e8] sm:$0xff] }
0x267d   : > { %11388 = vmatprep.subr.bf16.mxu1 %v13013_v63  ;;  %11346 = vmatpush1.bf16.msra.mxu0 %v12884_v31  ;;  %v13101_v43 = vcombine.high %v4978_v52, %v4982_v42  ;;  %v4842_v50 = vld [vmem:[%s15435_s10 + $0x388] sm:$0xff]  ;;  %v13100_v21 = vcombine.low %v4978_v52, %v4982_v42 }
0x267e   : > { %11347 = vmatprep.subr.bf16.mxu0 %v12877_v47  ;;  %v4846_v8 = vld [vmem:[%s15435_s10 + $0x3a8] sm:$0xff] }
0x267f   : > { %v4970_v10 = vld [vmem:[%s15435_s10 + $0x788] sm:$0xff]  ;;  %v12965_v11 = vcombine.high %v4842_v50, %v4846_v8  ;;  %v12964_v35 = vcombine.low %v4842_v50, %v4846_v8 }
0x2680   : > { %11389 = vmatpush1.bf16.msra.mxu1 %v13012_v16  ;;  %v4974_v9 = vld [vmem:[%s15435_s10 + $0x7a8] sm:$0xff] }
0x2681   : > { %11390 = vmatprep.subr.bf16.mxu1 %v13005_v60  ;;  %11348 = vmatpush1.bf16.msra.mxu0 %v12876_v6  ;;  %v13093_v34 = vcombine.high %v4970_v10, %v4974_v9  ;;  %v4834_v58 = vld [vmem:[%s15435_s10 + $0x348] sm:$0xff]  ;;  %v13092_v23 = vcombine.low %v4970_v10, %v4974_v9 }
0x2682   : > { %11349 = vmatprep.subr.bf16.mxu0 %v12869_v44  ;;  %v4838_v63 = vld [vmem:[%s15435_s10 + $0x368] sm:$0xff] }
0x2683   : > { %v4962_v25 = vld [vmem:[%s15435_s10 + $0x748] sm:$0xff]  ;;  %v12957_v29 = vcombine.high %v4834_v58, %v4838_v63  ;;  %v12956_v39 = vcombine.low %v4834_v58, %v4838_v63 }
0x2684   : > { %11391 = vmatpush1.bf16.msra.mxu1 %v13004_v33  ;;  %v4966_v28 = vld [vmem:[%s15435_s10 + $0x768] sm:$0xff] }
0x2685   : > { %11392 = vmatprep.subr.bf16.mxu1 %v12997_v45  ;;  %11350 = vmatpush1.bf16.msra.mxu0 %v12868_v46  ;;  %v13085_v31 = vcombine.high %v4962_v25, %v4966_v28  ;;  %v4826_v16 = vld [vmem:[%s15435_s10 + $0x308] sm:$0xff]  ;;  %v13084_v41 = vcombine.low %v4962_v25, %v4966_v28 }
0x2686   : > { %11351 = vmatprep.subr.bf16.mxu0 %v12861_v0  ;;  %v4830_v47 = vld [vmem:[%s15435_s10 + $0x328] sm:$0xff] }
0x2687   : > { %v4954_v60 = vld [vmem:[%s15435_s10 + $0x708] sm:$0xff]  ;;  %v12949_v40 = vcombine.high %v4826_v16, %v4830_v47  ;;  %v12948_v32 = vcombine.low %v4826_v16, %v4830_v47 }
0x2688   : > { %11393 = vmatpush1.bf16.msra.mxu1 %v12996_v49  ;;  %v4958_v59 = vld [vmem:[%s15435_s10 + $0x728] sm:$0xff] }
0x2689   : > { %11394 = vmatprep.subr.bf16.mxu1 %v12989_v22  ;;  %11352 = vmatpush1.bf16.msra.mxu0 %v12860_v26  ;;  %v13077_v6 = vcombine.high %v4954_v60, %v4958_v59  ;;  %v4818_v33 = vld [vmem:[%s15435_s10 + $0x2c8] sm:$0xff]  ;;  %v13076_v61 = vcombine.low %v4954_v60, %v4958_v59 }
0x268a   : > { %11353 = vmatprep.subr.bf16.mxu0 %v12853_v1  ;;  %v4822_v44 = vld [vmem:[%s15435_s10 + $0x2e8] sm:$0xff] }
0x268b   : > { %v4946_v45 = vld [vmem:[%s15435_s10 + $0x6c8] sm:$0xff]  ;;  %v12941_v4 = vcombine.high %v4818_v33, %v4822_v44  ;;  %v12940_v12 = vcombine.low %v4818_v33, %v4822_v44 }
0x268c   : > { %11395 = vmatpush1.bf16.msra.mxu1 %v12988_v27  ;;  %v4950_v48 = vld [vmem:[%s15435_s10 + $0x6e8] sm:$0xff] }
0x268d   : > { %11396 = vmatprep.subr.bf16.mxu1 %v12981_v7  ;;  %11354 = vmatpush1.bf16.msra.mxu0 %v12852_v3  ;;  %v13069_v46 = vcombine.high %v4946_v45, %v4950_v48  ;;  %v4810_v49 = vld [vmem:[%s15435_s10 + $0x288] sm:$0xff]  ;;  %v13068_v54 = vcombine.low %v4946_v45, %v4950_v48 }
0x268e   : > { %11355 = vmatprep.subr.bf16.mxu0 %v12973_v36  ;;  %v4814_v0 = vld [vmem:[%s15435_s10 + $0x2a8] sm:$0xff] }
0x268f   : > { %v4938_v22 = vld [vmem:[%s15435_s10 + $0x688] sm:$0xff]  ;;  %v12933_v2 = vcombine.high %v4810_v49, %v4814_v0  ;;  %v12932_v62 = vcombine.low %v4810_v49, %v4814_v0 }
0x2690   : > { %11397 = vmatpush1.bf16.msra.mxu1 %v12980_v5  ;;  %v4942_v14 = vld [vmem:[%s15435_s10 + $0x6a8] sm:$0xff] }
0x2691   : > { %11398 = vmatprep.subr.bf16.mxu1 %v13101_v43  ;;  %11356 = vmatpush2.bf16.msra.mxu0 %v12972_v18  ;;  %v13061_v26 = vcombine.high %v4938_v22, %v4942_v14  ;;  %v4802_v27 = vld [vmem:[%s15435_s10 + $0x248] sm:$0xff]  ;;  %v13060_v52 = vcombine.low %v4938_v22, %v4942_v14 }
0x2692   : > { %11357 = vmatprep.subr.bf16.mxu0 %v12965_v11  ;;  %v4806_v1 = vld [vmem:[%s15435_s10 + $0x268] sm:$0xff] }
0x2693   : > { %v4930_v7 = vld [vmem:[%s15435_s10 + $0x648] sm:$0xff]  ;;  %v12925_v42 = vcombine.high %v4802_v27, %v4806_v1  ;;  %v12924_v8 = vcombine.low %v4802_v27, %v4806_v1 }
0x2694   : > { %11399 = vmatpush2.bf16.msra.mxu1 %v13100_v21  ;;  %v4934_v15 = vld [vmem:[%s15435_s10 + $0x668] sm:$0xff] }
0x2695   : > { %11400 = vmatprep.subr.bf16.mxu1 %v13093_v34  ;;  %11358 = vmatpush2.bf16.msra.mxu0 %v12964_v35  ;;  %v13053_v3 = vcombine.high %v4930_v7, %v4934_v15  ;;  %v4794_v5 = vld [vmem:[%s15435_s10 + $0x208] sm:$0xff]  ;;  %v13052_v10 = vcombine.low %v4930_v7, %v4934_v15 }
0x2696   : > { %11359 = vmatprep.subr.bf16.mxu0 %v12957_v29  ;;  %v4798_v36 = vld [vmem:[%s15435_s10 + $0x228] sm:$0xff] }
0x2697   : > { %v4922_v43 = vld [vmem:[%s15435_s10 + $0x608] sm:$0xff]  ;;  %v12917_v9 = vcombine.high %v4794_v5, %v4798_v36  ;;  %v12916_v63 = vcombine.low %v4794_v5, %v4798_v36 }
0x2698   : > { %11401 = vmatpush2.bf16.msra.mxu1 %v13092_v23  ;;  %v4926_v50 = vld [vmem:[%s15435_s10 + $0x628] sm:$0xff] }
0x2699   : > { %11402 = vmatprep.subr.bf16.mxu1 %v13085_v31  ;;  %11360 = vmatpush2.bf16.msra.mxu0 %v12956_v39  ;;  %v13045_v18 = vcombine.high %v4922_v43, %v4926_v50  ;;  %v5042_v21 = vld [vmem:[%s15435_s10 + $0x9c8] sm:$0xff]  ;;  %v13044_v25 = vcombine.low %v4922_v43, %v4926_v50 }
0x269a   : > { %11361 = vmatprep.subr.bf16.mxu0 %v12949_v40  ;;  %v5046_v11 = vld [vmem:[%s15435_s10 + $0x9e8] sm:$0xff] }
0x269b   : > { %v5170_v34 = vld [vmem:[%s15435_s10 + $0xdc8] sm:$0xff]  ;;  %v13165_v28 = vcombine.high %v5042_v21, %v5046_v11  ;;  %v13164_v47 = vcombine.low %v5042_v21, %v5046_v11 }
0x269c   : > { %11403 = vmatpush2.bf16.msra.mxu1 %v13084_v41  ;;  %v5174_v58 = vld [vmem:[%s15435_s10 + $0xde8] sm:$0xff] }
0x269d   : > { %11404 = vmatprep.subr.bf16.mxu1 %v13077_v6  ;;  %11362 = vmatpush2.bf16.msra.mxu0 %v12948_v32  ;;  %v13293_v35 = vcombine.high %v5170_v34, %v5174_v58  ;;  %v5034_v23 = vld [vmem:[%s15435_s10 + $0x988] sm:$0xff]  ;;  %v13292_v60 = vcombine.low %v5170_v34, %v5174_v58 }
0x269e   : > { %11363 = vmatprep.subr.bf16.mxu0 %v12941_v4  ;;  %v5038_v29 = vld [vmem:[%s15435_s10 + $0x9a8] sm:$0xff] }
0x269f   : > { %v5162_v31 = vld [vmem:[%s15435_s10 + $0xd88] sm:$0xff]  ;;  %v13157_v59 = vcombine.high %v5034_v23, %v5038_v29 }
0x26a0   : > { %11405 = vmatpush2.bf16.msra.mxu1 %v13076_v61  ;;  %v5166_v16 = vld [vmem:[%s15435_s10 + $0xda8] sm:$0xff]  ;;  %v13156_v61 = vcombine.low %v5034_v23, %v5038_v29 }
0x26a1   : > { %11406 = vmatprep.subr.bf16.mxu1 %v13069_v46  ;;  %11364 = vmatpush2.bf16.msra.mxu0 %v12940_v12  ;;  %v13285_v39 = vcombine.high %v5162_v31, %v5166_v16  ;;  %v5026_v41 = vld [vmem:[%s15435_s10 + $0x948] sm:$0xff]  ;;  %v13284_v46 = vcombine.low %v5162_v31, %v5166_v16 }
0x26a2   : > { %11365 = vmatprep.subr.bf16.mxu0 %v12933_v2  ;;  %v5030_v40 = vld [vmem:[%s15435_s10 + $0x968] sm:$0xff]  ;;  %v14663_v2 = vld [vmem:[#allocation2 + $0x5c] ss:$-72 sps:$4 sm:$0xff]  }
0x26a3   : > { %v14662_v33 = vld [vmem:[#allocation2 + $0x30] ss:$16 sps:$4 sm:$0xff]   ;;  %v13149_v49 = vcombine.high %v5026_v41, %v5030_v40 }
0x26a4   : > { %11407 = vmatpush2.bf16.msra.mxu1 %v13068_v54  ;;  %v5154_v44 = vld [vmem:[%s15435_s10 + $0xd48] sm:$0xff] }
0x26a5   : > { %11408 = vmatprep.subr.bf16.mxu1 %v13061_v26  ;;  %11366 = vmatpush2.bf16.msra.mxu0 %v12932_v62  ;;  %v5158_v45 = vld [vmem:[%s15435_s10 + $0xd68] sm:$0xff]  ;;  %v13148_v62 = vcombine.low %v5026_v41, %v5030_v40 }
0x26a6   : > { %11367 = vmatprep.subr.bf16.mxu0 %v12925_v42  ;;  %v5018_v12 = vld [vmem:[%s15435_s10 + $0x908] sm:$0xff]  ;;  %v13276_v42 = vcombine.low %v5154_v44, %v5158_v45 }
0x26a7   : > { %v5022_v54 = vld [vmem:[%s15435_s10 + $0x928] sm:$0xff] }
0x26a8   : > { %11409 = vmatpush2.bf16.msra.mxu1 %v13060_v52  ;;  %v5146_v27 = vld [vmem:[%s15435_s10 + $0xd08] sm:$0xff]  ;;  %v13140_v21 = vcombine.low %v5018_v12, %v5022_v54 }
0x26a9   : > { %11410 = vmatprep.subr.bf16.mxu1 %v13053_v3  ;;  %11368 = vmatpush2.bf16.msra.mxu0 %v12924_v8  ;;  %v5150_v1 = vld [vmem:[%s15435_s10 + $0xd28] sm:$0xff]  ;;  %v13141_v3 = vcombine.high %v5018_v12, %v5022_v54 }
0x26aa   : > { %11369 = vmatprep.subr.bf16.mxu0 %v12917_v9  ;;  %v13269_v43 = vcombine.high %v5146_v27, %v5150_v1  ;;  %v5010_v50 = vld [vmem:[%s15435_s10 + $0x8c8] sm:$0xff]  ;;  %v13268_v11 = vcombine.low %v5146_v27, %v5150_v1 }
0x26ab   : > { %v5142_v9 = vld [vmem:[%s15435_s10 + $0xce8] sm:$0xff] }
0x26ac   : > { %11411 = vmatpush2.bf16.msra.mxu1 %v13052_v10  ;;  %v5138_v10 = vld [vmem:[%s15435_s10 + $0xcc8] sm:$0xff] }
0x26ad   : > { %11412 = vmatprep.subr.bf16.mxu1 %v13045_v18  ;;  %11370 = vmatpush2.bf16.msra.mxu0 %v12916_v63  ;;  %v13261_v34 = vcombine.high %v5138_v10, %v5142_v9  ;;  %v5002_v58 = vld [vmem:[%s15435_s10 + $0x888] sm:$0xff]  ;;  %v13260_v23 = vcombine.low %v5138_v10, %v5142_v9 }
0x26ae   : > { %11425 = vmatprep.subr.bf16.mxu0 %v13165_v28  ;;  %v11115_v6 = vpop.f32.mrf.mxu0  ;;  %v5006_v63 = vld [vmem:[%s15435_s10 + $0x8a8] sm:$0xff] }
0x26af   : > { %v11116_v48 = vadd.f32 %v11115_v6, %v16521_v37  ;;  %v11158_v32 = vpop.f32.mrf.mxu1  ;;  %v13277_v37 = vcombine.high %v5154_v44, %v5158_v45  ;;  %v5134_v28 = vld [vmem:[%s15435_s10 + $0xca8] sm:$0xff]  ;;  %v13125_v29 = vcombine.high %v5002_v58, %v5006_v63 }
0x26b0   : > { %11413 = vmatpush2.bf16.msra.mxu1 %v13044_v25  ;;  %11372 = vmatmul.mubr.bf16.vlgmr.msra.gmra.mxu0 %v14662_v33  ;;  %v11117_v4 = vpop.f32.mrf.mxu0  ;;  %v5130_v25 = vld [vmem:[%s15435_s10 + $0xc88] sm:$0xff] }
0x26b1   : > { %11468 = vmatprep.subr.bf16.mxu1 %v13293_v35  ;;  %11426 = vmatpush1.bf16.msra.mxu0 %v13164_v47  ;;  %v16596_v0 = vadd.f32 %v11158_v32, %v11116_v48  ;;  %v11118_v22 = vadd.f32 %v11117_v4, %v16528_v13  ;;  %v11160_v14 = vpop.f32.mrf.mxu1  ;;  %v13253_v31 = vcombine.high %v5130_v25, %v5134_v28  ;;  %v4994_v16 = vld [vmem:[%s15435_s10 + $0x848] sm:$0xff] }
0x26b2   : > { %11427 = vmatprep.subr.bf16.mxu0 %v13157_v59  ;;  %11457 = vmatprep.mubr.bf16.mxu0 %v14663_v2  ;;  %v11119_v26 = vpop.f32.mrf.mxu0  ;;  %v4998_v47 = vld [vmem:[%s15435_s10 + $0x868] sm:$0xff]  ;;  %v13252_v41 = vcombine.low %v5130_v25, %v5134_v28 }
0x26b3   : > { %11415 = vmatmul.mubr.bf16.vlgmr.msra.gmra.mxu1 %v16285_v56  ;;  %v16604_v7 = vadd.f32 %v11160_v14, %v11118_v22  ;;  %v11120_v15 = vadd.f32 %v11119_v26, %v16530_v20  ;;  %v11162_v13 = vpop.f32.mrf.mxu1  ;;  %v5014_v20 = vld [vmem:[%s15435_s10 + $0x8e8] sm:$0xff]  ;;  %v13117_v40 = vcombine.high %v4994_v16, %v4998_v47  ;;  %v13116_v32 = vcombine.low %v4994_v16, %v4998_v47 }
0x26b4   : > { %11469 = vmatpush1.bf16.msra.mxu1 %v13292_v60  ;;  %11500 = vmatprep.mubr.bf16.mxu1 %v16297_v17  ;;  %v11121_v52 = vpop.f32.mrf.mxu0  ;;  %v13132_v35 = vcombine.low %v5010_v50, %v5014_v20  ;;  %v5122_v60 = vld [vmem:[%s15435_s10 + $0xc48] sm:$0xff] }
0x26b5   : > { %11470 = vmatprep.subr.bf16.mxu1 %v13285_v39  ;;  %11428 = vmatpush1.bf16.msra.mxu0 %v13156_v61  ;;  %v16607_v5 = vadd.f32 %v11162_v13, %v11120_v15  ;;  %v11122_v36 = vadd.f32 %v11121_v52, %v16536_v30  ;;  %v11164_v8 = vpop.f32.mrf.mxu1  ;;  %v13133_v30 = vcombine.high %v5010_v50, %v5014_v20  ;;  %v5126_v59 = vld [vmem:[%s15435_s10 + $0xc68] sm:$0xff] }
0x26b6   : > { %11429 = vmatprep.subr.bf16.mxu0 %v13149_v49  ;;  %v13124_v39 = vcombine.low %v5002_v58, %v5006_v63  ;;  %v13245_v6 = vcombine.high %v5122_v60, %v5126_v59  ;;  %v4986_v33 = vld [vmem:[%s15435_s10 + $0x808] sm:$0xff]  ;;  %v13244_v61 = vcombine.low %v5122_v60, %v5126_v59 }
0x26b7   : > { %v16614_v18 = vadd.f32 %v11164_v8, %v11122_v36  ;;  %v4990_v44 = vld [vmem:[%s15435_s10 + $0x828] sm:$0xff] }
0x26b8   : > { %11471 = vmatpush1.bf16.msra.mxu1 %v13284_v46  ;;  %v5114_v45 = vld [vmem:[%s15435_s10 + $0xc08] sm:$0xff]  ;;  %v13109_v4 = vcombine.high %v4986_v33, %v4990_v44  ;;  %v13108_v12 = vcombine.low %v4986_v33, %v4990_v44 }
0x26b9   : > { %11472 = vmatprep.subr.bf16.mxu1 %v13277_v37  ;;  %11430 = vmatpush1.bf16.msra.mxu0 %v13148_v62  ;;  %v5118_v48 = vld [vmem:[%s15435_s10 + $0xc28] sm:$0xff] }
0x26ba   : > { %11431 = vmatprep.subr.bf16.mxu0 %v13141_v3  ;;  %v13237_v46 = vcombine.high %v5114_v45, %v5118_v48  ;;  %v5106_v49 = vld [vmem:[%s15435_s10 + $0xbc8] sm:$0xff]  ;;  %v13236_v54 = vcombine.low %v5114_v45, %v5118_v48 }
0x26bb   : > { %v5110_v22 = vld [vmem:[%s15435_s10 + $0xbe8] sm:$0xff] }
0x26bc   : > { %11473 = vmatpush1.bf16.msra.mxu1 %v13276_v42  ;;  %v5234_v14 = vld [vmem:[%s15435_s10 + $0xfc8] sm:$0xff]  ;;  %v13229_v2 = vcombine.high %v5106_v49, %v5110_v22  ;;  %v13228_v62 = vcombine.low %v5106_v49, %v5110_v22 }
0x26bd   : > { %11474 = vmatprep.subr.bf16.mxu1 %v13269_v43  ;;  %11432 = vmatpush1.bf16.msra.mxu0 %v13140_v21  ;;  %v5238_v37 = vld [vmem:[%s15435_s10 + $0xfe8] sm:$0xff] }
0x26be   : > { %11433 = vmatprep.subr.bf16.mxu0 %v13133_v30  ;;  %v13357_v26 = vcombine.high %v5234_v14, %v5238_v37  ;;  %v5098_v27 = vld [vmem:[%s15435_s10 + $0xb88] sm:$0xff]  ;;  %v13356_v52 = vcombine.low %v5234_v14, %v5238_v37 }
0x26bf   : > { %v5102_v1 = vld [vmem:[%s15435_s10 + $0xba8] sm:$0xff] }
0x26c0   : > { %11475 = vmatpush1.bf16.msra.mxu1 %v13268_v11  ;;  %v5226_v15 = vld [vmem:[%s15435_s10 + $0xf88] sm:$0xff]  ;;  %v13221_v42 = vcombine.high %v5098_v27, %v5102_v1  ;;  %v13220_v8 = vcombine.low %v5098_v27, %v5102_v1 }
0x26c1   : > { %11476 = vmatprep.subr.bf16.mxu1 %v13261_v34  ;;  %11434 = vmatpush1.bf16.msra.mxu0 %v13132_v35  ;;  %v5230_v13 = vld [vmem:[%s15435_s10 + $0xfa8] sm:$0xff] }
0x26c2   : > { %11435 = vmatprep.subr.bf16.mxu0 %v13125_v29  ;;  %v13349_v3 = vcombine.high %v5226_v15, %v5230_v13  ;;  %v5090_v36 = vld [vmem:[%s15435_s10 + $0xb48] sm:$0xff]  ;;  %v13348_v10 = vcombine.low %v5226_v15, %v5230_v13 }
0x26c3   : > { %v5094_v43 = vld [vmem:[%s15435_s10 + $0xb68] sm:$0xff] }
0x26c4   : > { %11477 = vmatpush1.bf16.msra.mxu1 %v13260_v23  ;;  %v5218_v50 = vld [vmem:[%s15435_s10 + $0xf48] sm:$0xff]  ;;  %v13213_v9 = vcombine.high %v5090_v36, %v5094_v43  ;;  %v13212_v63 = vcombine.low %v5090_v36, %v5094_v43 }
0x26c5   : > { %11478 = vmatprep.subr.bf16.mxu1 %v13253_v31  ;;  %11436 = vmatpush1.bf16.msra.mxu0 %v13124_v39  ;;  %v5222_v20 = vld [vmem:[%s15435_s10 + $0xf68] sm:$0xff] }
0x26c6   : > { %11437 = vmatprep.subr.bf16.mxu0 %v13117_v40  ;;  %v13341_v21 = vcombine.high %v5218_v50, %v5222_v20  ;;  %v5082_v11 = vld [vmem:[%s15435_s10 + $0xb08] sm:$0xff]  ;;  %v13340_v25 = vcombine.low %v5218_v50, %v5222_v20 }
0x26c7   : > { %v5086_v30 = vld [vmem:[%s15435_s10 + $0xb28] sm:$0xff] }
0x26c8   : > { %11479 = vmatpush1.bf16.msra.mxu1 %v13252_v41  ;;  %v5210_v34 = vld [vmem:[%s15435_s10 + $0xf08] sm:$0xff]  ;;  %v13205_v28 = vcombine.high %v5082_v11, %v5086_v30  ;;  %v13204_v47 = vcombine.low %v5082_v11, %v5086_v30 }
0x26c9   : > { %11480 = vmatprep.subr.bf16.mxu1 %v13245_v6  ;;  %11438 = vmatpush1.bf16.msra.mxu0 %v13116_v32  ;;  %v5214_v58 = vld [vmem:[%s15435_s10 + $0xf28] sm:$0xff] }
0x26ca   : > { %11439 = vmatprep.subr.bf16.mxu0 %v13109_v4  ;;  %v13333_v35 = vcombine.high %v5210_v34, %v5214_v58  ;;  %v5074_v23 = vld [vmem:[%s15435_s10 + $0xac8] sm:$0xff]  ;;  %v13332_v60 = vcombine.low %v5210_v34, %v5214_v58 }
0x26cb   : > { %v5078_v29 = vld [vmem:[%s15435_s10 + $0xae8] sm:$0xff] }
0x26cc   : > { %11481 = vmatpush1.bf16.msra.mxu1 %v13244_v61  ;;  %v5202_v31 = vld [vmem:[%s15435_s10 + $0xec8] sm:$0xff]  ;;  %v13197_v59 = vcombine.high %v5074_v23, %v5078_v29  ;;  %v13196_v44 = vcombine.low %v5074_v23, %v5078_v29 }
0x26cd   : > { %11482 = vmatprep.subr.bf16.mxu1 %v13237_v46  ;;  %11440 = vmatpush1.bf16.msra.mxu0 %v13108_v12  ;;  %v5206_v16 = vld [vmem:[%s15435_s10 + $0xee8] sm:$0xff] }
0x26ce   : > { %11441 = vmatprep.subr.bf16.mxu0 %v13229_v2  ;;  %v13325_v39 = vcombine.high %v5202_v31, %v5206_v16  ;;  %v5066_v41 = vld [vmem:[%s15435_s10 + $0xa88] sm:$0xff]  ;;  %v13324_v45 = vcombine.low %v5202_v31, %v5206_v16 }
0x26cf   : > { %v5070_v40 = vld [vmem:[%s15435_s10 + $0xaa8] sm:$0xff] }
0x26d0   : > { %11483 = vmatpush1.bf16.msra.mxu1 %v13236_v54  ;;  %v5194_v6 = vld [vmem:[%s15435_s10 + $0xe88] sm:$0xff]  ;;  %v13189_v48 = vcombine.high %v5066_v41, %v5070_v40  ;;  %v13188_v22 = vcombine.low %v5066_v41, %v5070_v40 }
0x26d1   : > { %11484 = vmatprep.subr.bf16.mxu1 %v13357_v26  ;;  %11442 = vmatpush2.bf16.msra.mxu0 %v13228_v62  ;;  %v5198_v33 = vld [vmem:[%s15435_s10 + $0xea8] sm:$0xff] }
0x26d2   : > { %11443 = vmatprep.subr.bf16.mxu0 %v13221_v42  ;;  %v13317_v32 = vcombine.high %v5194_v6, %v5198_v33  ;;  %v5058_v61 = vld [vmem:[%s15435_s10 + $0xa48] sm:$0xff]  ;;  %v13316_v14 = vcombine.low %v5194_v6, %v5198_v33 }
0x26d3   : > { %v5062_v4 = vld [vmem:[%s15435_s10 + $0xa68] sm:$0xff] }
0x26d4   : > { %11485 = vmatpush2.bf16.msra.mxu1 %v13356_v52  ;;  %v5186_v46 = vld [vmem:[%s15435_s10 + $0xe48] sm:$0xff]  ;;  %v13181_v37 = vcombine.high %v5058_v61, %v5062_v4  ;;  %v13180_v1 = vcombine.low %v5058_v61, %v5062_v4 }
0x26d5   : > { %11486 = vmatprep.subr.bf16.mxu1 %v13349_v3  ;;  %11444 = vmatpush2.bf16.msra.mxu0 %v13220_v8  ;;  %v5190_v49 = vld [vmem:[%s15435_s10 + $0xe68] sm:$0xff] }
0x26d6   : > { %11445 = vmatprep.subr.bf16.mxu0 %v13213_v9  ;;  %v13309_v12 = vcombine.high %v5186_v46, %v5190_v49  ;;  %v5050_v54 = vld [vmem:[%s15435_s10 + $0xa08] sm:$0xff]  ;;  %v13308_v15 = vcombine.low %v5186_v46, %v5190_v49 }
0x26d7   : > { %v5054_v2 = vld [vmem:[%s15435_s10 + $0xa28] sm:$0xff] }
0x26d8   : > { %11487 = vmatpush2.bf16.msra.mxu1 %v13348_v10  ;;  %v5178_v26 = vld [vmem:[%s15435_s10 + $0xe08] sm:$0xff]  ;;  %v13173_v13 = vcombine.high %v5050_v54, %v5054_v2  ;;  %v13172_v43 = vcombine.low %v5050_v54, %v5054_v2 }
0x26d9   : > { %11488 = vmatprep.subr.bf16.mxu1 %v13341_v21  ;;  %11446 = vmatpush2.bf16.msra.mxu0 %v13212_v63  ;;  %v5182_v27 = vld [vmem:[%s15435_s10 + $0xe28] sm:$0xff] }
0x26da   : > { %11447 = vmatprep.subr.bf16.mxu0 %v13205_v28  ;;  %v13301_v62 = vcombine.high %v5178_v26, %v5182_v27  ;;  %v5298_v52 = vld [vmem:[%s15435_s10 + $0x11c8] sm:$0xff]  ;;  %v13300_v50 = vcombine.low %v5178_v26, %v5182_v27 }
0x26db   : > { %v5302_v42 = vld [vmem:[%s15435_s10 + $0x11e8] sm:$0xff] }
0x26dc   : > { %11489 = vmatpush2.bf16.msra.mxu1 %v13340_v25  ;;  %v5426_v3 = vld [vmem:[%s15435_s10 + $0x15c8] sm:$0xff]  ;;  %v13421_v20 = vcombine.high %v5298_v52, %v5302_v42  ;;  %v13420_v30 = vcombine.low %v5298_v52, %v5302_v42 }
0x26dd   : > { %11490 = vmatprep.subr.bf16.mxu1 %v13333_v35  ;;  %11448 = vmatpush2.bf16.msra.mxu0 %v13204_v47  ;;  %v5430_v36 = vld [vmem:[%s15435_s10 + $0x15e8] sm:$0xff] }
0x26de   : > { %11449 = vmatprep.subr.bf16.mxu0 %v13197_v59  ;;  %v13549_v8 = vcombine.high %v5426_v3, %v5430_v36  ;;  %v5290_v10 = vld [vmem:[%s15435_s10 + $0x1188] sm:$0xff]  ;;  %v13548_v34 = vcombine.low %v5426_v3, %v5430_v36 }
0x26df   : > { %v5294_v9 = vld [vmem:[%s15435_s10 + $0x11a8] sm:$0xff] }
0x26e0   : > { %11491 = vmatpush2.bf16.msra.mxu1 %v13332_v60  ;;  %v5418_v21 = vld [vmem:[%s15435_s10 + $0x1588] sm:$0xff]  ;;  %v13413_v58 = vcombine.high %v5290_v10, %v5294_v9  ;;  %v13412_v60 = vcombine.low %v5290_v10, %v5294_v9 }
0x26e1   : > { %11492 = vmatprep.subr.bf16.mxu1 %v13325_v39  ;;  %11450 = vmatpush2.bf16.msra.mxu0 %v13196_v44  ;;  %v5422_v11 = vld [vmem:[%s15435_s10 + $0x15a8] sm:$0xff] }
0x26e2   : > { %11451 = vmatprep.subr.bf16.mxu0 %v13189_v48  ;;  %v13541_v63 = vcombine.high %v5418_v21, %v5422_v11  ;;  %v5282_v25 = vld [vmem:[%s15435_s10 + $0x1148] sm:$0xff]  ;;  %v13540_v39 = vcombine.low %v5418_v21, %v5422_v11  ;;  %v14665_v48 = vld [vmem:[#allocation2 + $0x54] ss:$16 sps:$4 sm:$0xff]  }
0x26e3   : > { %v5286_v28 = vld [vmem:[%s15435_s10 + $0x1168] sm:$0xff] }
0x26e4   : > { %11493 = vmatpush2.bf16.msra.mxu1 %v13324_v45  ;;  %v14664_v23 = vld [vmem:[#allocation2 + $0x58] ss:$-72 sps:$4 sm:$0xff]   ;;  %v13405_v41 = vcombine.high %v5282_v25, %v5286_v28  ;;  %v14666_v46 = vld [vmem:[#allocation2 + $0x6c] ss:$8 sps:$4 sm:$0xff]  }
0x26e5   : > { %11494 = vmatprep.subr.bf16.mxu1 %v13317_v32  ;;  %11452 = vmatpush2.bf16.msra.mxu0 %v13188_v22  ;;  %v5410_v29 = vld [vmem:[%s15435_s10 + $0x1548] sm:$0xff] }
0x26e6   : > { %11453 = vmatprep.subr.bf16.mxu0 %v13181_v37  ;;  %v5414_v31 = vld [vmem:[%s15435_s10 + $0x1568] sm:$0xff] }
0x26e7   : > { %v5274_v44 = vld [vmem:[%s15435_s10 + $0x1108] sm:$0xff] }
0x26e8   : > { %11495 = vmatpush2.bf16.msra.mxu1 %v13316_v14  ;;  %v5278_v45 = vld [vmem:[%s15435_s10 + $0x1128] sm:$0xff]  ;;  %v13404_v14 = vcombine.low %v5282_v25, %v5286_v28 }
0x26e9   : > { %11496 = vmatprep.subr.bf16.mxu1 %v13309_v12  ;;  %11454 = vmatpush2.bf16.msra.mxu0 %v13180_v1  ;;  %v5402_v61 = vld [vmem:[%s15435_s10 + $0x1508] sm:$0xff]  ;;  %v13532_v12 = vcombine.low %v5410_v29, %v5414_v31  ;;  %v13397_v54 = vcombine.high %v5274_v44, %v5278_v45  ;;  %v13396_v42 = vcombine.low %v5274_v44, %v5278_v45 }
0x26ea   : > { %11455 = vmatprep.subr.bf16.mxu0 %v13173_v13  ;;  %v5406_v4 = vld [vmem:[%s15435_s10 + $0x1528] sm:$0xff] }
0x26eb   : > { %v13525_v27 = vcombine.high %v5402_v61, %v5406_v4  ;;  %v5266_v1 = vld [vmem:[%s15435_s10 + $0x10c8] sm:$0xff]  ;;  %v13524_v3 = vcombine.low %v5402_v61, %v5406_v4 }
0x26ec   : > { %11497 = vmatpush2.bf16.msra.mxu1 %v13308_v15  ;;  %v5394_v13 = vld [vmem:[%s15435_s10 + $0x14c8] sm:$0xff] }
0x26ed   : > { %11498 = vmatprep.subr.bf16.mxu1 %v13301_v62  ;;  %11456 = vmatpush2.bf16.msra.mxu0 %v13172_v43  ;;  %v5398_v62 = vld [vmem:[%s15435_s10 + $0x14e8] sm:$0xff] }
0x26ee   : > { %11511 = vmatprep.subr.bf16.mxu0 %v13421_v20  ;;  %v13517_v36 = vcombine.high %v5394_v13, %v5398_v62  ;;  %v5258_v43 = vld [vmem:[%s15435_s10 + $0x1088] sm:$0xff]  ;;  %v13516_v9 = vcombine.low %v5394_v13, %v5398_v62 }
0x26ef   : > { %v5386_v20 = vld [vmem:[%s15435_s10 + $0x1488] sm:$0xff] }
0x26f0   : > { %11499 = vmatpush2.bf16.msra.mxu1 %v13300_v50  ;;  %v11201_v35 = vpop.f32.mrf.mxu0  ;;  %11458 = vmatmul.mubr.bf16.vlgmr.msra.gmra.mxu0 %v14664_v23  ;;  %v5262_v50 = vld [vmem:[%s15435_s10 + $0x10a8] sm:$0xff] }
0x26f1   : > { %11554 = vmatprep.subr.bf16.mxu1 %v13549_v8  ;;  %v11202_v16 = vadd.f32 %v11201_v35, %v16596_v0  ;;  %11512 = vmatpush1.bf16.msra.mxu0 %v13420_v30  ;;  %v13533_v0 = vcombine.high %v5410_v29, %v5414_v31  ;;  %v5390_v8 = vld [vmem:[%s15435_s10 + $0x14a8] sm:$0xff]  ;;  %v13381_v21 = vcombine.high %v5258_v43, %v5262_v50 }
0x26f2   : > { %v11203_v59 = vpop.f32.mrf.mxu0  ;;  %11513 = vmatprep.subr.bf16.mxu0 %v13413_v58  ;;  %11543 = vmatprep.mubr.bf16.mxu0 %v14665_v48  ;;  %v13509_v11 = vcombine.high %v5386_v20, %v5390_v8  ;;  %v5250_v30 = vld [vmem:[%s15435_s10 + $0x1048] sm:$0xff]  ;;  %v13380_v25 = vcombine.low %v5258_v43, %v5262_v50  ;;  %v13508_v28 = vcombine.low %v5386_v20, %v5390_v8 }
0x26f3   : > { %v11244_v47 = vpop.f32.mrf.mxu1  ;;  %11501 = vmatmul.mubr.bf16.vlgmr.msra.gmra.mxu1 %v16363_v38  ;;  %v11204_v6 = vadd.f32 %v11203_v59, %v16604_v7  ;;  %v5378_v58 = vld [vmem:[%s15435_s10 + $0x1448] sm:$0xff] }
0x26f4   : > { %11555 = vmatpush1.bf16.msra.mxu1 %v13548_v34  ;;  %v16674_v40 = vadd.f32 %v11244_v47, %v11202_v16  ;;  %v11205_v32 = vpop.f32.mrf.mxu0  ;;  %11586 = vmatprep.mubr.bf16.mxu1 %v14666_v46  ;;  %v5254_v34 = vld [vmem:[%s15435_s10 + $0x1068] sm:$0xff] }
0x26f5   : > { %v11246_v33 = vpop.f32.mrf.mxu1  ;;  %11556 = vmatprep.subr.bf16.mxu1 %v13541_v63  ;;  %v11206_v22 = vadd.f32 %v11205_v32, %v16607_v5  ;;  %11514 = vmatpush1.bf16.msra.mxu0 %v13412_v60  ;;  %v5270_v5 = vld [vmem:[%s15435_s10 + $0x10e8] sm:$0xff]  ;;  %v13373_v35 = vcombine.high %v5250_v30, %v5254_v34  ;;  %v13372_v60 = vcombine.low %v5250_v30, %v5254_v34 }
0x26f6   : > { %v16681_v49 = vadd.f32 %v11246_v33, %v11204_v6  ;;  %v11207_v37 = vpop.f32.mrf.mxu0  ;;  %11515 = vmatprep.subr.bf16.mxu0 %v13405_v41  ;;  %v13388_v10 = vcombine.low %v5266_v1, %v5270_v5  ;;  %v5382_v63 = vld [vmem:[%s15435_s10 + $0x1468] sm:$0xff] }
0x26f7   : > { %v11248_v7 = vpop.f32.mrf.mxu1  ;;  %v11208_v26 = vadd.f32 %v11207_v37, %v16614_v18  ;;  %v13389_v18 = vcombine.high %v5266_v1, %v5270_v5  ;;  %v13501_v23 = vcombine.high %v5378_v58, %v5382_v63  ;;  %v5242_v29 = vld [vmem:[%s15435_s10 + $0x1008] sm:$0xff]  ;;  %v13500_v59 = vcombine.low %v5378_v58, %v5382_v63 }
0x26f8   : > { %11557 = vmatpush1.bf16.msra.mxu1 %v13540_v39  ;;  %v16684_v2 = vadd.f32 %v11248_v7, %v11206_v22  ;;  %v5246_v31 = vld [vmem:[%s15435_s10 + $0x1028] sm:$0xff] }
0x26f9   : > { %11558 = vmatprep.subr.bf16.mxu1 %v13533_v0  ;;  %v11250_v15 = vpop.f32.mrf.mxu1  ;;  %11516 = vmatpush1.bf16.msra.mxu0 %v13404_v14  ;;  %v5370_v16 = vld [vmem:[%s15435_s10 + $0x1408] sm:$0xff]  ;;  %v13365_v39 = vcombine.high %v5242_v29, %v5246_v31  ;;  %v13364_v45 = vcombine.low %v5242_v29, %v5246_v31 }
0x26fa   : > { %v16691_v52 = vadd.f32 %v11250_v15, %v11208_v26  ;;  %11517 = vmatprep.subr.bf16.mxu0 %v13397_v54  ;;  %v5374_v47 = vld [vmem:[%s15435_s10 + $0x1428] sm:$0xff] }
0x26fb   : > { %v13493_v41 = vcombine.high %v5370_v16, %v5374_v47  ;;  %v5362_v6 = vld [vmem:[%s15435_s10 + $0x13c8] sm:$0xff]  ;;  %v13492_v48 = vcombine.low %v5370_v16, %v5374_v47 }
0x26fc   : > { %11559 = vmatpush1.bf16.msra.mxu1 %v13532_v12  ;;  %v5366_v33 = vld [vmem:[%s15435_s10 + $0x13e8] sm:$0xff] }
0x26fd   : > { %11560 = vmatprep.subr.bf16.mxu1 %v13525_v27  ;;  %11518 = vmatpush1.bf16.msra.mxu0 %v13396_v42  ;;  %v5490_v0 = vld [vmem:[%s15435_s10 + $0x17c8] sm:$0xff]  ;;  %v13485_v32 = vcombine.high %v5362_v6, %v5366_v33  ;;  %v13484_v14 = vcombine.low %v5362_v6, %v5366_v33 }
0x26fe   : > { %11519 = vmatprep.subr.bf16.mxu0 %v13389_v18  ;;  %v5494_v44 = vld [vmem:[%s15435_s10 + $0x17e8] sm:$0xff] }
0x26ff   : > { %v13613_v61 = vcombine.high %v5490_v0, %v5494_v44  ;;  %v5354_v4 = vld [vmem:[%s15435_s10 + $0x1388] sm:$0xff]  ;;  %v13612_v37 = vcombine.low %v5490_v0, %v5494_v44 }
0x2700   : > { %11561 = vmatpush1.bf16.msra.mxu1 %v13524_v3  ;;  %v5358_v46 = vld [vmem:[%s15435_s10 + $0x13a8] sm:$0xff] }
0x2701   : > { %11562 = vmatprep.subr.bf16.mxu1 %v13517_v36  ;;  %11520 = vmatpush1.bf16.msra.mxu0 %v13388_v10  ;;  %v5482_v22 = vld [vmem:[%s15435_s10 + $0x1788] sm:$0xff]  ;;  %v13477_v12 = vcombine.high %v5354_v4, %v5358_v46  ;;  %v13476_v15 = vcombine.low %v5354_v4, %v5358_v46 }
0x2702   : > { %11521 = vmatprep.subr.bf16.mxu0 %v13381_v21  ;;  %v5486_v7 = vld [vmem:[%s15435_s10 + $0x17a8] sm:$0xff] }
0x2703   : > { %v13605_v54 = vcombine.high %v5482_v22, %v5486_v7  ;;  %v5346_v26 = vld [vmem:[%s15435_s10 + $0x1348] sm:$0xff]  ;;  %v13604_v13 = vcombine.low %v5482_v22, %v5486_v7 }
0x2704   : > { %11563 = vmatpush1.bf16.msra.mxu1 %v13516_v9  ;;  %v5350_v27 = vld [vmem:[%s15435_s10 + $0x1368] sm:$0xff] }
0x2705   : > { %11564 = vmatprep.subr.bf16.mxu1 %v13509_v11  ;;  %11522 = vmatpush1.bf16.msra.mxu0 %v13380_v25  ;;  %v5474_v1 = vld [vmem:[%s15435_s10 + $0x1748] sm:$0xff]  ;;  %v13469_v62 = vcombine.high %v5346_v26, %v5350_v27  ;;  %v13468_v50 = vcombine.low %v5346_v26, %v5350_v27 }
0x2706   : > { %11523 = vmatprep.subr.bf16.mxu0 %v13373_v35  ;;  %v5478_v5 = vld [vmem:[%s15435_s10 + $0x1768] sm:$0xff] }
0x2707   : > { %v13597_v42 = vcombine.high %v5474_v1, %v5478_v5  ;;  %v5338_v3 = vld [vmem:[%s15435_s10 + $0x1308] sm:$0xff]  ;;  %v13596_v20 = vcombine.low %v5474_v1, %v5478_v5 }
0x2708   : > { %11565 = vmatpush1.bf16.msra.mxu1 %v13508_v28  ;;  %v5342_v18 = vld [vmem:[%s15435_s10 + $0x1328] sm:$0xff] }
0x2709   : > { %11566 = vmatprep.subr.bf16.mxu1 %v13501_v23  ;;  %11524 = vmatpush1.bf16.msra.mxu0 %v13372_v60  ;;  %v5466_v36 = vld [vmem:[%s15435_s10 + $0x1708] sm:$0xff]  ;;  %v13461_v8 = vcombine.high %v5338_v3, %v5342_v18  ;;  %v13460_v34 = vcombine.low %v5338_v3, %v5342_v18 }
0x270a   : > { %11525 = vmatprep.subr.bf16.mxu0 %v13365_v39  ;;  %v5470_v43 = vld [vmem:[%s15435_s10 + $0x1728] sm:$0xff] }
0x270b   : > { %v13589_v10 = vcombine.high %v5466_v36, %v5470_v43  ;;  %v5330_v9 = vld [vmem:[%s15435_s10 + $0x12c8] sm:$0xff]  ;;  %v13588_v58 = vcombine.low %v5466_v36, %v5470_v43 }
0x270c   : > { %11567 = vmatpush1.bf16.msra.mxu1 %v13500_v59  ;;  %v5334_v21 = vld [vmem:[%s15435_s10 + $0x12e8] sm:$0xff] }
0x270d   : > { %11568 = vmatprep.subr.bf16.mxu1 %v13493_v41  ;;  %11526 = vmatpush1.bf16.msra.mxu0 %v13364_v45  ;;  %v5458_v11 = vld [vmem:[%s15435_s10 + $0x16c8] sm:$0xff]  ;;  %v13453_v63 = vcombine.high %v5330_v9, %v5334_v21  ;;  %v13452_v31 = vcombine.low %v5330_v9, %v5334_v21 }
0x270e   : > { %11527 = vmatprep.subr.bf16.mxu0 %v13485_v32  ;;  %v5462_v30 = vld [vmem:[%s15435_s10 + $0x16e8] sm:$0xff] }
0x270f   : > { %v13581_v25 = vcombine.high %v5458_v11, %v5462_v30  ;;  %v5322_v28 = vld [vmem:[%s15435_s10 + $0x1288] sm:$0xff]  ;;  %v13580_v16 = vcombine.low %v5458_v11, %v5462_v30 }
0x2710   : > { %11569 = vmatpush1.bf16.msra.mxu1 %v13492_v48  ;;  %v5326_v35 = vld [vmem:[%s15435_s10 + $0x12a8] sm:$0xff] }
0x2711   : > { %11570 = vmatprep.subr.bf16.mxu1 %v13613_v61  ;;  %11528 = vmatpush2.bf16.msra.mxu0 %v13484_v14  ;;  %v5450_v23 = vld [vmem:[%s15435_s10 + $0x1688] sm:$0xff]  ;;  %v13445_v47 = vcombine.high %v5322_v28, %v5326_v35  ;;  %v13444_v33 = vcombine.low %v5322_v28, %v5326_v35 }
0x2712   : > { %11529 = vmatprep.subr.bf16.mxu0 %v13477_v12  ;;  %v5454_v29 = vld [vmem:[%s15435_s10 + $0x16a8] sm:$0xff] }
0x2713   : > { %v13573_v60 = vcombine.high %v5450_v23, %v5454_v29  ;;  %v5314_v59 = vld [vmem:[%s15435_s10 + $0x1248] sm:$0xff]  ;;  %v13572_v0 = vcombine.low %v5450_v23, %v5454_v29 }
0x2714   : > { %11571 = vmatpush2.bf16.msra.mxu1 %v13612_v37  ;;  %v5318_v39 = vld [vmem:[%s15435_s10 + $0x1268] sm:$0xff] }
0x2715   : > { %11572 = vmatprep.subr.bf16.mxu1 %v13605_v54  ;;  %11530 = vmatpush2.bf16.msra.mxu0 %v13476_v15  ;;  %v5442_v41 = vld [vmem:[%s15435_s10 + $0x1648] sm:$0xff]  ;;  %v13437_v44 = vcombine.high %v5314_v59, %v5318_v39  ;;  %v13436_v46 = vcombine.low %v5314_v59, %v5318_v39 }
0x2716   : > { %11531 = vmatprep.subr.bf16.mxu0 %v13469_v62  ;;  %v5446_v6 = vld [vmem:[%s15435_s10 + $0x1668] sm:$0xff] }
0x2717   : > { %v13565_v45 = vcombine.high %v5442_v41, %v5446_v6  ;;  %v5306_v48 = vld [vmem:[%s15435_s10 + $0x1208] sm:$0xff]  ;;  %v13564_v22 = vcombine.low %v5442_v41, %v5446_v6 }
0x2718   : > { %11573 = vmatpush2.bf16.msra.mxu1 %v13604_v13  ;;  %v5310_v32 = vld [vmem:[%s15435_s10 + $0x1228] sm:$0xff] }
0x2719   : > { %11574 = vmatprep.subr.bf16.mxu1 %v13597_v42  ;;  %11532 = vmatpush2.bf16.msra.mxu0 %v13468_v50  ;;  %v5434_v61 = vld [vmem:[%s15435_s10 + $0x1608] sm:$0xff]  ;;  %v13429_v7 = vcombine.high %v5306_v48, %v5310_v32  ;;  %v13428_v27 = vcombine.low %v5306_v48, %v5310_v32 }
0x271a   : > { %11533 = vmatprep.subr.bf16.mxu0 %v13461_v8  ;;  %v5438_v4 = vld [vmem:[%s15435_s10 + $0x1628] sm:$0xff] }
0x271b   : > { %v13557_v14 = vcombine.high %v5434_v61, %v5438_v4  ;;  %v5554_v37 = vld [vmem:[%s15435_s10 + $0x19c8] sm:$0xff]  ;;  %v13556_v1 = vcombine.low %v5434_v61, %v5438_v4 }
0x271c   : > { %11575 = vmatpush2.bf16.msra.mxu1 %v13596_v20  ;;  %v5558_v12 = vld [vmem:[%s15435_s10 + $0x19e8] sm:$0xff] }
0x271d   : > { %11576 = vmatprep.subr.bf16.mxu1 %v13589_v10  ;;  %11534 = vmatpush2.bf16.msra.mxu0 %v13460_v34  ;;  %v5682_v54 = vld [vmem:[%s15435_s10 + $0x1dc8] sm:$0xff]  ;;  %v13677_v5 = vcombine.high %v5554_v37, %v5558_v12  ;;  %v13676_v18 = vcombine.low %v5554_v37, %v5558_v12 }
0x271e   : > { %11535 = vmatprep.subr.bf16.mxu0 %v13453_v63  ;;  %v5686_v26 = vld [vmem:[%s15435_s10 + $0x1de8] sm:$0xff] }
0x271f   : > { %v13805_v15 = vcombine.high %v5682_v54, %v5686_v26  ;;  %v5546_v13 = vld [vmem:[%s15435_s10 + $0x1988] sm:$0xff]  ;;  %v13804_v36 = vcombine.low %v5682_v54, %v5686_v26 }
0x2720   : > { %11577 = vmatpush2.bf16.msra.mxu1 %v13588_v58  ;;  %v5550_v62 = vld [vmem:[%s15435_s10 + $0x19a8] sm:$0xff]  ;;  %v12387_v58 = vld [vmem:[%s15443_s30] sm:$0xff] }
0x2721   : > { %11578 = vmatprep.subr.bf16.mxu1 %v13581_v25  ;;  %11536 = vmatpush2.bf16.msra.mxu0 %v13452_v31  ;;  %v5674_v42 = vld [vmem:[%s15435_s10 + $0x1d88] sm:$0xff]  ;;  %v13669_v43 = vcombine.high %v5546_v13, %v5550_v62  ;;  %v13668_v25 = vcombine.low %v5546_v13, %v5550_v62  ;;  %v12392_v39 = vrot.slane %v12387_v58, %v5757_v19 }
0x2722   : > { %11537 = vmatprep.subr.bf16.mxu0 %v13445_v47  ;;  %v5678_v3 = vld [vmem:[%s15435_s10 + $0x1da8] sm:$0xff]  ;;  %v12396_v41 = vrot.slane %v12387_v58, %v5761_v51 }
0x2723   : > { %v13797_v50 = vcombine.high %v5674_v42, %v5678_v3  ;;  %v5538_v20 = vld [vmem:[%s15435_s10 + $0x1948] sm:$0xff]  ;;  %v13796_v35 = vcombine.low %v5674_v42, %v5678_v3 }
0x2724   : > { %11579 = vmatpush2.bf16.msra.mxu1 %v13580_v16  ;;  %v5542_v8 = vld [vmem:[%s15435_s10 + $0x1968] sm:$0xff] }
0x2725   : > { %11580 = vmatprep.subr.bf16.mxu1 %v13573_v60  ;;  %11538 = vmatpush2.bf16.msra.mxu0 %v13444_v33  ;;  %v14667_v9 = vld [vmem:[#allocation2 + $0x50] ss:$16 sps:$4 sm:$0xff]   ;;  %v13661_v23 = vcombine.high %v5538_v20, %v5542_v8  ;;  %v14669_v59 = vld [vmem:[#allocation2 + $0xc] ss:$112 sps:$4 sm:$0xff]   ;;  %v13660_v32 = vcombine.low %v5538_v20, %v5542_v8 }
0x2726   : > { %11539 = vmatprep.subr.bf16.mxu0 %v13437_v44  ;;  %v5666_v21 = vld [vmem:[%s15435_s10 + $0x1d48] sm:$0xff] }
0x2727   : > { %v5670_v11 = vld [vmem:[%s15435_s10 + $0x1d68] sm:$0xff] }
0x2728   : > { %11581 = vmatpush2.bf16.msra.mxu1 %v13572_v0  ;;  %v14668_v63 = vld [vmem:[#allocation2 + $0x68] ss:$8 sps:$4 sm:$0xff]   ;;  %v13788_v51 = vcombine.low %v5666_v21, %v5670_v11 }
0x2729   : > { %11582 = vmatprep.subr.bf16.mxu1 %v13565_v45  ;;  %11540 = vmatpush2.bf16.msra.mxu0 %v13436_v46  ;;  %v5530_v47 = vld [vmem:[%s15435_s10 + $0x1908] sm:$0xff] }
0x272a   : > { %11541 = vmatprep.subr.bf16.mxu0 %v13429_v7  ;;  %v5534_v60 = vld [vmem:[%s15435_s10 + $0x1928] sm:$0xff] }
0x272b   : > { %v5658_v33 = vld [vmem:[%s15435_s10 + $0x1d08] sm:$0xff]  ;;  %v13653_v61 = vcombine.high %v5530_v47, %v5534_v60 }
0x272c   : > { %11583 = vmatpush2.bf16.msra.mxu1 %v13564_v22  ;;  %v5662_v0 = vld [vmem:[%s15435_s10 + $0x1d28] sm:$0xff] }
0x272d   : > { %11584 = vmatprep.subr.bf16.mxu1 %v13557_v14  ;;  %11542 = vmatpush2.bf16.msra.mxu0 %v13428_v27  ;;  %v13781_v7 = vcombine.high %v5658_v33, %v5662_v0  ;;  %v5522_v14 = vld [vmem:[%s15435_s10 + $0x18c8] sm:$0xff] }
0x272e   : > { %11597 = vmatprep.subr.bf16.mxu0 %v13677_v5  ;;  %v5526_v37 = vld [vmem:[%s15435_s10 + $0x18e8] sm:$0xff] }
0x272f   : > { %v5650_v54 = vld [vmem:[%s15435_s10 + $0x1cc8] sm:$0xff]  ;;  %v13645_v13 = vcombine.high %v5522_v14, %v5526_v37 }
0x2730   : > { %11585 = vmatpush2.bf16.msra.mxu1 %v13556_v1  ;;  %v11287_v10 = vpop.f32.mrf.mxu0  ;;  %11544 = vmatmul.mubr.bf16.vlgmr.msra.gmra.mxu0 %v14667_v9  ;;  %v5654_v26 = vld [vmem:[%s15435_s10 + $0x1ce8] sm:$0xff] }
0x2731   : > { %11640 = vmatprep.subr.bf16.mxu1 %v13805_v15  ;;  %v11288_v30 = vadd.f32 %v11287_v10, %v16674_v40  ;;  %11598 = vmatpush1.bf16.msra.mxu0 %v13676_v18  ;;  %v13789_v40 = vcombine.high %v5666_v21, %v5670_v11  ;;  %v13773_v3 = vcombine.high %v5650_v54, %v5654_v26  ;;  %v5514_v18 = vld [vmem:[%s15435_s10 + $0x1888] sm:$0xff] }
0x2732   : > { %v11289_v28 = vpop.f32.mrf.mxu0  ;;  %11599 = vmatprep.subr.bf16.mxu0 %v13669_v43  ;;  %11629 = vmatprep.mubr.bf16.mxu0 %v14669_v59  ;;  %v5642_v43 = vld [vmem:[%s15435_s10 + $0x1c88] sm:$0xff]  ;;  %v13644_v10 = vcombine.low %v5522_v14, %v5526_v37  ;;  %v13772_v9 = vcombine.low %v5650_v54, %v5654_v26 }
0x2733   : > { %v11330_v34 = vpop.f32.mrf.mxu1  ;;  %11587 = vmatmul.mubr.bf16.vlgmr.msra.gmra.mxu1 %v14668_v63  ;;  %v11290_v31 = vadd.f32 %v11289_v28, %v16681_v49  ;;  %v5510_v58 = vld [vmem:[%s15435_s10 + $0x1868] sm:$0xff] }
0x2734   : > { %11641 = vmatpush1.bf16.msra.mxu1 %v13804_v36  ;;  %v11331_v29 = vadd.f32 %v11330_v34, %v11288_v30  ;;  %v11291_v6 = vpop.f32.mrf.mxu0  ;;  %11672 = vmatprep.mubr.bf16.mxu1 %v16440_v24  ;;  %v5518_v36 = vld [vmem:[%s15435_s10 + $0x18a8] sm:$0xff] }
0x2735   : > { %v11332_v16 = vpop.f32.mrf.mxu1  ;;  %11642 = vmatprep.subr.bf16.mxu1 %v13797_v50  ;;  %v11292_v45 = vadd.f32 %v11291_v6, %v16684_v2  ;;  %11600 = vmatpush1.bf16.msra.mxu0 %v13668_v25  ;;  %v13652_v2 = vcombine.low %v5530_v47, %v5534_v60  ;;  %v5646_v50 = vld [vmem:[%s15435_s10 + $0x1ca8] sm:$0xff]  ;;  %v13637_v21 = vcombine.high %v5514_v18, %v5518_v36 }
0x2736   : > { %v12371_v44 = vmax.f32 %v11331_v29, 0.0  ;;  %v11333_v49 = vadd.f32 %v11332_v16, %v11290_v31  ;;  %v11293_v19 = vpop.f32.mrf.mxu0  ;;  %11601 = vmatprep.subr.bf16.mxu0 %v13661_v23  ;;  %v13765_v30 = vcombine.high %v5642_v43, %v5646_v50  ;;  %v5506_v34 = vld [vmem:[%s15435_s10 + $0x1848] sm:$0xff]  ;;  %v13636_v28 = vcombine.low %v5514_v18, %v5518_v36 }
0x2737   : > { %v11334_v48 = vpop.f32.mrf.mxu1  ;;  %v11294_v22 = vadd.f32 %v11293_v19, %v16691_v52  ;;  %v13780_v52 = vcombine.low %v5658_v33, %v5662_v0  ;;  %v5634_v63 = vld [vmem:[%s15435_s10 + $0x1c48] sm:$0xff]  ;;  %v13629_v23 = vcombine.high %v5506_v34, %v5510_v58  ;;  %v13628_v60 = vcombine.low %v5506_v34, %v5510_v58 }
0x2738   : > { %11643 = vmatpush1.bf16.msra.mxu1 %v13796_v35  ;;  %v12372_v4 = vmax.f32 %v11333_v49, 0.0  ;;  %v11335_v46 = vadd.f32 %v11334_v48, %v11292_v45  ;;  %v12429_v27 = vmul.f32 %v12392_v39, %v12371_v44  ;;  %v5638_v25 = vld [vmem:[%s15435_s10 + $0x1c68] sm:$0xff]  ;;  %v13764_v35 = vcombine.low %v5642_v43, %v5646_v50 }
0x2739   : > { %11644 = vmatprep.subr.bf16.mxu1 %v13789_v40  ;;  %v11336_v12 = vpop.f32.mrf.mxu1  ;;  %11602 = vmatpush1.bf16.msra.mxu0 %v13660_v32  ;;  %v13757_v29 = vcombine.high %v5634_v63, %v5638_v25  ;;  %v5498_v31 = vld [vmem:[%s15435_s10 + $0x1808] sm:$0xff]  ;;  %v13756_v59 = vcombine.low %v5634_v63, %v5638_v25 }
0x273a   : > { %v12430_v1 = vmul.f32 %v12396_v41, %v12372_v4  ;;  %v12379_v5 = vmax.f32 %v11335_v46, 0.0  ;;  %v11337_v15 = vadd.f32 %v11336_v12, %v11294_v22  ;;  %11603 = vmatprep.subr.bf16.mxu0 %v13653_v61  ;;  %v5502_v16 = vld [vmem:[%s15435_s10 + $0x1828] sm:$0xff] }
0x273b   : > { %v5626_v40 = vld [vmem:[%s15435_s10 + $0x1c08] sm:$0xff]  ;;  %v13620_v49 = vcombine.low %v5498_v31, %v5502_v16 }
0x273c   : > { %11645 = vmatpush1.bf16.msra.mxu1 %v13788_v51  ;;  %v16767_v62 = vadd.f32 %v12430_v1, %v12429_v27  ;;  %v12380_v42 = vmax.f32 %v11337_v15, 0.0  ;;  %v12437_v20 = vmul.f32 %v12392_v39, %v12379_v5  ;;  %v5630_v47 = vld [vmem:[%s15435_s10 + $0x1c28] sm:$0xff]  ;;  %v13621_v39 = vcombine.high %v5498_v31, %v5502_v16 }
0x273d   : > { %11646 = vmatprep.subr.bf16.mxu1 %v13781_v7  ;;  %11604 = vmatpush1.bf16.msra.mxu0 %v13652_v2  ;;  %v5618_v6 = vld [vmem:[%s15435_s10 + $0x1bc8] sm:$0xff]  ;;  %v13748_v45 = vcombine.low %v5626_v40, %v5630_v47 }
0x273e   : > { %v12438_v8 = vmul.f32 %v12396_v41, %v12380_v42  ;;  %11605 = vmatprep.subr.bf16.mxu0 %v13645_v13  ;;  %v13749_v41 = vcombine.high %v5626_v40, %v5630_v47  ;;  %v5622_v33 = vld [vmem:[%s15435_s10 + $0x1be8] sm:$0xff] }
0x273f   : > { %v5746_v0 = vld [vmem:[%s15435_s10 + $0x1fc8] sm:$0xff]  ;;  %v13741_v48 = vcombine.high %v5618_v6, %v5622_v33  ;;  %v13740_v46 = vcombine.low %v5618_v6, %v5622_v33 }
0x2740   : > { %11647 = vmatpush1.bf16.msra.mxu1 %v13780_v52  ;;  %v16773_v11 = vadd.f32 %v12438_v8, %v12437_v20  ;;  %v5750_v44 = vld [vmem:[%s15435_s10 + $0x1fe8] sm:$0xff] }
0x2741   : > { %11648 = vmatprep.subr.bf16.mxu1 %v13773_v3  ;;  %11606 = vmatpush1.bf16.msra.mxu0 %v13644_v10  ;;  %v13869_v32 = vcombine.high %v5746_v0, %v5750_v44  ;;  %v5610_v19 = vld [vmem:[%s15435_s10 + $0x1b88] sm:$0xff]  ;;  %v13868_v22 = vcombine.low %v5746_v0, %v5750_v44 }
0x2742   : > { %11607 = vmatprep.subr.bf16.mxu0 %v13637_v21  ;;  %v5614_v51 = vld [vmem:[%s15435_s10 + $0x1ba8] sm:$0xff] }
0x2743   : > { %v5738_v61 = vld [vmem:[%s15435_s10 + $0x1f88] sm:$0xff]  ;;  %v13733_v7 = vcombine.high %v5610_v19, %v5614_v51  ;;  %v13732_v26 = vcombine.low %v5610_v19, %v5614_v51  ;;  %v4787_v51 = vld [vmem:[%s15435_s10 + $0x1d0] sm:$0xff] }
0x2744   : > { %11649 = vmatpush1.bf16.msra.mxu1 %v13772_v9  ;;  %v5742_v4 = vld [vmem:[%s15435_s10 + $0x1fa8] sm:$0xff] }
0x2745   : > { %11650 = vmatprep.subr.bf16.mxu1 %v13765_v30  ;;  %11608 = vmatpush1.bf16.msra.mxu0 %v13636_v28  ;;  %v13861_v14 = vcombine.high %v5738_v61, %v5742_v4  ;;  %v5602_v37 = vld [vmem:[%s15435_s10 + $0x1b48] sm:$0xff]  ;;  %v13860_v27 = vcombine.low %v5738_v61, %v5742_v4  ;;  %v4791_v61 = vld [vmem:[%s15435_s10 + $0x1f0] sm:$0xff] }
0x2746   : > { %11609 = vmatprep.subr.bf16.mxu0 %v13629_v23  ;;  %v5606_v12 = vld [vmem:[%s15435_s10 + $0x1b68] sm:$0xff]  ;;  %v4915_v4 = vld [vmem:[%s15435_s10 + $0x5d0] sm:$0xff] }
0x2747   : > { %v5730_v2 = vld [vmem:[%s15435_s10 + $0x1f48] sm:$0xff]  ;;  %v13725_v1 = vcombine.high %v5602_v37, %v5606_v12  ;;  %v13724_v3 = vcombine.low %v5602_v37, %v5606_v12  ;;  %v12911_v37 = vcombine.high %v4787_v51, %v4791_v61 }
0x2748   : > { %11651 = vmatpush1.bf16.msra.mxu1 %v13764_v35  ;;  %v5734_v54 = vld [vmem:[%s15435_s10 + $0x1f68] sm:$0xff] }
0x2749   : > { %11652 = vmatprep.subr.bf16.mxu1 %v13757_v29  ;;  %11610 = vmatpush1.bf16.msra.mxu0 %v13628_v60  ;;  %v13853_v5 = vcombine.high %v5730_v2, %v5734_v54  ;;  %v5594_v15 = vld [vmem:[%s15435_s10 + $0x1b08] sm:$0xff]  ;;  %v13852_v18 = vcombine.low %v5730_v2, %v5734_v54  ;;  %v5769_v2 = vsub.s32 3, %v16495_v53  ;;  %v4779_v54 = vld [vmem:[%s15435_s10 + $0x190] sm:$0xff] }
0x274a   : > { %11611 = vmatprep.subr.bf16.mxu0 %v13621_v39  ;;  %v5598_v52 = vld [vmem:[%s15435_s10 + $0x1b28] sm:$0xff] }
0x274b   : > { %v5722_v13 = vld [vmem:[%s15435_s10 + $0x1f08] sm:$0xff]  ;;  %v13717_v36 = vcombine.high %v5594_v15, %v5598_v52  ;;  %v13716_v9 = vcombine.low %v5594_v15, %v5598_v52  ;;  %v12910_v52 = vcombine.low %v4787_v51, %v4791_v61  ;;  %v4883_v61 = vld [vmem:[%s15435_s10 + $0x4d0] sm:$0xff] }
0x274c   : > { %11653 = vmatpush1.bf16.msra.mxu1 %v13756_v59  ;;  %v5726_v42 = vld [vmem:[%s15435_s10 + $0x1f28] sm:$0xff] }
0x274d   : > { %11654 = vmatprep.subr.bf16.mxu1 %v13749_v41  ;;  %11612 = vmatpush1.bf16.msra.mxu0 %v13620_v49  ;;  %v13845_v43 = vcombine.high %v5722_v13, %v5726_v42  ;;  %v5586_v50 = vld [vmem:[%s15435_s10 + $0x1ac8] sm:$0xff]  ;;  %v13844_v21 = vcombine.low %v5722_v13, %v5726_v42 }
0x274e   : > { %11613 = vmatprep.subr.bf16.mxu0 %v13741_v48  ;;  %v5590_v20 = vld [vmem:[%s15435_s10 + $0x1ae8] sm:$0xff] }
0x274f   : > { %v5714_v8 = vld [vmem:[%s15435_s10 + $0x1ec8] sm:$0xff]  ;;  %v13709_v30 = vcombine.high %v5586_v50, %v5590_v20  ;;  %v13708_v35 = vcombine.low %v5586_v50, %v5590_v20 }
0x2750   : > { %11655 = vmatpush1.bf16.msra.mxu1 %v13748_v45  ;;  %v5718_v10 = vld [vmem:[%s15435_s10 + $0x1ee8] sm:$0xff] }
0x2751   : > { %11656 = vmatprep.subr.bf16.mxu1 %v13869_v32  ;;  %11614 = vmatpush2.bf16.msra.mxu0 %v13740_v46  ;;  %v13837_v34 = vcombine.high %v5714_v8, %v5718_v10  ;;  %v5578_v58 = vld [vmem:[%s15435_s10 + $0x1a88] sm:$0xff]  ;;  %v13836_v23 = vcombine.low %v5714_v8, %v5718_v10  ;;  %v4919_v46 = vld [vmem:[%s15435_s10 + $0x5f0] sm:$0xff] }
0x2752   : > { %11615 = vmatprep.subr.bf16.mxu0 %v13733_v7  ;;  %v5582_v63 = vld [vmem:[%s15435_s10 + $0x1aa8] sm:$0xff]  ;;  %v5765_v7 = vsub.s32 2, %v16495_v53  ;;  %v13039_v12 = vcombine.high %v4915_v4, %v4919_v46  ;;  %v13038_v13 = vcombine.low %v4915_v4, %v4919_v46  ;;  %v4899_v8 = vld [vmem:[%s15435_s10 + $0x550] sm:$0xff] }
0x2753   : > { %v5706_v25 = vld [vmem:[%s15435_s10 + $0x1e88] sm:$0xff]  ;;  %v13701_v29 = vcombine.high %v5578_v58, %v5582_v63  ;;  %v13700_v59 = vcombine.low %v5578_v58, %v5582_v63  ;;  %v4903_v10 = vld [vmem:[%s15435_s10 + $0x570] sm:$0xff] }
0x2754   : > { %11657 = vmatpush2.bf16.msra.mxu1 %v13868_v22  ;;  %v5710_v28 = vld [vmem:[%s15435_s10 + $0x1ea8] sm:$0xff]  ;;  %v4887_v4 = vld [vmem:[%s15435_s10 + $0x4f0] sm:$0xff] }
0x2755   : > { %11658 = vmatprep.subr.bf16.mxu1 %v13861_v14  ;;  %11616 = vmatpush2.bf16.msra.mxu0 %v13732_v26  ;;  %v13829_v31 = vcombine.high %v5706_v25, %v5710_v28  ;;  %v5570_v16 = vld [vmem:[%s15435_s10 + $0x1a48] sm:$0xff]  ;;  %v13828_v39 = vcombine.low %v5706_v25, %v5710_v28  ;;  %v4783_v26 = vld [vmem:[%s15435_s10 + $0x1b0] sm:$0xff] }
0x2756   : > { %11617 = vmatprep.subr.bf16.mxu0 %v13725_v1  ;;  %v5574_v40 = vld [vmem:[%s15435_s10 + $0x1a68] sm:$0xff]  ;;  %v4911_v1 = vld [vmem:[%s15435_s10 + $0x5b0] sm:$0xff]  ;;  %v12903_v42 = vcombine.high %v4779_v54, %v4783_v26 }
0x2757   : > { %v5698_v47 = vld [vmem:[%s15435_s10 + $0x1e48] sm:$0xff]  ;;  %v13693_v41 = vcombine.high %v5570_v16, %v5574_v40  ;;  %v13692_v45 = vcombine.low %v5570_v16, %v5574_v40  ;;  %v14672_v16 = vld [vmem:[#allocation2 + $0x34] ss:$16 sps:$4 sm:$0xff]  }
0x2758   : > { %11659 = vmatpush2.bf16.msra.mxu1 %v13860_v27  ;;  %v5702_v60 = vld [vmem:[%s15435_s10 + $0x1e68] sm:$0xff]  ;;  %v4907_v27 = vld [vmem:[%s15435_s10 + $0x590] sm:$0xff] }
0x2759   : > { %11660 = vmatprep.subr.bf16.mxu1 %v13853_v5  ;;  %11618 = vmatpush2.bf16.msra.mxu0 %v13724_v3  ;;  %v13821_v6 = vcombine.high %v5698_v47, %v5702_v60  ;;  %v5562_v33 = vld [vmem:[%s15435_s10 + $0x1a08] sm:$0xff]  ;;  %v13820_v48 = vcombine.low %v5698_v47, %v5702_v60  ;;  %v13030_v58 = vcombine.low %v4907_v27, %v4911_v1  ;;  %v4891_v47 = vld [vmem:[%s15435_s10 + $0x510] sm:$0xff] }
0x275a   : > { %11619 = vmatprep.subr.bf16.mxu0 %v13717_v36  ;;  %v5566_v0 = vld [vmem:[%s15435_s10 + $0x1a28] sm:$0xff]  ;;  %v4771_v36 = vld [vmem:[%s15435_s10 + $0x150] sm:$0xff] }
0x275b   : > { %v5690_v44 = vld [vmem:[%s15435_s10 + $0x1e08] sm:$0xff]  ;;  %v13685_v32 = vcombine.high %v5562_v33, %v5566_v0  ;;  %v13684_v22 = vcombine.low %v5562_v33, %v5566_v0  ;;  %v4895_v60 = vld [vmem:[%s15435_s10 + $0x530] sm:$0xff]  ;;  %v13022_v0 = vcombine.low %v4899_v8, %v4903_v10 }
0x275c   : > { %11661 = vmatpush2.bf16.msra.mxu1 %v13852_v18  ;;  %v5694_v49 = vld [vmem:[%s15435_s10 + $0x1e28] sm:$0xff]  ;;  %v13031_v18 = vcombine.high %v4907_v27, %v4911_v1  ;;  %v4875_v27 = vld [vmem:[%s15435_s10 + $0x490] sm:$0xff] }
0x275d   : > { %11662 = vmatprep.subr.bf16.mxu1 %v13845_v43  ;;  %11620 = vmatpush2.bf16.msra.mxu0 %v13716_v9  ;;  %v13813_v19 = vcombine.high %v5690_v44, %v5694_v49  ;;  %v13812_v14 = vcombine.low %v5690_v44, %v5694_v49  ;;  %v14670_v5 = vld [vmem:[%s15441_s20] sm:$0xff]  ;;  %v4775_v43 = vld [vmem:[%s15435_s10 + $0x170] sm:$0xff] }
0x275e   : > { %11621 = vmatprep.subr.bf16.mxu0 %v13709_v30  ;;  %v5766_v15 = vrot.slane %v14670_v5, %v5765_v7  ;;  %v5770_v3 = vrot.slane %v14670_v5, %v5769_v2  ;;  %v14671_v20 = vld [vmem:[#allocation2 + $0x8] ss:$112 sps:$4 sm:$0xff]   ;;  %v12902_v30 = vcombine.low %v4779_v54, %v4783_v26  ;;  %v12895_v63 = vcombine.high %v4771_v36, %v4775_v43 }
0x275f   : > { %v4747_v54 = vld [vmem:[%s15435_s10 + $0x90] sm:$0xff] }
0x2760   : > { %11663 = vmatpush2.bf16.msra.mxu1 %v13844_v21  ;;  %v4751_v26 = vld [vmem:[%s15435_s10 + $0xb0] sm:$0xff] }
0x2761   : > { %11664 = vmatprep.subr.bf16.mxu1 %v13837_v34  ;;  %11622 = vmatpush2.bf16.msra.mxu0 %v13708_v35  ;;  %v4879_v1 = vld [vmem:[%s15435_s10 + $0x4b0] sm:$0xff] }
0x2762   : > { %11623 = vmatprep.subr.bf16.mxu0 %v13701_v29  ;;  %v4763_v29 = vld [vmem:[%s15435_s10 + $0x110] sm:$0xff] }
0x2764   : > { %11665 = vmatpush2.bf16.msra.mxu1 %v13836_v23  ;;  %v13023_v23 = vcombine.high %v4899_v8, %v4903_v10  ;;  %v4731_v10 = vld [vmem:[%s15435_s10 + $0x10] sm:$0xff] }
0x2765   : > { %11666 = vmatprep.subr.bf16.mxu1 %v13829_v31  ;;  %11624 = vmatpush2.bf16.msra.mxu0 %v13700_v59  ;;  %v4767_v31 = vld [vmem:[%s15435_s10 + $0x130] sm:$0xff] }
0x2766   : > { %11625 = vmatprep.subr.bf16.mxu0 %v13693_v41  ;;  %v12887_v44 = vcombine.high %v4763_v29, %v4767_v31 }
0x2768   : > { %11667 = vmatpush2.bf16.msra.mxu1 %v13828_v39 }
0x2769   : > { %11668 = vmatprep.subr.bf16.mxu1 %v13821_v6  ;;  %11626 = vmatpush2.bf16.msra.mxu0 %v13692_v45  ;;  %v12894_v6 = vcombine.low %v4771_v36, %v4775_v43  ;;  %v4871_v36 = vld [vmem:[%s15435_s10 + $0x470] sm:$0xff]  ;;  %v12870_v43 = vcombine.low %v4747_v54, %v4751_v26 }
0x276a   : > { %11627 = vmatprep.subr.bf16.mxu0 %v13685_v32  ;;  %v4755_v32 = vld [vmem:[%s15435_s10 + $0xd0] sm:$0xff] }
0x276c   : > { %11669 = vmatpush2.bf16.msra.mxu1 %v13820_v48  ;;  %v13015_v48 = vcombine.high %v4891_v47, %v4895_v60 }
0x276d   : > { %11670 = vmatprep.subr.bf16.mxu1 %v13813_v19  ;;  %11628 = vmatpush2.bf16.msra.mxu0 %v13684_v22  ;;  %v4759_v19 = vld [vmem:[%s15435_s10 + $0xf0] sm:$0xff]  ;;  %v12886_v22 = vcombine.low %v4763_v29, %v4767_v31 }
0x276e   : > { %11683 = vmatprep.subr.bf16.mxu0 %v12911_v37  ;;  %v12879_v37 = vcombine.high %v4755_v32, %v4759_v19  ;;  %v12878_v5 = vcombine.low %v4755_v32, %v4759_v19  ;;  %v4979_v29 = vld [vmem:[%s15435_s10 + $0x7d0] sm:$0xff] }
0x276f   : > { %v4983_v31 = vld [vmem:[%s15435_s10 + $0x7f0] sm:$0xff] }
0x2770   : > { %11671 = vmatpush2.bf16.msra.mxu1 %v13812_v14  ;;  %v11373_v50 = vpop.f32.mrf.mxu0  ;;  %11630 = vmatmul.mubr.bf16.vlgmr.msra.gmra.mxu0 %v14671_v20  ;;  %v13014_v14 = vcombine.low %v4891_v47, %v4895_v60  ;;  %v13103_v60 = vcombine.high %v4979_v29, %v4983_v31  ;;  %v4835_v32 = vld [vmem:[%s15435_s10 + $0x350] sm:$0xff] }
0x2771   : > { %11726 = vmatprep.subr.bf16.mxu1 %v13039_v12  ;;  %v11374_v9 = vadd.f32 %v11373_v50, %v5766_v15  ;;  %11684 = vmatpush1.bf16.msra.mxu0 %v12910_v52  ;;  %v13007_v12 = vcombine.high %v4883_v61, %v4887_v4  ;;  %v12871_v52 = vcombine.high %v4747_v54, %v4751_v26  ;;  %v4839_v19 = vld [vmem:[%s15435_s10 + $0x370] sm:$0xff] }
0x2772   : > { %v11375_v34 = vpop.f32.mrf.mxu0  ;;  %11685 = vmatprep.subr.bf16.mxu0 %v12903_v42  ;;  %11715 = vmatprep.mubr.bf16.mxu0 %v14672_v16  ;;  %v4739_v42 = vld [vmem:[%s15435_s10 + $0x50] sm:$0xff]  ;;  %v12998_v50 = vcombine.low %v4875_v27, %v4879_v1 }
0x2773   : > { %v11416_v21 = vpop.f32.mrf.mxu1  ;;  %11673 = vmatmul.mubr.bf16.vlgmr.msra.gmra.mxu1 %v16512_v55  ;;  %v11376_v28 = vadd.f32 %v11375_v34, %v5770_v3  ;;  %v4831_v54 = vld [vmem:[%s15435_s10 + $0x330] sm:$0xff] }
0x2774   : > { %11727 = vmatpush1.bf16.msra.mxu1 %v13038_v13  ;;  %v16835_v25 = vadd.f32 %v11416_v21, %v11374_v9  ;;  %v11377_v40 = vpop.f32.mrf.mxu0  ;;  %11758 = vmatprep.mubr.bf16.mxu1 %v16240_v57  ;;  %v12999_v13 = vcombine.high %v4875_v27, %v4879_v1  ;;  %v4735_v9 = vld [vmem:[%s15435_s10 + $0x30] sm:$0xff]  ;;  %v12958_v1 = vcombine.low %v4835_v32, %v4839_v19 }
0x2775   : > { %v11418_v35 = vpop.f32.mrf.mxu1  ;;  %11728 = vmatprep.subr.bf16.mxu1 %v13031_v18  ;;  %v11378_v39 = vadd.f32 %v11377_v40, %v5766_v15  ;;  %11686 = vmatpush1.bf16.msra.mxu0 %v12902_v30  ;;  %v13006_v15 = vcombine.low %v4883_v61, %v4887_v4  ;;  %v4867_v18 = vld [vmem:[%s15435_s10 + $0x450] sm:$0xff]  ;;  %v12854_v16 = vcombine.low %v4731_v10, %v4735_v9 }
0x2776   : > { %v16842_v59 = vadd.f32 %v11418_v35, %v11376_v28  ;;  %v11379_v33 = vpop.f32.mrf.mxu0  ;;  %11687 = vmatprep.subr.bf16.mxu0 %v12895_v63  ;;  %v12991_v8 = vcombine.high %v4867_v18, %v4871_v36  ;;  %v4859_v21 = vld [vmem:[%s15435_s10 + $0x410] sm:$0xff]  ;;  %v12855_v63 = vcombine.high %v4731_v10, %v4735_v9 }
0x2777   : > { %v11420_v41 = vpop.f32.mrf.mxu1  ;;  %v11380_v45 = vadd.f32 %v11379_v33, %v5770_v3  ;;  %v4743_v3 = vld [vmem:[%s15435_s10 + $0x70] sm:$0xff] }
0x2778   : > { %11729 = vmatpush1.bf16.msra.mxu1 %v13030_v58  ;;  %v16844_v49 = vadd.f32 %v11420_v41, %v11378_v39  ;;  %v12863_v20 = vcombine.high %v4739_v42, %v4743_v3  ;;  %v4863_v30 = vld [vmem:[%s15435_s10 + $0x430] sm:$0xff]  ;;  %v12862_v34 = vcombine.low %v4739_v42, %v4743_v3  ;;  %v12990_v58 = vcombine.low %v4867_v18, %v4871_v36 }
0x2779   : > { %11730 = vmatprep.subr.bf16.mxu1 %v13023_v23  ;;  %v11422_v51 = vpop.f32.mrf.mxu1  ;;  %11688 = vmatpush1.bf16.msra.mxu0 %v12894_v6  ;;  %v12983_v28 = vcombine.high %v4859_v21, %v4863_v30  ;;  %v4851_v35 = vld [vmem:[%s15435_s10 + $0x3d0] sm:$0xff]  ;;  %v12982_v40 = vcombine.low %v4859_v21, %v4863_v30 }
0x277a   : > { %v16850_v46 = vadd.f32 %v11422_v51, %v11380_v45  ;;  %11689 = vmatprep.subr.bf16.mxu0 %v12887_v44  ;;  %v4855_v23 = vld [vmem:[%s15435_s10 + $0x3f0] sm:$0xff]  ;;  %v13102_v44 = vcombine.low %v4979_v29, %v4983_v31 }
0x277b   : > { %v12975_v47 = vcombine.high %v4851_v35, %v4855_v23  ;;  %v4843_v39 = vld [vmem:[%s15435_s10 + $0x390] sm:$0xff] }
0x277c   : > { %11731 = vmatpush1.bf16.msra.mxu1 %v13022_v0  ;;  %v4847_v41 = vld [vmem:[%s15435_s10 + $0x3b0] sm:$0xff]  ;;  %v12974_v0 = vcombine.low %v4851_v35, %v4855_v23 }
0x277d   : > { %11732 = vmatprep.subr.bf16.mxu1 %v13015_v48  ;;  %11690 = vmatpush1.bf16.msra.mxu0 %v12886_v22  ;;  %v4971_v6 = vld [vmem:[%s15435_s10 + $0x790] sm:$0xff]  ;;  %v12967_v45 = vcombine.high %v4843_v39, %v4847_v41  ;;  %v12966_v4 = vcombine.low %v4843_v39, %v4847_v41 }
0x277e   : > { %11691 = vmatprep.subr.bf16.mxu0 %v12879_v37  ;;  %v4975_v33 = vld [vmem:[%s15435_s10 + $0x7b0] sm:$0xff] }
0x277f   : > { %v13095_v48 = vcombine.high %v4971_v6, %v4975_v33  ;;  %v4963_v51 = vld [vmem:[%s15435_s10 + $0x750] sm:$0xff]  ;;  %v13094_v22 = vcombine.low %v4971_v6, %v4975_v33 }
0x2780   : > { %11733 = vmatpush1.bf16.msra.mxu1 %v13014_v14  ;;  %v4967_v61 = vld [vmem:[%s15435_s10 + $0x770] sm:$0xff]  ;;  %v12959_v14 = vcombine.high %v4835_v32, %v4839_v19 }
0x2781   : > { %11734 = vmatprep.subr.bf16.mxu1 %v13007_v12  ;;  %11692 = vmatpush1.bf16.msra.mxu0 %v12878_v5  ;;  %v13087_v37 = vcombine.high %v4963_v51, %v4967_v61  ;;  %v4827_v12 = vld [vmem:[%s15435_s10 + $0x310] sm:$0xff]  ;;  %v13086_v5 = vcombine.low %v4963_v51, %v4967_v61 }
0x2782   : > { %11693 = vmatprep.subr.bf16.mxu0 %v12871_v52  ;;  %v4955_v26 = vld [vmem:[%s15435_s10 + $0x710] sm:$0xff]  ;;  %v12950_v36 = vcombine.low %v4827_v12, %v4831_v54 }
0x2783   : > { %v4959_v27 = vld [vmem:[%s15435_s10 + $0x730] sm:$0xff] }
0x2784   : > { %11735 = vmatpush1.bf16.msra.mxu1 %v13006_v15  ;;  %v12951_v15 = vcombine.high %v4827_v12, %v4831_v54  ;;  %v13079_v52 = vcombine.high %v4955_v26, %v4959_v27  ;;  %v4823_v42 = vld [vmem:[%s15435_s10 + $0x2f0] sm:$0xff] }
0x2785   : > { %11736 = vmatprep.subr.bf16.mxu1 %v12999_v13  ;;  %11694 = vmatpush1.bf16.msra.mxu0 %v12870_v43  ;;  %v4819_v13 = vld [vmem:[%s15435_s10 + $0x2d0] sm:$0xff]  ;;  %v13078_v43 = vcombine.low %v4955_v26, %v4959_v27 }
0x2786   : > { %11695 = vmatprep.subr.bf16.mxu0 %v12863_v20  ;;  %v4947_v3 = vld [vmem:[%s15435_s10 + $0x6d0] sm:$0xff]  ;;  %v12942_v30 = vcombine.low %v4819_v13, %v4823_v42 }
0x2787   : > { %v4951_v18 = vld [vmem:[%s15435_s10 + $0x6f0] sm:$0xff] }
0x2788   : > { %11737 = vmatpush1.bf16.msra.mxu1 %v12998_v50  ;;  %v12943_v50 = vcombine.high %v4819_v13, %v4823_v42  ;;  %v13071_v20 = vcombine.high %v4947_v3, %v4951_v18  ;;  %v4815_v10 = vld [vmem:[%s15435_s10 + $0x2b0] sm:$0xff] }
0x2789   : > { %11738 = vmatprep.subr.bf16.mxu1 %v12991_v8  ;;  %11696 = vmatpush1.bf16.msra.mxu0 %v12862_v34  ;;  %v4811_v8 = vld [vmem:[%s15435_s10 + $0x290] sm:$0xff]  ;;  %v13070_v34 = vcombine.low %v4947_v3, %v4951_v18 }
0x278a   : > { %11697 = vmatprep.subr.bf16.mxu0 %v12855_v63  ;;  %v4939_v9 = vld [vmem:[%s15435_s10 + $0x690] sm:$0xff]  ;;  %v12934_v31 = vcombine.low %v4811_v8, %v4815_v10 }
0x278b   : > { %v4943_v21 = vld [vmem:[%s15435_s10 + $0x6b0] sm:$0xff] }
0x278c   : > { %11739 = vmatpush1.bf16.msra.mxu1 %v12990_v58  ;;  %v12935_v58 = vcombine.high %v4811_v8, %v4815_v10  ;;  %v13063_v63 = vcombine.high %v4939_v9, %v4943_v21  ;;  %v4807_v35 = vld [vmem:[%s15435_s10 + $0x270] sm:$0xff] }
0x278d   : > { %11740 = vmatprep.subr.bf16.mxu1 %v12983_v28  ;;  %11698 = vmatpush1.bf16.msra.mxu0 %v12854_v16  ;;  %v4803_v28 = vld [vmem:[%s15435_s10 + $0x250] sm:$0xff]  ;;  %v13062_v16 = vcombine.low %v4939_v9, %v4943_v21 }
0x278e   : > { %11699 = vmatprep.subr.bf16.mxu0 %v12975_v47  ;;  %v4931_v23 = vld [vmem:[%s15435_s10 + $0x650] sm:$0xff]  ;;  %v12926_v33 = vcombine.low %v4803_v28, %v4807_v35 }
0x278f   : > { %v4935_v29 = vld [vmem:[%s15435_s10 + $0x670] sm:$0xff] }
0x2790   : > { %11741 = vmatpush1.bf16.msra.mxu1 %v12982_v40  ;;  %v12927_v40 = vcombine.high %v4803_v28, %v4807_v35  ;;  %v13055_v47 = vcombine.high %v4931_v23, %v4935_v29  ;;  %v4799_v39 = vld [vmem:[%s15435_s10 + $0x230] sm:$0xff] }
0x2791   : > { %11742 = vmatprep.subr.bf16.mxu1 %v13103_v60  ;;  %11700 = vmatpush2.bf16.msra.mxu0 %v12974_v0  ;;  %v4795_v60 = vld [vmem:[%s15435_s10 + $0x210] sm:$0xff]  ;;  %v13054_v0 = vcombine.low %v4931_v23, %v4935_v29 }
0x2792   : > { %11701 = vmatprep.subr.bf16.mxu0 %v12967_v45  ;;  %v4923_v41 = vld [vmem:[%s15435_s10 + $0x610] sm:$0xff]  ;;  %v12918_v61 = vcombine.low %v4795_v60, %v4799_v39 }
0x2793   : > { %v4927_v6 = vld [vmem:[%s15435_s10 + $0x630] sm:$0xff] }
0x2794   : > { %11743 = vmatpush2.bf16.msra.mxu1 %v13102_v44  ;;  %v12919_v44 = vcombine.high %v4795_v60, %v4799_v39  ;;  %v13047_v45 = vcombine.high %v4923_v41, %v4927_v6  ;;  %v5047_v32 = vld [vmem:[%s15435_s10 + $0x9f0] sm:$0xff] }
0x2795   : > { %11744 = vmatprep.subr.bf16.mxu1 %v13095_v48  ;;  %11702 = vmatpush2.bf16.msra.mxu0 %v12966_v4  ;;  %v5043_v48 = vld [vmem:[%s15435_s10 + $0x9d0] sm:$0xff]  ;;  %v13046_v4 = vcombine.low %v4923_v41, %v4927_v6 }
0x2796   : > { %11703 = vmatprep.subr.bf16.mxu0 %v12959_v14  ;;  %v5171_v19 = vld [vmem:[%s15435_s10 + $0xdd0] sm:$0xff]  ;;  %v13166_v27 = vcombine.low %v5043_v48, %v5047_v32 }
0x2797   : > { %v5175_v51 = vld [vmem:[%s15435_s10 + $0xdf0] sm:$0xff] }
0x2798   : > { %11745 = vmatpush2.bf16.msra.mxu1 %v13094_v22  ;;  %v13167_v22 = vcombine.high %v5043_v48, %v5047_v32  ;;  %v13295_v14 = vcombine.high %v5171_v19, %v5175_v51  ;;  %v5039_v12 = vld [vmem:[%s15435_s10 + $0x9b0] sm:$0xff] }
0x2799   : > { %11746 = vmatprep.subr.bf16.mxu1 %v13087_v37  ;;  %11704 = vmatpush2.bf16.msra.mxu0 %v12958_v1  ;;  %v5035_v37 = vld [vmem:[%s15435_s10 + $0x990] sm:$0xff]  ;;  %v13294_v1 = vcombine.low %v5171_v19, %v5175_v51 }
0x279a   : > { %11705 = vmatprep.subr.bf16.mxu0 %v12951_v15  ;;  %v5163_v54 = vld [vmem:[%s15435_s10 + $0xd90] sm:$0xff] }
0x279b   : > { %v5167_v26 = vld [vmem:[%s15435_s10 + $0xdb0] sm:$0xff] }
0x279c   : > { %11747 = vmatpush2.bf16.msra.mxu1 %v13086_v5  ;;  %v13159_v5 = vcombine.high %v5035_v37, %v5039_v12  ;;  %v13287_v15 = vcombine.high %v5163_v54, %v5167_v26  ;;  %v5031_v13 = vld [vmem:[%s15435_s10 + $0x970] sm:$0xff]  ;;  %v13286_v10 = vcombine.low %v5163_v54, %v5167_v26 }
0x279d   : > { %11748 = vmatprep.subr.bf16.mxu1 %v13079_v52  ;;  %11706 = vmatpush2.bf16.msra.mxu0 %v12950_v36  ;;  %v5027_v52 = vld [vmem:[%s15435_s10 + $0x950] sm:$0xff] }
0x279e   : > { %11707 = vmatprep.subr.bf16.mxu0 %v12943_v50  ;;  %v14673_v3 = vld [vmem:[#allocation2 + $0x30] ss:$16 sps:$4 sm:$0xff]   ;;  %v13151_v9 = vcombine.high %v5027_v52, %v5031_v13  ;;  %v14674_v28 = vld [vmem:[#allocation2 + $0x5c] ss:$-72 sps:$4 sm:$0xff]  }
0x279f   : > { %v5155_v18 = vld [vmem:[%s15435_s10 + $0xd50] sm:$0xff] }
0x27a0   : > { %11749 = vmatpush2.bf16.msra.mxu1 %v13078_v43  ;;  %v5159_v36 = vld [vmem:[%s15435_s10 + $0xd70] sm:$0xff] }
0x27a1   : > { %11750 = vmatprep.subr.bf16.mxu1 %v13071_v20  ;;  %11708 = vmatpush2.bf16.msra.mxu0 %v12942_v30  ;;  %v13158_v20 = vcombine.low %v5035_v37, %v5039_v12  ;;  %v5147_v23 = vld [vmem:[%s15435_s10 + $0xd10] sm:$0xff]  ;;  %v13278_v60 = vcombine.low %v5155_v18, %v5159_v36 }
0x27a2   : > { %11709 = vmatprep.subr.bf16.mxu0 %v12935_v58  ;;  %v5019_v58 = vld [vmem:[%s15435_s10 + $0x910] sm:$0xff] }
0x27a3   : > { %v5151_v29 = vld [vmem:[%s15435_s10 + $0xd30] sm:$0xff] }
0x27a4   : > { %11751 = vmatpush2.bf16.msra.mxu1 %v13070_v34  ;;  %v5143_v48 = vld [vmem:[%s15435_s10 + $0xcf0] sm:$0xff]  ;;  %v13270_v51 = vcombine.low %v5147_v23, %v5151_v29 }
0x27a5   : > { %11752 = vmatprep.subr.bf16.mxu1 %v13063_v63  ;;  %11710 = vmatpush2.bf16.msra.mxu0 %v12934_v31  ;;  %v5023_v63 = vld [vmem:[%s15435_s10 + $0x930] sm:$0xff] }
0x27a6   : > { %11711 = vmatprep.subr.bf16.mxu0 %v12927_v40  ;;  %v13150_v40 = vcombine.low %v5027_v52, %v5031_v13  ;;  %v13143_v39 = vcombine.high %v5019_v58, %v5023_v63  ;;  %v13142_v19 = vcombine.low %v5019_v58, %v5023_v63  ;;  %v5135_v37 = vld [vmem:[%s15435_s10 + $0xcb0] sm:$0xff] }
0x27a7   : > { %v5127_v52 = vld [vmem:[%s15435_s10 + $0xc70] sm:$0xff] }
0x27a8   : > { %11753 = vmatpush2.bf16.msra.mxu1 %v13062_v16  ;;  %v5235_v58 = vld [vmem:[%s15435_s10 + $0xfd0] sm:$0xff] }
0x27a9   : > { %11754 = vmatprep.subr.bf16.mxu1 %v13055_v47  ;;  %11712 = vmatpush2.bf16.msra.mxu0 %v12926_v33  ;;  %v13271_v33 = vcombine.high %v5147_v23, %v5151_v29  ;;  %v5239_v63 = vld [vmem:[%s15435_s10 + $0xff0] sm:$0xff] }
0x27aa   : > { %11713 = vmatprep.subr.bf16.mxu0 %v12919_v44  ;;  %v13359_v29 = vcombine.high %v5235_v58, %v5239_v63 }
0x27ac   : > { %11755 = vmatpush2.bf16.msra.mxu1 %v13054_v0  ;;  %v5011_v0 = vld [vmem:[%s15435_s10 + $0x8d0] sm:$0xff] }
0x27ad   : > { %11756 = vmatprep.subr.bf16.mxu1 %v13047_v45  ;;  %11714 = vmatpush2.bf16.msra.mxu0 %v12918_v61  ;;  %v5139_v45 = vld [vmem:[%s15435_s10 + $0xcd0] sm:$0xff] }
0x27ae   : > { %11769 = vmatprep.subr.bf16.mxu0 %v13167_v22  ;;  %v13263_v61 = vcombine.high %v5139_v45, %v5143_v48  ;;  %v5007_v22 = vld [vmem:[%s15435_s10 + $0x8b0] sm:$0xff]  ;;  %v13262_v54 = vcombine.low %v5139_v45, %v5143_v48 }
0x27af   : > { %v5223_v45 = vld [vmem:[%s15435_s10 + $0xf70] sm:$0xff] }
0x27b0   : > { %11757 = vmatpush2.bf16.msra.mxu1 %v13046_v4  ;;  %v11459_v42 = vpop.f32.mrf.mxu0  ;;  %11716 = vmatmul.mubr.bf16.vlgmr.msra.gmra.mxu0 %v14673_v3  ;;  %v5003_v4 = vld [vmem:[%s15435_s10 + $0x890] sm:$0xff] }
0x27b1   : > { %11812 = vmatprep.subr.bf16.mxu1 %v13295_v14  ;;  %v11460_v43 = vadd.f32 %v11459_v42, %v16835_v25  ;;  %11770 = vmatpush1.bf16.msra.mxu0 %v13166_v27  ;;  %v13279_v25 = vcombine.high %v5155_v18, %v5159_v36  ;;  %v5131_v14 = vld [vmem:[%s15435_s10 + $0xc90] sm:$0xff]  ;;  %v13127_v26 = vcombine.high %v5003_v4, %v5007_v22 }
0x27b2   : > { %v11461_v8 = vpop.f32.mrf.mxu0  ;;  %11771 = vmatprep.subr.bf16.mxu0 %v13159_v5  ;;  %11801 = vmatprep.mubr.bf16.mxu0 %v14674_v28  ;;  %v13255_v27 = vcombine.high %v5131_v14, %v5135_v37  ;;  %v4999_v5 = vld [vmem:[%s15435_s10 + $0x870] sm:$0xff]  ;;  %v13126_v13 = vcombine.low %v5003_v4, %v5007_v22  ;;  %v13254_v42 = vcombine.low %v5131_v14, %v5135_v37 }
0x27b3   : > { %v11502_v50 = vpop.f32.mrf.mxu1  ;;  %11759 = vmatmul.mubr.bf16.vlgmr.msra.gmra.mxu1 %v16285_v56  ;;  %v11462_v30 = vadd.f32 %v11461_v8, %v16842_v59  ;;  %v4987_v36 = vld [vmem:[%s15435_s10 + $0x810] sm:$0xff] }
0x27b4   : > { %11813 = vmatpush1.bf16.msra.mxu1 %v13294_v1  ;;  %v16910_v21 = vadd.f32 %v11502_v50, %v11460_v43  ;;  %v11463_v35 = vpop.f32.mrf.mxu0  ;;  %11844 = vmatprep.mubr.bf16.mxu1 %v16297_v17  ;;  %v4995_v1 = vld [vmem:[%s15435_s10 + $0x850] sm:$0xff] }
0x27b5   : > { %v11504_v34 = vpop.f32.mrf.mxu1  ;;  %11814 = vmatprep.subr.bf16.mxu1 %v13287_v15  ;;  %v11464_v16 = vadd.f32 %v11463_v35, %v16844_v49  ;;  %11772 = vmatpush1.bf16.msra.mxu0 %v13158_v20  ;;  %v5015_v49 = vld [vmem:[%s15435_s10 + $0x8f0] sm:$0xff]  ;;  %v13119_v3 = vcombine.high %v4995_v1, %v4999_v5  ;;  %v13118_v8 = vcombine.low %v4995_v1, %v4999_v5 }
0x27b6   : > { %v16918_v31 = vadd.f32 %v11504_v34, %v11462_v30  ;;  %v11465_v47 = vpop.f32.mrf.mxu0  ;;  %11773 = vmatprep.subr.bf16.mxu0 %v13151_v9  ;;  %v13134_v12 = vcombine.low %v5011_v0, %v5015_v49  ;;  %v5123_v15 = vld [vmem:[%s15435_s10 + $0xc50] sm:$0xff] }
0x27b7   : > { %v11506_v59 = vpop.f32.mrf.mxu1  ;;  %v11466_v6 = vadd.f32 %v11465_v47, %v16850_v46  ;;  %v13135_v46 = vcombine.high %v5011_v0, %v5015_v49  ;;  %v13247_v18 = vcombine.high %v5123_v15, %v5127_v52  ;;  %v4991_v43 = vld [vmem:[%s15435_s10 + $0x830] sm:$0xff] }
0x27b8   : > { %11815 = vmatpush1.bf16.msra.mxu1 %v13286_v10  ;;  %v16921_v41 = vadd.f32 %v11506_v59, %v11464_v16  ;;  %v5115_v50 = vld [vmem:[%s15435_s10 + $0xc10] sm:$0xff]  ;;  %v13246_v10 = vcombine.low %v5123_v15, %v5127_v52  ;;  %v13111_v9 = vcombine.high %v4987_v36, %v4991_v43  ;;  %v13110_v28 = vcombine.low %v4987_v36, %v4991_v43 }
0x27b9   : > { %11816 = vmatprep.subr.bf16.mxu1 %v13279_v25  ;;  %v11508_v44 = vpop.f32.mrf.mxu1  ;;  %11774 = vmatpush1.bf16.msra.mxu0 %v13150_v40  ;;  %v5119_v20 = vld [vmem:[%s15435_s10 + $0xc30] sm:$0xff] }
0x27ba   : > { %v16928_v32 = vadd.f32 %v11508_v44, %v11466_v6  ;;  %11775 = vmatprep.subr.bf16.mxu0 %v13143_v39  ;;  %v13239_v30 = vcombine.high %v5115_v50, %v5119_v20  ;;  %v5107_v34 = vld [vmem:[%s15435_s10 + $0xbd0] sm:$0xff]  ;;  %v13238_v35 = vcombine.low %v5115_v50, %v5119_v20  ;;  %v13358_v39 = vcombine.low %v5235_v58, %v5239_v63 }
0x27bb   : > { %v5111_v25 = vld [vmem:[%s15435_s10 + $0xbf0] sm:$0xff] }
0x27bc   : > { %11817 = vmatpush1.bf16.msra.mxu1 %v13278_v60  ;;  %v13231_v23 = vcombine.high %v5107_v34, %v5111_v25  ;;  %v5099_v16 = vld [vmem:[%s15435_s10 + $0xb90] sm:$0xff]  ;;  %v13230_v60 = vcombine.low %v5107_v34, %v5111_v25 }
0x27bd   : > { %11818 = vmatprep.subr.bf16.mxu1 %v13271_v33  ;;  %11776 = vmatpush1.bf16.msra.mxu0 %v13142_v19  ;;  %v5103_v59 = vld [vmem:[%s15435_s10 + $0xbb0] sm:$0xff] }
0x27be   : > { %11777 = vmatprep.subr.bf16.mxu0 %v13135_v46  ;;  %v5227_v40 = vld [vmem:[%s15435_s10 + $0xf90] sm:$0xff]  ;;  %v13223_v6 = vcombine.high %v5099_v16, %v5103_v59  ;;  %v13222_v48 = vcombine.low %v5099_v16, %v5103_v59 }
0x27bf   : > { %v5231_v47 = vld [vmem:[%s15435_s10 + $0xfb0] sm:$0xff] }
0x27c0   : > { %11819 = vmatpush1.bf16.msra.mxu1 %v13270_v51  ;;  %v13351_v33 = vcombine.high %v5227_v40, %v5231_v47  ;;  %v5091_v0 = vld [vmem:[%s15435_s10 + $0xb50] sm:$0xff]  ;;  %v13350_v19 = vcombine.low %v5227_v40, %v5231_v47 }
0x27c1   : > { %11820 = vmatprep.subr.bf16.mxu1 %v13263_v61  ;;  %11778 = vmatpush1.bf16.msra.mxu0 %v13134_v12  ;;  %v5095_v49 = vld [vmem:[%s15435_s10 + $0xb70] sm:$0xff] }
0x27c2   : > { %11779 = vmatprep.subr.bf16.mxu0 %v13127_v26  ;;  %v5219_v44 = vld [vmem:[%s15435_s10 + $0xf50] sm:$0xff]  ;;  %v13215_v51 = vcombine.high %v5091_v0, %v5095_v49  ;;  %v13214_v37 = vcombine.low %v5091_v0, %v5095_v49 }
0x27c3   : > { %v13343_v46 = vcombine.high %v5219_v44, %v5223_v45  ;;  %v5083_v61 = vld [vmem:[%s15435_s10 + $0xb10] sm:$0xff]  ;;  %v13342_v12 = vcombine.low %v5219_v44, %v5223_v45 }
0x27c4   : > { %11821 = vmatpush1.bf16.msra.mxu1 %v13262_v54  ;;  %v5087_v4 = vld [vmem:[%s15435_s10 + $0xb30] sm:$0xff] }
0x27c5   : > { %11822 = vmatprep.subr.bf16.mxu1 %v13255_v27  ;;  %11780 = vmatpush1.bf16.msra.mxu0 %v13126_v13  ;;  %v5211_v22 = vld [vmem:[%s15435_s10 + $0xf10] sm:$0xff]  ;;  %v13207_v54 = vcombine.high %v5083_v61, %v5087_v4  ;;  %v13206_v52 = vcombine.low %v5083_v61, %v5087_v4 }
0x27c6   : > { %11781 = vmatprep.subr.bf16.mxu0 %v13119_v3  ;;  %v5215_v14 = vld [vmem:[%s15435_s10 + $0xf30] sm:$0xff] }
0x27c7   : > { %v13335_v26 = vcombine.high %v5211_v22, %v5215_v14  ;;  %v5075_v27 = vld [vmem:[%s15435_s10 + $0xad0] sm:$0xff]  ;;  %v13334_v13 = vcombine.low %v5211_v22, %v5215_v14 }
0x27c8   : > { %11823 = vmatpush1.bf16.msra.mxu1 %v13254_v42  ;;  %v5079_v1 = vld [vmem:[%s15435_s10 + $0xaf0] sm:$0xff] }
0x27c9   : > { %11824 = vmatprep.subr.bf16.mxu1 %v13247_v18  ;;  %11782 = vmatpush1.bf16.msra.mxu0 %v13118_v8  ;;  %v5203_v5 = vld [vmem:[%s15435_s10 + $0xed0] sm:$0xff]  ;;  %v13199_v42 = vcombine.high %v5075_v27, %v5079_v1  ;;  %v13198_v20 = vcombine.low %v5075_v27, %v5079_v1 }
0x27ca   : > { %11783 = vmatprep.subr.bf16.mxu0 %v13111_v9  ;;  %v5207_v15 = vld [vmem:[%s15435_s10 + $0xef0] sm:$0xff] }
0x27cb   : > { %v13327_v3 = vcombine.high %v5203_v5, %v5207_v15  ;;  %v5067_v18 = vld [vmem:[%s15435_s10 + $0xa90] sm:$0xff]  ;;  %v13326_v8 = vcombine.low %v5203_v5, %v5207_v15 }
0x27cc   : > { %11825 = vmatpush1.bf16.msra.mxu1 %v13246_v10  ;;  %v5071_v36 = vld [vmem:[%s15435_s10 + $0xab0] sm:$0xff] }
0x27cd   : > { %11826 = vmatprep.subr.bf16.mxu1 %v13239_v30  ;;  %11784 = vmatpush1.bf16.msra.mxu0 %v13110_v28  ;;  %v5195_v43 = vld [vmem:[%s15435_s10 + $0xe90] sm:$0xff]  ;;  %v13191_v10 = vcombine.high %v5067_v18, %v5071_v36  ;;  %v13190_v63 = vcombine.low %v5067_v18, %v5071_v36 }
0x27ce   : > { %11785 = vmatprep.subr.bf16.mxu0 %v13231_v23  ;;  %v5199_v50 = vld [vmem:[%s15435_s10 + $0xeb0] sm:$0xff] }
0x27cf   : > { %v13319_v9 = vcombine.high %v5195_v43, %v5199_v50  ;;  %v5059_v30 = vld [vmem:[%s15435_s10 + $0xa50] sm:$0xff]  ;;  %v13318_v28 = vcombine.low %v5195_v43, %v5199_v50 }
0x27d0   : > { %11827 = vmatpush1.bf16.msra.mxu1 %v13238_v35  ;;  %v5063_v34 = vld [vmem:[%s15435_s10 + $0xa70] sm:$0xff] }
0x27d1   : > { %11828 = vmatprep.subr.bf16.mxu1 %v13359_v29  ;;  %11786 = vmatpush2.bf16.msra.mxu0 %v13230_v60  ;;  %v5187_v25 = vld [vmem:[%s15435_s10 + $0xe50] sm:$0xff]  ;;  %v13183_v35 = vcombine.high %v5059_v30, %v5063_v34  ;;  %v13182_v47 = vcombine.low %v5059_v30, %v5063_v34 }
0x27d2   : > { %11787 = vmatprep.subr.bf16.mxu0 %v13223_v6  ;;  %v5191_v58 = vld [vmem:[%s15435_s10 + $0xe70] sm:$0xff] }
0x27d3   : > { %v13311_v23 = vcombine.high %v5187_v25, %v5191_v58  ;;  %v5051_v29 = vld [vmem:[%s15435_s10 + $0xa10] sm:$0xff]  ;;  %v13310_v60 = vcombine.low %v5187_v25, %v5191_v58 }
0x27d4   : > { %11829 = vmatpush2.bf16.msra.mxu1 %v13358_v39  ;;  %v5055_v16 = vld [vmem:[%s15435_s10 + $0xa30] sm:$0xff] }
0x27d5   : > { %11830 = vmatprep.subr.bf16.mxu1 %v13351_v33  ;;  %11788 = vmatpush2.bf16.msra.mxu0 %v13222_v48  ;;  %v5179_v59 = vld [vmem:[%s15435_s10 + $0xe10] sm:$0xff]  ;;  %v13175_v39 = vcombine.high %v5051_v29, %v5055_v16  ;;  %v13174_v45 = vcombine.low %v5051_v29, %v5055_v16 }
0x27d6   : > { %11789 = vmatprep.subr.bf16.mxu0 %v13215_v51  ;;  %v5183_v40 = vld [vmem:[%s15435_s10 + $0xe30] sm:$0xff] }
0x27d7   : > { %v13303_v6 = vcombine.high %v5179_v59, %v5183_v40  ;;  %v5299_v33 = vld [vmem:[%s15435_s10 + $0x11d0] sm:$0xff]  ;;  %v13302_v48 = vcombine.low %v5179_v59, %v5183_v40 }
0x27d8   : > { %11831 = vmatpush2.bf16.msra.mxu1 %v13350_v19  ;;  %v5303_v0 = vld [vmem:[%s15435_s10 + $0x11f0] sm:$0xff] }
0x27d9   : > { %11832 = vmatprep.subr.bf16.mxu1 %v13343_v46  ;;  %11790 = vmatpush2.bf16.msra.mxu0 %v13214_v37  ;;  %v5427_v49 = vld [vmem:[%s15435_s10 + $0x15d0] sm:$0xff]  ;;  %v13423_v19 = vcombine.high %v5299_v33, %v5303_v0  ;;  %v13422_v14 = vcombine.low %v5299_v33, %v5303_v0 }
0x27da   : > { %11791 = vmatprep.subr.bf16.mxu0 %v13207_v54  ;;  %v5431_v44 = vld [vmem:[%s15435_s10 + $0x15f0] sm:$0xff] }
0x27db   : > { %v13551_v51 = vcombine.high %v5427_v49, %v5431_v44  ;;  %v5291_v46 = vld [vmem:[%s15435_s10 + $0x1190] sm:$0xff]  ;;  %v13550_v37 = vcombine.low %v5427_v49, %v5431_v44 }
0x27dc   : > { %11833 = vmatpush2.bf16.msra.mxu1 %v13342_v12  ;;  %v5295_v61 = vld [vmem:[%s15435_s10 + $0x11b0] sm:$0xff] }
0x27dd   : > { %11834 = vmatprep.subr.bf16.mxu1 %v13335_v26  ;;  %11792 = vmatpush2.bf16.msra.mxu0 %v13206_v52  ;;  %v5419_v4 = vld [vmem:[%s15435_s10 + $0x1590] sm:$0xff]  ;;  %v13415_v12 = vcombine.high %v5291_v46, %v5295_v61  ;;  %v13414_v52 = vcombine.low %v5291_v46, %v5295_v61 }
0x27de   : > { %11793 = vmatprep.subr.bf16.mxu0 %v13199_v42  ;;  %v5423_v22 = vld [vmem:[%s15435_s10 + $0x15b0] sm:$0xff] }
0x27df   : > { %v13543_v54 = vcombine.high %v5419_v4, %v5423_v22  ;;  %v5283_v26 = vld [vmem:[%s15435_s10 + $0x1150] sm:$0xff] }
0x27e0   : > { %11835 = vmatpush2.bf16.msra.mxu1 %v13334_v13  ;;  %v5287_v27 = vld [vmem:[%s15435_s10 + $0x1170] sm:$0xff]  ;;  %v13542_v13 = vcombine.low %v5419_v4, %v5423_v22 }
0x27e1   : > { %11836 = vmatprep.subr.bf16.mxu1 %v13327_v3  ;;  %11794 = vmatpush2.bf16.msra.mxu0 %v13198_v20  ;;  %v14675_v1 = vld [vmem:[#allocation2 + $0x58] ss:$-72 sps:$4 sm:$0xff]   ;;  %v13407_v42 = vcombine.high %v5283_v26, %v5287_v27  ;;  %v14676_v43 = vld [vmem:[#allocation2 + $0x54] ss:$16 sps:$4 sm:$0xff]  }
0x27e2   : > { %11795 = vmatprep.subr.bf16.mxu0 %v13191_v10  ;;  %v5411_v5 = vld [vmem:[%s15435_s10 + $0x1550] sm:$0xff]  ;;  %v13406_v10 = vcombine.low %v5283_v26, %v5287_v27 }
0x27e3   : > { %v5415_v15 = vld [vmem:[%s15435_s10 + $0x1570] sm:$0xff] }
0x27e4   : > { %11837 = vmatpush2.bf16.msra.mxu1 %v13326_v8  ;;  %v13535_v3 = vcombine.high %v5411_v5, %v5415_v15  ;;  %v5275_v18 = vld [vmem:[%s15435_s10 + $0x1110] sm:$0xff] }
0x27e5   : > { %11838 = vmatprep.subr.bf16.mxu1 %v13319_v9  ;;  %11796 = vmatpush2.bf16.msra.mxu0 %v13190_v63  ;;  %v5279_v36 = vld [vmem:[%s15435_s10 + $0x1130] sm:$0xff]  ;;  %v13534_v9 = vcombine.low %v5411_v5, %v5415_v15 }
0x27e6   : > { %11797 = vmatprep.subr.bf16.mxu0 %v13183_v35  ;;  %v5403_v50 = vld [vmem:[%s15435_s10 + $0x1510] sm:$0xff]  ;;  %v13399_v30 = vcombine.high %v5275_v18, %v5279_v36  ;;  %v13398_v35 = vcombine.low %v5275_v18, %v5279_v36 }
0x27e7   : > { %v5407_v20 = vld [vmem:[%s15435_s10 + $0x1530] sm:$0xff] }
0x27e8   : > { %11839 = vmatpush2.bf16.msra.mxu1 %v13318_v28  ;;  %v14677_v8 = vld [vmem:[#allocation2 + $0x6c] ss:$8 sps:$4 sm:$0xff]   ;;  %v13527_v34 = vcombine.high %v5403_v50, %v5407_v20 }
0x27e9   : > { %11840 = vmatprep.subr.bf16.mxu1 %v13311_v23  ;;  %11798 = vmatpush2.bf16.msra.mxu0 %v13182_v47  ;;  %v5267_v25 = vld [vmem:[%s15435_s10 + $0x10d0] sm:$0xff]  ;;  %v13526_v23 = vcombine.low %v5403_v50, %v5407_v20 }
0x27ea   : > { %11799 = vmatprep.subr.bf16.mxu0 %v13175_v39  ;;  %v5271_v58 = vld [vmem:[%s15435_s10 + $0x10f0] sm:$0xff] }
0x27eb   : > { %v5395_v63 = vld [vmem:[%s15435_s10 + $0x14d0] sm:$0xff]  ;;  %v13391_v29 = vcombine.high %v5267_v25, %v5271_v58  ;;  %v13390_v39 = vcombine.low %v5267_v25, %v5271_v58 }
0x27ec   : > { %11841 = vmatpush2.bf16.msra.mxu1 %v13310_v60  ;;  %v5399_v28 = vld [vmem:[%s15435_s10 + $0x14f0] sm:$0xff] }
0x27ed   : > { %11842 = vmatprep.subr.bf16.mxu1 %v13303_v6  ;;  %11800 = vmatpush2.bf16.msra.mxu0 %v13174_v45  ;;  %v13519_v16 = vcombine.high %v5395_v63, %v5399_v28  ;;  %v5259_v59 = vld [vmem:[%s15435_s10 + $0x1090] sm:$0xff]  ;;  %v13518_v6 = vcombine.low %v5395_v63, %v5399_v28 }
0x27ee   : > { %11855 = vmatprep.subr.bf16.mxu0 %v13423_v19  ;;  %v5263_v40 = vld [vmem:[%s15435_s10 + $0x10b0] sm:$0xff] }
0x27ef   : > { %v5387_v47 = vld [vmem:[%s15435_s10 + $0x1490] sm:$0xff]  ;;  %v13383_v33 = vcombine.high %v5259_v59, %v5263_v40  ;;  %v13382_v19 = vcombine.low %v5259_v59, %v5263_v40 }
0x27f0   : > { %11843 = vmatpush2.bf16.msra.mxu1 %v13302_v48  ;;  %11802 = vmatmul.mubr.bf16.vlgmr.msra.gmra.mxu0 %v14675_v1  ;;  %v5391_v60 = vld [vmem:[%s15435_s10 + $0x14b0] sm:$0xff] }
0x27f1   : > { %11898 = vmatprep.subr.bf16.mxu1 %v13551_v51  ;;  %11856 = vmatpush1.bf16.msra.mxu0 %v13422_v14  ;;  %v13511_v0 = vcombine.high %v5387_v47, %v5391_v60  ;;  %v5251_v49 = vld [vmem:[%s15435_s10 + $0x1050] sm:$0xff]  ;;  %v13510_v51 = vcombine.low %v5387_v47, %v5391_v60 }
0x27f2   : > { %11857 = vmatprep.subr.bf16.mxu0 %v13415_v12  ;;  %11887 = vmatprep.mubr.bf16.mxu0 %v14676_v43  ;;  %v5255_v44 = vld [vmem:[%s15435_s10 + $0x1070] sm:$0xff] }
0x27f3   : > { %11845 = vmatmul.mubr.bf16.vlgmr.msra.gmra.mxu1 %v16363_v38  ;;  %v5379_v45 = vld [vmem:[%s15435_s10 + $0x1450] sm:$0xff]  ;;  %v13375_v46 = vcombine.high %v5251_v49, %v5255_v44  ;;  %v13374_v12 = vcombine.low %v5251_v49, %v5255_v44 }
0x27f4   : > { %11899 = vmatpush1.bf16.msra.mxu1 %v13550_v37  ;;  %11930 = vmatprep.mubr.bf16.mxu1 %v14677_v8  ;;  %v5383_v48 = vld [vmem:[%s15435_s10 + $0x1470] sm:$0xff] }
0x27f5   : > { %11900 = vmatprep.subr.bf16.mxu1 %v13543_v54  ;;  %11858 = vmatpush1.bf16.msra.mxu0 %v13414_v52  ;;  %v13503_v61 = vcombine.high %v5379_v45, %v5383_v48  ;;  %v5243_v4 = vld [vmem:[%s15435_s10 + $0x1010] sm:$0xff]  ;;  %v13502_v54 = vcombine.low %v5379_v45, %v5383_v48 }
0x27f6   : > { %11859 = vmatprep.subr.bf16.mxu0 %v13407_v42  ;;  %v5247_v22 = vld [vmem:[%s15435_s10 + $0x1030] sm:$0xff] }
0x27f7   : > { %v5371_v14 = vld [vmem:[%s15435_s10 + $0x1410] sm:$0xff]  ;;  %v13367_v26 = vcombine.high %v5243_v4, %v5247_v22 }
0x27f8   : > { %11901 = vmatpush1.bf16.msra.mxu1 %v13542_v13  ;;  %v5375_v37 = vld [vmem:[%s15435_s10 + $0x1430] sm:$0xff]  ;;  %v13366_v13 = vcombine.low %v5243_v4, %v5247_v22 }
0x27f9   : > { %11902 = vmatprep.subr.bf16.mxu1 %v13535_v3  ;;  %11860 = vmatpush1.bf16.msra.mxu0 %v13406_v10  ;;  %v13495_v27 = vcombine.high %v5371_v14, %v5375_v37  ;;  %v5363_v1 = vld [vmem:[%s15435_s10 + $0x13d0] sm:$0xff]  ;;  %v13494_v42 = vcombine.low %v5371_v14, %v5375_v37 }
0x27fa   : > { %11861 = vmatprep.subr.bf16.mxu0 %v13399_v30  ;;  %v5367_v5 = vld [vmem:[%s15435_s10 + $0x13f0] sm:$0xff] }
0x27fb   : > { %v5491_v15 = vld [vmem:[%s15435_s10 + $0x17d0] sm:$0xff]  ;;  %v13487_v3 = vcombine.high %v5363_v1, %v5367_v5  ;;  %v13486_v8 = vcombine.low %v5363_v1, %v5367_v5 }
0x27fc   : > { %11903 = vmatpush1.bf16.msra.mxu1 %v13534_v9  ;;  %v5495_v52 = vld [vmem:[%s15435_s10 + $0x17f0] sm:$0xff] }
0x27fd   : > { %11904 = vmatprep.subr.bf16.mxu1 %v13527_v34  ;;  %11862 = vmatpush1.bf16.msra.mxu0 %v13398_v35  ;;  %v13615_v18 = vcombine.high %v5491_v15, %v5495_v52  ;;  %v5355_v36 = vld [vmem:[%s15435_s10 + $0x1390] sm:$0xff]  ;;  %v13614_v10 = vcombine.low %v5491_v15, %v5495_v52 }
0x27fe   : > { %11863 = vmatprep.subr.bf16.mxu0 %v13391_v29  ;;  %v5359_v43 = vld [vmem:[%s15435_s10 + $0x13b0] sm:$0xff] }
0x27ff   : > { %v5483_v50 = vld [vmem:[%s15435_s10 + $0x1790] sm:$0xff]  ;;  %v13479_v9 = vcombine.high %v5355_v36, %v5359_v43  ;;  %v13478_v28 = vcombine.low %v5355_v36, %v5359_v43 }
0x2800   : > { %11905 = vmatpush1.bf16.msra.mxu1 %v13526_v23  ;;  %v5487_v20 = vld [vmem:[%s15435_s10 + $0x17b0] sm:$0xff] }
0x2801   : > { %11906 = vmatprep.subr.bf16.mxu1 %v13519_v16  ;;  %11864 = vmatpush1.bf16.msra.mxu0 %v13390_v39  ;;  %v13607_v30 = vcombine.high %v5483_v50, %v5487_v20  ;;  %v5347_v34 = vld [vmem:[%s15435_s10 + $0x1350] sm:$0xff]  ;;  %v13606_v35 = vcombine.low %v5483_v50, %v5487_v20 }
0x2802   : > { %11865 = vmatprep.subr.bf16.mxu0 %v13383_v33  ;;  %v5351_v25 = vld [vmem:[%s15435_s10 + $0x1370] sm:$0xff] }
0x2803   : > { %v5475_v58 = vld [vmem:[%s15435_s10 + $0x1750] sm:$0xff]  ;;  %v13471_v23 = vcombine.high %v5347_v34, %v5351_v25  ;;  %v13470_v60 = vcombine.low %v5347_v34, %v5351_v25 }
0x2804   : > { %11907 = vmatpush1.bf16.msra.mxu1 %v13518_v6  ;;  %v5479_v63 = vld [vmem:[%s15435_s10 + $0x1770] sm:$0xff] }
0x2805   : > { %11908 = vmatprep.subr.bf16.mxu1 %v13511_v0  ;;  %11866 = vmatpush1.bf16.msra.mxu0 %v13382_v19  ;;  %v13599_v29 = vcombine.high %v5475_v58, %v5479_v63  ;;  %v5339_v16 = vld [vmem:[%s15435_s10 + $0x1310] sm:$0xff]  ;;  %v13598_v39 = vcombine.low %v5475_v58, %v5479_v63 }
0x2806   : > { %11867 = vmatprep.subr.bf16.mxu0 %v13375_v46  ;;  %v5343_v59 = vld [vmem:[%s15435_s10 + $0x1330] sm:$0xff] }
0x2807   : > { %v5467_v40 = vld [vmem:[%s15435_s10 + $0x1710] sm:$0xff]  ;;  %v13463_v6 = vcombine.high %v5339_v16, %v5343_v59  ;;  %v13462_v48 = vcombine.low %v5339_v16, %v5343_v59 }
0x2808   : > { %11909 = vmatpush1.bf16.msra.mxu1 %v13510_v51  ;;  %v5471_v47 = vld [vmem:[%s15435_s10 + $0x1730] sm:$0xff] }
0x2809   : > { %11910 = vmatprep.subr.bf16.mxu1 %v13503_v61  ;;  %11868 = vmatpush1.bf16.msra.mxu0 %v13374_v12  ;;  %v13591_v33 = vcombine.high %v5467_v40, %v5471_v47  ;;  %v5331_v0 = vld [vmem:[%s15435_s10 + $0x12d0] sm:$0xff]  ;;  %v13590_v19 = vcombine.low %v5467_v40, %v5471_v47 }
0x280a   : > { %11869 = vmatprep.subr.bf16.mxu0 %v13367_v26  ;;  %v5335_v49 = vld [vmem:[%s15435_s10 + $0x12f0] sm:$0xff] }
0x280b   : > { %v5459_v44 = vld [vmem:[%s15435_s10 + $0x16d0] sm:$0xff]  ;;  %v13455_v51 = vcombine.high %v5331_v0, %v5335_v49  ;;  %v13454_v37 = vcombine.low %v5331_v0, %v5335_v49 }
0x280c   : > { %11911 = vmatpush1.bf16.msra.mxu1 %v13502_v54  ;;  %v5463_v45 = vld [vmem:[%s15435_s10 + $0x16f0] sm:$0xff] }
0x280d   : > { %11912 = vmatprep.subr.bf16.mxu1 %v13495_v27  ;;  %11870 = vmatpush1.bf16.msra.mxu0 %v13366_v13  ;;  %v13583_v46 = vcombine.high %v5459_v44, %v5463_v45  ;;  %v5323_v61 = vld [vmem:[%s15435_s10 + $0x1290] sm:$0xff]  ;;  %v13582_v12 = vcombine.low %v5459_v44, %v5463_v45  ;;  %v11545_v13 = vpop.f32.mrf.mxu0 }
0x280e   : > { %11871 = vmatprep.subr.bf16.mxu0 %v13487_v3  ;;  %v5327_v4 = vld [vmem:[%s15435_s10 + $0x12b0] sm:$0xff]  ;;  %v11546_v47 = vadd.f32 %v11545_v13, %v16910_v21 }
0x280f   : > { %v5451_v22 = vld [vmem:[%s15435_s10 + $0x1690] sm:$0xff]  ;;  %v13447_v54 = vcombine.high %v5323_v61, %v5327_v4  ;;  %v13446_v52 = vcombine.low %v5323_v61, %v5327_v4 }
0x2810   : > { %11913 = vmatpush1.bf16.msra.mxu1 %v13494_v42  ;;  %v5455_v14 = vld [vmem:[%s15435_s10 + $0x16b0] sm:$0xff] }
0x2811   : > { %11914 = vmatprep.subr.bf16.mxu1 %v13615_v18  ;;  %11872 = vmatpush2.bf16.msra.mxu0 %v13486_v8  ;;  %v13575_v26 = vcombine.high %v5451_v22, %v5455_v14  ;;  %v5315_v27 = vld [vmem:[%s15435_s10 + $0x1250] sm:$0xff]  ;;  %v13574_v42 = vcombine.low %v5451_v22, %v5455_v14  ;;  %v11588_v18 = vpop.f32.mrf.mxu1 }
0x2812   : > { %11873 = vmatprep.subr.bf16.mxu0 %v13479_v9  ;;  %v5319_v1 = vld [vmem:[%s15435_s10 + $0x1270] sm:$0xff]  ;;  %v11547_v9 = vpop.f32.mrf.mxu0 }
0x2813   : > { %v5443_v5 = vld [vmem:[%s15435_s10 + $0x1650] sm:$0xff]  ;;  %v13439_v3 = vcombine.high %v5315_v27, %v5319_v1  ;;  %v11590_v25 = vpop.f32.mrf.mxu1  ;;  %v11548_v44 = vadd.f32 %v11547_v9, %v16918_v31 }
0x2814   : > { %11915 = vmatpush2.bf16.msra.mxu1 %v13614_v10  ;;  %v5447_v15 = vld [vmem:[%s15435_s10 + $0x1670] sm:$0xff]  ;;  %v13438_v10 = vcombine.low %v5315_v27, %v5319_v1  ;;  %v11549_v16 = vpop.f32.mrf.mxu0 }
0x2815   : > { %11916 = vmatprep.subr.bf16.mxu1 %v13607_v30  ;;  %11874 = vmatpush2.bf16.msra.mxu0 %v13478_v28  ;;  %v13567_v36 = vcombine.high %v5443_v5, %v5447_v15  ;;  %v5307_v43 = vld [vmem:[%s15435_s10 + $0x1210] sm:$0xff]  ;;  %v13566_v30 = vcombine.low %v5443_v5, %v5447_v15  ;;  %v11550_v61 = vadd.f32 %v11549_v16, %v16921_v41 }
0x2816   : > { %11875 = vmatprep.subr.bf16.mxu0 %v13471_v23  ;;  %v5311_v50 = vld [vmem:[%s15435_s10 + $0x1230] sm:$0xff]  ;;  %v11591_v1 = vadd.f32 %v11590_v25, %v11548_v44 }
0x2817   : > { %v5435_v20 = vld [vmem:[%s15435_s10 + $0x1610] sm:$0xff]  ;;  %v13431_v34 = vcombine.high %v5307_v43, %v5311_v50 }
0x2818   : > { %11917 = vmatpush2.bf16.msra.mxu1 %v13606_v35  ;;  %v5439_v8 = vld [vmem:[%s15435_s10 + $0x1630] sm:$0xff] }
0x2819   : > { %11918 = vmatprep.subr.bf16.mxu1 %v13599_v29  ;;  %11876 = vmatpush2.bf16.msra.mxu0 %v13470_v60  ;;  %v13559_v58 = vcombine.high %v5435_v20, %v5439_v8  ;;  %v5555_v63 = vld [vmem:[%s15435_s10 + $0x19d0] sm:$0xff]  ;;  %v13430_v29 = vcombine.low %v5307_v43, %v5311_v50  ;;  %v13558_v59 = vcombine.low %v5435_v20, %v5439_v8  ;;  %v11592_v60 = vpop.f32.mrf.mxu1 }
0x281a   : > { %11877 = vmatprep.subr.bf16.mxu0 %v13463_v6  ;;  %v5559_v28 = vld [vmem:[%s15435_s10 + $0x19f0] sm:$0xff]  ;;  %v11593_v43 = vadd.f32 %v11592_v60, %v11550_v61 }
0x281b   : > { %v5683_v35 = vld [vmem:[%s15435_s10 + $0x1dd0] sm:$0xff]  ;;  %v13679_v40 = vcombine.high %v5555_v63, %v5559_v28  ;;  %v13678_v45 = vcombine.low %v5555_v63, %v5559_v28  ;;  %v11594_v4 = vpop.f32.mrf.mxu1 }
0x281c   : > { %11919 = vmatpush2.bf16.msra.mxu1 %v13598_v39  ;;  %v5687_v23 = vld [vmem:[%s15435_s10 + $0x1df0] sm:$0xff] }
0x281d   : > { %11920 = vmatprep.subr.bf16.mxu1 %v13591_v33  ;;  %11878 = vmatpush2.bf16.msra.mxu0 %v13462_v48  ;;  %v13807_v39 = vcombine.high %v5683_v35, %v5687_v23  ;;  %v5547_v6 = vld [vmem:[%s15435_s10 + $0x1990] sm:$0xff]  ;;  %v11551_v48 = vpop.f32.mrf.mxu0 }
0x281e   : > { %11879 = vmatprep.subr.bf16.mxu0 %v13455_v51  ;;  %v5551_v33 = vld [vmem:[%s15435_s10 + $0x19b0] sm:$0xff]  ;;  %v11552_v5 = vadd.f32 %v11551_v48, %v16928_v32 }
0x281f   : > { %v5675_v0 = vld [vmem:[%s15435_s10 + $0x1d90] sm:$0xff]  ;;  %v13671_v21 = vcombine.high %v5547_v6, %v5551_v33 }
0x2820   : > { %11921 = vmatpush2.bf16.msra.mxu1 %v13590_v19  ;;  %v5679_v49 = vld [vmem:[%s15435_s10 + $0x1db0] sm:$0xff]  ;;  %v13806_v19 = vcombine.low %v5683_v35, %v5687_v23  ;;  %v11595_v63 = vadd.f32 %v11594_v4, %v11552_v5 }
0x2821   : > { %11922 = vmatprep.subr.bf16.mxu1 %v13583_v46  ;;  %11880 = vmatpush2.bf16.msra.mxu0 %v13454_v37  ;;  %v17050_v51 = vld [vmem:[%s15435_s10 + $0x1950] sm:$0xff]  ;;  %v11589_v46 = vadd.f32 %v11588_v18, %v11546_v47  ;;  %v13799_v22 = vcombine.high %v5675_v0, %v5679_v49  ;;  %v13798_v27 = vcombine.low %v5675_v0, %v5679_v49 }
0x2822   : > { %11881 = vmatprep.subr.bf16.mxu0 %v13447_v54  ;;  %v17054_v14 = vld [vmem:[%s15435_s10 + $0x1970] sm:$0xff] }
0x2823   : > { %v17057_v31 = vld [vmem:[%s15435_s10 + $0x1d50] sm:$0xff]  ;;  %v13663_v18 = vcombine.high %v17050_v51, %v17054_v14 }
0x2824   : > { %11923 = vmatpush2.bf16.msra.mxu1 %v13582_v12  ;;  %v17060_v37 = vld [vmem:[%s15435_s10 + $0x1d70] sm:$0xff] }
0x2825   : > { %11924 = vmatprep.subr.bf16.mxu1 %v13575_v26  ;;  %11882 = vmatpush2.bf16.msra.mxu0 %v13446_v52  ;;  %v14678_v54 = vld [vmem:[#allocation2 + $0x50] ss:$16 sps:$4 sm:$0xff]   ;;  %v13670_v26 = vcombine.low %v5547_v6, %v5551_v33  ;;  %v13791_v32 = vcombine.high %v17057_v31, %v17060_v37 }
0x2826   : > { %11883 = vmatprep.subr.bf16.mxu0 %v13439_v3  ;;  %v14679_v52 = vld [vmem:[#allocation2 + $0x68] ss:$8 sps:$4 sm:$0xff]  }
0x2827   : > { %v14680_v13 = vld [vmem:[%s15443_s30] sm:$0xff] }
0x2828   : > { %11925 = vmatpush2.bf16.msra.mxu1 %v13574_v42  ;;  %v12400_v42 = vrot.slane %v14680_v13, %v5765_v7  ;;  %v5659_v9 = vld [vmem:[%s15435_s10 + $0x1d10] sm:$0xff]  ;;  %v12404_v7 = vrot.slane %v14680_v13, %v5769_v2  ;;  %v13790_v2 = vcombine.low %v17057_v31, %v17060_v37 }
0x2829   : > { %11926 = vmatprep.subr.bf16.mxu1 %v13567_v36  ;;  %11884 = vmatpush2.bf16.msra.mxu0 %v13438_v10  ;;  %v5531_v36 = vld [vmem:[%s15435_s10 + $0x1910] sm:$0xff] }
0x282a   : > { %11885 = vmatprep.subr.bf16.mxu0 %v13431_v34  ;;  %v5535_v10 = vld [vmem:[%s15435_s10 + $0x1930] sm:$0xff]  ;;  %v14681_v34 = vld [vmem:[#allocation2 + $0xc] ss:$112 sps:$4 sm:$0xff]  }
0x282b   : > { %v5523_v33 = vld [vmem:[%s15435_s10 + $0x18d0] sm:$0xff]  ;;  %v13654_v44 = vcombine.low %v5531_v36, %v5535_v10 }
0x282c   : > { %11927 = vmatpush2.bf16.msra.mxu1 %v13566_v30  ;;  %v5663_v30 = vld [vmem:[%s15435_s10 + $0x1d30] sm:$0xff] }
0x282d   : > { %11928 = vmatprep.subr.bf16.mxu1 %v13559_v58  ;;  %11886 = vmatpush2.bf16.msra.mxu0 %v13430_v29  ;;  %v13662_v58 = vcombine.low %v17050_v51, %v17054_v14  ;;  %v5527_v0 = vld [vmem:[%s15435_s10 + $0x18f0] sm:$0xff]  ;;  %v13782_v61 = vcombine.low %v5659_v9, %v5663_v30 }
0x282e   : > { %11941 = vmatprep.subr.bf16.mxu0 %v13679_v40  ;;  %v13783_v40 = vcombine.high %v5659_v9, %v5663_v30  ;;  %v5655_v48 = vld [vmem:[%s15435_s10 + $0x1cf0] sm:$0xff]  ;;  %v13647_v4 = vcombine.high %v5523_v33, %v5527_v0  ;;  %v13646_v5 = vcombine.low %v5523_v33, %v5527_v0 }
0x282f   : > { %v5631_v9 = vld [vmem:[%s15435_s10 + $0x1c30] sm:$0xff] }
0x2830   : > { %11929 = vmatpush2.bf16.msra.mxu1 %v13558_v59  ;;  %v11631_v12 = vpop.f32.mrf.mxu0  ;;  %11888 = vmatmul.mubr.bf16.vlgmr.msra.gmra.mxu0 %v14678_v54  ;;  %v13655_v59 = vcombine.high %v5531_v36, %v5535_v10  ;;  %v5643_v54 = vld [vmem:[%s15435_s10 + $0x1c90] sm:$0xff] }
0x2831   : > { %11984 = vmatprep.subr.bf16.mxu1 %v13807_v39  ;;  %v11632_v41 = vadd.f32 %v11631_v12, %v11589_v46  ;;  %11942 = vmatpush1.bf16.msra.mxu0 %v13678_v45  ;;  %v5651_v45 = vld [vmem:[%s15435_s10 + $0x1cd0] sm:$0xff] }
0x2832   : > { %v11633_v3 = vpop.f32.mrf.mxu0  ;;  %11943 = vmatprep.subr.bf16.mxu0 %v13671_v21  ;;  %11973 = vmatprep.mubr.bf16.mxu0 %v14681_v34  ;;  %v13775_v37 = vcombine.high %v5651_v45, %v5655_v48  ;;  %v5515_v12 = vld [vmem:[%s15435_s10 + $0x1890] sm:$0xff] }
0x2833   : > { %v11674_v15 = vpop.f32.mrf.mxu1  ;;  %11931 = vmatmul.mubr.bf16.vlgmr.msra.gmra.mxu1 %v14679_v52  ;;  %v11634_v20 = vadd.f32 %v11633_v3, %v11591_v1  ;;  %v5511_v3 = vld [vmem:[%s15435_s10 + $0x1870] sm:$0xff] }
0x2834   : > { %11985 = vmatpush1.bf16.msra.mxu1 %v13806_v19  ;;  %v11675_v50 = vadd.f32 %v11674_v15, %v11632_v41  ;;  %v11635_v25 = vpop.f32.mrf.mxu0  ;;  %12016 = vmatprep.mubr.bf16.mxu1 %v16440_v24  ;;  %v13774_v41 = vcombine.low %v5651_v45, %v5655_v48  ;;  %v5627_v10 = vld [vmem:[%s15435_s10 + $0x1c10] sm:$0xff] }
0x2835   : > { %v11676_v8 = vpop.f32.mrf.mxu1  ;;  %11986 = vmatprep.subr.bf16.mxu1 %v13799_v22  ;;  %v11636_v23 = vadd.f32 %v11635_v25, %v11593_v43  ;;  %11944 = vmatpush1.bf16.msra.mxu0 %v13670_v26  ;;  %v5647_v26 = vld [vmem:[%s15435_s10 + $0x1cb0] sm:$0xff]  ;;  %v13751_v25 = vcombine.high %v5627_v10, %v5631_v9 }
0x2836   : > { %v12373_v28 = vmax.f32 %v11675_v50, 0.0  ;;  %v11677_v35 = vadd.f32 %v11676_v8, %v11634_v20  ;;  %v11637_v16 = vpop.f32.mrf.mxu0  ;;  %11945 = vmatprep.subr.bf16.mxu0 %v13663_v18  ;;  %v13767_v13 = vcombine.high %v5643_v54, %v5647_v26  ;;  %v5635_v18 = vld [vmem:[%s15435_s10 + $0x1c50] sm:$0xff]  ;;  %v13766_v36 = vcombine.low %v5643_v54, %v5647_v26 }
0x2837   : > { %v11678_v29 = vpop.f32.mrf.mxu1  ;;  %v11638_v6 = vadd.f32 %v11637_v16, %v11595_v63  ;;  %v5499_v20 = vld [vmem:[%s15435_s10 + $0x1810] sm:$0xff] }
0x2838   : > { %11987 = vmatpush1.bf16.msra.mxu1 %v13798_v27  ;;  %v12431_v47 = vmul.f32 %v12400_v42, %v12373_v28  ;;  %v12374_v60 = vmax.f32 %v11677_v35, 0.0  ;;  %v11679_v39 = vadd.f32 %v11678_v29, %v11636_v23  ;;  %v5503_v8 = vld [vmem:[%s15435_s10 + $0x1830] sm:$0xff]  ;;  %v13750_v29 = vcombine.low %v5627_v10, %v5631_v9 }
0x2839   : > { %11988 = vmatprep.subr.bf16.mxu1 %v13791_v32  ;;  %v11680_v49 = vpop.f32.mrf.mxu1  ;;  %11946 = vmatpush1.bf16.msra.mxu0 %v13662_v58  ;;  %v5639_v32 = vld [vmem:[%s15435_s10 + $0x1c70] sm:$0xff]  ;;  %v13622_v23 = vcombine.low %v5499_v20, %v5503_v8 }
0x283a   : > { %v12447_v19 = vadd.f32 %v16767_v62, %v12431_v47  ;;  %v12432_v21 = vmul.f32 %v12404_v7, %v12374_v60  ;;  %v12381_v51 = vmax.f32 %v11679_v39, 0.0  ;;  %v11681_v46 = vadd.f32 %v11680_v49, %v11638_v6  ;;  %11947 = vmatprep.subr.bf16.mxu0 %v13655_v59  ;;  %v5519_v62 = vld [vmem:[%s15435_s10 + $0x18b0] sm:$0xff] }
0x283b   : > { %v13639_v15 = vcombine.high %v5515_v12, %v5519_v62  ;;  %v13759_v50 = vcombine.high %v5635_v18, %v5639_v32  ;;  %v13758_v34 = vcombine.low %v5635_v18, %v5639_v32  ;;  %v5619_v58 = vld [vmem:[%s15435_s10 + $0x1bd0] sm:$0xff] }
0x283c   : > { %11989 = vmatpush1.bf16.msra.mxu1 %v13790_v2  ;;  %v17086_v22 = vadd.f32 %v12447_v19, %v12432_v21  ;;  %v12439_v14 = vmul.f32 %v12400_v42, %v12381_v51  ;;  %v12382_v31 = vmax.f32 %v11681_v46, 0.0  ;;  %v5507_v42 = vld [vmem:[%s15435_s10 + $0x1850] sm:$0xff] }
0x283d   : > { %11990 = vmatprep.subr.bf16.mxu1 %v13783_v40  ;;  %11948 = vmatpush1.bf16.msra.mxu0 %v13654_v44  ;;  %v13631_v43 = vcombine.high %v5507_v42, %v5511_v3  ;;  %v13630_v30 = vcombine.low %v5507_v42, %v5511_v3  ;;  %v5623_v63 = vld [vmem:[%s15435_s10 + $0x1bf0] sm:$0xff] }
0x283e   : > { %v12448_v27 = vadd.f32 %v16773_v11, %v12439_v14  ;;  %v12440_v1 = vmul.f32 %v12404_v7, %v12382_v31  ;;  %11949 = vmatprep.subr.bf16.mxu0 %v13647_v4  ;;  %v13638_v11 = vcombine.low %v5515_v12, %v5519_v62  ;;  %v13623_v7 = vcombine.high %v5499_v20, %v5503_v8  ;;  %v5747_v28 = vld [vmem:[%s15435_s10 + $0x1fd0] sm:$0xff] }
0x283f   : > { %v5751_v35 = vld [vmem:[%s15435_s10 + $0x1ff0] sm:$0xff]  ;;  %v13743_v16 = vcombine.high %v5619_v58, %v5623_v63  ;;  %v13742_v39 = vcombine.low %v5619_v58, %v5623_v63 }
0x2840   : > { %11991 = vmatpush1.bf16.msra.mxu1 %v13782_v61  ;;  %v17093_v52 = vadd.f32 %v12448_v27, %v12440_v1  ;;  %v13871_v2 = vcombine.high %v5747_v28, %v5751_v35  ;;  %v5611_v59 = vld [vmem:[%s15435_s10 + $0x1b90] sm:$0xff]  ;;  %v13870_v6 = vcombine.low %v5747_v28, %v5751_v35 }
0x2841   : > { %11992 = vmatprep.subr.bf16.mxu1 %v13775_v37  ;;  %11950 = vmatpush1.bf16.msra.mxu0 %v13646_v5  ;;  %v5615_v40 = vld [vmem:[%s15435_s10 + $0x1bb0] sm:$0xff] }
0x2842   : > { %11951 = vmatprep.subr.bf16.mxu0 %v13639_v15  ;;  %v5739_v47 = vld [vmem:[%s15435_s10 + $0x1f90] sm:$0xff]  ;;  %v13735_v33 = vcombine.high %v5611_v59, %v5615_v40  ;;  %v13734_v19 = vcombine.low %v5611_v59, %v5615_v40  ;;  %v4788_v40 = vld [vmem:[%s15435_s10 + $0x1d8] sm:$0xff] }
0x2843   : > { %v5743_v60 = vld [vmem:[%s15435_s10 + $0x1fb0] sm:$0xff] }
0x2844   : > { %11993 = vmatpush1.bf16.msra.mxu1 %v13774_v41  ;;  %v13863_v0 = vcombine.high %v5739_v47, %v5743_v60  ;;  %v5603_v49 = vld [vmem:[%s15435_s10 + $0x1b50] sm:$0xff]  ;;  %v13862_v21 = vcombine.low %v5739_v47, %v5743_v60  ;;  %v4792_v47 = vld [vmem:[%s15435_s10 + $0x1f8] sm:$0xff] }
0x2845   : > { %11994 = vmatprep.subr.bf16.mxu1 %v13767_v13  ;;  %11952 = vmatpush1.bf16.msra.mxu0 %v13638_v11  ;;  %v5607_v44 = vld [vmem:[%s15435_s10 + $0x1b70] sm:$0xff]  ;;  %v4916_v60 = vld [vmem:[%s15435_s10 + $0x5d8] sm:$0xff] }
0x2846   : > { %11953 = vmatprep.subr.bf16.mxu0 %v13631_v43  ;;  %v5731_v45 = vld [vmem:[%s15435_s10 + $0x1f50] sm:$0xff]  ;;  %v13727_v51 = vcombine.high %v5603_v49, %v5607_v44  ;;  %v13726_v37 = vcombine.low %v5603_v49, %v5607_v44  ;;  %v4780_v44 = vld [vmem:[%s15435_s10 + $0x198] sm:$0xff] }
0x2847   : > { %v5735_v48 = vld [vmem:[%s15435_s10 + $0x1f70] sm:$0xff] }
0x2848   : > { %11995 = vmatpush1.bf16.msra.mxu1 %v13766_v36  ;;  %v13855_v46 = vcombine.high %v5731_v45, %v5735_v48  ;;  %v5595_v61 = vld [vmem:[%s15435_s10 + $0x1b10] sm:$0xff]  ;;  %v13854_v12 = vcombine.low %v5731_v45, %v5735_v48  ;;  %v4784_v45 = vld [vmem:[%s15435_s10 + $0x1b8] sm:$0xff] }
0x2849   : > { %11996 = vmatprep.subr.bf16.mxu1 %v13759_v50  ;;  %11954 = vmatpush1.bf16.msra.mxu0 %v13630_v30  ;;  %v5599_v4 = vld [vmem:[%s15435_s10 + $0x1b30] sm:$0xff]  ;;  %v4908_v48 = vld [vmem:[%s15435_s10 + $0x598] sm:$0xff] }
0x284a   : > { %11955 = vmatprep.subr.bf16.mxu0 %v13623_v7  ;;  %v5723_v14 = vld [vmem:[%s15435_s10 + $0x1f10] sm:$0xff]  ;;  %v13719_v62 = vcombine.high %v5595_v61, %v5599_v4  ;;  %v13718_v41 = vcombine.low %v5595_v61, %v5599_v4  ;;  %v4772_v4 = vld [vmem:[%s15435_s10 + $0x158] sm:$0xff] }
0x284b   : > { %v5727_v31 = vld [vmem:[%s15435_s10 + $0x1f30] sm:$0xff] }
0x284c   : > { %11997 = vmatpush1.bf16.msra.mxu1 %v13758_v34  ;;  %v13847_v54 = vcombine.high %v5723_v14, %v5727_v31  ;;  %v5587_v26 = vld [vmem:[%s15435_s10 + $0x1ad0] sm:$0xff]  ;;  %v13846_v15 = vcombine.low %v5723_v14, %v5727_v31  ;;  %v4776_v14 = vld [vmem:[%s15435_s10 + $0x178] sm:$0xff] }
0x284d   : > { %11998 = vmatprep.subr.bf16.mxu1 %v13751_v25  ;;  %11956 = vmatpush1.bf16.msra.mxu0 %v13622_v23  ;;  %v5591_v27 = vld [vmem:[%s15435_s10 + $0x1af0] sm:$0xff] }
0x284e   : > { %11957 = vmatprep.subr.bf16.mxu0 %v13743_v16  ;;  %v5715_v1 = vld [vmem:[%s15435_s10 + $0x1ed0] sm:$0xff]  ;;  %v13711_v13 = vcombine.high %v5587_v26, %v5591_v27  ;;  %v13710_v36 = vcombine.low %v5587_v26, %v5591_v27  ;;  %v12897_v26 = vcombine.high %v4772_v4, %v4776_v14 }
0x284f   : > { %v5719_v5 = vld [vmem:[%s15435_s10 + $0x1ef0] sm:$0xff] }
0x2850   : > { %11999 = vmatpush1.bf16.msra.mxu1 %v13750_v29  ;;  %v13839_v42 = vcombine.high %v5715_v1, %v5719_v5  ;;  %v5579_v3 = vld [vmem:[%s15435_s10 + $0x1a90] sm:$0xff]  ;;  %v13838_v43 = vcombine.low %v5715_v1, %v5719_v5  ;;  %v4764_v1 = vld [vmem:[%s15435_s10 + $0x118] sm:$0xff] }
0x2851   : > { %12000 = vmatprep.subr.bf16.mxu1 %v13871_v2  ;;  %11958 = vmatpush2.bf16.msra.mxu0 %v13742_v39  ;;  %v5583_v18 = vld [vmem:[%s15435_s10 + $0x1ab0] sm:$0xff]  ;;  %v4920_v39 = vld [vmem:[%s15435_s10 + $0x5f8] sm:$0xff] }
0x2852   : > { %11959 = vmatprep.subr.bf16.mxu0 %v13735_v33  ;;  %v5707_v32 = vld [vmem:[%s15435_s10 + $0x1e90] sm:$0xff]  ;;  %v13703_v50 = vcombine.high %v5579_v3, %v5583_v18  ;;  %v13702_v34 = vcombine.low %v5579_v3, %v5583_v18  ;;  %v13041_v49 = vcombine.high %v4916_v60, %v4920_v39  ;;  %v4768_v5 = vld [vmem:[%s15435_s10 + $0x138] sm:$0xff] }
0x2853   : > { %v5711_v11 = vld [vmem:[%s15435_s10 + $0x1eb0] sm:$0xff]  ;;  %v12889_v18 = vcombine.high %v4764_v1, %v4768_v5 }
0x2854   : > { %12001 = vmatpush2.bf16.msra.mxu1 %v13870_v6  ;;  %v13831_v20 = vcombine.high %v5707_v32, %v5711_v11  ;;  %v5571_v8 = vld [vmem:[%s15435_s10 + $0x1a50] sm:$0xff]  ;;  %v13830_v7 = vcombine.low %v5707_v32, %v5711_v11  ;;  %v4756_v11 = vld [vmem:[%s15435_s10 + $0xd8] sm:$0xff] }
0x2855   : > { %12002 = vmatprep.subr.bf16.mxu1 %v13863_v0  ;;  %11960 = vmatpush2.bf16.msra.mxu0 %v13734_v19  ;;  %v5575_v10 = vld [vmem:[%s15435_s10 + $0x1a70] sm:$0xff]  ;;  %v12913_v0 = vcombine.high %v4788_v40, %v4792_v47  ;;  %v4912_v19 = vld [vmem:[%s15435_s10 + $0x5b8] sm:$0xff] }
0x2856   : > { %11961 = vmatprep.subr.bf16.mxu0 %v13727_v51  ;;  %v5699_v9 = vld [vmem:[%s15435_s10 + $0x1e50] sm:$0xff]  ;;  %v13695_v25 = vcombine.high %v5571_v8, %v5575_v10  ;;  %v13694_v29 = vcombine.low %v5571_v8, %v5575_v10  ;;  %v13040_v51 = vcombine.low %v4916_v60, %v4920_v39  ;;  %v13033_v61 = vcombine.high %v4908_v48, %v4912_v19  ;;  %v4732_v60 = vld [vmem:[%s15435_s10 + $0x18] sm:$0xff] }
0x2857   : > { %v5703_v30 = vld [vmem:[%s15435_s10 + $0x1e70] sm:$0xff]  ;;  %v4736_v39 = vld [vmem:[%s15435_s10 + $0x38] sm:$0xff] }
0x2858   : > { %12003 = vmatpush2.bf16.msra.mxu1 %v13862_v21  ;;  %v13823_v58 = vcombine.high %v5699_v9, %v5703_v30  ;;  %v5563_v63 = vld [vmem:[%s15435_s10 + $0x1a10] sm:$0xff]  ;;  %v13822_v16 = vcombine.low %v5699_v9, %v5703_v30  ;;  %v12912_v21 = vcombine.low %v4788_v40, %v4792_v47  ;;  %v4748_v9 = vld [vmem:[%s15435_s10 + $0x98] sm:$0xff] }
0x2859   : > { %12004 = vmatprep.subr.bf16.mxu1 %v13855_v46  ;;  %11962 = vmatpush2.bf16.msra.mxu0 %v13726_v37  ;;  %v5567_v28 = vld [vmem:[%s15435_s10 + $0x1a30] sm:$0xff]  ;;  %v12905_v46 = vcombine.high %v4780_v44, %v4784_v45  ;;  %v4900_v37 = vld [vmem:[%s15435_s10 + $0x558] sm:$0xff] }
0x285a   : > { %11963 = vmatprep.subr.bf16.mxu0 %v13719_v62  ;;  %v5691_v35 = vld [vmem:[%s15435_s10 + $0x1e10] sm:$0xff]  ;;  %v13687_v2 = vcombine.high %v5563_v63, %v5567_v28  ;;  %v13686_v6 = vcombine.low %v5563_v63, %v5567_v28  ;;  %v12904_v62 = vcombine.low %v4780_v44, %v4784_v45  ;;  %v4752_v30 = vld [vmem:[%s15435_s10 + $0xb8] sm:$0xff]  ;;  %v12857_v44 = vcombine.high %v4732_v60, %v4736_v39 }
0x285b   : > { %v5695_v23 = vld [vmem:[%s15435_s10 + $0x1e30] sm:$0xff]  ;;  %v12873_v63 = vcombine.high %v4748_v9, %v4752_v30 }
0x285c   : > { %12005 = vmatpush2.bf16.msra.mxu1 %v13854_v12  ;;  %v13815_v59 = vcombine.high %v5691_v35, %v5695_v23  ;;  %v13814_v33 = vcombine.low %v5691_v35, %v5695_v23  ;;  %v14682_v31 = vld [vmem:[#allocation2 + $0x8] ss:$112 sps:$4 sm:$0xff]  }
0x285d   : > { %12006 = vmatprep.subr.bf16.mxu1 %v13847_v54  ;;  %11964 = vmatpush2.bf16.msra.mxu0 %v13718_v41  ;;  %v4904_v12 = vld [vmem:[%s15435_s10 + $0x578] sm:$0xff]  ;;  %v13032_v54 = vcombine.low %v4908_v48, %v4912_v19  ;;  %v14683_v41 = vld [vmem:[#allocation2 + $0x34] ss:$16 sps:$4 sm:$0xff]  }
0x285e   : > { %11965 = vmatprep.subr.bf16.mxu0 %v13711_v13  ;;  %v13025_v27 = vcombine.high %v4900_v37, %v4904_v12  ;;  %v4896_v13 = vld [vmem:[%s15435_s10 + $0x538] sm:$0xff]  ;;  %v13024_v3 = vcombine.low %v4900_v37, %v4904_v12 }
0x285f   : > { %v4740_v35 = vld [vmem:[%s15435_s10 + $0x58] sm:$0xff] }
0x2860   : > { %12007 = vmatpush2.bf16.msra.mxu1 %v13846_v15  ;;  %v4892_v15 = vld [vmem:[%s15435_s10 + $0x518] sm:$0xff] }
0x2861   : > { %12008 = vmatprep.subr.bf16.mxu1 %v13839_v42  ;;  %11966 = vmatpush2.bf16.msra.mxu0 %v13710_v36  ;;  %v12896_v42 = vcombine.low %v4772_v4, %v4776_v14  ;;  %v13017_v32 = vcombine.high %v4892_v15, %v4896_v13  ;;  %v4760_v36 = vld [vmem:[%s15435_s10 + $0xf8] sm:$0xff] }
0x2862   : > { %11967 = vmatprep.subr.bf16.mxu0 %v13703_v50  ;;  %v4888_v50 = vld [vmem:[%s15435_s10 + $0x4f8] sm:$0xff]  ;;  %v12881_v8 = vcombine.high %v4756_v11, %v4760_v36 }
0x2863   : > { %v4744_v23 = vld [vmem:[%s15435_s10 + $0x78] sm:$0xff] }
0x2864   : > { %12009 = vmatpush2.bf16.msra.mxu1 %v13838_v43  ;;  %v4884_v43 = vld [vmem:[%s15435_s10 + $0x4d8] sm:$0xff]  ;;  %v12865_v40 = vcombine.high %v4740_v35, %v4744_v23 }
0x2865   : > { %12010 = vmatprep.subr.bf16.mxu1 %v13831_v20  ;;  %11968 = vmatpush2.bf16.msra.mxu0 %v13702_v34  ;;  %v12888_v20 = vcombine.low %v4764_v1, %v4768_v5  ;;  %v13009_v10 = vcombine.high %v4884_v43, %v4888_v50  ;;  %v4876_v34 = vld [vmem:[%s15435_s10 + $0x498] sm:$0xff] }
0x2866   : > { %11969 = vmatprep.subr.bf16.mxu0 %v13695_v25  ;;  %v12880_v25 = vcombine.low %v4756_v11, %v4760_v36  ;;  %v4852_v48 = vld [vmem:[%s15435_s10 + $0x3d8] sm:$0xff] }
0x2867   : > { %v4856_v19 = vld [vmem:[%s15435_s10 + $0x3f8] sm:$0xff] }
0x2868   : > { %12011 = vmatpush2.bf16.msra.mxu1 %v13830_v7  ;;  %v4880_v7 = vld [vmem:[%s15435_s10 + $0x4b8] sm:$0xff]  ;;  %v12977_v4 = vcombine.high %v4852_v48, %v4856_v19 }
0x2869   : > { %12012 = vmatprep.subr.bf16.mxu1 %v13823_v58  ;;  %11970 = vmatpush2.bf16.msra.mxu0 %v13694_v29  ;;  %v13008_v58 = vcombine.low %v4884_v43, %v4888_v50  ;;  %v13001_v28 = vcombine.high %v4876_v34, %v4880_v7  ;;  %v4868_v29 = vld [vmem:[%s15435_s10 + $0x458] sm:$0xff] }
0x286a   : > { %11971 = vmatprep.subr.bf16.mxu0 %v13687_v2  ;;  %v12872_v2 = vcombine.low %v4748_v9, %v4752_v30  ;;  %v4848_v37 = vld [vmem:[%s15435_s10 + $0x3b8] sm:$0xff] }
0x286b   : > { %v4972_v12 = vld [vmem:[%s15435_s10 + $0x798] sm:$0xff] }
0x286c   : > { %12013 = vmatpush2.bf16.msra.mxu1 %v13822_v16  ;;  %v4872_v16 = vld [vmem:[%s15435_s10 + $0x478] sm:$0xff] }
0x286d   : > { %12014 = vmatprep.subr.bf16.mxu1 %v13815_v59  ;;  %11972 = vmatpush2.bf16.msra.mxu0 %v13686_v6  ;;  %v13000_v59 = vcombine.low %v4876_v34, %v4880_v7  ;;  %v12993_v47 = vcombine.high %v4868_v29, %v4872_v16  ;;  %v4860_v6 = vld [vmem:[%s15435_s10 + $0x418] sm:$0xff] }
0x286e   : > { %12027 = vmatprep.subr.bf16.mxu0 %v12913_v0  ;;  %v12864_v0 = vcombine.low %v4740_v35, %v4744_v23  ;;  %v4836_v5 = vld [vmem:[%s15435_s10 + $0x358] sm:$0xff] }
0x286f   : > { %v4828_v11 = vld [vmem:[%s15435_s10 + $0x318] sm:$0xff] }
0x2870   : > { %12015 = vmatpush2.bf16.msra.mxu1 %v13814_v33  ;;  %11974 = vmatmul.mubr.bf16.vlgmr.msra.gmra.mxu0 %v14682_v31  ;;  %v4864_v33 = vld [vmem:[%s15435_s10 + $0x438] sm:$0xff] }
0x2871   : > { %12070 = vmatprep.subr.bf16.mxu1 %v13041_v49  ;;  %12028 = vmatpush1.bf16.msra.mxu0 %v12912_v21  ;;  %v12992_v49 = vcombine.low %v4868_v29, %v4872_v16  ;;  %v12985_v45 = vcombine.high %v4860_v6, %v4864_v33  ;;  %v4980_v21 = vld [vmem:[%s15435_s10 + $0x7d8] sm:$0xff] }
0x2872   : > { %12029 = vmatprep.subr.bf16.mxu0 %v12905_v46  ;;  %12059 = vmatprep.mubr.bf16.mxu0 %v14683_v41  ;;  %v12856_v46 = vcombine.low %v4732_v60, %v4736_v39  ;;  %v4844_v31 = vld [vmem:[%s15435_s10 + $0x398] sm:$0xff] }
0x2873   : > { %12017 = vmatmul.mubr.bf16.vlgmr.msra.gmra.mxu1 %v16512_v55  ;;  %v4840_v41 = vld [vmem:[%s15435_s10 + $0x378] sm:$0xff] }
0x2874   : > { %12071 = vmatpush1.bf16.msra.mxu1 %v13040_v51  ;;  %12102 = vmatprep.mubr.bf16.mxu1 %v16240_v57  ;;  %v13016_v57 = vcombine.low %v4892_v15, %v4896_v13  ;;  %v4984_v51 = vld [vmem:[%s15435_s10 + $0x7f8] sm:$0xff] }
0x2875   : > { %12072 = vmatprep.subr.bf16.mxu1 %v13033_v61  ;;  %12030 = vmatpush1.bf16.msra.mxu0 %v12904_v62  ;;  %v12984_v61 = vcombine.low %v4860_v6, %v4864_v33  ;;  %v13105_v14 = vcombine.high %v4980_v21, %v4984_v51  ;;  %v4976_v62 = vld [vmem:[%s15435_s10 + $0x7b8] sm:$0xff] }
0x2876   : > { %12031 = vmatprep.subr.bf16.mxu0 %v12897_v26  ;;  %v13104_v26 = vcombine.low %v4980_v21, %v4984_v51  ;;  %v13097_v1 = vcombine.high %v4972_v12, %v4976_v62  ;;  %v4964_v15 = vld [vmem:[%s15435_s10 + $0x758] sm:$0xff] }
0x2877   : > { %v4968_v13 = vld [vmem:[%s15435_s10 + $0x778] sm:$0xff] }
0x2878   : > { %12073 = vmatpush1.bf16.msra.mxu1 %v13032_v54  ;;  %v12976_v54 = vcombine.low %v4852_v48, %v4856_v19  ;;  %v4832_v36 = vld [vmem:[%s15435_s10 + $0x338] sm:$0xff] }
0x2879   : > { %12074 = vmatprep.subr.bf16.mxu1 %v13025_v27  ;;  %12032 = vmatpush1.bf16.msra.mxu0 %v12896_v42  ;;  %v12969_v27 = vcombine.high %v4844_v31, %v4848_v37  ;;  %v12968_v42 = vcombine.low %v4844_v31, %v4848_v37  ;;  %v4956_v43 = vld [vmem:[%s15435_s10 + $0x718] sm:$0xff] }
0x287a   : > { %12033 = vmatprep.subr.bf16.mxu0 %v12889_v18  ;;  %v12961_v18 = vcombine.high %v4836_v5, %v4840_v41  ;;  %v4960_v50 = vld [vmem:[%s15435_s10 + $0x738] sm:$0xff] }
0x287b   : > { %v4820_v9 = vld [vmem:[%s15435_s10 + $0x2d8] sm:$0xff] }
0x287c   : > { %12075 = vmatpush1.bf16.msra.mxu1 %v13024_v3  ;;  %v13096_v3 = vcombine.low %v4972_v12, %v4976_v62  ;;  %v4824_v30 = vld [vmem:[%s15435_s10 + $0x2f8] sm:$0xff] }
0x287d   : > { %12076 = vmatprep.subr.bf16.mxu1 %v13017_v32  ;;  %12034 = vmatpush1.bf16.msra.mxu0 %v12888_v20  ;;  %v13089_v32 = vcombine.high %v4964_v15, %v4968_v13  ;;  %v12960_v20 = vcombine.low %v4836_v5, %v4840_v41  ;;  %v4948_v34 = vld [vmem:[%s15435_s10 + $0x6d8] sm:$0xff] }
0x287e   : > { %12035 = vmatprep.subr.bf16.mxu0 %v12881_v8  ;;  %v12953_v8 = vcombine.high %v4828_v11, %v4832_v36  ;;  %v4952_v7 = vld [vmem:[%s15435_s10 + $0x6f8] sm:$0xff] }
0x287f   : > { %v4812_v35 = vld [vmem:[%s15435_s10 + $0x298] sm:$0xff] }
0x2880   : > { %12077 = vmatpush1.bf16.msra.mxu1 %v13016_v57  ;;  %v13088_v57 = vcombine.low %v4964_v15, %v4968_v13  ;;  %v4816_v23 = vld [vmem:[%s15435_s10 + $0x2b8] sm:$0xff] }
0x2881   : > { %12078 = vmatprep.subr.bf16.mxu1 %v13009_v10  ;;  %12036 = vmatpush1.bf16.msra.mxu0 %v12880_v25  ;;  %v13081_v10 = vcombine.high %v4956_v43, %v4960_v50  ;;  %v12952_v25 = vcombine.low %v4828_v11, %v4832_v36  ;;  %v4940_v29 = vld [vmem:[%s15435_s10 + $0x698] sm:$0xff] }
0x2882   : > { %12037 = vmatprep.subr.bf16.mxu0 %v12873_v63  ;;  %v12945_v63 = vcombine.high %v4820_v9, %v4824_v30  ;;  %v4944_v16 = vld [vmem:[%s15435_s10 + $0x6b8] sm:$0xff] }
0x2883   : > { %v4804_v60 = vld [vmem:[%s15435_s10 + $0x258] sm:$0xff] }
0x2884   : > { %12079 = vmatpush1.bf16.msra.mxu1 %v13008_v58  ;;  %v13080_v58 = vcombine.low %v4956_v43, %v4960_v50  ;;  %v4808_v39 = vld [vmem:[%s15435_s10 + $0x278] sm:$0xff] }
0x2885   : > { %12080 = vmatprep.subr.bf16.mxu1 %v13001_v28  ;;  %12038 = vmatpush1.bf16.msra.mxu0 %v12872_v2  ;;  %v13073_v28 = vcombine.high %v4948_v34, %v4952_v7  ;;  %v12944_v2 = vcombine.low %v4820_v9, %v4824_v30  ;;  %v4932_v6 = vld [vmem:[%s15435_s10 + $0x658] sm:$0xff] }
0x2886   : > { %12039 = vmatprep.subr.bf16.mxu0 %v12865_v40  ;;  %v12937_v40 = vcombine.high %v4812_v35, %v4816_v23  ;;  %v4936_v33 = vld [vmem:[%s15435_s10 + $0x678] sm:$0xff] }
0x2887   : > { %v4796_v48 = vld [vmem:[%s15435_s10 + $0x218] sm:$0xff] }
0x2888   : > { %12081 = vmatpush1.bf16.msra.mxu1 %v13000_v59  ;;  %v13072_v59 = vcombine.low %v4948_v34, %v4952_v7  ;;  %v4800_v19 = vld [vmem:[%s15435_s10 + $0x238] sm:$0xff] }
0x2889   : > { %12082 = vmatprep.subr.bf16.mxu1 %v12993_v47  ;;  %12040 = vmatpush1.bf16.msra.mxu0 %v12864_v0  ;;  %v13065_v47 = vcombine.high %v4940_v29, %v4944_v16  ;;  %v12936_v0 = vcombine.low %v4812_v35, %v4816_v23  ;;  %v4924_v21 = vld [vmem:[%s15435_s10 + $0x618] sm:$0xff] }
0x288a   : > { %12041 = vmatprep.subr.bf16.mxu0 %v12857_v44  ;;  %v12929_v44 = vcombine.high %v4804_v60, %v4808_v39  ;;  %v4928_v51 = vld [vmem:[%s15435_s10 + $0x638] sm:$0xff] }
0x288b   : > { %v5044_v31 = vld [vmem:[%s15435_s10 + $0x9d8] sm:$0xff] }
0x288c   : > { %12083 = vmatpush1.bf16.msra.mxu1 %v12992_v49  ;;  %v13064_v49 = vcombine.low %v4940_v29, %v4944_v16  ;;  %v5048_v37 = vld [vmem:[%s15435_s10 + $0x9f8] sm:$0xff] }
0x288d   : > { %12084 = vmatprep.subr.bf16.mxu1 %v12985_v45  ;;  %12042 = vmatpush1.bf16.msra.mxu0 %v12856_v46  ;;  %v13057_v45 = vcombine.high %v4932_v6, %v4936_v33  ;;  %v12928_v46 = vcombine.low %v4804_v60, %v4808_v39  ;;  %v5172_v12 = vld [vmem:[%s15435_s10 + $0xdd8] sm:$0xff] }
0x288e   : > { %12043 = vmatprep.subr.bf16.mxu0 %v12977_v4  ;;  %v12921_v4 = vcombine.high %v4796_v48, %v4800_v19  ;;  %v5176_v62 = vld [vmem:[%s15435_s10 + $0xdf8] sm:$0xff] }
0x288f   : > { %v5036_v5 = vld [vmem:[%s15435_s10 + $0x998] sm:$0xff] }
0x2890   : > { %12085 = vmatpush1.bf16.msra.mxu1 %v12984_v61  ;;  %v13056_v61 = vcombine.low %v4932_v6, %v4936_v33  ;;  %v5040_v41 = vld [vmem:[%s15435_s10 + $0x9b8] sm:$0xff] }
0x2891   : > { %12086 = vmatprep.subr.bf16.mxu1 %v13105_v14  ;;  %12044 = vmatpush2.bf16.msra.mxu0 %v12976_v54  ;;  %v13049_v14 = vcombine.high %v4924_v21, %v4928_v51  ;;  %v12920_v54 = vcombine.low %v4796_v48, %v4800_v19  ;;  %v5164_v15 = vld [vmem:[%s15435_s10 + $0xd98] sm:$0xff] }
0x2892   : > { %12045 = vmatprep.subr.bf16.mxu0 %v12969_v27  ;;  %v13169_v27 = vcombine.high %v5044_v31, %v5048_v37  ;;  %v5168_v13 = vld [vmem:[%s15435_s10 + $0xdb8] sm:$0xff] }
0x2893   : > { %v5028_v11 = vld [vmem:[%s15435_s10 + $0x958] sm:$0xff] }
0x2894   : > { %12087 = vmatpush2.bf16.msra.mxu1 %v13104_v26  ;;  %v13048_v26 = vcombine.low %v4924_v21, %v4928_v51  ;;  %v5032_v36 = vld [vmem:[%s15435_s10 + $0x978] sm:$0xff] }
0x2895   : > { %12088 = vmatprep.subr.bf16.mxu1 %v13097_v1  ;;  %12046 = vmatpush2.bf16.msra.mxu0 %v12968_v42  ;;  %v13297_v1 = vcombine.high %v5172_v12, %v5176_v62  ;;  %v13168_v42 = vcombine.low %v5044_v31, %v5048_v37  ;;  %v14684_v43 = vld [vmem:[#allocation2 + $0x30] ss:$16 sps:$4 sm:$0xff]   ;;  %v14685_v7 = vld [vmem:[#allocation2 + $0x5c] ss:$-72 sps:$4 sm:$0xff]  }
0x2896   : > { %12047 = vmatprep.subr.bf16.mxu0 %v12961_v18  ;;  %v13161_v18 = vcombine.high %v5036_v5, %v5040_v41  ;;  %v5156_v50 = vld [vmem:[%s15435_s10 + $0xd58] sm:$0xff] }
0x2897   : > { %v5020_v30 = vld [vmem:[%s15435_s10 + $0x918] sm:$0xff] }
0x2898   : > { %12089 = vmatpush2.bf16.msra.mxu1 %v13096_v3  ;;  %v13296_v3 = vcombine.low %v5172_v12, %v5176_v62  ;;  %v5024_v34 = vld [vmem:[%s15435_s10 + $0x938] sm:$0xff] }
0x2899   : > { %12090 = vmatprep.subr.bf16.mxu1 %v13089_v32  ;;  %12048 = vmatpush2.bf16.msra.mxu0 %v12960_v20  ;;  %v13289_v32 = vcombine.high %v5164_v15, %v5168_v13  ;;  %v5160_v20 = vld [vmem:[%s15435_s10 + $0xd78] sm:$0xff] }
0x289a   : > { %12049 = vmatprep.subr.bf16.mxu0 %v12953_v8  ;;  %v13288_v8 = vcombine.low %v5164_v15, %v5168_v13  ;;  %v13281_v9 = vcombine.high %v5156_v50, %v5160_v20  ;;  %v5012_v23 = vld [vmem:[%s15435_s10 + $0x8d8] sm:$0xff] }
0x289b   : > { %v5016_v29 = vld [vmem:[%s15435_s10 + $0x8f8] sm:$0xff] }
0x289c   : > { %12091 = vmatpush2.bf16.msra.mxu1 %v13088_v57  ;;  %v13160_v57 = vcombine.low %v5036_v5, %v5040_v41  ;;  %v5140_v16 = vld [vmem:[%s15435_s10 + $0xcd8] sm:$0xff] }
0x289d   : > { %12092 = vmatprep.subr.bf16.mxu1 %v13081_v10  ;;  %12050 = vmatpush2.bf16.msra.mxu0 %v12952_v25  ;;  %v13153_v10 = vcombine.high %v5028_v11, %v5032_v36  ;;  %v5148_v25 = vld [vmem:[%s15435_s10 + $0xd18] sm:$0xff] }
0x289e   : > { %12051 = vmatprep.subr.bf16.mxu0 %v12945_v63  ;;  %v13280_v63 = vcombine.low %v5156_v50, %v5160_v20  ;;  %v5004_v60 = vld [vmem:[%s15435_s10 + $0x898] sm:$0xff] }
0x289f   : > { %v5008_v39 = vld [vmem:[%s15435_s10 + $0x8b8] sm:$0xff] }
0x28a0   : > { %12093 = vmatpush2.bf16.msra.mxu1 %v13080_v58  ;;  %v5152_v58 = vld [vmem:[%s15435_s10 + $0xd38] sm:$0xff] }
0x28a1   : > { %12094 = vmatprep.subr.bf16.mxu1 %v13073_v28  ;;  %12052 = vmatpush2.bf16.msra.mxu0 %v12944_v2  ;;  %v13145_v28 = vcombine.high %v5020_v30, %v5024_v34  ;;  %v13273_v35 = vcombine.high %v5148_v25, %v5152_v58  ;;  %v5144_v2 = vld [vmem:[%s15435_s10 + $0xcf8] sm:$0xff] }
0x28a2   : > { %12053 = vmatprep.subr.bf16.mxu0 %v12937_v40  ;;  %v13137_v40 = vcombine.high %v5012_v23, %v5016_v29  ;;  %v5132_v6 = vld [vmem:[%s15435_s10 + $0xc98] sm:$0xff] }
0x28a3   : > { %v5136_v33 = vld [vmem:[%s15435_s10 + $0xcb8] sm:$0xff] }
0x28a4   : > { %12095 = vmatpush2.bf16.msra.mxu1 %v13072_v59  ;;  %v13144_v59 = vcombine.low %v5020_v30, %v5024_v34  ;;  %v4996_v48 = vld [vmem:[%s15435_s10 + $0x858] sm:$0xff] }
0x28a5   : > { %12096 = vmatprep.subr.bf16.mxu1 %v13065_v47  ;;  %12054 = vmatpush2.bf16.msra.mxu0 %v12936_v0  ;;  %v13265_v47 = vcombine.high %v5140_v16, %v5144_v2  ;;  %v13136_v0 = vcombine.low %v5012_v23, %v5016_v29  ;;  %v5000_v19 = vld [vmem:[%s15435_s10 + $0x878] sm:$0xff] }
0x28a6   : > { %12055 = vmatprep.subr.bf16.mxu0 %v12929_v44  ;;  %v13129_v44 = vcombine.high %v5004_v60, %v5008_v39  ;;  %v5124_v21 = vld [vmem:[%s15435_s10 + $0xc58] sm:$0xff] }
0x28a7   : > { %v5128_v51 = vld [vmem:[%s15435_s10 + $0xc78] sm:$0xff] }
0x28a8   : > { %12097 = vmatpush2.bf16.msra.mxu1 %v13064_v49  ;;  %v13264_v49 = vcombine.low %v5140_v16, %v5144_v2  ;;  %v4988_v31 = vld [vmem:[%s15435_s10 + $0x818] sm:$0xff] }
0x28a9   : > { %12098 = vmatprep.subr.bf16.mxu1 %v13057_v45  ;;  %12056 = vmatpush2.bf16.msra.mxu0 %v12928_v46  ;;  %v13257_v45 = vcombine.high %v5132_v6, %v5136_v33  ;;  %v13128_v46 = vcombine.low %v5004_v60, %v5008_v39  ;;  %v4992_v37 = vld [vmem:[%s15435_s10 + $0x838] sm:$0xff] }
0x28aa   : > { %12057 = vmatprep.subr.bf16.mxu0 %v12921_v4  ;;  %v13121_v4 = vcombine.high %v4996_v48, %v5000_v19  ;;  %v5116_v12 = vld [vmem:[%s15435_s10 + $0xc18] sm:$0xff] }
0x28ab   : > { %v5120_v62 = vld [vmem:[%s15435_s10 + $0xc38] sm:$0xff] }
0x28ac   : > { %12099 = vmatpush2.bf16.msra.mxu1 %v13056_v61  ;;  %v13256_v61 = vcombine.low %v5132_v6, %v5136_v33  ;;  %v5108_v5 = vld [vmem:[%s15435_s10 + $0xbd8] sm:$0xff] }
0x28ad   : > { %12100 = vmatprep.subr.bf16.mxu1 %v13049_v14  ;;  %12058 = vmatpush2.bf16.msra.mxu0 %v12920_v54  ;;  %v13249_v14 = vcombine.high %v5124_v21, %v5128_v51  ;;  %v13120_v54 = vcombine.low %v4996_v48, %v5000_v19  ;;  %v5112_v41 = vld [vmem:[%s15435_s10 + $0xbf8] sm:$0xff] }
0x28ae   : > { %12113 = vmatprep.subr.bf16.mxu0 %v13169_v27  ;;  %v13113_v27 = vcombine.high %v4988_v31, %v4992_v37  ;;  %v5236_v15 = vld [vmem:[%s15435_s10 + $0xfd8] sm:$0xff]  ;;  %v13232_v20 = vcombine.low %v5108_v5, %v5112_v41 }
0x28af   : > { %v5240_v13 = vld [vmem:[%s15435_s10 + $0xff8] sm:$0xff] }
0x28b0   : > { %12101 = vmatpush2.bf16.msra.mxu1 %v13048_v26  ;;  %12060 = vmatmul.mubr.bf16.vlgmr.msra.gmra.mxu0 %v14684_v43  ;;  %v13248_v26 = vcombine.low %v5124_v21, %v5128_v51  ;;  %v5228_v43 = vld [vmem:[%s15435_s10 + $0xf98] sm:$0xff] }
0x28b1   : > { %12156 = vmatprep.subr.bf16.mxu1 %v13297_v1  ;;  %12114 = vmatpush1.bf16.msra.mxu0 %v13168_v42  ;;  %v13241_v1 = vcombine.high %v5116_v12, %v5120_v62  ;;  %v13112_v42 = vcombine.low %v4988_v31, %v4992_v37  ;;  %v5232_v50 = vld [vmem:[%s15435_s10 + $0xfb8] sm:$0xff] }
0x28b2   : > { %12115 = vmatprep.subr.bf16.mxu0 %v13161_v18  ;;  %12145 = vmatprep.mubr.bf16.mxu0 %v14685_v7  ;;  %v13233_v18 = vcombine.high %v5108_v5, %v5112_v41  ;;  %v5096_v30 = vld [vmem:[%s15435_s10 + $0xb78] sm:$0xff] }
0x28b3   : > { %12103 = vmatmul.mubr.bf16.vlgmr.msra.gmra.mxu1 %v16285_v56  ;;  %v13152_v56 = vcombine.low %v5028_v11, %v5032_v36  ;;  %v5100_v11 = vld [vmem:[%s15435_s10 + $0xb98] sm:$0xff] }
0x28b4   : > { %12157 = vmatpush1.bf16.msra.mxu1 %v13296_v3  ;;  %12188 = vmatprep.mubr.bf16.mxu1 %v16297_v17  ;;  %v13272_v17 = vcombine.low %v5148_v25, %v5152_v58  ;;  %v13240_v3 = vcombine.low %v5116_v12, %v5120_v62  ;;  %v5104_v36 = vld [vmem:[%s15435_s10 + $0xbb8] sm:$0xff]  ;;  %v13352_v58 = vcombine.low %v5228_v43, %v5232_v50 }
0x28b5   : > { %12158 = vmatprep.subr.bf16.mxu1 %v13289_v32  ;;  %12116 = vmatpush1.bf16.msra.mxu0 %v13160_v57  ;;  %v13361_v32 = vcombine.high %v5236_v15, %v5240_v13  ;;  %v13360_v57 = vcombine.low %v5236_v15, %v5240_v13  ;;  %v5220_v34 = vld [vmem:[%s15435_s10 + $0xf58] sm:$0xff]  ;;  %v13224_v25 = vcombine.low %v5100_v11, %v5104_v36 }
0x28b6   : > { %12117 = vmatprep.subr.bf16.mxu0 %v13153_v10  ;;  %v13353_v10 = vcombine.high %v5228_v43, %v5232_v50  ;;  %v5224_v7 = vld [vmem:[%s15435_s10 + $0xf78] sm:$0xff] }
0x28b7   : > { %v5212_v23 = vld [vmem:[%s15435_s10 + $0xf18] sm:$0xff]  ;;  %v13344_v2 = vcombine.low %v5220_v34, %v5224_v7 }
0x28b8   : > { %12159 = vmatpush1.bf16.msra.mxu1 %v13288_v8  ;;  %v13225_v8 = vcombine.high %v5100_v11, %v5104_v36  ;;  %v5216_v29 = vld [vmem:[%s15435_s10 + $0xf38] sm:$0xff] }
0x28b9   : > { %12160 = vmatprep.subr.bf16.mxu1 %v13281_v9  ;;  %12118 = vmatpush1.bf16.msra.mxu0 %v13152_v56  ;;  %v5092_v9 = vld [vmem:[%s15435_s10 + $0xb58] sm:$0xff]  ;;  %v13336_v33 = vcombine.low %v5212_v23, %v5216_v29 }
0x28ba   : > { %12119 = vmatprep.subr.bf16.mxu0 %v13145_v28  ;;  %v13217_v56 = vcombine.high %v5092_v9, %v5096_v30  ;;  %v5084_v28 = vld [vmem:[%s15435_s10 + $0xb18] sm:$0xff]  ;;  %v13216_v16 = vcombine.low %v5092_v9, %v5096_v30 }
0x28bb   : > { %v5204_v60 = vld [vmem:[%s15435_s10 + $0xed8] sm:$0xff] }
0x28bc   : > { %12161 = vmatpush1.bf16.msra.mxu1 %v13280_v63  ;;  %v13345_v63 = vcombine.high %v5220_v34, %v5224_v7  ;;  %v5208_v39 = vld [vmem:[%s15435_s10 + $0xef8] sm:$0xff] }
0x28bd   : > { %12162 = vmatprep.subr.bf16.mxu1 %v13273_v35  ;;  %12120 = vmatpush1.bf16.msra.mxu0 %v13144_v59  ;;  %v5088_v35 = vld [vmem:[%s15435_s10 + $0xb38] sm:$0xff]  ;;  %v13328_v51 = vcombine.low %v5204_v60, %v5208_v39 }
0x28be   : > { %12121 = vmatprep.subr.bf16.mxu0 %v13137_v40  ;;  %v13209_v59 = vcombine.high %v5084_v28, %v5088_v35  ;;  %v5076_v40 = vld [vmem:[%s15435_s10 + $0xad8] sm:$0xff]  ;;  %v13208_v6 = vcombine.low %v5084_v28, %v5088_v35 }
0x28bf   : > { %v5196_v48 = vld [vmem:[%s15435_s10 + $0xe98] sm:$0xff] }
0x28c0   : > { %12163 = vmatpush1.bf16.msra.mxu1 %v13272_v17  ;;  %v13337_v17 = vcombine.high %v5212_v23, %v5216_v29  ;;  %v5200_v19 = vld [vmem:[%s15435_s10 + $0xeb8] sm:$0xff] }
0x28c1   : > { %12164 = vmatprep.subr.bf16.mxu1 %v13265_v47  ;;  %12122 = vmatpush1.bf16.msra.mxu0 %v13136_v0  ;;  %v5080_v47 = vld [vmem:[%s15435_s10 + $0xaf8] sm:$0xff]  ;;  %v13320_v62 = vcombine.low %v5196_v48, %v5200_v19 }
0x28c2   : > { %12123 = vmatprep.subr.bf16.mxu0 %v13129_v44  ;;  %v13201_v0 = vcombine.high %v5076_v40, %v5080_v47  ;;  %v5068_v44 = vld [vmem:[%s15435_s10 + $0xa98] sm:$0xff]  ;;  %v13200_v21 = vcombine.low %v5076_v40, %v5080_v47  ;;  %v14687_v47 = vld [vmem:[#allocation2 + $0x54] ss:$16 sps:$4 sm:$0xff]  }
0x28c3   : > { %v5188_v31 = vld [vmem:[%s15435_s10 + $0xe58] sm:$0xff] }
0x28c4   : > { %12165 = vmatpush1.bf16.msra.mxu1 %v13264_v49  ;;  %v13329_v49 = vcombine.high %v5204_v60, %v5208_v39  ;;  %v5192_v37 = vld [vmem:[%s15435_s10 + $0xe78] sm:$0xff] }
0x28c5   : > { %12166 = vmatprep.subr.bf16.mxu1 %v13257_v45  ;;  %12124 = vmatpush1.bf16.msra.mxu0 %v13128_v46  ;;  %v5072_v45 = vld [vmem:[%s15435_s10 + $0xab8] sm:$0xff]  ;;  %v13312_v13 = vcombine.low %v5188_v31, %v5192_v37 }
0x28c6   : > { %12125 = vmatprep.subr.bf16.mxu0 %v13121_v4  ;;  %v13193_v46 = vcombine.high %v5068_v44, %v5072_v45  ;;  %v5060_v4 = vld [vmem:[%s15435_s10 + $0xa58] sm:$0xff]  ;;  %v13192_v12 = vcombine.low %v5068_v44, %v5072_v45 }
0x28c7   : > { %v5180_v5 = vld [vmem:[%s15435_s10 + $0xe18] sm:$0xff] }
0x28c8   : > { %12167 = vmatpush1.bf16.msra.mxu1 %v13256_v61  ;;  %v13321_v61 = vcombine.high %v5196_v48, %v5200_v19  ;;  %v5184_v41 = vld [vmem:[%s15435_s10 + $0xe38] sm:$0xff] }
0x28c9   : > { %12168 = vmatprep.subr.bf16.mxu1 %v13249_v14  ;;  %12126 = vmatpush1.bf16.msra.mxu0 %v13120_v54  ;;  %v5064_v14 = vld [vmem:[%s15435_s10 + $0xa78] sm:$0xff]  ;;  %v13304_v50 = vcombine.low %v5180_v5, %v5184_v41 }
0x28ca   : > { %12127 = vmatprep.subr.bf16.mxu0 %v13113_v27  ;;  %v13185_v54 = vcombine.high %v5060_v4, %v5064_v14  ;;  %v5052_v27 = vld [vmem:[%s15435_s10 + $0xa18] sm:$0xff]  ;;  %v13184_v15 = vcombine.low %v5060_v4, %v5064_v14 }
0x28cb   : > { %v5428_v11 = vld [vmem:[%s15435_s10 + $0x15d8] sm:$0xff] }
0x28cc   : > { %12169 = vmatpush1.bf16.msra.mxu1 %v13248_v26  ;;  %v13313_v26 = vcombine.high %v5188_v31, %v5192_v37  ;;  %v5432_v36 = vld [vmem:[%s15435_s10 + $0x15f8] sm:$0xff] }
0x28cd   : > { %12170 = vmatprep.subr.bf16.mxu1 %v13241_v1  ;;  %12128 = vmatpush1.bf16.msra.mxu0 %v13112_v42  ;;  %v5056_v1 = vld [vmem:[%s15435_s10 + $0xa38] sm:$0xff]  ;;  %v13552_v7 = vcombine.low %v5428_v11, %v5432_v36 }
0x28ce   : > { %12129 = vmatprep.subr.bf16.mxu0 %v13233_v18  ;;  %v13177_v42 = vcombine.high %v5052_v27, %v5056_v1  ;;  %v5300_v18 = vld [vmem:[%s15435_s10 + $0x11d8] sm:$0xff]  ;;  %v13176_v43 = vcombine.low %v5052_v27, %v5056_v1 }
0x28cf   : > { %v5420_v9 = vld [vmem:[%s15435_s10 + $0x1598] sm:$0xff] }
0x28d0   : > { %12171 = vmatpush1.bf16.msra.mxu1 %v13240_v3  ;;  %v13305_v3 = vcombine.high %v5180_v5, %v5184_v41  ;;  %v5424_v30 = vld [vmem:[%s15435_s10 + $0x15b8] sm:$0xff] }
0x28d1   : > { %12172 = vmatprep.subr.bf16.mxu1 %v13361_v32  ;;  %12130 = vmatpush2.bf16.msra.mxu0 %v13232_v20  ;;  %v5304_v32 = vld [vmem:[%s15435_s10 + $0x11f8] sm:$0xff] }
0x28d2   : > { %12131 = vmatprep.subr.bf16.mxu0 %v13225_v8  ;;  %v13425_v20 = vcombine.high %v5300_v18, %v5304_v32  ;;  %v5292_v8 = vld [vmem:[%s15435_s10 + $0x1198] sm:$0xff]  ;;  %v13424_v34 = vcombine.low %v5300_v18, %v5304_v32 }
0x28d3   : > { %v14686_v28 = vld [vmem:[#allocation2 + $0x58] ss:$-72 sps:$4 sm:$0xff]  }
0x28d4   : > { %12173 = vmatpush2.bf16.msra.mxu1 %v13360_v57  ;;  %v13553_v57 = vcombine.high %v5428_v11, %v5432_v36  ;;  %v5412_v35 = vld [vmem:[%s15435_s10 + $0x1558] sm:$0xff] }
0x28d5   : > { %12174 = vmatprep.subr.bf16.mxu1 %v13353_v10  ;;  %12132 = vmatpush2.bf16.msra.mxu0 %v13224_v25  ;;  %v5296_v10 = vld [vmem:[%s15435_s10 + $0x11b8] sm:$0xff] }
0x28d6   : > { %12133 = vmatprep.subr.bf16.mxu0 %v13217_v56  ;;  %v13417_v25 = vcombine.high %v5292_v8, %v5296_v10  ;;  %v5284_v56 = vld [vmem:[%s15435_s10 + $0x1158] sm:$0xff]  ;;  %v13416_v29 = vcombine.low %v5292_v8, %v5296_v10 }
0x28d7   : > { %v5416_v23 = vld [vmem:[%s15435_s10 + $0x1578] sm:$0xff] }
0x28d8   : > { %12175 = vmatpush2.bf16.msra.mxu1 %v13352_v58  ;;  %v13545_v58 = vcombine.high %v5420_v9, %v5424_v30  ;;  %v5280_v40 = vld [vmem:[%s15435_s10 + $0x1138] sm:$0xff] }
0x28d9   : > { %12176 = vmatprep.subr.bf16.mxu1 %v13345_v63  ;;  %12134 = vmatpush2.bf16.msra.mxu0 %v13216_v16  ;;  %v5288_v63 = vld [vmem:[%s15435_s10 + $0x1178] sm:$0xff]  ;;  %v13544_v16 = vcombine.low %v5420_v9, %v5424_v30 }
0x28da   : > { %12135 = vmatprep.subr.bf16.mxu0 %v13209_v59  ;;  %v13537_v59 = vcombine.high %v5412_v35, %v5416_v23  ;;  %v5404_v60 = vld [vmem:[%s15435_s10 + $0x1518] sm:$0xff] }
0x28db   : > { %v5408_v39 = vld [vmem:[%s15435_s10 + $0x1538] sm:$0xff] }
0x28dc   : > { %12177 = vmatpush2.bf16.msra.mxu1 %v13344_v2  ;;  %v13409_v2 = vcombine.high %v5284_v56, %v5288_v63  ;;  %v5268_v44 = vld [vmem:[%s15435_s10 + $0x10d8] sm:$0xff] }
0x28dd   : > { %12178 = vmatprep.subr.bf16.mxu1 %v13337_v17  ;;  %12136 = vmatpush2.bf16.msra.mxu0 %v13208_v6  ;;  %v5276_v17 = vld [vmem:[%s15435_s10 + $0x1118] sm:$0xff]  ;;  %v14688_v6 = vld [vmem:[#allocation2 + $0x6c] ss:$8 sps:$4 sm:$0xff]  }
0x28de   : > { %12137 = vmatprep.subr.bf16.mxu0 %v13201_v0  ;;  %v13401_v0 = vcombine.high %v5276_v17, %v5280_v40  ;;  %v5272_v45 = vld [vmem:[%s15435_s10 + $0x10f8] sm:$0xff] }
0x28df   : > { %v5396_v48 = vld [vmem:[%s15435_s10 + $0x14d8] sm:$0xff] }
0x28e0   : > { %12179 = vmatpush2.bf16.msra.mxu1 %v13336_v33  ;;  %v13536_v33 = vcombine.low %v5412_v35, %v5416_v23  ;;  %v5400_v19 = vld [vmem:[%s15435_s10 + $0x14f8] sm:$0xff] }
0x28e1   : > { %12180 = vmatprep.subr.bf16.mxu1 %v13329_v49  ;;  %12138 = vmatpush2.bf16.msra.mxu0 %v13200_v21  ;;  %v13529_v49 = vcombine.high %v5404_v60, %v5408_v39  ;;  %v13400_v21 = vcombine.low %v5276_v17, %v5280_v40  ;;  %v5260_v4 = vld [vmem:[%s15435_s10 + $0x1098] sm:$0xff] }
0x28e2   : > { %12139 = vmatprep.subr.bf16.mxu0 %v13193_v46  ;;  %v13393_v46 = vcombine.high %v5268_v44, %v5272_v45  ;;  %v5264_v14 = vld [vmem:[%s15435_s10 + $0x10b8] sm:$0xff] }
0x28e3   : > { %v5388_v31 = vld [vmem:[%s15435_s10 + $0x1498] sm:$0xff] }
0x28e4   : > { %12181 = vmatpush2.bf16.msra.mxu1 %v13328_v51  ;;  %v13528_v51 = vcombine.low %v5404_v60, %v5408_v39  ;;  %v5392_v37 = vld [vmem:[%s15435_s10 + $0x14b8] sm:$0xff] }
0x28e5   : > { %12182 = vmatprep.subr.bf16.mxu1 %v13321_v61  ;;  %12140 = vmatpush2.bf16.msra.mxu0 %v13192_v12  ;;  %v13521_v61 = vcombine.high %v5396_v48, %v5400_v19  ;;  %v13392_v12 = vcombine.low %v5268_v44, %v5272_v45  ;;  %v5252_v27 = vld [vmem:[%s15435_s10 + $0x1058] sm:$0xff] }
0x28e6   : > { %12141 = vmatprep.subr.bf16.mxu0 %v13185_v54  ;;  %v13385_v54 = vcombine.high %v5260_v4, %v5264_v14  ;;  %v5256_v1 = vld [vmem:[%s15435_s10 + $0x1078] sm:$0xff] }
0x28e7   : > { %v5380_v5 = vld [vmem:[%s15435_s10 + $0x1458] sm:$0xff] }
0x28e8   : > { %12183 = vmatpush2.bf16.msra.mxu1 %v13320_v62  ;;  %v13520_v62 = vcombine.low %v5396_v48, %v5400_v19  ;;  %v5384_v41 = vld [vmem:[%s15435_s10 + $0x1478] sm:$0xff] }
0x28e9   : > { %12184 = vmatprep.subr.bf16.mxu1 %v13313_v26  ;;  %12142 = vmatpush2.bf16.msra.mxu0 %v13184_v15  ;;  %v13513_v26 = vcombine.high %v5388_v31, %v5392_v37  ;;  %v13384_v15 = vcombine.low %v5260_v4, %v5264_v14  ;;  %v5244_v18 = vld [vmem:[%s15435_s10 + $0x1018] sm:$0xff] }
0x28ea   : > { %12143 = vmatprep.subr.bf16.mxu0 %v13177_v42  ;;  %v13377_v42 = vcombine.high %v5252_v27, %v5256_v1  ;;  %v5248_v32 = vld [vmem:[%s15435_s10 + $0x1038] sm:$0xff] }
0x28eb   : > { %v5372_v11 = vld [vmem:[%s15435_s10 + $0x1418] sm:$0xff] }
0x28ec   : > { %12185 = vmatpush2.bf16.msra.mxu1 %v13312_v13  ;;  %v13512_v13 = vcombine.low %v5388_v31, %v5392_v37  ;;  %v5376_v36 = vld [vmem:[%s15435_s10 + $0x1438] sm:$0xff] }
0x28ed   : > { %12186 = vmatprep.subr.bf16.mxu1 %v13305_v3  ;;  %12144 = vmatpush2.bf16.msra.mxu0 %v13176_v43  ;;  %v13505_v3 = vcombine.high %v5380_v5, %v5384_v41  ;;  %v13376_v43 = vcombine.low %v5252_v27, %v5256_v1  ;;  %v5364_v8 = vld [vmem:[%s15435_s10 + $0x13d8] sm:$0xff] }
0x28ee   : > { %12199 = vmatprep.subr.bf16.mxu0 %v13425_v20  ;;  %v13369_v20 = vcombine.high %v5244_v18, %v5248_v32  ;;  %v5368_v10 = vld [vmem:[%s15435_s10 + $0x13f8] sm:$0xff] }
0x28ef   : > { %v5492_v9 = vld [vmem:[%s15435_s10 + $0x17d8] sm:$0xff]  ;;  %v13488_v23 = vcombine.low %v5364_v8, %v5368_v10 }
0x28f0   : > { %12187 = vmatpush2.bf16.msra.mxu1 %v13304_v50  ;;  %12146 = vmatmul.mubr.bf16.vlgmr.msra.gmra.mxu0 %v14686_v28  ;;  %v13504_v50 = vcombine.low %v5380_v5, %v5384_v41  ;;  %v5496_v30 = vld [vmem:[%s15435_s10 + $0x17f8] sm:$0xff] }
0x28f1   : > { %12242 = vmatprep.subr.bf16.mxu1 %v13553_v57  ;;  %12200 = vmatpush1.bf16.msra.mxu0 %v13424_v34  ;;  %v13497_v57 = vcombine.high %v5372_v11, %v5376_v36  ;;  %v13368_v34 = vcombine.low %v5244_v18, %v5248_v32  ;;  %v5484_v28 = vld [vmem:[%s15435_s10 + $0x1798] sm:$0xff] }
0x28f2   : > { %12201 = vmatprep.subr.bf16.mxu0 %v13417_v25  ;;  %12231 = vmatprep.mubr.bf16.mxu0 %v14687_v47  ;;  %v13489_v25 = vcombine.high %v5364_v8, %v5368_v10  ;;  %v5488_v35 = vld [vmem:[%s15435_s10 + $0x17b8] sm:$0xff] }
0x28f3   : > { %12189 = vmatmul.mubr.bf16.vlgmr.msra.gmra.mxu1 %v16363_v38  ;;  %v13408_v38 = vcombine.low %v5284_v56, %v5288_v63  ;;  %v5356_v56 = vld [vmem:[%s15435_s10 + $0x1398] sm:$0xff]  ;;  %v13608_v39 = vcombine.low %v5484_v28, %v5488_v35 }
0x28f4   : > { %12243 = vmatpush1.bf16.msra.mxu1 %v13552_v7  ;;  %12274 = vmatprep.mubr.bf16.mxu1 %v14688_v6  ;;  %v13496_v7 = vcombine.low %v5372_v11, %v5376_v36  ;;  %v5360_v63 = vld [vmem:[%s15435_s10 + $0x13b8] sm:$0xff] }
0x28f5   : > { %12244 = vmatprep.subr.bf16.mxu1 %v13545_v58  ;;  %12202 = vmatpush1.bf16.msra.mxu0 %v13416_v29  ;;  %v13617_v58 = vcombine.high %v5492_v9, %v5496_v30  ;;  %v13616_v29 = vcombine.low %v5492_v9, %v5496_v30  ;;  %v5352_v17 = vld [vmem:[%s15435_s10 + $0x1378] sm:$0xff]  ;;  %v13480_v60 = vcombine.low %v5356_v56, %v5360_v63 }
0x28f6   : > { %12203 = vmatprep.subr.bf16.mxu0 %v13409_v2  ;;  %v13609_v2 = vcombine.high %v5484_v28, %v5488_v35  ;;  %v5476_v40 = vld [vmem:[%s15435_s10 + $0x1758] sm:$0xff] }
0x28f7   : > { %v5480_v47 = vld [vmem:[%s15435_s10 + $0x1778] sm:$0xff] }
0x28f8   : > { %12245 = vmatpush1.bf16.msra.mxu1 %v13544_v16  ;;  %v13481_v16 = vcombine.high %v5356_v56, %v5360_v63  ;;  %v5472_v44 = vld [vmem:[%s15435_s10 + $0x1738] sm:$0xff]  ;;  %v13600_v48 = vcombine.low %v5476_v40, %v5480_v47 }
0x28f9   : > { %12246 = vmatprep.subr.bf16.mxu1 %v13537_v59  ;;  %12204 = vmatpush1.bf16.msra.mxu0 %v13408_v38  ;;  %v5348_v59 = vld [vmem:[%s15435_s10 + $0x1358] sm:$0xff]  ;;  %v13601_v38 = vcombine.high %v5476_v40, %v5480_v47 }
0x28fa   : > { %12205 = vmatprep.subr.bf16.mxu0 %v13401_v0  ;;  %v13473_v6 = vcombine.high %v5348_v59, %v5352_v17  ;;  %v5344_v0 = vld [vmem:[%s15435_s10 + $0x1338] sm:$0xff]  ;;  %v13472_v45 = vcombine.low %v5348_v59, %v5352_v17 }
0x28fb   : > { %v5464_v4 = vld [vmem:[%s15435_s10 + $0x16f8] sm:$0xff] }
0x28fc   : > { %12247 = vmatpush1.bf16.msra.mxu1 %v13536_v33  ;;  %v5340_v33 = vld [vmem:[%s15435_s10 + $0x1318] sm:$0xff] }
0x28fd   : > { %12248 = vmatprep.subr.bf16.mxu1 %v13529_v49  ;;  %12206 = vmatpush1.bf16.msra.mxu0 %v13400_v21  ;;  %v5468_v49 = vld [vmem:[%s15435_s10 + $0x1718] sm:$0xff]  ;;  %v13465_v19 = vcombine.high %v5340_v33, %v5344_v0  ;;  %v13464_v14 = vcombine.low %v5340_v33, %v5344_v0 }
0x28fe   : > { %12207 = vmatprep.subr.bf16.mxu0 %v13393_v46  ;;  %v13593_v21 = vcombine.high %v5468_v49, %v5472_v44  ;;  %v5336_v46 = vld [vmem:[%s15435_s10 + $0x12f8] sm:$0xff]  ;;  %v13592_v31 = vcombine.low %v5468_v49, %v5472_v44  ;;  %v14690_v49 = vld [vmem:[#allocation2 + $0x68] ss:$8 sps:$4 sm:$0xff]  }
0x28ff   : > { %v5456_v27 = vld [vmem:[%s15435_s10 + $0x16b8] sm:$0xff] }
0x2900   : > { %12249 = vmatpush1.bf16.msra.mxu1 %v13528_v51  ;;  %v5332_v51 = vld [vmem:[%s15435_s10 + $0x12d8] sm:$0xff] }
0x2901   : > { %12250 = vmatprep.subr.bf16.mxu1 %v13521_v61  ;;  %12208 = vmatpush1.bf16.msra.mxu0 %v13392_v12  ;;  %v5460_v61 = vld [vmem:[%s15435_s10 + $0x16d8] sm:$0xff]  ;;  %v13457_v37 = vcombine.high %v5332_v51, %v5336_v46  ;;  %v13456_v1 = vcombine.low %v5332_v51, %v5336_v46 }
0x2902   : > { %12209 = vmatprep.subr.bf16.mxu0 %v13385_v54  ;;  %v13585_v12 = vcombine.high %v5460_v61, %v5464_v4  ;;  %v5328_v54 = vld [vmem:[%s15435_s10 + $0x12b8] sm:$0xff]  ;;  %v13584_v5 = vcombine.low %v5460_v61, %v5464_v4 }
0x2903   : > { %v5448_v18 = vld [vmem:[%s15435_s10 + $0x1678] sm:$0xff] }
0x2904   : > { %12251 = vmatpush1.bf16.msra.mxu1 %v13520_v62  ;;  %v5324_v62 = vld [vmem:[%s15435_s10 + $0x1298] sm:$0xff] }
0x2905   : > { %12252 = vmatprep.subr.bf16.mxu1 %v13513_v26  ;;  %12210 = vmatpush1.bf16.msra.mxu0 %v13384_v15  ;;  %v5452_v26 = vld [vmem:[%s15435_s10 + $0x1698] sm:$0xff]  ;;  %v13449_v41 = vcombine.high %v5324_v62, %v5328_v54  ;;  %v13448_v32 = vcombine.low %v5324_v62, %v5328_v54 }
0x2906   : > { %12211 = vmatprep.subr.bf16.mxu0 %v13377_v42  ;;  %v13577_v15 = vcombine.high %v5452_v26, %v5456_v27  ;;  %v5320_v42 = vld [vmem:[%s15435_s10 + $0x1278] sm:$0xff]  ;;  %v13576_v11 = vcombine.low %v5452_v26, %v5456_v27 }
0x2907   : > { %v5440_v8 = vld [vmem:[%s15435_s10 + $0x1638] sm:$0xff] }
0x2908   : > { %12253 = vmatpush1.bf16.msra.mxu1 %v13512_v13  ;;  %v5316_v13 = vld [vmem:[%s15435_s10 + $0x1258] sm:$0xff] }
0x2909   : > { %12254 = vmatprep.subr.bf16.mxu1 %v13505_v3  ;;  %12212 = vmatpush1.bf16.msra.mxu0 %v13376_v43  ;;  %v5444_v3 = vld [vmem:[%s15435_s10 + $0x1658] sm:$0xff]  ;;  %v13441_v36 = vcombine.high %v5316_v13, %v5320_v42  ;;  %v13440_v10 = vcombine.low %v5316_v13, %v5320_v42 }
0x290a   : > { %12213 = vmatprep.subr.bf16.mxu0 %v13369_v20  ;;  %v13569_v43 = vcombine.high %v5444_v3, %v5448_v18  ;;  %v5312_v20 = vld [vmem:[%s15435_s10 + $0x1238] sm:$0xff]  ;;  %v13568_v9 = vcombine.low %v5444_v3, %v5448_v18 }
0x290b   : > { %v5688_v56 = vld [vmem:[%s15435_s10 + $0x1df8] sm:$0xff] }
0x290c   : > { %12255 = vmatpush1.bf16.msra.mxu1 %v13504_v50  ;;  %v5308_v50 = vld [vmem:[%s15435_s10 + $0x1218] sm:$0xff] }
0x290d   : > { %12256 = vmatprep.subr.bf16.mxu1 %v13497_v57  ;;  %12214 = vmatpush1.bf16.msra.mxu0 %v13368_v34  ;;  %v5436_v57 = vld [vmem:[%s15435_s10 + $0x1618] sm:$0xff]  ;;  %v13433_v30 = vcombine.high %v5308_v50, %v5312_v20  ;;  %v13432_v63 = vcombine.low %v5308_v50, %v5312_v20 }
0x290e   : > { %12215 = vmatprep.subr.bf16.mxu0 %v13489_v25  ;;  %v13561_v34 = vcombine.high %v5436_v57, %v5440_v8  ;;  %v5560_v25 = vld [vmem:[%s15435_s10 + $0x19f8] sm:$0xff]  ;;  %v13560_v28 = vcombine.low %v5436_v57, %v5440_v8 }
0x290f   : > { %v5680_v59 = vld [vmem:[%s15435_s10 + $0x1db8] sm:$0xff] }
0x2910   : > { %12257 = vmatpush1.bf16.msra.mxu1 %v13496_v7  ;;  %v5556_v7 = vld [vmem:[%s15435_s10 + $0x19d8] sm:$0xff] }
0x2911   : > { %12258 = vmatprep.subr.bf16.mxu1 %v13617_v58  ;;  %12216 = vmatpush2.bf16.msra.mxu0 %v13488_v23  ;;  %v5684_v58 = vld [vmem:[%s15435_s10 + $0x1dd8] sm:$0xff]  ;;  %v13681_v35 = vcombine.high %v5556_v7, %v5560_v25  ;;  %v13680_v17 = vcombine.low %v5556_v7, %v5560_v25 }
0x2912   : > { %12217 = vmatprep.subr.bf16.mxu0 %v13481_v16  ;;  %v13809_v23 = vcombine.high %v5684_v58, %v5688_v56  ;;  %v5552_v16 = vld [vmem:[%s15435_s10 + $0x19b8] sm:$0xff]  ;;  %v13808_v40 = vcombine.low %v5684_v58, %v5688_v56 }
0x2913   : > { %v5668_v33 = vld [vmem:[%s15435_s10 + $0x1d58] sm:$0xff] }
0x2914   : > { %12259 = vmatpush2.bf16.msra.mxu1 %v13616_v29  ;;  %v5548_v29 = vld [vmem:[%s15435_s10 + $0x1998] sm:$0xff] }
0x2915   : > { %12260 = vmatprep.subr.bf16.mxu1 %v13609_v2  ;;  %12218 = vmatpush2.bf16.msra.mxu0 %v13480_v60  ;;  %v5676_v2 = vld [vmem:[%s15435_s10 + $0x1d98] sm:$0xff]  ;;  %v13673_v47 = vcombine.high %v5548_v29, %v5552_v16  ;;  %v13672_v44 = vcombine.low %v5548_v29, %v5552_v16 }
0x2916   : > { %12219 = vmatprep.subr.bf16.mxu0 %v13473_v6  ;;  %v13801_v60 = vcombine.high %v5676_v2, %v5680_v59  ;;  %v5544_v6 = vld [vmem:[%s15435_s10 + $0x1978] sm:$0xff] }
0x2917   : > { %v5672_v0 = vld [vmem:[%s15435_s10 + $0x1d78] sm:$0xff] }
0x2918   : > { %12261 = vmatpush2.bf16.msra.mxu1 %v13608_v39  ;;  %v5540_v39 = vld [vmem:[%s15435_s10 + $0x1958] sm:$0xff] }
0x2919   : > { %12262 = vmatprep.subr.bf16.mxu1 %v13601_v38  ;;  %12220 = vmatpush2.bf16.msra.mxu0 %v13472_v45  ;;  %v14689_v38 = vld [vmem:[#allocation2 + $0x50] ss:$16 sps:$4 sm:$0xff]   ;;  %v13800_v45 = vcombine.low %v5676_v2, %v5680_v59  ;;  %v14691_v46 = vld [vmem:[#allocation2 + $0xc] ss:$112 sps:$4 sm:$0xff]  }
0x291a   : > { %12221 = vmatprep.subr.bf16.mxu0 %v13465_v19  ;;  %v13793_v19 = vcombine.high %v5668_v33, %v5672_v0  ;;  %v5536_v51 = vld [vmem:[%s15435_s10 + $0x1938] sm:$0xff] }
0x291b   : > { %v5660_v61 = vld [vmem:[%s15435_s10 + $0x1d18] sm:$0xff] }
0x291c   : > { %12263 = vmatpush2.bf16.msra.mxu1 %v13600_v48  ;;  %v13665_v48 = vcombine.high %v5540_v39, %v5544_v6  ;;  %v5664_v4 = vld [vmem:[%s15435_s10 + $0x1d38] sm:$0xff] }
0x291d   : > { %12264 = vmatprep.subr.bf16.mxu1 %v13593_v21  ;;  %12222 = vmatpush2.bf16.msra.mxu0 %v13464_v14  ;;  %v5532_v21 = vld [vmem:[%s15435_s10 + $0x1918] sm:$0xff]  ;;  %v13664_v14 = vcombine.low %v5540_v39, %v5544_v6 }
0x291e   : > { %12223 = vmatprep.subr.bf16.mxu0 %v13457_v37  ;;  %v13657_v37 = vcombine.high %v5532_v21, %v5536_v51  ;;  %v5524_v62 = vld [vmem:[%s15435_s10 + $0x18d8] sm:$0xff] }
0x291f   : > { %v5528_v54 = vld [vmem:[%s15435_s10 + $0x18f8] sm:$0xff] }
0x2920   : > { %12265 = vmatpush2.bf16.msra.mxu1 %v13592_v31  ;;  %v13792_v31 = vcombine.low %v5668_v33, %v5672_v0  ;;  %v5652_v26 = vld [vmem:[%s15435_s10 + $0x1cd8] sm:$0xff]  ;;  %v13648_v18 = vcombine.low %v5524_v62, %v5528_v54 }
0x2921   : > { %12266 = vmatprep.subr.bf16.mxu1 %v13585_v12  ;;  %12224 = vmatpush2.bf16.msra.mxu0 %v13456_v1  ;;  %v13785_v12 = vcombine.high %v5660_v61, %v5664_v4  ;;  %v5656_v27 = vld [vmem:[%s15435_s10 + $0x1cf8] sm:$0xff]  ;;  %v13656_v1 = vcombine.low %v5532_v21, %v5536_v51 }
0x2922   : > { %12225 = vmatprep.subr.bf16.mxu0 %v13449_v41  ;;  %v13777_v41 = vcombine.high %v5652_v26, %v5656_v27  ;;  %v5520_v13 = vld [vmem:[%s15435_s10 + $0x18b8] sm:$0xff] }
0x2923   : > { %v5644_v42 = vld [vmem:[%s15435_s10 + $0x1c98] sm:$0xff] }
0x2924   : > { %12267 = vmatpush2.bf16.msra.mxu1 %v13584_v5  ;;  %v13649_v5 = vcombine.high %v5524_v62, %v5528_v54  ;;  %v5648_v3 = vld [vmem:[%s15435_s10 + $0x1cb8] sm:$0xff] }
0x2925   : > { %12268 = vmatprep.subr.bf16.mxu1 %v13577_v15  ;;  %12226 = vmatpush2.bf16.msra.mxu0 %v13448_v32  ;;  %v5516_v15 = vld [vmem:[%s15435_s10 + $0x1898] sm:$0xff]  ;;  %v13776_v32 = vcombine.low %v5652_v26, %v5656_v27 }
0x2926   : > { %12227 = vmatprep.subr.bf16.mxu0 %v13441_v36  ;;  %v13769_v36 = vcombine.high %v5644_v42, %v5648_v3  ;;  %v5512_v50 = vld [vmem:[%s15435_s10 + $0x1878] sm:$0xff]  ;;  %v13640_v8 = vcombine.low %v5516_v15, %v5520_v13 }
0x2927   : > { %v5636_v20 = vld [vmem:[%s15435_s10 + $0x1c58] sm:$0xff] }
0x2928   : > { %12269 = vmatpush2.bf16.msra.mxu1 %v13576_v11  ;;  %v13641_v11 = vcombine.high %v5516_v15, %v5520_v13  ;;  %v5640_v57 = vld [vmem:[%s15435_s10 + $0x1c78] sm:$0xff] }
0x2929   : > { %12270 = vmatprep.subr.bf16.mxu1 %v13569_v43  ;;  %12228 = vmatpush2.bf16.msra.mxu0 %v13440_v10  ;;  %v5508_v43 = vld [vmem:[%s15435_s10 + $0x1858] sm:$0xff]  ;;  %v13768_v10 = vcombine.low %v5644_v42, %v5648_v3 }
0x292a   : > { %12229 = vmatprep.subr.bf16.mxu0 %v13433_v30  ;;  %v13761_v30 = vcombine.high %v5636_v20, %v5640_v57  ;;  %v5504_v7 = vld [vmem:[%s15435_s10 + $0x1838] sm:$0xff]  ;;  %v13632_v56 = vcombine.low %v5508_v43, %v5512_v50 }
0x292b   : > { %v5628_v25 = vld [vmem:[%s15435_s10 + $0x1c18] sm:$0xff] }
0x292c   : > { %12271 = vmatpush2.bf16.msra.mxu1 %v13568_v9  ;;  %v13633_v9 = vcombine.high %v5508_v43, %v5512_v50  ;;  %v5632_v58 = vld [vmem:[%s15435_s10 + $0x1c38] sm:$0xff] }
0x292d   : > { %12272 = vmatprep.subr.bf16.mxu1 %v13561_v34  ;;  %12230 = vmatpush2.bf16.msra.mxu0 %v13432_v63  ;;  %v5500_v34 = vld [vmem:[%s15435_s10 + $0x1818] sm:$0xff]  ;;  %v13760_v63 = vcombine.low %v5636_v20, %v5640_v57 }
0x292e   : > { %12285 = vmatprep.subr.bf16.mxu0 %v13681_v35  ;;  %v13753_v35 = vcombine.high %v5628_v25, %v5632_v58  ;;  %v5624_v29 = vld [vmem:[%s15435_s10 + $0x1bf8] sm:$0xff]  ;;  %v13624_v59 = vcombine.low %v5500_v34, %v5504_v7 }
0x292f   : > { %v5748_v16 = vld [vmem:[%s15435_s10 + $0x1fd8] sm:$0xff] }
0x2930   : > { %12273 = vmatpush2.bf16.msra.mxu1 %v13560_v28  ;;  %12232 = vmatmul.mubr.bf16.vlgmr.msra.gmra.mxu0 %v14689_v38  ;;  %v13625_v28 = vcombine.high %v5500_v34, %v5504_v7  ;;  %v5752_v2 = vld [vmem:[%s15435_s10 + $0x1ff8] sm:$0xff] }
0x2931   : > { %12328 = vmatprep.subr.bf16.mxu1 %v13809_v23  ;;  %12286 = vmatpush1.bf16.msra.mxu0 %v13680_v17  ;;  %v5620_v23 = vld [vmem:[%s15435_s10 + $0x1bd8] sm:$0xff]  ;;  %v13752_v17 = vcombine.low %v5628_v25, %v5632_v58  ;;  %v13872_v0 = vcombine.low %v5748_v16, %v5752_v2 }
0x2932   : > { %12287 = vmatprep.subr.bf16.mxu0 %v13673_v47  ;;  %12317 = vmatprep.mubr.bf16.mxu0 %v14691_v46  ;;  %v13873_v47 = vcombine.high %v5748_v16, %v5752_v2  ;;  %v5616_v39 = vld [vmem:[%s15435_s10 + $0x1bb8] sm:$0xff]  ;;  %v13744_v33 = vcombine.low %v5620_v23, %v5624_v29 }
0x2933   : > { %12275 = vmatmul.mubr.bf16.vlgmr.msra.gmra.mxu1 %v14690_v49  ;;  %v5740_v6 = vld [vmem:[%s15435_s10 + $0x1f98] sm:$0xff] }
0x2934   : > { %12329 = vmatpush1.bf16.msra.mxu1 %v13808_v40  ;;  %12360 = vmatprep.mubr.bf16.mxu1 %v16440_v24  ;;  %v13784_v24 = vcombine.low %v5660_v61, %v5664_v4  ;;  %v13745_v40 = vcombine.high %v5620_v23, %v5624_v29  ;;  %v5744_v38 = vld [vmem:[%s15435_s10 + $0x1fb8] sm:$0xff] }
0x2935   : > { %12330 = vmatprep.subr.bf16.mxu1 %v13801_v60  ;;  %12288 = vmatpush1.bf16.msra.mxu0 %v13672_v44  ;;  %v5612_v60 = vld [vmem:[%s15435_s10 + $0x1b98] sm:$0xff]  ;;  %v13865_v44 = vcombine.high %v5740_v6, %v5744_v38  ;;  %v13864_v46 = vcombine.low %v5740_v6, %v5744_v38 }
0x2936   : > { %12289 = vmatprep.subr.bf16.mxu0 %v13665_v48  ;;  %v13737_v49 = vcombine.high %v5612_v60, %v5616_v39  ;;  %v5608_v48 = vld [vmem:[%s15435_s10 + $0x1b78] sm:$0xff]  ;;  %v13736_v51 = vcombine.low %v5612_v60, %v5616_v39  ;;  %v11760_v60 = vpop.f32.mrf.mxu1 }
0x2937   : > { %v5736_v21 = vld [vmem:[%s15435_s10 + $0x1f78] sm:$0xff] }
0x2938   : > { %12331 = vmatpush1.bf16.msra.mxu1 %v13800_v45  ;;  %v5604_v45 = vld [vmem:[%s15435_s10 + $0x1b58] sm:$0xff]  ;;  %v11762_v6 = vpop.f32.mrf.mxu1 }
0x2939   : > { %12332 = vmatprep.subr.bf16.mxu1 %v13793_v19  ;;  %12290 = vmatpush1.bf16.msra.mxu0 %v13664_v14  ;;  %v5732_v19 = vld [vmem:[%s15435_s10 + $0x1f58] sm:$0xff]  ;;  %v13729_v61 = vcombine.high %v5604_v45, %v5608_v48  ;;  %v13728_v62 = vcombine.low %v5604_v45, %v5608_v48 }
0x293a   : > { %12291 = vmatprep.subr.bf16.mxu0 %v13657_v37  ;;  %v13857_v4 = vcombine.high %v5732_v19, %v5736_v21  ;;  %v5596_v14 = vld [vmem:[%s15435_s10 + $0x1b18] sm:$0xff]  ;;  %v13856_v54 = vcombine.low %v5732_v19, %v5736_v21 }
0x293b   : > { %v5724_v37 = vld [vmem:[%s15435_s10 + $0x1f18] sm:$0xff] }
0x293c   : > { %12333 = vmatpush1.bf16.msra.mxu1 %v13792_v31  ;;  %v5600_v31 = vld [vmem:[%s15435_s10 + $0x1b38] sm:$0xff] }
0x293d   : > { %12334 = vmatprep.subr.bf16.mxu1 %v13785_v12  ;;  %12292 = vmatpush1.bf16.msra.mxu0 %v13656_v1  ;;  %v5728_v12 = vld [vmem:[%s15435_s10 + $0x1f38] sm:$0xff]  ;;  %v13721_v26 = vcombine.high %v5596_v14, %v5600_v31  ;;  %v13720_v15 = vcombine.low %v5596_v14, %v5600_v31 }
0x293e   : > { %12293 = vmatprep.subr.bf16.mxu0 %v13649_v5  ;;  %v13849_v27 = vcombine.high %v5724_v37, %v5728_v12  ;;  %v5588_v1 = vld [vmem:[%s15435_s10 + $0x1ad8] sm:$0xff]  ;;  %v13848_v13 = vcombine.low %v5724_v37, %v5728_v12 }
0x293f   : > { %v5716_v5 = vld [vmem:[%s15435_s10 + $0x1ed8] sm:$0xff] }
0x2940   : > { %12335 = vmatpush1.bf16.msra.mxu1 %v13784_v24  ;;  %v5592_v24 = vld [vmem:[%s15435_s10 + $0x1af8] sm:$0xff] }
0x2941   : > { %12336 = vmatprep.subr.bf16.mxu1 %v13777_v41  ;;  %12294 = vmatpush1.bf16.msra.mxu0 %v13648_v18  ;;  %v5720_v41 = vld [vmem:[%s15435_s10 + $0x1ef8] sm:$0xff]  ;;  %v13713_v42 = vcombine.high %v5588_v1, %v5592_v24  ;;  %v13712_v43 = vcombine.low %v5588_v1, %v5592_v24 }
0x2942   : > { %12295 = vmatprep.subr.bf16.mxu0 %v13641_v11  ;;  %v13841_v3 = vcombine.high %v5716_v5, %v5720_v41  ;;  %v5580_v18 = vld [vmem:[%s15435_s10 + $0x1a98] sm:$0xff]  ;;  %v13840_v50 = vcombine.low %v5716_v5, %v5720_v41 }
0x2943   : > { %v5708_v11 = vld [vmem:[%s15435_s10 + $0x1e98] sm:$0xff] }
0x2944   : > { %12337 = vmatpush1.bf16.msra.mxu1 %v13776_v32  ;;  %v5584_v32 = vld [vmem:[%s15435_s10 + $0x1ab8] sm:$0xff] }
0x2945   : > { %12338 = vmatprep.subr.bf16.mxu1 %v13769_v36  ;;  %12296 = vmatpush1.bf16.msra.mxu0 %v13640_v8  ;;  %v5712_v36 = vld [vmem:[%s15435_s10 + $0x1eb8] sm:$0xff]  ;;  %v13705_v20 = vcombine.high %v5580_v18, %v5584_v32  ;;  %v13704_v34 = vcombine.low %v5580_v18, %v5584_v32  ;;  %v5773_v18 = vsub.s32 4, %v16495_v53 }
0x2946   : > { %12297 = vmatprep.subr.bf16.mxu0 %v13633_v9  ;;  %v13833_v57 = vcombine.high %v5708_v11, %v5712_v36  ;;  %v5572_v8 = vld [vmem:[%s15435_s10 + $0x1a58] sm:$0xff]  ;;  %v13832_v7 = vcombine.low %v5708_v11, %v5712_v36  ;;  %v14693_v36 = vld [vmem:[%s15441_s20] sm:$0xff] }
0x2947   : > { %v5700_v9 = vld [vmem:[%s15435_s10 + $0x1e58] sm:$0xff] }
0x2948   : > { %12339 = vmatpush1.bf16.msra.mxu1 %v13768_v10  ;;  %v5576_v10 = vld [vmem:[%s15435_s10 + $0x1a78] sm:$0xff] }
0x2949   : > { %12340 = vmatprep.subr.bf16.mxu1 %v13761_v30  ;;  %12298 = vmatpush1.bf16.msra.mxu0 %v13632_v56  ;;  %v5704_v30 = vld [vmem:[%s15435_s10 + $0x1e78] sm:$0xff]  ;;  %v13697_v25 = vcombine.high %v5572_v8, %v5576_v10  ;;  %v13696_v23 = vcombine.low %v5572_v8, %v5576_v10 }
0x294a   : > { %12299 = vmatprep.subr.bf16.mxu0 %v13625_v28  ;;  %v13825_v58 = vcombine.high %v5700_v9, %v5704_v30  ;;  %v5564_v56 = vld [vmem:[%s15435_s10 + $0x1a18] sm:$0xff]  ;;  %v13824_v29 = vcombine.low %v5700_v9, %v5704_v30 }
0x294b   : > { %v5692_v28 = vld [vmem:[%s15435_s10 + $0x1e18] sm:$0xff] }
0x294c   : > { %12341 = vmatpush1.bf16.msra.mxu1 %v13760_v63  ;;  %v5568_v63 = vld [vmem:[%s15435_s10 + $0x1a38] sm:$0xff] }
0x294d   : > { %12342 = vmatprep.subr.bf16.mxu1 %v13753_v35  ;;  %12300 = vmatpush1.bf16.msra.mxu0 %v13624_v59  ;;  %v5696_v35 = vld [vmem:[%s15435_s10 + $0x1e38] sm:$0xff]  ;;  %v13689_v16 = vcombine.high %v5564_v56, %v5568_v63  ;;  %v13688_v59 = vcombine.low %v5564_v56, %v5568_v63 }
0x294e   : > { %12301 = vmatprep.subr.bf16.mxu0 %v13745_v40  ;;  %v13817_v2 = vcombine.high %v5692_v28, %v5696_v35  ;;  %v14692_v40 = vld [vmem:[#allocation2 + $0x8] ss:$112 sps:$4 sm:$0xff]  }
0x2950   : > { %12343 = vmatpush1.bf16.msra.mxu1 %v13752_v17  ;;  %v13816_v17 = vcombine.low %v5692_v28, %v5696_v35  ;;  %v5781_v28 = vsub.s32 6, %v16495_v53 }
0x2951   : > { %12344 = vmatprep.subr.bf16.mxu1 %v13873_v47  ;;  %12302 = vmatpush2.bf16.msra.mxu0 %v13744_v33  ;;  %v11717_v47 = vpop.f32.mrf.mxu0  ;;  %v11764_v33 = vpop.f32.mrf.mxu1 }
0x2952   : > { %12303 = vmatprep.subr.bf16.mxu0 %v13737_v49 }
0x2953   : > { %v11719_v39 = vpop.f32.mrf.mxu0  ;;  %v11766_v49 = vpop.f32.mrf.mxu1 }
0x2954   : > { %12345 = vmatpush2.bf16.msra.mxu1 %v13872_v0 }
0x2955   : > { %12346 = vmatprep.subr.bf16.mxu1 %v13865_v44  ;;  %12304 = vmatpush2.bf16.msra.mxu0 %v13736_v51  ;;  %v11721_v38 = vpop.f32.mrf.mxu0  ;;  %v11846_v45 = vpop.f32.mrf.mxu1 }
0x2956   : > { %12305 = vmatprep.subr.bf16.mxu0 %v13729_v61 }
0x2957   : > { %v11723_v0 = vpop.f32.mrf.mxu0  ;;  %v11848_v19 = vpop.f32.mrf.mxu1 }
0x2958   : > { %12347 = vmatpush2.bf16.msra.mxu1 %v13864_v46 }
0x2959   : > { %12348 = vmatprep.subr.bf16.mxu1 %v13857_v4  ;;  %12306 = vmatpush2.bf16.msra.mxu0 %v13728_v62  ;;  %v11803_v44 = vpop.f32.mrf.mxu0  ;;  %v11850_v51 = vpop.f32.mrf.mxu1 }
0x295a   : > { %12307 = vmatprep.subr.bf16.mxu0 %v13721_v26 }
0x295b   : > { %v11805_v48 = vpop.f32.mrf.mxu0  ;;  %v17398_v61 = vpop.f32.mrf.mxu1 }
0x295c   : > { %12349 = vmatpush2.bf16.msra.mxu1 %v13856_v54 }
0x295d   : > { %12350 = vmatprep.subr.bf16.mxu1 %v13849_v27  ;;  %12308 = vmatpush2.bf16.msra.mxu0 %v13720_v15  ;;  %v11807_v21 = vpop.f32.mrf.mxu0  ;;  %v11932_v14 = vpop.f32.mrf.mxu1 }
0x295e   : > { %12309 = vmatprep.subr.bf16.mxu0 %v13713_v42 }
0x295f   : > { %v11809_v46 = vpop.f32.mrf.mxu0  ;;  %v17400_v31 = vpop.f32.mrf.mxu1 }
0x2960   : > { %12351 = vmatpush2.bf16.msra.mxu1 %v13848_v13 }
0x2961   : > { %12352 = vmatprep.subr.bf16.mxu1 %v13841_v3  ;;  %12310 = vmatpush2.bf16.msra.mxu0 %v13712_v43  ;;  %v11889_v4 = vpop.f32.mrf.mxu0  ;;  %v17402_v12 = vpop.f32.mrf.mxu1  ;;  %v5774_v43 = vrot.slane %v14693_v36, %v5773_v18 }
0x2962   : > { %12311 = vmatprep.subr.bf16.mxu0 %v13705_v20 }
0x2963   : > { %v17406_v54 = vpop.f32.mrf.mxu1  ;;  %v11718_v8 = vadd.f32 %v11717_v47, %v5774_v43 }
0x2964   : > { %12353 = vmatpush2.bf16.msra.mxu1 %v13840_v50  ;;  %v5777_v50 = vsub.s32 5, %v16495_v53 }
0x2965   : > { %12354 = vmatprep.subr.bf16.mxu1 %v13833_v57  ;;  %12312 = vmatpush2.bf16.msra.mxu0 %v13704_v34  ;;  %v17408_v27 = vpop.f32.mrf.mxu1  ;;  %v11761_v34 = vadd.f32 %v11760_v60, %v11718_v8  ;;  %v5782_v60 = vrot.slane %v14693_v36, %v5781_v28 }
0x2966   : > { %12313 = vmatprep.subr.bf16.mxu0 %v13697_v25  ;;  %v5778_v10 = vrot.slane %v14693_v36, %v5777_v50  ;;  %v11722_v25 = vadd.f32 %v11721_v38, %v5774_v43 }
0x2967   : > { %v17412_v24 = vpop.f32.mrf.mxu1  ;;  %v11804_v63 = vadd.f32 %v11803_v44, %v11761_v34 }
0x2968   : > { %12355 = vmatpush2.bf16.msra.mxu1 %v13832_v7  ;;  %v11720_v7 = vadd.f32 %v11719_v39, %v5778_v10 }
0x2969   : > { %12356 = vmatprep.subr.bf16.mxu1 %v13825_v58  ;;  %12314 = vmatpush2.bf16.msra.mxu0 %v13696_v23  ;;  %v17416_v41 = vpop.f32.mrf.mxu1  ;;  %v11765_v23 = vadd.f32 %v11764_v33, %v11722_v25 }
0x296a   : > { %12315 = vmatprep.subr.bf16.mxu0 %v13689_v16  ;;  %v11763_v35 = vadd.f32 %v11762_v6, %v11720_v7 }
0x296b   : > { %v17420_v13 = vpop.f32.mrf.mxu1  ;;  %v11808_v47 = vadd.f32 %v11807_v21, %v11765_v23 }
0x296c   : > { %12357 = vmatpush2.bf16.msra.mxu1 %v13824_v29  ;;  %v11724_v29 = vadd.f32 %v11723_v0, %v5778_v10 }
0x296d   : > { %12358 = vmatprep.subr.bf16.mxu1 %v13817_v2  ;;  %12316 = vmatpush2.bf16.msra.mxu0 %v13688_v59  ;;  %v5785_v2 = vsub.s32 7, %v16495_v53  ;;  %v11851_v33 = vadd.f32 %v11850_v51, %v11808_v47 }
0x296e   : > { %v11767_v39 = vadd.f32 %v11766_v49, %v11724_v29 }
0x296f   : > { %v5786_v44 = vrot.slane %v14693_v36, %v5785_v2 }
0x2970   : > { %12359 = vmatpush2.bf16.msra.mxu1 %v13816_v17  ;;  %12318 = vmatmul.mubr.bf16.vlgmr.msra.gmra.mxu0 %v14692_v40  ;;  %v11847_v17 = vadd.f32 %v11846_v45, %v11804_v63  ;;  %v11806_v40 = vadd.f32 %v11805_v48, %v11763_v35  ;;  %v11810_v0 = vadd.f32 %v11809_v46, %v11767_v39 }
0x2972   : > { %v11890_v38 = vadd.f32 %v11889_v4, %v11847_v17  ;;  %v11849_v6 = vadd.f32 %v11848_v19, %v11806_v40  ;;  %v11853_v63 = vadd.f32 %v17398_v61, %v11810_v0 }
0x2973   : > { %12361 = vmatmul.mubr.bf16.vlgmr.msra.gmra.mxu1 %v16512_v55  ;;  %v11891_v55 = vpop.f32.mrf.mxu0  ;;  %v12104_v3 = vpop.f32.mrf.mxu1 }
0x2974   : > { %v11933_v34 = vadd.f32 %v11932_v14, %v11890_v38  ;;  %v11892_v7 = vadd.f32 %v11891_v55, %v11849_v6 }
0x2975   : > { %v11893_v37 = vpop.f32.mrf.mxu0  ;;  %v12106_v11 = vpop.f32.mrf.mxu1 }
0x2976   : > { %v11894_v25 = vadd.f32 %v11893_v37, %v11851_v33  ;;  %v11935_v36 = vadd.f32 %v17400_v31, %v11892_v7  ;;  %v14694_v31 = vld [vmem:[%s15443_s30] sm:$0xff]  ;;  %s17610_s30 = sld [smem:[#allocation43_spill]] (!%p13874_p4) }
0x2977   : > { %v17404_v62 = vpop.f32.mrf.mxu0  ;;  %v12108_v57 = vpop.f32.mrf.mxu1 }
0x2978   : > { %v11937_v19 = vadd.f32 %v17402_v12, %v11894_v25  ;;  %v11896_v51 = vadd.f32 %v17404_v62, %v11853_v63  ;;  %v12408_v12 = vrot.slane %v14694_v31, %v5773_v18 }
0x2979   : > { %v11975_v26 = vpop.f32.mrf.mxu0  ;;  %v12110_v30 = vpop.f32.mrf.mxu1 }
0x297a   : > { %v11976_v35 = vadd.f32 %v11975_v26, %v11933_v34  ;;  %v11939_v17 = vadd.f32 %v17406_v54, %v11896_v51  ;;  %v12412_v54 = vrot.slane %v14694_v31, %v5777_v50 }
0x297b   : > { %v17410_v1 = vpop.f32.mrf.mxu0 }
0x297c   : > { %v12019_v37 = vadd.f32 %v17408_v27, %v11976_v35 }
0x297d   : > { %v17414_v5 = vpop.f32.mrf.mxu0 }
0x297e   : > { %v11980_v61 = vadd.f32 %v17414_v5, %v11937_v19 }
0x297f   : > { %v17418_v15 = vpop.f32.mrf.mxu0 }
0x2980   : > { %v11982_v5 = vadd.f32 %v17418_v15, %v11939_v17 }
0x2981   : > { %v12061_v42 = vpop.f32.mrf.mxu0 }
0x2982   : > { %v12062_v10 = vadd.f32 %v12061_v42, %v5782_v60  ;;  %v11978_v42 = vadd.f32 %v17410_v1, %v11935_v36  ;;  %v12023_v1 = vadd.f32 %v17416_v41, %v11980_v61 }
0x2983   : > { %v12063_v32 = vpop.f32.mrf.mxu0 }
0x2984   : > { %v12064_v48 = vadd.f32 %v12063_v32, %v5786_v44  ;;  %v12105_v4 = vadd.f32 %v12104_v3, %v12062_v10  ;;  %v12021_v27 = vadd.f32 %v17412_v24, %v11978_v42  ;;  %v12383_v38 = vmax.f32 %v12023_v1, 0.0 }
0x2985   : > { %v12065_v20 = vpop.f32.mrf.mxu0 }
0x2986   : > { %v12066_v23 = vadd.f32 %v12065_v20, %v5782_v60  ;;  %v12107_v46 = vadd.f32 %v12106_v11, %v12064_v48 }
0x2987   : > { %v12067_v9 = vpop.f32.mrf.mxu0 }
0x2988   : > { %v12068_v14 = vadd.f32 %v12067_v9, %v5786_v44  ;;  %v12109_v3 = vadd.f32 %v12108_v57, %v12066_v23 }
0x298a   : > { %v12111_v62 = vadd.f32 %v12110_v30, %v12068_v14 }
0x29b0   : > { %v12147_v58 = vpop.f32.mrf.mxu0 }
0x29b1   : > { %v12148_v55 = vadd.f32 %v12147_v58, %v12105_v4  ;;  %v12375_v58 = vmax.f32 %v12019_v37, 0.0 }
0x29b2   : > { %v12149_v16 = vpop.f32.mrf.mxu0 }
0x29b3   : > { %v12190_v56 = vpop.f32.mrf.mxu1  ;;  %v12150_v32 = vadd.f32 %v12149_v16, %v12107_v46  ;;  %v12433_v30 = vmul.f32 %v12408_v12, %v12375_v58 }
0x29b4   : > { %v12151_v43 = vpop.f32.mrf.mxu0  ;;  %v12191_v11 = vadd.f32 %v12190_v56, %v12148_v55  ;;  %v12376_v56 = vmax.f32 %v12021_v27, 0.0 }
0x29b5   : > { %v12192_v59 = vpop.f32.mrf.mxu1  ;;  %v12152_v9 = vadd.f32 %v12151_v43, %v12109_v3  ;;  %v12025_v43 = vadd.f32 %v17420_v13, %v11982_v5  ;;  %v12451_v7 = vadd.f32 %v17086_v22, %v12433_v30  ;;  %v12416_v13 = vrot.slane %v14694_v31, %v5781_v28 }
0x29b6   : > { %v12153_v45 = vpop.f32.mrf.mxu0  ;;  %v12193_v57 = vadd.f32 %v12192_v59, %v12150_v32  ;;  %v12434_v50 = vmul.f32 %v12412_v54, %v12376_v56 }
0x29b7   : > { %v12194_v8 = vpop.f32.mrf.mxu1  ;;  %v12154_v16 = vadd.f32 %v12153_v45, %v12111_v62  ;;  %v12384_v25 = vmax.f32 %v12025_v43, 0.0 }
0x29b8   : > { %v12195_v39 = vadd.f32 %v12194_v8, %v12152_v9  ;;  %v12441_v8 = vmul.f32 %v12408_v12, %v12383_v38  ;;  %v12453_v51 = vadd.f32 %v12451_v7, %v12434_v50 }
0x29b9   : > { %v12196_v21 = vpop.f32.mrf.mxu1  ;;  %v12442_v14 = vmul.f32 %v12412_v54, %v12384_v25 }
0x29ba   : > { %v12197_v44 = vadd.f32 %v12196_v21, %v12154_v16  ;;  %v12452_v46 = vadd.f32 %v17093_v52, %v12441_v8  ;;  %v12460_v52 = vld [vmem:[#allocation3] sm:$0xff] }
0x29bc   : > { %v12454_v17 = vadd.f32 %v12452_v46, %v12442_v14 }
0x29f0   : > { %v12233_v49 = vpop.f32.mrf.mxu0 }
0x29f1   : > { %v12234_v47 = vadd.f32 %v12233_v49, %v12191_v11  ;;  %v12420_v49 = vrot.slane %v14694_v31, %v5785_v2 }
0x29f2   : > { %v12235_v26 = vpop.f32.mrf.mxu0 }
0x29f3   : > { %v12276_v29 = vpop.f32.mrf.mxu1  ;;  %v12236_v18 = vadd.f32 %v12235_v26, %v12193_v57 }
0x29f4   : > { %v12237_v40 = vpop.f32.mrf.mxu0  ;;  %v12277_v41 = vadd.f32 %v12276_v29, %v12234_v47 }
0x29f5   : > { %v12278_v20 = vpop.f32.mrf.mxu1  ;;  %v12238_v6 = vadd.f32 %v12237_v40, %v12195_v39 }
0x29f6   : > { %v12239_v24 = vpop.f32.mrf.mxu0  ;;  %v12279_v59 = vadd.f32 %v12278_v20, %v12236_v18  ;;  %v12459_v20 = vld [vmem:[#allocation3 + $0x8] sm:$0xff] }
0x29f7   : > { %v12280_v60 = vpop.f32.mrf.mxu1  ;;  %v12240_v0 = vadd.f32 %v12239_v24, %v12197_v44 }
0x29f8   : > { %v12281_v48 = vadd.f32 %v12280_v60, %v12238_v6 }
0x29f9   : > { %v12282_v15 = vpop.f32.mrf.mxu1 }
0x29fa   : > { %v12283_v23 = vadd.f32 %v12282_v15, %v12240_v0 }
0x2a30   : > { %v12319_v33 = vpop.f32.mrf.mxu0 }
0x2a31   : > { %v12320_v10 = vadd.f32 %v12319_v33, %v12277_v41 }
0x2a32   : > { %v12321_v45 = vpop.f32.mrf.mxu0 }
0x2a33   : > { %v12362_v34 = vpop.f32.mrf.mxu1  ;;  %v12322_v21 = vadd.f32 %v12321_v45, %v12279_v59 }
0x2a34   : > { %v12363_v63 = vadd.f32 %v12362_v34, %v12320_v10  ;;  %v12323_v4 = vpop.f32.mrf.mxu0 }
0x2a35   : > { %v12364_v35 = vpop.f32.mrf.mxu1  ;;  %v12324_v19 = vadd.f32 %v12323_v4, %v12281_v48 }
0x2a36   : > { %v12377_v29 = vmax.f32 %v12363_v63, 0.0  ;;  %v12365_v36 = vadd.f32 %v12364_v35, %v12322_v21  ;;  %v12325_v55 = vpop.f32.mrf.mxu0 }
0x2a37   : > { %v12366_v22 = vpop.f32.mrf.mxu1  ;;  %v12326_v28 = vadd.f32 %v12325_v55, %v12283_v23 }
0x2a38   : > { %v12435_v37 = vmul.f32 %v12416_v13, %v12377_v29  ;;  %v12378_v42 = vmax.f32 %v12365_v36, 0.0  ;;  %v12367_v61 = vadd.f32 %v12366_v22, %v12324_v19 }
0x2a39   : > { %v12368_v26 = vpop.f32.mrf.mxu1 }
0x2a3a   : > { %v12455_v3 = vadd.f32 %v12453_v51, %v12435_v37  ;;  %v12436_v32 = vmul.f32 %v12420_v49, %v12378_v42  ;;  %v12385_v53 = vmax.f32 %v12367_v61, 0.0  ;;  %v12369_v2 = vadd.f32 %v12368_v26, %v12326_v28 }
0x2a3c   : > { %v12457_v31 = vadd.f32 %v12455_v3, %v12436_v32  ;;  %v12443_v12 = vmul.f32 %v12416_v13, %v12385_v53  ;;  %v12386_v62 = vmax.f32 %v12369_v2, 0.0 }
0x2a3e   : > { %v12461_v11 = vadd.f32 %v12459_v20, %v12457_v31  ;;  %v12456_v9 = vadd.f32 %v12454_v17, %v12443_v12  ;;  %v12444_v58 = vmul.f32 %v12420_v49, %v12386_v62 }
0x2a40   : > { %12463 = vst [vmem:[#allocation3 + $0x8] sm:$0xff] %v12461_v11  ;;  %v12458_v27 = vadd.f32 %v12456_v9, %v12444_v58  ;;  %12468 = sbr.rel (%p13874_p4) target bundleno = 10969 (0x2ad9), region = 148 }
0x2a42   : > { %v12462_v1 = vadd.f32 %v12460_v52, %v12458_v27 }
0x2a44   : > { %12464 = vst [vmem:[#allocation3] sm:$0xff] %v12462_v1 }
0x2a45   : > { %v13875_v57 = vld [vmem:[#allocation4] ss:$0 sm:$0xff]  ;;  %vm12484_vm5 = vcmask 7168  }
0x2a47   : > { %v12469_v5 = vld [vmem:[#allocation3 + $0x8] sm:$0xff] }
0x2a48   : > { %12471 = vadd.xlane.f32.xlu0 %v12469_v5 }
0x2a4b   : > { %v12470_v40 = vld [vmem:[#allocation3] sm:$0xff] }
0x2a4c   : > { %12473 = vadd.xlane.f32.xlu0 %v12470_v40 }
0x2ad1   : > { %v12472_v16 = vpop.xlane.xlu0 %12471 }
0x2ad2   : > { %v12482_v47 = vadd.f32 %v13875_v57, %v12472_v16 }
0x2ad4   : > { %12485 = vst.msk [vmem:[%s17610_s30] sm:$0xff] %vm12484_vm5, %v12482_v47 }
0x2ad5   : > { %v12474_v60 = vpop.xlane.xlu0 %12473 }
0x2ad6   : > { %v12483_v54 = vadd.f32 %v13875_v57, %v12474_v60 }
0x2ad8   : > { %12486 = vst.msk [vmem:[%s17610_s30 + $0x8] sm:$0xff] %vm12484_vm5, %v12483_v54 }
0x2ad9 PF: > { %s17611_s25 = sld [smem:[#allocation28_spill]]  ;;  %s17614_s23 = smov %s15033_s24 }
0x2ada   : > { %s17612_s26 = sld [smem:[#allocation27_spill]] }
0x2adb   : > { %s17613_s2 = sld [smem:[#allocation29_spill]] }
0x2adf   : > { %p35_p6 = scmp.ge.s32.totalorder %s17611_s25, 4  }
0x2ae0   : > { %s17615_s24 = smov %s17612_s26 }
0x2ae1   :  { %37 = sbr.rel (!%p35_p6) target bundleno = 20 (0x14), region = 207 }
0x2ae6   :  { %12504 = vsyncpa [#allocation6], 1 }
0x2ae7   :  { %12506 = vsyncpa [#allocation6 + $0x1], 1 }
0x2ae8   :  { %12507 = vsyncpa [#allocation8], 1 }
0x2ae9   :  { %12508 = vsyncpa [#allocation11], 1 }
0x2aea   :  { %12509 = vsyncpa [#allocation14], 1 }
0x2aeb   :  { %12510 = vsyncpa [#allocation17], 1 }

</bundles_post_ra>
